<compile_context>
chip_gen: v6e
topology: v6e:2x2x1
jax: 0.10.0
libtpu: 0.0.40
codegen_flags: <defaults>
</compile_context>

<pallas_src>
import functools

import jax
import jax.numpy as jnp
from jax.experimental import pallas as pl
from jax.experimental.pallas import tpu as pltpu

NEG_LARGE = -1e30  # stands in for float('-inf') in the masked softmax


def icon_kernel(
    # data (time-major, flattened to T*B rows)
    query_ref, own_x_ref, oth_x_ref, own_mf_ref, oth_mf_ref, allm_ref,
    # fc
    fc_w_ref, fc_b_ref,
    # local GRUCells: [own, other] x [r, z, n]
    loc_wih_ref, loc_whh_ref, loc_bias_ref,
    # hop GRUs: [global, memory] x [r, z, n]
    hop_wih_ref, hop_whh_ref, hop_bias_ref,
    # classifier
    cls_w_ref, cls_b_ref,
    # output
    out_ref,
    *, B, T, E, hop_size):
  f32 = jnp.float32

  def mm(a, b):
    return jnp.dot(a, b, preferred_element_type=f32)

  # query = tanh(fc(query))
  q = jnp.tanh(mm(query_ref[...], fc_w_ref[...]) + fc_b_ref[...])

  # Hoisted masks: compared once; every per-step slice is an aligned 8-row tile.
  own_mb = own_mf_ref[...] > 0.0          # (T*B, 1) bool
  oth_mb = oth_mf_ref[...] > 0.0
  all_mb = allm_ref[...] > 0.0
  own_lm = [own_mb[t * B:(t + 1) * B] for t in range(T)]   # (B, 1) each
  oth_lm = [oth_mb[t * B:(t + 1) * B] for t in range(T)]
  hop_lm = [all_mb[t * B:(t + 1) * B] for t in range(T)]

  def gru_step(gi_r, gi_z, gi_n, h, whh, bhh_n):
    """One GRU(Cell) step; gi_* already contain x @ W_ih (+ fused input biases)."""
    gh_r = mm(h, whh[0])
    gh_z = mm(h, whh[1])
    gh_n = mm(h, whh[2]) + bhh_n
    r = jax.nn.sigmoid(gi_r + gh_r)
    z = jax.nn.sigmoid(gi_z + gh_z)
    n = jnp.tanh(gi_n + r * gh_n)
    return (1.0 - z) * n + z * h

  # =============== local own / other GRUCell scans (interleaved) ==============
  # Batched input projections: one (T*B, F) x (F, E) matmul per gate per GRU.
  own_x = own_x_ref[...]                  # (T*B, F)
  oth_x = oth_x_ref[...]

  def in_proj(x, wih_ref, bias_ref, g):
    return (mm(x, wih_ref[g, 0]) + bias_ref[g, 0],
            mm(x, wih_ref[g, 1]) + bias_ref[g, 1],
            mm(x, wih_ref[g, 2]) + bias_ref[g, 2])

  own_gi = in_proj(own_x, loc_wih_ref, loc_bias_ref, 0)
  oth_gi = in_proj(oth_x, loc_wih_ref, loc_bias_ref, 1)

  own_whh = [loc_whh_ref[0, k] for k in range(3)]
  oth_whh = [loc_whh_ref[1, k] for k in range(3)]
  own_bhh_n = loc_bias_ref[0, 3]
  oth_bhh_n = loc_bias_ref[1, 3]

  zeros_be = jnp.zeros((B, E), f32)
  h_own, h_oth = zeros_be, zeros_be
  g_in = []                               # T x (B, E), kept in vregs
  for t in range(T):
    lo, hi = t * B, (t + 1) * B
    # Two independent recurrences issued together -> 2x ILP on the serial chain.
    hn_own = gru_step(own_gi[0][lo:hi], own_gi[1][lo:hi], own_gi[2][lo:hi],
                      h_own, own_whh, own_bhh_n)
    hn_oth = gru_step(oth_gi[0][lo:hi], oth_gi[1][lo:hi], oth_gi[2][lo:hi],
                      h_oth, oth_whh, oth_bhh_n)
    h_own = jnp.where(own_lm[t], hn_own, h_own)
    h_oth = jnp.where(oth_lm[t], hn_oth, h_oth)
    o_own = jnp.where(own_lm[t], h_own, 0.0)
    o_oth = jnp.where(oth_lm[t], h_oth, 0.0)
    # TODO(synk): F.dropout is treated as identity (eval-mode deterministic kernel).
    g_in.append(jnp.tanh(o_own + o_oth))

  # (T*B, E) slab feeding the first hop's batched input projection
  # (aligned full-tile concatenation, stays out of VMEM scratch).
  rnn_flat = jnp.concatenate(g_in, axis=0)

  # ============================== memory hops =================================
  for hop in range(hop_size):
    g = 0 if hop == 0 else 1              # 0 = global_GRU, 1 = memory_GRU
    whh = [hop_whh_ref[g, k] for k in range(3)]
    bhh_n = hop_bias_ref[g, 3]

    # Batched input projection for all T steps (off the serial chain).
    gi_r = mm(rnn_flat, hop_wih_ref[g, 0]) + hop_bias_ref[g, 0]
    gi_z = mm(rnn_flat, hop_wih_ref[g, 1]) + hop_bias_ref[g, 1]
    gi_n = mm(rnn_flat, hop_wih_ref[g, 2]) + hop_bias_ref[g, 2]

    h = zeros_be
    r_list = []
    for t in range(T):
      lo, hi = t * B, (t + 1) * B
      h = gru_step(gi_r[lo:hi], gi_z[lo:hi], gi_n[lo:hi], h, whh, bhh_n)
      r_list.append(jnp.where(hop_lm[t], h, 0.0))   # masked rnn_output

    r_flat = jnp.concatenate(r_list, axis=0)        # (T*B, E)

    # attn_score_t = tanh(q . r_t): one fused multiply + lane reduce on the slab.
    q_rep = jnp.concatenate([q] * T, axis=0)        # (T*B, E)
    s_flat = jnp.tanh(jnp.sum(q_rep * r_flat, axis=-1, keepdims=True))
    s_flat = jnp.where(all_mb, s_flat, NEG_LARGE)
    s_t = [s_flat[t * B:(t + 1) * B] for t in range(T)]   # (B, 1) each

    # Masked softmax over time (tree max / sum over the T per-step columns).
    m = s_t[0]
    for t in range(1, T):
      m = jnp.maximum(m, s_t[t])
    e_t = [jnp.exp(s - m) for s in s_t]
    denom = e_t[0]
    for t in range(1, T):
      denom = denom + e_t[t]
    inv = pl.reciprocal(denom, approx=True)

    weight = jnp.zeros((B, E), f32)
    for t in range(T):
      a_t = jnp.where(hop_lm[t], e_t[t] * inv, 0.0)       # (B, 1)
      weight = weight + a_t * r_list[t]
    q = jnp.tanh(q + weight)

    rnn_flat = r_flat                                     # next hop's GRU input

  out_ref[...] = mm(q, cls_w_ref[...]) + cls_b_ref[...]


def pack_params(params, E):
  """Split each GRU's (in, 3E) weights per gate (r, z, n) and stack the GRUs."""
  def split_w(w):                          # (in, 3E) -> (3, in, E)
    return jnp.stack([w[:, 0:E], w[:, E:2 * E], w[:, 2 * E:3 * E]], axis=0)

  def pack_bias(bih, bhh):                 # -> (4, 1, E): [b_ir+b_hr, b_iz+b_hz, b_in, b_hn]
    return jnp.stack([bih[:, 0:E] + bhh[:, 0:E],
                      bih[:, E:2 * E] + bhh[:, E:2 * E],
                      bih[:, 2 * E:3 * E],
                      bhh[:, 2 * E:3 * E]], axis=0)

  return dict(
      loc_wih=jnp.stack([split_w(params["own_wih"]), split_w(params["oth_wih"])]),
      loc_whh=jnp.stack([split_w(params["own_whh"]), split_w(params["oth_whh"])]),
      loc_bias=jnp.stack([pack_bias(params["own_bih"], params["own_bhh"]),
                          pack_bias(params["oth_bih"], params["oth_bhh"])]),
      hop_wih=jnp.stack([split_w(params["glb_wih"]), split_w(params["mem_wih"])]),
      hop_whh=jnp.stack([split_w(params["glb_whh"]), split_w(params["mem_whh"])]),
      hop_bias=jnp.stack([pack_bias(params["glb_bih"], params["glb_bhh"]),
                          pack_bias(params["mem_bih"], params["mem_bhh"])]),
  )


def icon_forward(query, own_hist, other_hist, own_mask, other_mask, params,
                 hop_size):
  B, T, F = own_hist.shape
  E = params["fc_w"].shape[1]
  C = params["cls_w"].shape[1]

  # Pad the batch to a sublane multiple (8): every per-timestep (B, E) tile and
  # every (T*B, .) row slice becomes tile aligned. Padded rows carry a zero mask
  # and are sliced off the output.
  B_pad = max(8, ((B + 7) // 8) * 8)
  pad = B_pad - B
  if pad:
    query = jnp.pad(query, ((0, pad), (0, 0)))
    own_hist = jnp.pad(own_hist, ((0, pad), (0, 0), (0, 0)))
    other_hist = jnp.pad(other_hist, ((0, pad), (0, 0), (0, 0)))
    own_mask = jnp.pad(own_mask, ((0, pad), (0, 0)))
    other_mask = jnp.pad(other_mask, ((0, pad), (0, 0)))

  # Layout preprocessing (plain XLA ops outside the kernel): time-major and
  # flattened so in-kernel per-step access is a static aligned row slice.
  own_x2 = own_hist.transpose(1, 0, 2).reshape(T * B_pad, F)
  oth_x2 = other_hist.transpose(1, 0, 2).reshape(T * B_pad, F)
  own_mf = own_mask.T.reshape(T * B_pad, 1)
  oth_mf = other_mask.T.reshape(T * B_pad, 1)
  allm_f = jnp.maximum(own_mask, other_mask).T.reshape(T * B_pad, 1)

  packed = pack_params(params, E)
  inputs = [
      query, own_x2, oth_x2, own_mf, oth_mf, allm_f,
      params["fc_w"], params["fc_b"],
      packed["loc_wih"], packed["loc_whh"], packed["loc_bias"],
      packed["hop_wih"], packed["hop_whh"], packed["hop_bias"],
      params["cls_w"], params["cls_b"],
  ]

  kernel = functools.partial(icon_kernel, B=B_pad, T=T, E=E, hop_size=hop_size)
  out = pl.pallas_call(
      kernel,
      out_shape=jax.ShapeDtypeStruct((B_pad, C), jnp.float32),
      in_specs=[pl.BlockSpec(memory_space=pltpu.MemorySpace.VMEM)] * len(inputs),
      out_specs=pl.BlockSpec(memory_space=pltpu.MemorySpace.VMEM),
  )(*inputs)
  return out[:B]


# ---------------- pure-JAX reference (same math) for validation ----------------
def icon_reference(query, own_hist, other_hist, own_mask, other_mask, params,
                   hop_size):
  B, T, F = own_hist.shape
  E = params["fc_w"].shape[1]

  def gru_cell(x, h, wih, whh, bih, bhh):
    gi = x @ wih + bih
    gh = h @ whh + bhh
    r = jax.nn.sigmoid(gi[:, :E] + gh[:, :E])
    z = jax.nn.sigmoid(gi[:, E:2 * E] + gh[:, E:2 * E])
    n = jnp.tanh(gi[:, 2 * E:] + r * gh[:, 2 * E:])
    return (1.0 - z) * n + z * h

  q = jnp.tanh(query @ params["fc_w"] + params["fc_b"])
  mask = jnp.maximum(own_mask, other_mask)

  def local_scan(hist, msk, pre):
    h = jnp.zeros((B, E), jnp.float32)
    outs = []
    for i in range(T):
      prev = h
      hn = gru_cell(hist[:, i, :], h, params[pre + "_wih"],
                    params[pre + "_whh"], params[pre + "_bih"],
                    params[pre + "_bhh"])
      lm = msk[:, i:i + 1] > 0.0
      h = jnp.where(lm, hn, prev)
      outs.append(jnp.where(lm, h, 0.0))
    return jnp.stack(outs, axis=1)

  g_in = jnp.tanh(local_scan(own_hist, own_mask, "own")
                  + local_scan(other_hist, other_mask, "oth"))

  rnn_in = g_in
  for hop in range(hop_size):
    pre = "glb" if hop == 0 else "mem"
    h = jnp.zeros((B, E), jnp.float32)
    outs = []
    for j in range(T):
      h = gru_cell(rnn_in[:, j, :], h, params[pre + "_wih"],
                   params[pre + "_whh"], params[pre + "_bih"],
                   params[pre + "_bhh"])
      outs.append(jnp.where(mask[:, j:j + 1] > 0.0, h, 0.0))
    r = jnp.stack(outs, axis=1)
    score = jnp.tanh(jnp.sum(q[:, None, :] * r, axis=-1))
    score = jnp.where(mask > 0.0, score, NEG_LARGE)
    attn = jax.nn.softmax(score, axis=-1)
    attn = jnp.where(mask > 0.0, attn, 0.0)
    weight = jnp.sum(attn[:, :, None] * r, axis=1)
    q = jnp.tanh(q + weight)
    rnn_in = r
  return q @ params["cls_w"] + params["cls_b"]


# ---------------------------- parameter init ----------------------------
def init_params(key, F, E, C):
  def u(k, shape, scale):
    return jax.random.uniform(k, shape, jnp.float32, -scale, scale)

  ks = list(jax.random.split(key, 24))
  sF, sE = 1.0 / float(F) ** 0.5, 1.0 / float(E) ** 0.5
  p = {}
  p["fc_w"], p["fc_b"] = u(ks[0], (F, E), sF), u(ks[1], (1, E), sF)

  def gru(k0, k1, k2, k3, in_sz, pre):
    p[pre + "_wih"] = u(k0, (in_sz, 3 * E), sE)
    p[pre + "_whh"] = u(k1, (E, 3 * E), sE)
    p[pre + "_bih"] = u(k2, (1, 3 * E), sE)
    p[pre + "_bhh"] = u(k3, (1, 3 * E), sE)

  gru(ks[2], ks[3], ks[4], ks[5], F, "own")      # local_own_GRU  (GRUCell)
  gru(ks[6], ks[7], ks[8], ks[9], F, "oth")      # local_other_GRU (GRUCell)
  gru(ks[10], ks[11], ks[12], ks[13], E, "glb")  # global_GRU
  gru(ks[14], ks[15], ks[16], ks[17], E, "mem")  # memory_GRU
  p["cls_w"], p["cls_b"] = u(ks[18], (E, C), sE), u(ks[19], (1, C), sE)
  return p


if __name__ == "__main__":
  B, T, F, E, C = 2, 8, 16, 32, 4   # batch, time_step, feature, embedding, num_class
  HOP_SIZE = 3

  key = jax.random.PRNGKey(0)
  k_q, k_own, k_oth, k_m1, k_m2, k_p = jax.random.split(key, 6)

  query = jax.random.normal(k_q, (B, F), jnp.float32)
  own_hist = jax.random.normal(k_own, (B, T, F), jnp.float32)
  other_hist = jax.random.normal(k_oth, (B, T, F), jnp.float32)
  own_mask = (jax.random.uniform(k_m1, (B, T)) > 0.3).astype(jnp.float32)
  other_mask = (jax.random.uniform(k_m2, (B, T)) > 0.3).astype(jnp.float32)
  # guarantee at least one valid timestep per row (avoids all-masked softmax)
  own_mask = own_mask.at[:, 0].set(1.0)
  other_mask = other_mask.at[:, 0].set(1.0)

  params = init_params(k_p, F, E, C)

  out = icon_forward(query, own_hist, other_hist, own_mask, other_mask,
                     params, HOP_SIZE)
  out = jax.block_until_ready(out)

  with jax.default_matmul_precision("float32"):
    ref = icon_reference(query, own_hist, other_hist, own_mask, other_mask,
                         params, HOP_SIZE)
  ref = jax.block_until_ready(ref)

  assert out.shape == (B, C)
  assert jnp.allclose(out, ref, atol=1e-2, rtol=1e-2), (out, ref)
  print("KERNEL_OK")
</pallas_src>

<mosaic_0001>
module attributes {stable_mosaic.version = 11 : i64} {
  func.func @icon_kernel(%arg0: memref<8x16xf32, #tpu.memory_space<vmem>>, %arg1: memref<64x16xf32, #tpu.memory_space<vmem>>, %arg2: memref<64x16xf32, #tpu.memory_space<vmem>>, %arg3: memref<64x1xf32, #tpu.memory_space<vmem>>, %arg4: memref<64x1xf32, #tpu.memory_space<vmem>>, %arg5: memref<64x1xf32, #tpu.memory_space<vmem>>, %arg6: memref<16x32xf32, #tpu.memory_space<vmem>>, %arg7: memref<1x32xf32, #tpu.memory_space<vmem>>, %arg8: memref<2x3x16x32xf32, #tpu.memory_space<vmem>>, %arg9: memref<2x3x32x32xf32, #tpu.memory_space<vmem>>, %arg10: memref<2x4x1x32xf32, #tpu.memory_space<vmem>>, %arg11: memref<2x3x32x32xf32, #tpu.memory_space<vmem>>, %arg12: memref<2x3x32x32xf32, #tpu.memory_space<vmem>>, %arg13: memref<2x4x1x32xf32, #tpu.memory_space<vmem>>, %arg14: memref<32x4xf32, #tpu.memory_space<vmem>>, %arg15: memref<1x4xf32, #tpu.memory_space<vmem>>, %arg16: memref<8x4xf32, #tpu.memory_space<vmem>>) attributes {dimension_semantics = [], scalar_prefetch = 0 : i64, scratch_operands = 0 : i64, tpu.core_type = #tpu.core_type<tc>} {
    %c0 = arith.constant 0 : index
    %c0_0 = arith.constant 0 : index
    %0 = vector.load %arg0[%c0, %c0_0] : memref<8x16xf32, #tpu.memory_space<vmem>>, vector<8x16xf32>
    %c0_1 = arith.constant 0 : index
    %c0_2 = arith.constant 0 : index
    %1 = vector.load %arg6[%c0_1, %c0_2] : memref<16x32xf32, #tpu.memory_space<vmem>>, vector<16x32xf32>
    %cst = arith.constant dense<0.000000e+00> : vector<8x32xf32>
    %2 = tpu.matmul %0, %1, %cst {dimension_numbers = #tpu.dot_dimension_numbers<[1], [0], [0], [1], [0, 0, 1, 1], [], []>} : vector<8x16xf32>, vector<16x32xf32>, vector<8x32xf32> -> vector<8x32xf32>
    %c0_3 = arith.constant 0 : index
    %c0_4 = arith.constant 0 : index
    %3 = vector.load %arg7[%c0_3, %c0_4] : memref<1x32xf32, #tpu.memory_space<vmem>>, vector<1x32xf32>
    %4 = vector.broadcast %3 : vector<1x32xf32> to vector<8x32xf32>
    %5 = arith.addf %2, %4 : vector<8x32xf32>
    %6 = math.tanh %5 : vector<8x32xf32>
    %c0_5 = arith.constant 0 : index
    %c0_6 = arith.constant 0 : index
    %7 = vector.load %arg3[%c0_5, %c0_6] : memref<64x1xf32, #tpu.memory_space<vmem>>, vector<64x1xf32>
    %cst_7 = arith.constant 0.000000e+00 : f32
    %8 = vector.broadcast %cst_7 : f32 to vector<64x1xf32>
    %9 = arith.cmpf ogt, %7, %8 : vector<64x1xf32>
    %c0_8 = arith.constant 0 : index
    %c0_9 = arith.constant 0 : index
    %10 = vector.load %arg4[%c0_8, %c0_9] : memref<64x1xf32, #tpu.memory_space<vmem>>, vector<64x1xf32>
    %cst_10 = arith.constant 0.000000e+00 : f32
    %11 = vector.broadcast %cst_10 : f32 to vector<64x1xf32>
    %12 = arith.cmpf ogt, %10, %11 : vector<64x1xf32>
    %c0_11 = arith.constant 0 : index
    %c0_12 = arith.constant 0 : index
    %13 = vector.load %arg5[%c0_11, %c0_12] : memref<64x1xf32, #tpu.memory_space<vmem>>, vector<64x1xf32>
    %cst_13 = arith.constant 0.000000e+00 : f32
    %14 = vector.broadcast %cst_13 : f32 to vector<64x1xf32>
    %15 = arith.cmpf ogt, %13, %14 : vector<64x1xf32>
    %16 = vector.extract_strided_slice %9 {offsets = [0, 0], sizes = [8, 1], strides = [1, 1]} : vector<64x1xi1> to vector<8x1xi1>
    %17 = vector.extract_strided_slice %9 {offsets = [8, 0], sizes = [8, 1], strides = [1, 1]} : vector<64x1xi1> to vector<8x1xi1>
    %18 = vector.extract_strided_slice %9 {offsets = [16, 0], sizes = [8, 1], strides = [1, 1]} : vector<64x1xi1> to vector<8x1xi1>
    %19 = vector.extract_strided_slice %9 {offsets = [24, 0], sizes = [8, 1], strides = [1, 1]} : vector<64x1xi1> to vector<8x1xi1>
    %20 = vector.extract_strided_slice %9 {offsets = [32, 0], sizes = [8, 1], strides = [1, 1]} : vector<64x1xi1> to vector<8x1xi1>
    %21 = vector.extract_strided_slice %9 {offsets = [40, 0], sizes = [8, 1], strides = [1, 1]} : vector<64x1xi1> to vector<8x1xi1>
    %22 = vector.extract_strided_slice %9 {offsets = [48, 0], sizes = [8, 1], strides = [1, 1]} : vector<64x1xi1> to vector<8x1xi1>
    %23 = vector.extract_strided_slice %9 {offsets = [56, 0], sizes = [8, 1], strides = [1, 1]} : vector<64x1xi1> to vector<8x1xi1>
    %24 = vector.extract_strided_slice %12 {offsets = [0, 0], sizes = [8, 1], strides = [1, 1]} : vector<64x1xi1> to vector<8x1xi1>
    %25 = vector.extract_strided_slice %12 {offsets = [8, 0], sizes = [8, 1], strides = [1, 1]} : vector<64x1xi1> to vector<8x1xi1>
    %26 = vector.extract_strided_slice %12 {offsets = [16, 0], sizes = [8, 1], strides = [1, 1]} : vector<64x1xi1> to vector<8x1xi1>
    %27 = vector.extract_strided_slice %12 {offsets = [24, 0], sizes = [8, 1], strides = [1, 1]} : vector<64x1xi1> to vector<8x1xi1>
    %28 = vector.extract_strided_slice %12 {offsets = [32, 0], sizes = [8, 1], strides = [1, 1]} : vector<64x1xi1> to vector<8x1xi1>
    %29 = vector.extract_strided_slice %12 {offsets = [40, 0], sizes = [8, 1], strides = [1, 1]} : vector<64x1xi1> to vector<8x1xi1>
    %30 = vector.extract_strided_slice %12 {offsets = [48, 0], sizes = [8, 1], strides = [1, 1]} : vector<64x1xi1> to vector<8x1xi1>
    %31 = vector.extract_strided_slice %12 {offsets = [56, 0], sizes = [8, 1], strides = [1, 1]} : vector<64x1xi1> to vector<8x1xi1>
    %32 = vector.extract_strided_slice %15 {offsets = [0, 0], sizes = [8, 1], strides = [1, 1]} : vector<64x1xi1> to vector<8x1xi1>
    %33 = vector.extract_strided_slice %15 {offsets = [8, 0], sizes = [8, 1], strides = [1, 1]} : vector<64x1xi1> to vector<8x1xi1>
    %34 = vector.extract_strided_slice %15 {offsets = [16, 0], sizes = [8, 1], strides = [1, 1]} : vector<64x1xi1> to vector<8x1xi1>
    %35 = vector.extract_strided_slice %15 {offsets = [24, 0], sizes = [8, 1], strides = [1, 1]} : vector<64x1xi1> to vector<8x1xi1>
    %36 = vector.extract_strided_slice %15 {offsets = [32, 0], sizes = [8, 1], strides = [1, 1]} : vector<64x1xi1> to vector<8x1xi1>
    %37 = vector.extract_strided_slice %15 {offsets = [40, 0], sizes = [8, 1], strides = [1, 1]} : vector<64x1xi1> to vector<8x1xi1>
    %38 = vector.extract_strided_slice %15 {offsets = [48, 0], sizes = [8, 1], strides = [1, 1]} : vector<64x1xi1> to vector<8x1xi1>
    %39 = vector.extract_strided_slice %15 {offsets = [56, 0], sizes = [8, 1], strides = [1, 1]} : vector<64x1xi1> to vector<8x1xi1>
    %c0_14 = arith.constant 0 : index
    %c0_15 = arith.constant 0 : index
    %40 = vector.load %arg1[%c0_14, %c0_15] : memref<64x16xf32, #tpu.memory_space<vmem>>, vector<64x16xf32>
    %c0_16 = arith.constant 0 : index
    %c0_17 = arith.constant 0 : index
    %41 = vector.load %arg2[%c0_16, %c0_17] : memref<64x16xf32, #tpu.memory_space<vmem>>, vector<64x16xf32>
    %c0_18 = arith.constant 0 : index
    %c0_19 = arith.constant 0 : index
    %c0_20 = arith.constant 0 : index
    %c0_21 = arith.constant 0 : index
    %42 = vector.load %arg8[%c0_18, %c0_19, %c0_20, %c0_21] : memref<2x3x16x32xf32, #tpu.memory_space<vmem>>, vector<1x1x16x32xf32>
    %43 = vector.shape_cast %42 : vector<1x1x16x32xf32> to vector<16x32xf32>
    %cst_22 = arith.constant dense<0.000000e+00> : vector<64x32xf32>
    %44 = tpu.matmul %40, %43, %cst_22 {dimension_numbers = #tpu.dot_dimension_numbers<[1], [0], [0], [1], [0, 0, 1, 1], [], []>} : vector<64x16xf32>, vector<16x32xf32>, vector<64x32xf32> -> vector<64x32xf32>
    %c0_23 = arith.constant 0 : index
    %c0_24 = arith.constant 0 : index
    %c0_25 = arith.constant 0 : index
    %c0_26 = arith.constant 0 : index
    %45 = vector.load %arg10[%c0_23, %c0_24, %c0_25, %c0_26] : memref<2x4x1x32xf32, #tpu.memory_space<vmem>>, vector<1x1x1x32xf32>
    %46 = vector.shape_cast %45 : vector<1x1x1x32xf32> to vector<1x32xf32>
    %47 = vector.broadcast %46 : vector<1x32xf32> to vector<64x32xf32>
    %48 = arith.addf %44, %47 : vector<64x32xf32>
    %c0_27 = arith.constant 0 : index
    %c1 = arith.constant 1 : index
    %c0_28 = arith.constant 0 : index
    %c0_29 = arith.constant 0 : index
    %49 = vector.load %arg8[%c0_27, %c1, %c0_28, %c0_29] : memref<2x3x16x32xf32, #tpu.memory_space<vmem>>, vector<1x1x16x32xf32>
    %50 = vector.shape_cast %49 : vector<1x1x16x32xf32> to vector<16x32xf32>
    %cst_30 = arith.constant dense<0.000000e+00> : vector<64x32xf32>
    %51 = tpu.matmul %40, %50, %cst_30 {dimension_numbers = #tpu.dot_dimension_numbers<[1], [0], [0], [1], [0, 0, 1, 1], [], []>} : vector<64x16xf32>, vector<16x32xf32>, vector<64x32xf32> -> vector<64x32xf32>
    %c0_31 = arith.constant 0 : index
    %c1_32 = arith.constant 1 : index
    %c0_33 = arith.constant 0 : index
    %c0_34 = arith.constant 0 : index
    %52 = vector.load %arg10[%c0_31, %c1_32, %c0_33, %c0_34] : memref<2x4x1x32xf32, #tpu.memory_space<vmem>>, vector<1x1x1x32xf32>
    %53 = vector.shape_cast %52 : vector<1x1x1x32xf32> to vector<1x32xf32>
    %54 = vector.broadcast %53 : vector<1x32xf32> to vector<64x32xf32>
    %55 = arith.addf %51, %54 : vector<64x32xf32>
    %c0_35 = arith.constant 0 : index
    %c2 = arith.constant 2 : index
    %c0_36 = arith.constant 0 : index
    %c0_37 = arith.constant 0 : index
    %56 = vector.load %arg8[%c0_35, %c2, %c0_36, %c0_37] : memref<2x3x16x32xf32, #tpu.memory_space<vmem>>, vector<1x1x16x32xf32>
    %57 = vector.shape_cast %56 : vector<1x1x16x32xf32> to vector<16x32xf32>
    %cst_38 = arith.constant dense<0.000000e+00> : vector<64x32xf32>
    %58 = tpu.matmul %40, %57, %cst_38 {dimension_numbers = #tpu.dot_dimension_numbers<[1], [0], [0], [1], [0, 0, 1, 1], [], []>} : vector<64x16xf32>, vector<16x32xf32>, vector<64x32xf32> -> vector<64x32xf32>
    %c0_39 = arith.constant 0 : index
    %c2_40 = arith.constant 2 : index
    %c0_41 = arith.constant 0 : index
    %c0_42 = arith.constant 0 : index
    %59 = vector.load %arg10[%c0_39, %c2_40, %c0_41, %c0_42] : memref<2x4x1x32xf32, #tpu.memory_space<vmem>>, vector<1x1x1x32xf32>
    %60 = vector.shape_cast %59 : vector<1x1x1x32xf32> to vector<1x32xf32>
    %61 = vector.broadcast %60 : vector<1x32xf32> to vector<64x32xf32>
    %62 = arith.addf %58, %61 : vector<64x32xf32>
    %c1_43 = arith.constant 1 : index
    %c0_44 = arith.constant 0 : index
    %c0_45 = arith.constant 0 : index
    %c0_46 = arith.constant 0 : index
    %63 = vector.load %arg8[%c1_43, %c0_44, %c0_45, %c0_46] : memref<2x3x16x32xf32, #tpu.memory_space<vmem>>, vector<1x1x16x32xf32>
    %64 = vector.shape_cast %63 : vector<1x1x16x32xf32> to vector<16x32xf32>
    %cst_47 = arith.constant dense<0.000000e+00> : vector<64x32xf32>
    %65 = tpu.matmul %41, %64, %cst_47 {dimension_numbers = #tpu.dot_dimension_numbers<[1], [0], [0], [1], [0, 0, 1, 1], [], []>} : vector<64x16xf32>, vector<16x32xf32>, vector<64x32xf32> -> vector<64x32xf32>
    %c1_48 = arith.constant 1 : index
    %c0_49 = arith.constant 0 : index
    %c0_50 = arith.constant 0 : index
    %c0_51 = arith.constant 0 : index
    %66 = vector.load %arg10[%c1_48, %c0_49, %c0_50, %c0_51] : memref<2x4x1x32xf32, #tpu.memory_space<vmem>>, vector<1x1x1x32xf32>
    %67 = vector.shape_cast %66 : vector<1x1x1x32xf32> to vector<1x32xf32>
    %68 = vector.broadcast %67 : vector<1x32xf32> to vector<64x32xf32>
    %69 = arith.addf %65, %68 : vector<64x32xf32>
    %c1_52 = arith.constant 1 : index
    %c1_53 = arith.constant 1 : index
    %c0_54 = arith.constant 0 : index
    %c0_55 = arith.constant 0 : index
    %70 = vector.load %arg8[%c1_52, %c1_53, %c0_54, %c0_55] : memref<2x3x16x32xf32, #tpu.memory_space<vmem>>, vector<1x1x16x32xf32>
    %71 = vector.shape_cast %70 : vector<1x1x16x32xf32> to vector<16x32xf32>
    %cst_56 = arith.constant dense<0.000000e+00> : vector<64x32xf32>
    %72 = tpu.matmul %41, %71, %cst_56 {dimension_numbers = #tpu.dot_dimension_numbers<[1], [0], [0], [1], [0, 0, 1, 1], [], []>} : vector<64x16xf32>, vector<16x32xf32>, vector<64x32xf32> -> vector<64x32xf32>
    %c1_57 = arith.constant 1 : index
    %c1_58 = arith.constant 1 : index
    %c0_59 = arith.constant 0 : index
    %c0_60 = arith.constant 0 : index
    %73 = vector.load %arg10[%c1_57, %c1_58, %c0_59, %c0_60] : memref<2x4x1x32xf32, #tpu.memory_space<vmem>>, vector<1x1x1x32xf32>
    %74 = vector.shape_cast %73 : vector<1x1x1x32xf32> to vector<1x32xf32>
    %75 = vector.broadcast %74 : vector<1x32xf32> to vector<64x32xf32>
    %76 = arith.addf %72, %75 : vector<64x32xf32>
    %c1_61 = arith.constant 1 : index
    %c2_62 = arith.constant 2 : index
    %c0_63 = arith.constant 0 : index
    %c0_64 = arith.constant 0 : index
    %77 = vector.load %arg8[%c1_61, %c2_62, %c0_63, %c0_64] : memref<2x3x16x32xf32, #tpu.memory_space<vmem>>, vector<1x1x16x32xf32>
    %78 = vector.shape_cast %77 : vector<1x1x16x32xf32> to vector<16x32xf32>
    %cst_65 = arith.constant dense<0.000000e+00> : vector<64x32xf32>
    %79 = tpu.matmul %41, %78, %cst_65 {dimension_numbers = #tpu.dot_dimension_numbers<[1], [0], [0], [1], [0, 0, 1, 1], [], []>} : vector<64x16xf32>, vector<16x32xf32>, vector<64x32xf32> -> vector<64x32xf32>
    %c1_66 = arith.constant 1 : index
    %c2_67 = arith.constant 2 : index
    %c0_68 = arith.constant 0 : index
    %c0_69 = arith.constant 0 : index
    %80 = vector.load %arg10[%c1_66, %c2_67, %c0_68, %c0_69] : memref<2x4x1x32xf32, #tpu.memory_space<vmem>>, vector<1x1x1x32xf32>
    %81 = vector.shape_cast %80 : vector<1x1x1x32xf32> to vector<1x32xf32>
    %82 = vector.broadcast %81 : vector<1x32xf32> to vector<64x32xf32>
    %83 = arith.addf %79, %82 : vector<64x32xf32>
    %c0_70 = arith.constant 0 : index
    %c0_71 = arith.constant 0 : index
    %c0_72 = arith.constant 0 : index
    %c0_73 = arith.constant 0 : index
    %84 = vector.load %arg9[%c0_70, %c0_71, %c0_72, %c0_73] : memref<2x3x32x32xf32, #tpu.memory_space<vmem>>, vector<1x1x32x32xf32>
    %85 = vector.shape_cast %84 : vector<1x1x32x32xf32> to vector<32x32xf32>
    %c0_74 = arith.constant 0 : index
    %c1_75 = arith.constant 1 : index
    %c0_76 = arith.constant 0 : index
    %c0_77 = arith.constant 0 : index
    %86 = vector.load %arg9[%c0_74, %c1_75, %c0_76, %c0_77] : memref<2x3x32x32xf32, #tpu.memory_space<vmem>>, vector<1x1x32x32xf32>
    %87 = vector.shape_cast %86 : vector<1x1x32x32xf32> to vector<32x32xf32>
    %c0_78 = arith.constant 0 : index
    %c2_79 = arith.constant 2 : index
    %c0_80 = arith.constant 0 : index
    %c0_81 = arith.constant 0 : index
    %88 = vector.load %arg9[%c0_78, %c2_79, %c0_80, %c0_81] : memref<2x3x32x32xf32, #tpu.memory_space<vmem>>, vector<1x1x32x32xf32>
    %89 = vector.shape_cast %88 : vector<1x1x32x32xf32> to vector<32x32xf32>
    %c1_82 = arith.constant 1 : index
    %c0_83 = arith.constant 0 : index
    %c0_84 = arith.constant 0 : index
    %c0_85 = arith.constant 0 : index
    %90 = vector.load %arg9[%c1_82, %c0_83, %c0_84, %c0_85] : memref<2x3x32x32xf32, #tpu.memory_space<vmem>>, vector<1x1x32x32xf32>
    %91 = vector.shape_cast %90 : vector<1x1x32x32xf32> to vector<32x32xf32>
    %c1_86 = arith.constant 1 : index
    %c1_87 = arith.constant 1 : index
    %c0_88 = arith.constant 0 : index
    %c0_89 = arith.constant 0 : index
    %92 = vector.load %arg9[%c1_86, %c1_87, %c0_88, %c0_89] : memref<2x3x32x32xf32, #tpu.memory_space<vmem>>, vector<1x1x32x32xf32>
    %93 = vector.shape_cast %92 : vector<1x1x32x32xf32> to vector<32x32xf32>
    %c1_90 = arith.constant 1 : index
    %c2_91 = arith.constant 2 : index
    %c0_92 = arith.constant 0 : index
    %c0_93 = arith.constant 0 : index
    %94 = vector.load %arg9[%c1_90, %c2_91, %c0_92, %c0_93] : memref<2x3x32x32xf32, #tpu.memory_space<vmem>>, vector<1x1x32x32xf32>
    %95 = vector.shape_cast %94 : vector<1x1x32x32xf32> to vector<32x32xf32>
    %c0_94 = arith.constant 0 : index
    %c3 = arith.constant 3 : index
    %c0_95 = arith.constant 0 : index
    %c0_96 = arith.constant 0 : index
    %96 = vector.load %arg10[%c0_94, %c3, %c0_95, %c0_96] : memref<2x4x1x32xf32, #tpu.memory_space<vmem>>, vector<1x1x1x32xf32>
    %97 = vector.shape_cast %96 : vector<1x1x1x32xf32> to vector<1x32xf32>
    %c1_97 = arith.constant 1 : index
    %c3_98 = arith.constant 3 : index
    %c0_99 = arith.constant 0 : index
    %c0_100 = arith.constant 0 : index
    %98 = vector.load %arg10[%c1_97, %c3_98, %c0_99, %c0_100] : memref<2x4x1x32xf32, #tpu.memory_space<vmem>>, vector<1x1x1x32xf32>
    %99 = vector.shape_cast %98 : vector<1x1x1x32xf32> to vector<1x32xf32>
    %cst_101 = arith.constant 0.000000e+00 : f32
    %100 = vector.broadcast %cst_101 : f32 to vector<8x32xf32>
    %101 = vector.extract_strided_slice %48 {offsets = [0, 0], sizes = [8, 32], strides = [1, 1]} : vector<64x32xf32> to vector<8x32xf32>
    %102 = vector.extract_strided_slice %55 {offsets = [0, 0], sizes = [8, 32], strides = [1, 1]} : vector<64x32xf32> to vector<8x32xf32>
    %103 = vector.extract_strided_slice %62 {offsets = [0, 0], sizes = [8, 32], strides = [1, 1]} : vector<64x32xf32> to vector<8x32xf32>
    %cst_102 = arith.constant dense<0.000000e+00> : vector<8x32xf32>
    %104 = tpu.matmul %100, %85, %cst_102 {dimension_numbers = #tpu.dot_dimension_numbers<[1], [0], [0], [1], [0, 0, 1, 1], [], []>} : vector<8x32xf32>, vector<32x32xf32>, vector<8x32xf32> -> vector<8x32xf32>
    %cst_103 = arith.constant dense<0.000000e+00> : vector<8x32xf32>
    %105 = tpu.matmul %100, %87, %cst_103 {dimension_numbers = #tpu.dot_dimension_numbers<[1], [0], [0], [1], [0, 0, 1, 1], [], []>} : vector<8x32xf32>, vector<32x32xf32>, vector<8x32xf32> -> vector<8x32xf32>
    %cst_104 = arith.constant dense<0.000000e+00> : vector<8x32xf32>
    %106 = tpu.matmul %100, %89, %cst_104 {dimension_numbers = #tpu.dot_dimension_numbers<[1], [0], [0], [1], [0, 0, 1, 1], [], []>} : vector<8x32xf32>, vector<32x32xf32>, vector<8x32xf32> -> vector<8x32xf32>
    %107 = vector.broadcast %97 : vector<1x32xf32> to vector<8x32xf32>
    %108 = arith.addf %106, %107 : vector<8x32xf32>
    %109 = arith.addf %101, %104 : vector<8x32xf32>
    %110 = arith.negf %109 : vector<8x32xf32>
    %111 = math.exp %110 : vector<8x32xf32>
    %cst_105 = arith.constant 1.000000e+00 : f32
    %112 = vector.broadcast %cst_105 : f32 to vector<8x32xf32>
    %113 = arith.addf %112, %111 : vector<8x32xf32>
    %114 = arith.divf %112, %113 : vector<8x32xf32>
    %115 = arith.addf %102, %105 : vector<8x32xf32>
    %116 = arith.negf %115 : vector<8x32xf32>
    %117 = math.exp %116 : vector<8x32xf32>
    %cst_106 = arith.constant 1.000000e+00 : f32
    %118 = vector.broadcast %cst_106 : f32 to vector<8x32xf32>
    %119 = arith.addf %118, %117 : vector<8x32xf32>
    %120 = arith.divf %118, %119 : vector<8x32xf32>
    %121 = arith.mulf %114, %108 : vector<8x32xf32>
    %122 = arith.addf %103, %121 : vector<8x32xf32>
    %123 = math.tanh %122 : vector<8x32xf32>
    %cst_107 = arith.constant 1.000000e+00 : f32
    %124 = vector.broadcast %cst_107 : f32 to vector<8x32xf32>
    %125 = arith.subf %124, %120 : vector<8x32xf32>
    %126 = arith.mulf %125, %123 : vector<8x32xf32>
    %127 = arith.mulf %120, %100 : vector<8x32xf32>
    %128 = arith.addf %126, %127 : vector<8x32xf32>
    %129 = vector.extract_strided_slice %69 {offsets = [0, 0], sizes = [8, 32], strides = [1, 1]} : vector<64x32xf32> to vector<8x32xf32>
    %130 = vector.extract_strided_slice %76 {offsets = [0, 0], sizes = [8, 32], strides = [1, 1]} : vector<64x32xf32> to vector<8x32xf32>
    %131 = vector.extract_strided_slice %83 {offsets = [0, 0], sizes = [8, 32], strides = [1, 1]} : vector<64x32xf32> to vector<8x32xf32>
    %cst_108 = arith.constant dense<0.000000e+00> : vector<8x32xf32>
    %132 = tpu.matmul %100, %91, %cst_108 {dimension_numbers = #tpu.dot_dimension_numbers<[1], [0], [0], [1], [0, 0, 1, 1], [], []>} : vector<8x32xf32>, vector<32x32xf32>, vector<8x32xf32> -> vector<8x32xf32>
    %cst_109 = arith.constant dense<0.000000e+00> : vector<8x32xf32>
    %133 = tpu.matmul %100, %93, %cst_109 {dimension_numbers = #tpu.dot_dimension_numbers<[1], [0], [0], [1], [0, 0, 1, 1], [], []>} : vector<8x32xf32>, vector<32x32xf32>, vector<8x32xf32> -> vector<8x32xf32>
    %cst_110 = arith.constant dense<0.000000e+00> : vector<8x32xf32>
    %134 = tpu.matmul %100, %95, %cst_110 {dimension_numbers = #tpu.dot_dimension_numbers<[1], [0], [0], [1], [0, 0, 1, 1], [], []>} : vector<8x32xf32>, vector<32x32xf32>, vector<8x32xf32> -> vector<8x32xf32>
    %135 = vector.broadcast %99 : vector<1x32xf32> to vector<8x32xf32>
    %136 = arith.addf %134, %135 : vector<8x32xf32>
    %137 = arith.addf %129, %132 : vector<8x32xf32>
    %138 = arith.negf %137 : vector<8x32xf32>
    %139 = math.exp %138 : vector<8x32xf32>
    %cst_111 = arith.constant 1.000000e+00 : f32
    %140 = vector.broadcast %cst_111 : f32 to vector<8x32xf32>
    %141 = arith.addf %140, %139 : vector<8x32xf32>
    %142 = arith.divf %140, %141 : vector<8x32xf32>
    %143 = arith.addf %130, %133 : vector<8x32xf32>
    %144 = arith.negf %143 : vector<8x32xf32>
    %145 = math.exp %144 : vector<8x32xf32>
    %cst_112 = arith.constant 1.000000e+00 : f32
    %146 = vector.broadcast %cst_112 : f32 to vector<8x32xf32>
    %147 = arith.addf %146, %145 : vector<8x32xf32>
    %148 = arith.divf %146, %147 : vector<8x32xf32>
    %149 = arith.mulf %142, %136 : vector<8x32xf32>
    %150 = arith.addf %131, %149 : vector<8x32xf32>
    %151 = math.tanh %150 : vector<8x32xf32>
    %cst_113 = arith.constant 1.000000e+00 : f32
    %152 = vector.broadcast %cst_113 : f32 to vector<8x32xf32>
    %153 = arith.subf %152, %148 : vector<8x32xf32>
    %154 = arith.mulf %153, %151 : vector<8x32xf32>
    %155 = arith.mulf %148, %100 : vector<8x32xf32>
    %156 = arith.addf %154, %155 : vector<8x32xf32>
    %157 = vector.shape_cast %16 : vector<8x1xi1> to vector<8x1xi1>
    %158 = vector.broadcast %157 : vector<8x1xi1> to vector<8x32xi1>
    %159 = arith.select %158, %128, %100 : vector<8x32xi1>, vector<8x32xf32>
    %160 = vector.shape_cast %24 : vector<8x1xi1> to vector<8x1xi1>
    %161 = vector.broadcast %160 : vector<8x1xi1> to vector<8x32xi1>
    %162 = arith.select %161, %156, %100 : vector<8x32xi1>, vector<8x32xf32>
    %cst_114 = arith.constant 0.000000e+00 : f32
    %163 = vector.shape_cast %16 : vector<8x1xi1> to vector<8x1xi1>
    %164 = vector.broadcast %163 : vector<8x1xi1> to vector<8x32xi1>
    %165 = vector.broadcast %cst_114 : f32 to vector<8x32xf32>
    %166 = arith.select %164, %159, %165 : vector<8x32xi1>, vector<8x32xf32>
    %cst_115 = arith.constant 0.000000e+00 : f32
    %167 = vector.shape_cast %24 : vector<8x1xi1> to vector<8x1xi1>
    %168 = vector.broadcast %167 : vector<8x1xi1> to vector<8x32xi1>
    %169 = vector.broadcast %cst_115 : f32 to vector<8x32xf32>
    %170 = arith.select %168, %162, %169 : vector<8x32xi1>, vector<8x32xf32>
    %171 = arith.addf %166, %170 : vector<8x32xf32>
    %172 = math.tanh %171 : vector<8x32xf32>
    %173 = vector.extract_strided_slice %48 {offsets = [8, 0], sizes = [8, 32], strides = [1, 1]} : vector<64x32xf32> to vector<8x32xf32>
    %174 = vector.extract_strided_slice %55 {offsets = [8, 0], sizes = [8, 32], strides = [1, 1]} : vector<64x32xf32> to vector<8x32xf32>
    %175 = vector.extract_strided_slice %62 {offsets = [8, 0], sizes = [8, 32], strides = [1, 1]} : vector<64x32xf32> to vector<8x32xf32>
    %cst_116 = arith.constant dense<0.000000e+00> : vector<8x32xf32>
    %176 = tpu.matmul %159, %85, %cst_116 {dimension_numbers = #tpu.dot_dimension_numbers<[1], [0], [0], [1], [0, 0, 1, 1], [], []>} : vector<8x32xf32>, vector<32x32xf32>, vector<8x32xf32> -> vector<8x32xf32>
    %cst_117 = arith.constant dense<0.000000e+00> : vector<8x32xf32>
    %177 = tpu.matmul %159, %87, %cst_117 {dimension_numbers = #tpu.dot_dimension_numbers<[1], [0], [0], [1], [0, 0, 1, 1], [], []>} : vector<8x32xf32>, vector<32x32xf32>, vector<8x32xf32> -> vector<8x32xf32>
    %cst_118 = arith.constant dense<0.000000e+00> : vector<8x32xf32>
    %178 = tpu.matmul %159, %89, %cst_118 {dimension_numbers = #tpu.dot_dimension_numbers<[1], [0], [0], [1], [0, 0, 1, 1], [], []>} : vector<8x32xf32>, vector<32x32xf32>, vector<8x32xf32> -> vector<8x32xf32>
    %179 = vector.broadcast %97 : vector<1x32xf32> to vector<8x32xf32>
    %180 = arith.addf %178, %179 : vector<8x32xf32>
    %181 = arith.addf %173, %176 : vector<8x32xf32>
    %182 = arith.negf %181 : vector<8x32xf32>
    %183 = math.exp %182 : vector<8x32xf32>
    %cst_119 = arith.constant 1.000000e+00 : f32
    %184 = vector.broadcast %cst_119 : f32 to vector<8x32xf32>
    %185 = arith.addf %184, %183 : vector<8x32xf32>
    %186 = arith.divf %184, %185 : vector<8x32xf32>
    %187 = arith.addf %174, %177 : vector<8x32xf32>
    %188 = arith.negf %187 : vector<8x32xf32>
    %189 = math.exp %188 : vector<8x32xf32>
    %cst_120 = arith.constant 1.000000e+00 : f32
    %190 = vector.broadcast %cst_120 : f32 to vector<8x32xf32>
    %191 = arith.addf %190, %189 : vector<8x32xf32>
    %192 = arith.divf %190, %191 : vector<8x32xf32>
    %193 = arith.mulf %186, %180 : vector<8x32xf32>
    %194 = arith.addf %175, %193 : vector<8x32xf32>
    %195 = math.tanh %194 : vector<8x32xf32>
    %cst_121 = arith.constant 1.000000e+00 : f32
    %196 = vector.broadcast %cst_121 : f32 to vector<8x32xf32>
    %197 = arith.subf %196, %192 : vector<8x32xf32>
    %198 = arith.mulf %197, %195 : vector<8x32xf32>
    %199 = arith.mulf %192, %159 : vector<8x32xf32>
    %200 = arith.addf %198, %199 : vector<8x32xf32>
    %201 = vector.extract_strided_slice %69 {offsets = [8, 0], sizes = [8, 32], strides = [1, 1]} : vector<64x32xf32> to vector<8x32xf32>
    %202 = vector.extract_strided_slice %76 {offsets = [8, 0], sizes = [8, 32], strides = [1, 1]} : vector<64x32xf32> to vector<8x32xf32>
    %203 = vector.extract_strided_slice %83 {offsets = [8, 0], sizes = [8, 32], strides = [1, 1]} : vector<64x32xf32> to vector<8x32xf32>
    %cst_122 = arith.constant dense<0.000000e+00> : vector<8x32xf32>
    %204 = tpu.matmul %162, %91, %cst_122 {dimension_numbers = #tpu.dot_dimension_numbers<[1], [0], [0], [1], [0, 0, 1, 1], [], []>} : vector<8x32xf32>, vector<32x32xf32>, vector<8x32xf32> -> vector<8x32xf32>
    %cst_123 = arith.constant dense<0.000000e+00> : vector<8x32xf32>
    %205 = tpu.matmul %162, %93, %cst_123 {dimension_numbers = #tpu.dot_dimension_numbers<[1], [0], [0], [1], [0, 0, 1, 1], [], []>} : vector<8x32xf32>, vector<32x32xf32>, vector<8x32xf32> -> vector<8x32xf32>
    %cst_124 = arith.constant dense<0.000000e+00> : vector<8x32xf32>
    %206 = tpu.matmul %162, %95, %cst_124 {dimension_numbers = #tpu.dot_dimension_numbers<[1], [0], [0], [1], [0, 0, 1, 1], [], []>} : vector<8x32xf32>, vector<32x32xf32>, vector<8x32xf32> -> vector<8x32xf32>
    %207 = vector.broadcast %99 : vector<1x32xf32> to vector<8x32xf32>
    %208 = arith.addf %206, %207 : vector<8x32xf32>
    %209 = arith.addf %201, %204 : vector<8x32xf32>
    %210 = arith.negf %209 : vector<8x32xf32>
    %211 = math.exp %210 : vector<8x32xf32>
    %cst_125 = arith.constant 1.000000e+00 : f32
    %212 = vector.broadcast %cst_125 : f32 to vector<8x32xf32>
    %213 = arith.addf %212, %211 : vector<8x32xf32>
    %214 = arith.divf %212, %213 : vector<8x32xf32>
    %215 = arith.addf %202, %205 : vector<8x32xf32>
    %216 = arith.negf %215 : vector<8x32xf32>
    %217 = math.exp %216 : vector<8x32xf32>
    %cst_126 = arith.constant 1.000000e+00 : f32
    %218 = vector.broadcast %cst_126 : f32 to vector<8x32xf32>
    %219 = arith.addf %218, %217 : vector<8x32xf32>
    %220 = arith.divf %218, %219 : vector<8x32xf32>
    %221 = arith.mulf %214, %208 : vector<8x32xf32>
    %222 = arith.addf %203, %221 : vector<8x32xf32>
    %223 = math.tanh %222 : vector<8x32xf32>
    %cst_127 = arith.constant 1.000000e+00 : f32
    %224 = vector.broadcast %cst_127 : f32 to vector<8x32xf32>
    %225 = arith.subf %224, %220 : vector<8x32xf32>
    %226 = arith.mulf %225, %223 : vector<8x32xf32>
    %227 = arith.mulf %220, %162 : vector<8x32xf32>
    %228 = arith.addf %226, %227 : vector<8x32xf32>
    %229 = vector.shape_cast %17 : vector<8x1xi1> to vector<8x1xi1>
    %230 = vector.broadcast %229 : vector<8x1xi1> to vector<8x32xi1>
    %231 = arith.select %230, %200, %159 : vector<8x32xi1>, vector<8x32xf32>
    %232 = vector.shape_cast %25 : vector<8x1xi1> to vector<8x1xi1>
    %233 = vector.broadcast %232 : vector<8x1xi1> to vector<8x32xi1>
    %234 = arith.select %233, %228, %162 : vector<8x32xi1>, vector<8x32xf32>
    %cst_128 = arith.constant 0.000000e+00 : f32
    %235 = vector.shape_cast %17 : vector<8x1xi1> to vector<8x1xi1>
    %236 = vector.broadcast %235 : vector<8x1xi1> to vector<8x32xi1>
    %237 = vector.broadcast %cst_128 : f32 to vector<8x32xf32>
    %238 = arith.select %236, %231, %237 : vector<8x32xi1>, vector<8x32xf32>
    %cst_129 = arith.constant 0.000000e+00 : f32
    %239 = vector.shape_cast %25 : vector<8x1xi1> to vector<8x1xi1>
    %240 = vector.broadcast %239 : vector<8x1xi1> to vector<8x32xi1>
    %241 = vector.broadcast %cst_129 : f32 to vector<8x32xf32>
    %242 = arith.select %240, %234, %241 : vector<8x32xi1>, vector<8x32xf32>
    %243 = arith.addf %238, %242 : vector<8x32xf32>
    %244 = math.tanh %243 : vector<8x32xf32>
    %245 = vector.extract_strided_slice %48 {offsets = [16, 0], sizes = [8, 32], strides = [1, 1]} : vector<64x32xf32> to vector<8x32xf32>
    %246 = vector.extract_strided_slice %55 {offsets = [16, 0], sizes = [8, 32], strides = [1, 1]} : vector<64x32xf32> to vector<8x32xf32>
    %247 = vector.extract_strided_slice %62 {offsets = [16, 0], sizes = [8, 32], strides = [1, 1]} : vector<64x32xf32> to vector<8x32xf32>
    %cst_130 = arith.constant dense<0.000000e+00> : vector<8x32xf32>
    %248 = tpu.matmul %231, %85, %cst_130 {dimension_numbers = #tpu.dot_dimension_numbers<[1], [0], [0], [1], [0, 0, 1, 1], [], []>} : vector<8x32xf32>, vector<32x32xf32>, vector<8x32xf32> -> vector<8x32xf32>
    %cst_131 = arith.constant dense<0.000000e+00> : vector<8x32xf32>
    %249 = tpu.matmul %231, %87, %cst_131 {dimension_numbers = #tpu.dot_dimension_numbers<[1], [0], [0], [1], [0, 0, 1, 1], [], []>} : vector<8x32xf32>, vector<32x32xf32>, vector<8x32xf32> -> vector<8x32xf32>
    %cst_132 = arith.constant dense<0.000000e+00> : vector<8x32xf32>
    %250 = tpu.matmul %231, %89, %cst_132 {dimension_numbers = #tpu.dot_dimension_numbers<[1], [0], [0], [1], [0, 0, 1, 1], [], []>} : vector<8x32xf32>, vector<32x32xf32>, vector<8x32xf32> -> vector<8x32xf32>
    %251 = vector.broadcast %97 : vector<1x32xf32> to vector<8x32xf32>
    %252 = arith.addf %250, %251 : vector<8x32xf32>
    %253 = arith.addf %245, %248 : vector<8x32xf32>
    %254 = arith.negf %253 : vector<8x32xf32>
    %255 = math.exp %254 : vector<8x32xf32>
    %cst_133 = arith.constant 1.000000e+00 : f32
    %256 = vector.broadcast %cst_133 : f32 to vector<8x32xf32>
    %257 = arith.addf %256, %255 : vector<8x32xf32>
    %258 = arith.divf %256, %257 : vector<8x32xf32>
    %259 = arith.addf %246, %249 : vector<8x32xf32>
    %260 = arith.negf %259 : vector<8x32xf32>
    %261 = math.exp %260 : vector<8x32xf32>
    %cst_134 = arith.constant 1.000000e+00 : f32
    %262 = vector.broadcast %cst_134 : f32 to vector<8x32xf32>
    %263 = arith.addf %262, %261 : vector<8x32xf32>
    %264 = arith.divf %262, %263 : vector<8x32xf32>
    %265 = arith.mulf %258, %252 : vector<8x32xf32>
    %266 = arith.addf %247, %265 : vector<8x32xf32>
    %267 = math.tanh %266 : vector<8x32xf32>
    %cst_135 = arith.constant 1.000000e+00 : f32
    %268 = vector.broadcast %cst_135 : f32 to vector<8x32xf32>
    %269 = arith.subf %268, %264 : vector<8x32xf32>
    %270 = arith.mulf %269, %267 : vector<8x32xf32>
    %271 = arith.mulf %264, %231 : vector<8x32xf32>
    %272 = arith.addf %270, %271 : vector<8x32xf32>
    %273 = vector.extract_strided_slice %69 {offsets = [16, 0], sizes = [8, 32], strides = [1, 1]} : vector<64x32xf32> to vector<8x32xf32>
    %274 = vector.extract_strided_slice %76 {offsets = [16, 0], sizes = [8, 32], strides = [1, 1]} : vector<64x32xf32> to vector<8x32xf32>
    %275 = vector.extract_strided_slice %83 {offsets = [16, 0], sizes = [8, 32], strides = [1, 1]} : vector<64x32xf32> to vector<8x32xf32>
    %cst_136 = arith.constant dense<0.000000e+00> : vector<8x32xf32>
    %276 = tpu.matmul %234, %91, %cst_136 {dimension_numbers = #tpu.dot_dimension_numbers<[1], [0], [0], [1], [0, 0, 1, 1], [], []>} : vector<8x32xf32>, vector<32x32xf32>, vector<8x32xf32> -> vector<8x32xf32>
    %cst_137 = arith.constant dense<0.000000e+00> : vector<8x32xf32>
    %277 = tpu.matmul %234, %93, %cst_137 {dimension_numbers = #tpu.dot_dimension_numbers<[1], [0], [0], [1], [0, 0, 1, 1], [], []>} : vector<8x32xf32>, vector<32x32xf32>, vector<8x32xf32> -> vector<8x32xf32>
    %cst_138 = arith.constant dense<0.000000e+00> : vector<8x32xf32>
    %278 = tpu.matmul %234, %95, %cst_138 {dimension_numbers = #tpu.dot_dimension_numbers<[1], [0], [0], [1], [0, 0, 1, 1], [], []>} : vector<8x32xf32>, vector<32x32xf32>, vector<8x32xf32> -> vector<8x32xf32>
    %279 = vector.broadcast %99 : vector<1x32xf32> to vector<8x32xf32>
    %280 = arith.addf %278, %279 : vector<8x32xf32>
    %281 = arith.addf %273, %276 : vector<8x32xf32>
    %282 = arith.negf %281 : vector<8x32xf32>
    %283 = math.exp %282 : vector<8x32xf32>
    %cst_139 = arith.constant 1.000000e+00 : f32
    %284 = vector.broadcast %cst_139 : f32 to vector<8x32xf32>
    %285 = arith.addf %284, %283 : vector<8x32xf32>
    %286 = arith.divf %284, %285 : vector<8x32xf32>
    %287 = arith.addf %274, %277 : vector<8x32xf32>
    %288 = arith.negf %287 : vector<8x32xf32>
    %289 = math.exp %288 : vector<8x32xf32>
    %cst_140 = arith.constant 1.000000e+00 : f32
    %290 = vector.broadcast %cst_140 : f32 to vector<8x32xf32>
    %291 = arith.addf %290, %289 : vector<8x32xf32>
    %292 = arith.divf %290, %291 : vector<8x32xf32>
    %293 = arith.mulf %286, %280 : vector<8x32xf32>
    %294 = arith.addf %275, %293 : vector<8x32xf32>
    %295 = math.tanh %294 : vector<8x32xf32>
    %cst_141 = arith.constant 1.000000e+00 : f32
    %296 = vector.broadcast %cst_141 : f32 to vector<8x32xf32>
    %297 = arith.subf %296, %292 : vector<8x32xf32>
    %298 = arith.mulf %297, %295 : vector<8x32xf32>
    %299 = arith.mulf %292, %234 : vector<8x32xf32>
    %300 = arith.addf %298, %299 : vector<8x32xf32>
    %301 = vector.shape_cast %18 : vector<8x1xi1> to vector<8x1xi1>
    %302 = vector.broadcast %301 : vector<8x1xi1> to vector<8x32xi1>
    %303 = arith.select %302, %272, %231 : vector<8x32xi1>, vector<8x32xf32>
    %304 = vector.shape_cast %26 : vector<8x1xi1> to vector<8x1xi1>
    %305 = vector.broadcast %304 : vector<8x1xi1> to vector<8x32xi1>
    %306 = arith.select %305, %300, %234 : vector<8x32xi1>, vector<8x32xf32>
    %cst_142 = arith.constant 0.000000e+00 : f32
    %307 = vector.shape_cast %18 : vector<8x1xi1> to vector<8x1xi1>
    %308 = vector.broadcast %307 : vector<8x1xi1> to vector<8x32xi1>
    %309 = vector.broadcast %cst_142 : f32 to vector<8x32xf32>
    %310 = arith.select %308, %303, %309 : vector<8x32xi1>, vector<8x32xf32>
    %cst_143 = arith.constant 0.000000e+00 : f32
    %311 = vector.shape_cast %26 : vector<8x1xi1> to vector<8x1xi1>
    %312 = vector.broadcast %311 : vector<8x1xi1> to vector<8x32xi1>
    %313 = vector.broadcast %cst_143 : f32 to vector<8x32xf32>
    %314 = arith.select %312, %306, %313 : vector<8x32xi1>, vector<8x32xf32>
    %315 = arith.addf %310, %314 : vector<8x32xf32>
    %316 = math.tanh %315 : vector<8x32xf32>
    %317 = vector.extract_strided_slice %48 {offsets = [24, 0], sizes = [8, 32], strides = [1, 1]} : vector<64x32xf32> to vector<8x32xf32>
    %318 = vector.extract_strided_slice %55 {offsets = [24, 0], sizes = [8, 32], strides = [1, 1]} : vector<64x32xf32> to vector<8x32xf32>
    %319 = vector.extract_strided_slice %62 {offsets = [24, 0], sizes = [8, 32], strides = [1, 1]} : vector<64x32xf32> to vector<8x32xf32>
    %cst_144 = arith.constant dense<0.000000e+00> : vector<8x32xf32>
    %320 = tpu.matmul %303, %85, %cst_144 {dimension_numbers = #tpu.dot_dimension_numbers<[1], [0], [0], [1], [0, 0, 1, 1], [], []>} : vector<8x32xf32>, vector<32x32xf32>, vector<8x32xf32> -> vector<8x32xf32>
    %cst_145 = arith.constant dense<0.000000e+00> : vector<8x32xf32>
    %321 = tpu.matmul %303, %87, %cst_145 {dimension_numbers = #tpu.dot_dimension_numbers<[1], [0], [0], [1], [0, 0, 1, 1], [], []>} : vector<8x32xf32>, vector<32x32xf32>, vector<8x32xf32> -> vector<8x32xf32>
    %cst_146 = arith.constant dense<0.000000e+00> : vector<8x32xf32>
    %322 = tpu.matmul %303, %89, %cst_146 {dimension_numbers = #tpu.dot_dimension_numbers<[1], [0], [0], [1], [0, 0, 1, 1], [], []>} : vector<8x32xf32>, vector<32x32xf32>, vector<8x32xf32> -> vector<8x32xf32>
    %323 = vector.broadcast %97 : vector<1x32xf32> to vector<8x32xf32>
    %324 = arith.addf %322, %323 : vector<8x32xf32>
    %325 = arith.addf %317, %320 : vector<8x32xf32>
    %326 = arith.negf %325 : vector<8x32xf32>
    %327 = math.exp %326 : vector<8x32xf32>
    %cst_147 = arith.constant 1.000000e+00 : f32
    %328 = vector.broadcast %cst_147 : f32 to vector<8x32xf32>
    %329 = arith.addf %328, %327 : vector<8x32xf32>
    %330 = arith.divf %328, %329 : vector<8x32xf32>
    %331 = arith.addf %318, %321 : vector<8x32xf32>
    %332 = arith.negf %331 : vector<8x32xf32>
    %333 = math.exp %332 : vector<8x32xf32>
    %cst_148 = arith.constant 1.000000e+00 : f32
    %334 = vector.broadcast %cst_148 : f32 to vector<8x32xf32>
    %335 = arith.addf %334, %333 : vector<8x32xf32>
    %336 = arith.divf %334, %335 : vector<8x32xf32>
    %337 = arith.mulf %330, %324 : vector<8x32xf32>
    %338 = arith.addf %319, %337 : vector<8x32xf32>
    %339 = math.tanh %338 : vector<8x32xf32>
    %cst_149 = arith.constant 1.000000e+00 : f32
    %340 = vector.broadcast %cst_149 : f32 to vector<8x32xf32>
    %341 = arith.subf %340, %336 : vector<8x32xf32>
    %342 = arith.mulf %341, %339 : vector<8x32xf32>
    %343 = arith.mulf %336, %303 : vector<8x32xf32>
    %344 = arith.addf %342, %343 : vector<8x32xf32>
    %345 = vector.extract_strided_slice %69 {offsets = [24, 0], sizes = [8, 32], strides = [1, 1]} : vector<64x32xf32> to vector<8x32xf32>
    %346 = vector.extract_strided_slice %76 {offsets = [24, 0], sizes = [8, 32], strides = [1, 1]} : vector<64x32xf32> to vector<8x32xf32>
    %347 = vector.extract_strided_slice %83 {offsets = [24, 0], sizes = [8, 32], strides = [1, 1]} : vector<64x32xf32> to vector<8x32xf32>
    %cst_150 = arith.constant dense<0.000000e+00> : vector<8x32xf32>
    %348 = tpu.matmul %306, %91, %cst_150 {dimension_numbers = #tpu.dot_dimension_numbers<[1], [0], [0], [1], [0, 0, 1, 1], [], []>} : vector<8x32xf32>, vector<32x32xf32>, vector<8x32xf32> -> vector<8x32xf32>
    %cst_151 = arith.constant dense<0.000000e+00> : vector<8x32xf32>
    %349 = tpu.matmul %306, %93, %cst_151 {dimension_numbers = #tpu.dot_dimension_numbers<[1], [0], [0], [1], [0, 0, 1, 1], [], []>} : vector<8x32xf32>, vector<32x32xf32>, vector<8x32xf32> -> vector<8x32xf32>
    %cst_152 = arith.constant dense<0.000000e+00> : vector<8x32xf32>
    %350 = tpu.matmul %306, %95, %cst_152 {dimension_numbers = #tpu.dot_dimension_numbers<[1], [0], [0], [1], [0, 0, 1, 1], [], []>} : vector<8x32xf32>, vector<32x32xf32>, vector<8x32xf32> -> vector<8x32xf32>
    %351 = vector.broadcast %99 : vector<1x32xf32> to vector<8x32xf32>
    %352 = arith.addf %350, %351 : vector<8x32xf32>
    %353 = arith.addf %345, %348 : vector<8x32xf32>
    %354 = arith.negf %353 : vector<8x32xf32>
    %355 = math.exp %354 : vector<8x32xf32>
    %cst_153 = arith.constant 1.000000e+00 : f32
    %356 = vector.broadcast %cst_153 : f32 to vector<8x32xf32>
    %357 = arith.addf %356, %355 : vector<8x32xf32>
    %358 = arith.divf %356, %357 : vector<8x32xf32>
    %359 = arith.addf %346, %349 : vector<8x32xf32>
    %360 = arith.negf %359 : vector<8x32xf32>
    %361 = math.exp %360 : vector<8x32xf32>
    %cst_154 = arith.constant 1.000000e+00 : f32
    %362 = vector.broadcast %cst_154 : f32 to vector<8x32xf32>
    %363 = arith.addf %362, %361 : vector<8x32xf32>
    %364 = arith.divf %362, %363 : vector<8x32xf32>
    %365 = arith.mulf %358, %352 : vector<8x32xf32>
    %366 = arith.addf %347, %365 : vector<8x32xf32>
    %367 = math.tanh %366 : vector<8x32xf32>
    %cst_155 = arith.constant 1.000000e+00 : f32
    %368 = vector.broadcast %cst_155 : f32 to vector<8x32xf32>
    %369 = arith.subf %368, %364 : vector<8x32xf32>
    %370 = arith.mulf %369, %367 : vector<8x32xf32>
    %371 = arith.mulf %364, %306 : vector<8x32xf32>
    %372 = arith.addf %370, %371 : vector<8x32xf32>
    %373 = vector.shape_cast %19 : vector<8x1xi1> to vector<8x1xi1>
    %374 = vector.broadcast %373 : vector<8x1xi1> to vector<8x32xi1>
    %375 = arith.select %374, %344, %303 : vector<8x32xi1>, vector<8x32xf32>
    %376 = vector.shape_cast %27 : vector<8x1xi1> to vector<8x1xi1>
    %377 = vector.broadcast %376 : vector<8x1xi1> to vector<8x32xi1>
    %378 = arith.select %377, %372, %306 : vector<8x32xi1>, vector<8x32xf32>
    %cst_156 = arith.constant 0.000000e+00 : f32
    %379 = vector.shape_cast %19 : vector<8x1xi1> to vector<8x1xi1>
    %380 = vector.broadcast %379 : vector<8x1xi1> to vector<8x32xi1>
    %381 = vector.broadcast %cst_156 : f32 to vector<8x32xf32>
    %382 = arith.select %380, %375, %381 : vector<8x32xi1>, vector<8x32xf32>
    %cst_157 = arith.constant 0.000000e+00 : f32
    %383 = vector.shape_cast %27 : vector<8x1xi1> to vector<8x1xi1>
    %384 = vector.broadcast %383 : vector<8x1xi1> to vector<8x32xi1>
    %385 = vector.broadcast %cst_157 : f32 to vector<8x32xf32>
    %386 = arith.select %384, %378, %385 : vector<8x32xi1>, vector<8x32xf32>
    %387 = arith.addf %382, %386 : vector<8x32xf32>
    %388 = math.tanh %387 : vector<8x32xf32>
    %389 = vector.extract_strided_slice %48 {offsets = [32, 0], sizes = [8, 32], strides = [1, 1]} : vector<64x32xf32> to vector<8x32xf32>
    %390 = vector.extract_strided_slice %55 {offsets = [32, 0], sizes = [8, 32], strides = [1, 1]} : vector<64x32xf32> to vector<8x32xf32>
    %391 = vector.extract_strided_slice %62 {offsets = [32, 0], sizes = [8, 32], strides = [1, 1]} : vector<64x32xf32> to vector<8x32xf32>
    %cst_158 = arith.constant dense<0.000000e+00> : vector<8x32xf32>
    %392 = tpu.matmul %375, %85, %cst_158 {dimension_numbers = #tpu.dot_dimension_numbers<[1], [0], [0], [1], [0, 0, 1, 1], [], []>} : vector<8x32xf32>, vector<32x32xf32>, vector<8x32xf32> -> vector<8x32xf32>
    %cst_159 = arith.constant dense<0.000000e+00> : vector<8x32xf32>
    %393 = tpu.matmul %375, %87, %cst_159 {dimension_numbers = #tpu.dot_dimension_numbers<[1], [0], [0], [1], [0, 0, 1, 1], [], []>} : vector<8x32xf32>, vector<32x32xf32>, vector<8x32xf32> -> vector<8x32xf32>
    %cst_160 = arith.constant dense<0.000000e+00> : vector<8x32xf32>
    %394 = tpu.matmul %375, %89, %cst_160 {dimension_numbers = #tpu.dot_dimension_numbers<[1], [0], [0], [1], [0, 0, 1, 1], [], []>} : vector<8x32xf32>, vector<32x32xf32>, vector<8x32xf32> -> vector<8x32xf32>
    %395 = vector.broadcast %97 : vector<1x32xf32> to vector<8x32xf32>
    %396 = arith.addf %394, %395 : vector<8x32xf32>
    %397 = arith.addf %389, %392 : vector<8x32xf32>
    %398 = arith.negf %397 : vector<8x32xf32>
    %399 = math.exp %398 : vector<8x32xf32>
    %cst_161 = arith.constant 1.000000e+00 : f32
    %400 = vector.broadcast %cst_161 : f32 to vector<8x32xf32>
    %401 = arith.addf %400, %399 : vector<8x32xf32>
    %402 = arith.divf %400, %401 : vector<8x32xf32>
    %403 = arith.addf %390, %393 : vector<8x32xf32>
    %404 = arith.negf %403 : vector<8x32xf32>
    %405 = math.exp %404 : vector<8x32xf32>
    %cst_162 = arith.constant 1.000000e+00 : f32
    %406 = vector.broadcast %cst_162 : f32 to vector<8x32xf32>
    %407 = arith.addf %406, %405 : vector<8x32xf32>
    %408 = arith.divf %406, %407 : vector<8x32xf32>
    %409 = arith.mulf %402, %396 : vector<8x32xf32>
    %410 = arith.addf %391, %409 : vector<8x32xf32>
    %411 = math.tanh %410 : vector<8x32xf32>
    %cst_163 = arith.constant 1.000000e+00 : f32
    %412 = vector.broadcast %cst_163 : f32 to vector<8x32xf32>
    %413 = arith.subf %412, %408 : vector<8x32xf32>
    %414 = arith.mulf %413, %411 : vector<8x32xf32>
    %415 = arith.mulf %408, %375 : vector<8x32xf32>
    %416 = arith.addf %414, %415 : vector<8x32xf32>
    %417 = vector.extract_strided_slice %69 {offsets = [32, 0], sizes = [8, 32], strides = [1, 1]} : vector<64x32xf32> to vector<8x32xf32>
    %418 = vector.extract_strided_slice %76 {offsets = [32, 0], sizes = [8, 32], strides = [1, 1]} : vector<64x32xf32> to vector<8x32xf32>
    %419 = vector.extract_strided_slice %83 {offsets = [32, 0], sizes = [8, 32], strides = [1, 1]} : vector<64x32xf32> to vector<8x32xf32>
    %cst_164 = arith.constant dense<0.000000e+00> : vector<8x32xf32>
    %420 = tpu.matmul %378, %91, %cst_164 {dimension_numbers = #tpu.dot_dimension_numbers<[1], [0], [0], [1], [0, 0, 1, 1], [], []>} : vector<8x32xf32>, vector<32x32xf32>, vector<8x32xf32> -> vector<8x32xf32>
    %cst_165 = arith.constant dense<0.000000e+00> : vector<8x32xf32>
    %421 = tpu.matmul %378, %93, %cst_165 {dimension_numbers = #tpu.dot_dimension_numbers<[1], [0], [0], [1], [0, 0, 1, 1], [], []>} : vector<8x32xf32>, vector<32x32xf32>, vector<8x32xf32> -> vector<8x32xf32>
    %cst_166 = arith.constant dense<0.000000e+00> : vector<8x32xf32>
    %422 = tpu.matmul %378, %95, %cst_166 {dimension_numbers = #tpu.dot_dimension_numbers<[1], [0], [0], [1], [0, 0, 1, 1], [], []>} : vector<8x32xf32>, vector<32x32xf32>, vector<8x32xf32> -> vector<8x32xf32>
    %423 = vector.broadcast %99 : vector<1x32xf32> to vector<8x32xf32>
    %424 = arith.addf %422, %423 : vector<8x32xf32>
    %425 = arith.addf %417, %420 : vector<8x32xf32>
    %426 = arith.negf %425 : vector<8x32xf32>
    %427 = math.exp %426 : vector<8x32xf32>
    %cst_167 = arith.constant 1.000000e+00 : f32
    %428 = vector.broadcast %cst_167 : f32 to vector<8x32xf32>
    %429 = arith.addf %428, %427 : vector<8x32xf32>
    %430 = arith.divf %428, %429 : vector<8x32xf32>
    %431 = arith.addf %418, %421 : vector<8x32xf32>
    %432 = arith.negf %431 : vector<8x32xf32>
    %433 = math.exp %432 : vector<8x32xf32>
    %cst_168 = arith.constant 1.000000e+00 : f32
    %434 = vector.broadcast %cst_168 : f32 to vector<8x32xf32>
    %435 = arith.addf %434, %433 : vector<8x32xf32>
    %436 = arith.divf %434, %435 : vector<8x32xf32>
    %437 = arith.mulf %430, %424 : vector<8x32xf32>
    %438 = arith.addf %419, %437 : vector<8x32xf32>
    %439 = math.tanh %438 : vector<8x32xf32>
    %cst_169 = arith.constant 1.000000e+00 : f32
    %440 = vector.broadcast %cst_169 : f32 to vector<8x32xf32>
    %441 = arith.subf %440, %436 : vector<8x32xf32>
    %442 = arith.mulf %441, %439 : vector<8x32xf32>
    %443 = arith.mulf %436, %378 : vector<8x32xf32>
    %444 = arith.addf %442, %443 : vector<8x32xf32>
    %445 = vector.shape_cast %20 : vector<8x1xi1> to vector<8x1xi1>
    %446 = vector.broadcast %445 : vector<8x1xi1> to vector<8x32xi1>
    %447 = arith.select %446, %416, %375 : vector<8x32xi1>, vector<8x32xf32>
    %448 = vector.shape_cast %28 : vector<8x1xi1> to vector<8x1xi1>
    %449 = vector.broadcast %448 : vector<8x1xi1> to vector<8x32xi1>
    %450 = arith.select %449, %444, %378 : vector<8x32xi1>, vector<8x32xf32>
    %cst_170 = arith.constant 0.000000e+00 : f32
    %451 = vector.shape_cast %20 : vector<8x1xi1> to vector<8x1xi1>
    %452 = vector.broadcast %451 : vector<8x1xi1> to vector<8x32xi1>
    %453 = vector.broadcast %cst_170 : f32 to vector<8x32xf32>
    %454 = arith.select %452, %447, %453 : vector<8x32xi1>, vector<8x32xf32>
    %cst_171 = arith.constant 0.000000e+00 : f32
    %455 = vector.shape_cast %28 : vector<8x1xi1> to vector<8x1xi1>
    %456 = vector.broadcast %455 : vector<8x1xi1> to vector<8x32xi1>
    %457 = vector.broadcast %cst_171 : f32 to vector<8x32xf32>
    %458 = arith.select %456, %450, %457 : vector<8x32xi1>, vector<8x32xf32>
    %459 = arith.addf %454, %458 : vector<8x32xf32>
    %460 = math.tanh %459 : vector<8x32xf32>
    %461 = vector.extract_strided_slice %48 {offsets = [40, 0], sizes = [8, 32], strides = [1, 1]} : vector<64x32xf32> to vector<8x32xf32>
    %462 = vector.extract_strided_slice %55 {offsets = [40, 0], sizes = [8, 32], strides = [1, 1]} : vector<64x32xf32> to vector<8x32xf32>
    %463 = vector.extract_strided_slice %62 {offsets = [40, 0], sizes = [8, 32], strides = [1, 1]} : vector<64x32xf32> to vector<8x32xf32>
    %cst_172 = arith.constant dense<0.000000e+00> : vector<8x32xf32>
    %464 = tpu.matmul %447, %85, %cst_172 {dimension_numbers = #tpu.dot_dimension_numbers<[1], [0], [0], [1], [0, 0, 1, 1], [], []>} : vector<8x32xf32>, vector<32x32xf32>, vector<8x32xf32> -> vector<8x32xf32>
    %cst_173 = arith.constant dense<0.000000e+00> : vector<8x32xf32>
    %465 = tpu.matmul %447, %87, %cst_173 {dimension_numbers = #tpu.dot_dimension_numbers<[1], [0], [0], [1], [0, 0, 1, 1], [], []>} : vector<8x32xf32>, vector<32x32xf32>, vector<8x32xf32> -> vector<8x32xf32>
    %cst_174 = arith.constant dense<0.000000e+00> : vector<8x32xf32>
    %466 = tpu.matmul %447, %89, %cst_174 {dimension_numbers = #tpu.dot_dimension_numbers<[1], [0], [0], [1], [0, 0, 1, 1], [], []>} : vector<8x32xf32>, vector<32x32xf32>, vector<8x32xf32> -> vector<8x32xf32>
    %467 = vector.broadcast %97 : vector<1x32xf32> to vector<8x32xf32>
    %468 = arith.addf %466, %467 : vector<8x32xf32>
    %469 = arith.addf %461, %464 : vector<8x32xf32>
    %470 = arith.negf %469 : vector<8x32xf32>
    %471 = math.exp %470 : vector<8x32xf32>
    %cst_175 = arith.constant 1.000000e+00 : f32
    %472 = vector.broadcast %cst_175 : f32 to vector<8x32xf32>
    %473 = arith.addf %472, %471 : vector<8x32xf32>
    %474 = arith.divf %472, %473 : vector<8x32xf32>
    %475 = arith.addf %462, %465 : vector<8x32xf32>
    %476 = arith.negf %475 : vector<8x32xf32>
    %477 = math.exp %476 : vector<8x32xf32>
    %cst_176 = arith.constant 1.000000e+00 : f32
    %478 = vector.broadcast %cst_176 : f32 to vector<8x32xf32>
    %479 = arith.addf %478, %477 : vector<8x32xf32>
    %480 = arith.divf %478, %479 : vector<8x32xf32>
    %481 = arith.mulf %474, %468 : vector<8x32xf32>
    %482 = arith.addf %463, %481 : vector<8x32xf32>
    %483 = math.tanh %482 : vector<8x32xf32>
    %cst_177 = arith.constant 1.000000e+00 : f32
    %484 = vector.broadcast %cst_177 : f32 to vector<8x32xf32>
    %485 = arith.subf %484, %480 : vector<8x32xf32>
    %486 = arith.mulf %485, %483 : vector<8x32xf32>
    %487 = arith.mulf %480, %447 : vector<8x32xf32>
    %488 = arith.addf %486, %487 : vector<8x32xf32>
    %489 = vector.extract_strided_slice %69 {offsets = [40, 0], sizes = [8, 32], strides = [1, 1]} : vector<64x32xf32> to vector<8x32xf32>
    %490 = vector.extract_strided_slice %76 {offsets = [40, 0], sizes = [8, 32], strides = [1, 1]} : vector<64x32xf32> to vector<8x32xf32>
    %491 = vector.extract_strided_slice %83 {offsets = [40, 0], sizes = [8, 32], strides = [1, 1]} : vector<64x32xf32> to vector<8x32xf32>
    %cst_178 = arith.constant dense<0.000000e+00> : vector<8x32xf32>
    %492 = tpu.matmul %450, %91, %cst_178 {dimension_numbers = #tpu.dot_dimension_numbers<[1], [0], [0], [1], [0, 0, 1, 1], [], []>} : vector<8x32xf32>, vector<32x32xf32>, vector<8x32xf32> -> vector<8x32xf32>
    %cst_179 = arith.constant dense<0.000000e+00> : vector<8x32xf32>
    %493 = tpu.matmul %450, %93, %cst_179 {dimension_numbers = #tpu.dot_dimension_numbers<[1], [0], [0], [1], [0, 0, 1, 1], [], []>} : vector<8x32xf32>, vector<32x32xf32>, vector<8x32xf32> -> vector<8x32xf32>
    %cst_180 = arith.constant dense<0.000000e+00> : vector<8x32xf32>
    %494 = tpu.matmul %450, %95, %cst_180 {dimension_numbers = #tpu.dot_dimension_numbers<[1], [0], [0], [1], [0, 0, 1, 1], [], []>} : vector<8x32xf32>, vector<32x32xf32>, vector<8x32xf32> -> vector<8x32xf32>
    %495 = vector.broadcast %99 : vector<1x32xf32> to vector<8x32xf32>
    %496 = arith.addf %494, %495 : vector<8x32xf32>
    %497 = arith.addf %489, %492 : vector<8x32xf32>
    %498 = arith.negf %497 : vector<8x32xf32>
    %499 = math.exp %498 : vector<8x32xf32>
    %cst_181 = arith.constant 1.000000e+00 : f32
    %500 = vector.broadcast %cst_181 : f32 to vector<8x32xf32>
    %501 = arith.addf %500, %499 : vector<8x32xf32>
    %502 = arith.divf %500, %501 : vector<8x32xf32>
    %503 = arith.addf %490, %493 : vector<8x32xf32>
    %504 = arith.negf %503 : vector<8x32xf32>
    %505 = math.exp %504 : vector<8x32xf32>
    %cst_182 = arith.constant 1.000000e+00 : f32
    %506 = vector.broadcast %cst_182 : f32 to vector<8x32xf32>
    %507 = arith.addf %506, %505 : vector<8x32xf32>
    %508 = arith.divf %506, %507 : vector<8x32xf32>
    %509 = arith.mulf %502, %496 : vector<8x32xf32>
    %510 = arith.addf %491, %509 : vector<8x32xf32>
    %511 = math.tanh %510 : vector<8x32xf32>
    %cst_183 = arith.constant 1.000000e+00 : f32
    %512 = vector.broadcast %cst_183 : f32 to vector<8x32xf32>
    %513 = arith.subf %512, %508 : vector<8x32xf32>
    %514 = arith.mulf %513, %511 : vector<8x32xf32>
    %515 = arith.mulf %508, %450 : vector<8x32xf32>
    %516 = arith.addf %514, %515 : vector<8x32xf32>
    %517 = vector.shape_cast %21 : vector<8x1xi1> to vector<8x1xi1>
    %518 = vector.broadcast %517 : vector<8x1xi1> to vector<8x32xi1>
    %519 = arith.select %518, %488, %447 : vector<8x32xi1>, vector<8x32xf32>
    %520 = vector.shape_cast %29 : vector<8x1xi1> to vector<8x1xi1>
    %521 = vector.broadcast %520 : vector<8x1xi1> to vector<8x32xi1>
    %522 = arith.select %521, %516, %450 : vector<8x32xi1>, vector<8x32xf32>
    %cst_184 = arith.constant 0.000000e+00 : f32
    %523 = vector.shape_cast %21 : vector<8x1xi1> to vector<8x1xi1>
    %524 = vector.broadcast %523 : vector<8x1xi1> to vector<8x32xi1>
    %525 = vector.broadcast %cst_184 : f32 to vector<8x32xf32>
    %526 = arith.select %524, %519, %525 : vector<8x32xi1>, vector<8x32xf32>
    %cst_185 = arith.constant 0.000000e+00 : f32
    %527 = vector.shape_cast %29 : vector<8x1xi1> to vector<8x1xi1>
    %528 = vector.broadcast %527 : vector<8x1xi1> to vector<8x32xi1>
    %529 = vector.broadcast %cst_185 : f32 to vector<8x32xf32>
    %530 = arith.select %528, %522, %529 : vector<8x32xi1>, vector<8x32xf32>
    %531 = arith.addf %526, %530 : vector<8x32xf32>
    %532 = math.tanh %531 : vector<8x32xf32>
    %533 = vector.extract_strided_slice %48 {offsets = [48, 0], sizes = [8, 32], strides = [1, 1]} : vector<64x32xf32> to vector<8x32xf32>
    %534 = vector.extract_strided_slice %55 {offsets = [48, 0], sizes = [8, 32], strides = [1, 1]} : vector<64x32xf32> to vector<8x32xf32>
    %535 = vector.extract_strided_slice %62 {offsets = [48, 0], sizes = [8, 32], strides = [1, 1]} : vector<64x32xf32> to vector<8x32xf32>
    %cst_186 = arith.constant dense<0.000000e+00> : vector<8x32xf32>
    %536 = tpu.matmul %519, %85, %cst_186 {dimension_numbers = #tpu.dot_dimension_numbers<[1], [0], [0], [1], [0, 0, 1, 1], [], []>} : vector<8x32xf32>, vector<32x32xf32>, vector<8x32xf32> -> vector<8x32xf32>
    %cst_187 = arith.constant dense<0.000000e+00> : vector<8x32xf32>
    %537 = tpu.matmul %519, %87, %cst_187 {dimension_numbers = #tpu.dot_dimension_numbers<[1], [0], [0], [1], [0, 0, 1, 1], [], []>} : vector<8x32xf32>, vector<32x32xf32>, vector<8x32xf32> -> vector<8x32xf32>
    %cst_188 = arith.constant dense<0.000000e+00> : vector<8x32xf32>
    %538 = tpu.matmul %519, %89, %cst_188 {dimension_numbers = #tpu.dot_dimension_numbers<[1], [0], [0], [1], [0, 0, 1, 1], [], []>} : vector<8x32xf32>, vector<32x32xf32>, vector<8x32xf32> -> vector<8x32xf32>
    %539 = vector.broadcast %97 : vector<1x32xf32> to vector<8x32xf32>
    %540 = arith.addf %538, %539 : vector<8x32xf32>
    %541 = arith.addf %533, %536 : vector<8x32xf32>
    %542 = arith.negf %541 : vector<8x32xf32>
    %543 = math.exp %542 : vector<8x32xf32>
    %cst_189 = arith.constant 1.000000e+00 : f32
    %544 = vector.broadcast %cst_189 : f32 to vector<8x32xf32>
    %545 = arith.addf %544, %543 : vector<8x32xf32>
    %546 = arith.divf %544, %545 : vector<8x32xf32>
    %547 = arith.addf %534, %537 : vector<8x32xf32>
    %548 = arith.negf %547 : vector<8x32xf32>
    %549 = math.exp %548 : vector<8x32xf32>
    %cst_190 = arith.constant 1.000000e+00 : f32
    %550 = vector.broadcast %cst_190 : f32 to vector<8x32xf32>
    %551 = arith.addf %550, %549 : vector<8x32xf32>
    %552 = arith.divf %550, %551 : vector<8x32xf32>
    %553 = arith.mulf %546, %540 : vector<8x32xf32>
    %554 = arith.addf %535, %553 : vector<8x32xf32>
    %555 = math.tanh %554 : vector<8x32xf32>
    %cst_191 = arith.constant 1.000000e+00 : f32
    %556 = vector.broadcast %cst_191 : f32 to vector<8x32xf32>
    %557 = arith.subf %556, %552 : vector<8x32xf32>
    %558 = arith.mulf %557, %555 : vector<8x32xf32>
    %559 = arith.mulf %552, %519 : vector<8x32xf32>
    %560 = arith.addf %558, %559 : vector<8x32xf32>
    %561 = vector.extract_strided_slice %69 {offsets = [48, 0], sizes = [8, 32], strides = [1, 1]} : vector<64x32xf32> to vector<8x32xf32>
    %562 = vector.extract_strided_slice %76 {offsets = [48, 0], sizes = [8, 32], strides = [1, 1]} : vector<64x32xf32> to vector<8x32xf32>
    %563 = vector.extract_strided_slice %83 {offsets = [48, 0], sizes = [8, 32], strides = [1, 1]} : vector<64x32xf32> to vector<8x32xf32>
    %cst_192 = arith.constant dense<0.000000e+00> : vector<8x32xf32>
    %564 = tpu.matmul %522, %91, %cst_192 {dimension_numbers = #tpu.dot_dimension_numbers<[1], [0], [0], [1], [0, 0, 1, 1], [], []>} : vector<8x32xf32>, vector<32x32xf32>, vector<8x32xf32> -> vector<8x32xf32>
    %cst_193 = arith.constant dense<0.000000e+00> : vector<8x32xf32>
    %565 = tpu.matmul %522, %93, %cst_193 {dimension_numbers = #tpu.dot_dimension_numbers<[1], [0], [0], [1], [0, 0, 1, 1], [], []>} : vector<8x32xf32>, vector<32x32xf32>, vector<8x32xf32> -> vector<8x32xf32>
    %cst_194 = arith.constant dense<0.000000e+00> : vector<8x32xf32>
    %566 = tpu.matmul %522, %95, %cst_194 {dimension_numbers = #tpu.dot_dimension_numbers<[1], [0], [0], [1], [0, 0, 1, 1], [], []>} : vector<8x32xf32>, vector<32x32xf32>, vector<8x32xf32> -> vector<8x32xf32>
    %567 = vector.broadcast %99 : vector<1x32xf32> to vector<8x32xf32>
    %568 = arith.addf %566, %567 : vector<8x32xf32>
    %569 = arith.addf %561, %564 : vector<8x32xf32>
    %570 = arith.negf %569 : vector<8x32xf32>
    %571 = math.exp %570 : vector<8x32xf32>
    %cst_195 = arith.constant 1.000000e+00 : f32
    %572 = vector.broadcast %cst_195 : f32 to vector<8x32xf32>
    %573 = arith.addf %572, %571 : vector<8x32xf32>
    %574 = arith.divf %572, %573 : vector<8x32xf32>
    %575 = arith.addf %562, %565 : vector<8x32xf32>
    %576 = arith.negf %575 : vector<8x32xf32>
    %577 = math.exp %576 : vector<8x32xf32>
    %cst_196 = arith.constant 1.000000e+00 : f32
    %578 = vector.broadcast %cst_196 : f32 to vector<8x32xf32>
    %579 = arith.addf %578, %577 : vector<8x32xf32>
    %580 = arith.divf %578, %579 : vector<8x32xf32>
    %581 = arith.mulf %574, %568 : vector<8x32xf32>
    %582 = arith.addf %563, %581 : vector<8x32xf32>
    %583 = math.tanh %582 : vector<8x32xf32>
    %cst_197 = arith.constant 1.000000e+00 : f32
    %584 = vector.broadcast %cst_197 : f32 to vector<8x32xf32>
    %585 = arith.subf %584, %580 : vector<8x32xf32>
    %586 = arith.mulf %585, %583 : vector<8x32xf32>
    %587 = arith.mulf %580, %522 : vector<8x32xf32>
    %588 = arith.addf %586, %587 : vector<8x32xf32>
    %589 = vector.shape_cast %22 : vector<8x1xi1> to vector<8x1xi1>
    %590 = vector.broadcast %589 : vector<8x1xi1> to vector<8x32xi1>
    %591 = arith.select %590, %560, %519 : vector<8x32xi1>, vector<8x32xf32>
    %592 = vector.shape_cast %30 : vector<8x1xi1> to vector<8x1xi1>
    %593 = vector.broadcast %592 : vector<8x1xi1> to vector<8x32xi1>
    %594 = arith.select %593, %588, %522 : vector<8x32xi1>, vector<8x32xf32>
    %cst_198 = arith.constant 0.000000e+00 : f32
    %595 = vector.shape_cast %22 : vector<8x1xi1> to vector<8x1xi1>
    %596 = vector.broadcast %595 : vector<8x1xi1> to vector<8x32xi1>
    %597 = vector.broadcast %cst_198 : f32 to vector<8x32xf32>
    %598 = arith.select %596, %591, %597 : vector<8x32xi1>, vector<8x32xf32>
    %cst_199 = arith.constant 0.000000e+00 : f32
    %599 = vector.shape_cast %30 : vector<8x1xi1> to vector<8x1xi1>
    %600 = vector.broadcast %599 : vector<8x1xi1> to vector<8x32xi1>
    %601 = vector.broadcast %cst_199 : f32 to vector<8x32xf32>
    %602 = arith.select %600, %594, %601 : vector<8x32xi1>, vector<8x32xf32>
    %603 = arith.addf %598, %602 : vector<8x32xf32>
    %604 = math.tanh %603 : vector<8x32xf32>
    %605 = vector.extract_strided_slice %48 {offsets = [56, 0], sizes = [8, 32], strides = [1, 1]} : vector<64x32xf32> to vector<8x32xf32>
    %606 = vector.extract_strided_slice %55 {offsets = [56, 0], sizes = [8, 32], strides = [1, 1]} : vector<64x32xf32> to vector<8x32xf32>
    %607 = vector.extract_strided_slice %62 {offsets = [56, 0], sizes = [8, 32], strides = [1, 1]} : vector<64x32xf32> to vector<8x32xf32>
    %cst_200 = arith.constant dense<0.000000e+00> : vector<8x32xf32>
    %608 = tpu.matmul %591, %85, %cst_200 {dimension_numbers = #tpu.dot_dimension_numbers<[1], [0], [0], [1], [0, 0, 1, 1], [], []>} : vector<8x32xf32>, vector<32x32xf32>, vector<8x32xf32> -> vector<8x32xf32>
    %cst_201 = arith.constant dense<0.000000e+00> : vector<8x32xf32>
    %609 = tpu.matmul %591, %87, %cst_201 {dimension_numbers = #tpu.dot_dimension_numbers<[1], [0], [0], [1], [0, 0, 1, 1], [], []>} : vector<8x32xf32>, vector<32x32xf32>, vector<8x32xf32> -> vector<8x32xf32>
    %cst_202 = arith.constant dense<0.000000e+00> : vector<8x32xf32>
    %610 = tpu.matmul %591, %89, %cst_202 {dimension_numbers = #tpu.dot_dimension_numbers<[1], [0], [0], [1], [0, 0, 1, 1], [], []>} : vector<8x32xf32>, vector<32x32xf32>, vector<8x32xf32> -> vector<8x32xf32>
    %611 = vector.broadcast %97 : vector<1x32xf32> to vector<8x32xf32>
    %612 = arith.addf %610, %611 : vector<8x32xf32>
    %613 = arith.addf %605, %608 : vector<8x32xf32>
    %614 = arith.negf %613 : vector<8x32xf32>
    %615 = math.exp %614 : vector<8x32xf32>
    %cst_203 = arith.constant 1.000000e+00 : f32
    %616 = vector.broadcast %cst_203 : f32 to vector<8x32xf32>
    %617 = arith.addf %616, %615 : vector<8x32xf32>
    %618 = arith.divf %616, %617 : vector<8x32xf32>
    %619 = arith.addf %606, %609 : vector<8x32xf32>
    %620 = arith.negf %619 : vector<8x32xf32>
    %621 = math.exp %620 : vector<8x32xf32>
    %cst_204 = arith.constant 1.000000e+00 : f32
    %622 = vector.broadcast %cst_204 : f32 to vector<8x32xf32>
    %623 = arith.addf %622, %621 : vector<8x32xf32>
    %624 = arith.divf %622, %623 : vector<8x32xf32>
    %625 = arith.mulf %618, %612 : vector<8x32xf32>
    %626 = arith.addf %607, %625 : vector<8x32xf32>
    %627 = math.tanh %626 : vector<8x32xf32>
    %cst_205 = arith.constant 1.000000e+00 : f32
    %628 = vector.broadcast %cst_205 : f32 to vector<8x32xf32>
    %629 = arith.subf %628, %624 : vector<8x32xf32>
    %630 = arith.mulf %629, %627 : vector<8x32xf32>
    %631 = arith.mulf %624, %591 : vector<8x32xf32>
    %632 = arith.addf %630, %631 : vector<8x32xf32>
    %633 = vector.extract_strided_slice %69 {offsets = [56, 0], sizes = [8, 32], strides = [1, 1]} : vector<64x32xf32> to vector<8x32xf32>
    %634 = vector.extract_strided_slice %76 {offsets = [56, 0], sizes = [8, 32], strides = [1, 1]} : vector<64x32xf32> to vector<8x32xf32>
    %635 = vector.extract_strided_slice %83 {offsets = [56, 0], sizes = [8, 32], strides = [1, 1]} : vector<64x32xf32> to vector<8x32xf32>
    %cst_206 = arith.constant dense<0.000000e+00> : vector<8x32xf32>
    %636 = tpu.matmul %594, %91, %cst_206 {dimension_numbers = #tpu.dot_dimension_numbers<[1], [0], [0], [1], [0, 0, 1, 1], [], []>} : vector<8x32xf32>, vector<32x32xf32>, vector<8x32xf32> -> vector<8x32xf32>
    %cst_207 = arith.constant dense<0.000000e+00> : vector<8x32xf32>
    %637 = tpu.matmul %594, %93, %cst_207 {dimension_numbers = #tpu.dot_dimension_numbers<[1], [0], [0], [1], [0, 0, 1, 1], [], []>} : vector<8x32xf32>, vector<32x32xf32>, vector<8x32xf32> -> vector<8x32xf32>
    %cst_208 = arith.constant dense<0.000000e+00> : vector<8x32xf32>
    %638 = tpu.matmul %594, %95, %cst_208 {dimension_numbers = #tpu.dot_dimension_numbers<[1], [0], [0], [1], [0, 0, 1, 1], [], []>} : vector<8x32xf32>, vector<32x32xf32>, vector<8x32xf32> -> vector<8x32xf32>
    %639 = vector.broadcast %99 : vector<1x32xf32> to vector<8x32xf32>
    %640 = arith.addf %638, %639 : vector<8x32xf32>
    %641 = arith.addf %633, %636 : vector<8x32xf32>
    %642 = arith.negf %641 : vector<8x32xf32>
    %643 = math.exp %642 : vector<8x32xf32>
    %cst_209 = arith.constant 1.000000e+00 : f32
    %644 = vector.broadcast %cst_209 : f32 to vector<8x32xf32>
    %645 = arith.addf %644, %643 : vector<8x32xf32>
    %646 = arith.divf %644, %645 : vector<8x32xf32>
    %647 = arith.addf %634, %637 : vector<8x32xf32>
    %648 = arith.negf %647 : vector<8x32xf32>
    %649 = math.exp %648 : vector<8x32xf32>
    %cst_210 = arith.constant 1.000000e+00 : f32
    %650 = vector.broadcast %cst_210 : f32 to vector<8x32xf32>
    %651 = arith.addf %650, %649 : vector<8x32xf32>
    %652 = arith.divf %650, %651 : vector<8x32xf32>
    %653 = arith.mulf %646, %640 : vector<8x32xf32>
    %654 = arith.addf %635, %653 : vector<8x32xf32>
    %655 = math.tanh %654 : vector<8x32xf32>
    %cst_211 = arith.constant 1.000000e+00 : f32
    %656 = vector.broadcast %cst_211 : f32 to vector<8x32xf32>
    %657 = arith.subf %656, %652 : vector<8x32xf32>
    %658 = arith.mulf %657, %655 : vector<8x32xf32>
    %659 = arith.mulf %652, %594 : vector<8x32xf32>
    %660 = arith.addf %658, %659 : vector<8x32xf32>
    %661 = vector.shape_cast %23 : vector<8x1xi1> to vector<8x1xi1>
    %662 = vector.broadcast %661 : vector<8x1xi1> to vector<8x32xi1>
    %663 = arith.select %662, %632, %591 : vector<8x32xi1>, vector<8x32xf32>
    %664 = vector.shape_cast %31 : vector<8x1xi1> to vector<8x1xi1>
    %665 = vector.broadcast %664 : vector<8x1xi1> to vector<8x32xi1>
    %666 = arith.select %665, %660, %594 : vector<8x32xi1>, vector<8x32xf32>
    %cst_212 = arith.constant 0.000000e+00 : f32
    %667 = vector.shape_cast %23 : vector<8x1xi1> to vector<8x1xi1>
    %668 = vector.broadcast %667 : vector<8x1xi1> to vector<8x32xi1>
    %669 = vector.broadcast %cst_212 : f32 to vector<8x32xf32>
    %670 = arith.select %668, %663, %669 : vector<8x32xi1>, vector<8x32xf32>
    %cst_213 = arith.constant 0.000000e+00 : f32
    %671 = vector.shape_cast %31 : vector<8x1xi1> to vector<8x1xi1>
    %672 = vector.broadcast %671 : vector<8x1xi1> to vector<8x32xi1>
    %673 = vector.broadcast %cst_213 : f32 to vector<8x32xf32>
    %674 = arith.select %672, %666, %673 : vector<8x32xi1>, vector<8x32xf32>
    %675 = arith.addf %670, %674 : vector<8x32xf32>
    %676 = math.tanh %675 : vector<8x32xf32>
    %677 = tpu.concatenate %172, %244, %316, %388, %460, %532, %604, %676 in 0 : vector<8x32xf32>, vector<8x32xf32>, vector<8x32xf32>, vector<8x32xf32>, vector<8x32xf32>, vector<8x32xf32>, vector<8x32xf32>, vector<8x32xf32> -> vector<64x32xf32>
    %c0_214 = arith.constant 0 : index
    %c0_215 = arith.constant 0 : index
    %c0_216 = arith.constant 0 : index
    %c0_217 = arith.constant 0 : index
    %678 = vector.load %arg12[%c0_214, %c0_215, %c0_216, %c0_217] : memref<2x3x32x32xf32, #tpu.memory_space<vmem>>, vector<1x1x32x32xf32>
    %679 = vector.shape_cast %678 : vector<1x1x32x32xf32> to vector<32x32xf32>
    %c0_218 = arith.constant 0 : index
    %c1_219 = arith.constant 1 : index
    %c0_220 = arith.constant 0 : index
    %c0_221 = arith.constant 0 : index
    %680 = vector.load %arg12[%c0_218, %c1_219, %c0_220, %c0_221] : memref<2x3x32x32xf32, #tpu.memory_space<vmem>>, vector<1x1x32x32xf32>
    %681 = vector.shape_cast %680 : vector<1x1x32x32xf32> to vector<32x32xf32>
    %c0_222 = arith.constant 0 : index
    %c2_223 = arith.constant 2 : index
    %c0_224 = arith.constant 0 : index
    %c0_225 = arith.constant 0 : index
    %682 = vector.load %arg12[%c0_222, %c2_223, %c0_224, %c0_225] : memref<2x3x32x32xf32, #tpu.memory_space<vmem>>, vector<1x1x32x32xf32>
    %683 = vector.shape_cast %682 : vector<1x1x32x32xf32> to vector<32x32xf32>
    %c0_226 = arith.constant 0 : index
    %c3_227 = arith.constant 3 : index
    %c0_228 = arith.constant 0 : index
    %c0_229 = arith.constant 0 : index
    %684 = vector.load %arg13[%c0_226, %c3_227, %c0_228, %c0_229] : memref<2x4x1x32xf32, #tpu.memory_space<vmem>>, vector<1x1x1x32xf32>
    %685 = vector.shape_cast %684 : vector<1x1x1x32xf32> to vector<1x32xf32>
    %c0_230 = arith.constant 0 : index
    %c0_231 = arith.constant 0 : index
    %c0_232 = arith.constant 0 : index
    %c0_233 = arith.constant 0 : index
    %686 = vector.load %arg11[%c0_230, %c0_231, %c0_232, %c0_233] : memref<2x3x32x32xf32, #tpu.memory_space<vmem>>, vector<1x1x32x32xf32>
    %687 = vector.shape_cast %686 : vector<1x1x32x32xf32> to vector<32x32xf32>
    %cst_234 = arith.constant dense<0.000000e+00> : vector<64x32xf32>
    %688 = tpu.matmul %677, %687, %cst_234 {dimension_numbers = #tpu.dot_dimension_numbers<[1], [0], [0], [1], [0, 0, 1, 1], [], []>} : vector<64x32xf32>, vector<32x32xf32>, vector<64x32xf32> -> vector<64x32xf32>
    %c0_235 = arith.constant 0 : index
    %c0_236 = arith.constant 0 : index
    %c0_237 = arith.constant 0 : index
    %c0_238 = arith.constant 0 : index
    %689 = vector.load %arg13[%c0_235, %c0_236, %c0_237, %c0_238] : memref<2x4x1x32xf32, #tpu.memory_space<vmem>>, vector<1x1x1x32xf32>
    %690 = vector.shape_cast %689 : vector<1x1x1x32xf32> to vector<1x32xf32>
    %691 = vector.broadcast %690 : vector<1x32xf32> to vector<64x32xf32>
    %692 = arith.addf %688, %691 : vector<64x32xf32>
    %c0_239 = arith.constant 0 : index
    %c1_240 = arith.constant 1 : index
    %c0_241 = arith.constant 0 : index
    %c0_242 = arith.constant 0 : index
    %693 = vector.load %arg11[%c0_239, %c1_240, %c0_241, %c0_242] : memref<2x3x32x32xf32, #tpu.memory_space<vmem>>, vector<1x1x32x32xf32>
    %694 = vector.shape_cast %693 : vector<1x1x32x32xf32> to vector<32x32xf32>
    %cst_243 = arith.constant dense<0.000000e+00> : vector<64x32xf32>
    %695 = tpu.matmul %677, %694, %cst_243 {dimension_numbers = #tpu.dot_dimension_numbers<[1], [0], [0], [1], [0, 0, 1, 1], [], []>} : vector<64x32xf32>, vector<32x32xf32>, vector<64x32xf32> -> vector<64x32xf32>
    %c0_244 = arith.constant 0 : index
    %c1_245 = arith.constant 1 : index
    %c0_246 = arith.constant 0 : index
    %c0_247 = arith.constant 0 : index
    %696 = vector.load %arg13[%c0_244, %c1_245, %c0_246, %c0_247] : memref<2x4x1x32xf32, #tpu.memory_space<vmem>>, vector<1x1x1x32xf32>
    %697 = vector.shape_cast %696 : vector<1x1x1x32xf32> to vector<1x32xf32>
    %698 = vector.broadcast %697 : vector<1x32xf32> to vector<64x32xf32>
    %699 = arith.addf %695, %698 : vector<64x32xf32>
    %c0_248 = arith.constant 0 : index
    %c2_249 = arith.constant 2 : index
    %c0_250 = arith.constant 0 : index
    %c0_251 = arith.constant 0 : index
    %700 = vector.load %arg11[%c0_248, %c2_249, %c0_250, %c0_251] : memref<2x3x32x32xf32, #tpu.memory_space<vmem>>, vector<1x1x32x32xf32>
    %701 = vector.shape_cast %700 : vector<1x1x32x32xf32> to vector<32x32xf32>
    %cst_252 = arith.constant dense<0.000000e+00> : vector<64x32xf32>
    %702 = tpu.matmul %677, %701, %cst_252 {dimension_numbers = #tpu.dot_dimension_numbers<[1], [0], [0], [1], [0, 0, 1, 1], [], []>} : vector<64x32xf32>, vector<32x32xf32>, vector<64x32xf32> -> vector<64x32xf32>
    %c0_253 = arith.constant 0 : index
    %c2_254 = arith.constant 2 : index
    %c0_255 = arith.constant 0 : index
    %c0_256 = arith.constant 0 : index
    %703 = vector.load %arg13[%c0_253, %c2_254, %c0_255, %c0_256] : memref<2x4x1x32xf32, #tpu.memory_space<vmem>>, vector<1x1x1x32xf32>
    %704 = vector.shape_cast %703 : vector<1x1x1x32xf32> to vector<1x32xf32>
    %705 = vector.broadcast %704 : vector<1x32xf32> to vector<64x32xf32>
    %706 = arith.addf %702, %705 : vector<64x32xf32>
    %707 = vector.extract_strided_slice %692 {offsets = [0, 0], sizes = [8, 32], strides = [1, 1]} : vector<64x32xf32> to vector<8x32xf32>
    %708 = vector.extract_strided_slice %699 {offsets = [0, 0], sizes = [8, 32], strides = [1, 1]} : vector<64x32xf32> to vector<8x32xf32>
    %709 = vector.extract_strided_slice %706 {offsets = [0, 0], sizes = [8, 32], strides = [1, 1]} : vector<64x32xf32> to vector<8x32xf32>
    %cst_257 = arith.constant dense<0.000000e+00> : vector<8x32xf32>
    %710 = tpu.matmul %100, %679, %cst_257 {dimension_numbers = #tpu.dot_dimension_numbers<[1], [0], [0], [1], [0, 0, 1, 1], [], []>} : vector<8x32xf32>, vector<32x32xf32>, vector<8x32xf32> -> vector<8x32xf32>
    %cst_258 = arith.constant dense<0.000000e+00> : vector<8x32xf32>
    %711 = tpu.matmul %100, %681, %cst_258 {dimension_numbers = #tpu.dot_dimension_numbers<[1], [0], [0], [1], [0, 0, 1, 1], [], []>} : vector<8x32xf32>, vector<32x32xf32>, vector<8x32xf32> -> vector<8x32xf32>
    %cst_259 = arith.constant dense<0.000000e+00> : vector<8x32xf32>
    %712 = tpu.matmul %100, %683, %cst_259 {dimension_numbers = #tpu.dot_dimension_numbers<[1], [0], [0], [1], [0, 0, 1, 1], [], []>} : vector<8x32xf32>, vector<32x32xf32>, vector<8x32xf32> -> vector<8x32xf32>
    %713 = vector.broadcast %685 : vector<1x32xf32> to vector<8x32xf32>
    %714 = arith.addf %712, %713 : vector<8x32xf32>
    %715 = arith.addf %707, %710 : vector<8x32xf32>
    %716 = arith.negf %715 : vector<8x32xf32>
    %717 = math.exp %716 : vector<8x32xf32>
    %cst_260 = arith.constant 1.000000e+00 : f32
    %718 = vector.broadcast %cst_260 : f32 to vector<8x32xf32>
    %719 = arith.addf %718, %717 : vector<8x32xf32>
    %720 = arith.divf %718, %719 : vector<8x32xf32>
    %721 = arith.addf %708, %711 : vector<8x32xf32>
    %722 = arith.negf %721 : vector<8x32xf32>
    %723 = math.exp %722 : vector<8x32xf32>
    %cst_261 = arith.constant 1.000000e+00 : f32
    %724 = vector.broadcast %cst_261 : f32 to vector<8x32xf32>
    %725 = arith.addf %724, %723 : vector<8x32xf32>
    %726 = arith.divf %724, %725 : vector<8x32xf32>
    %727 = arith.mulf %720, %714 : vector<8x32xf32>
    %728 = arith.addf %709, %727 : vector<8x32xf32>
    %729 = math.tanh %728 : vector<8x32xf32>
    %cst_262 = arith.constant 1.000000e+00 : f32
    %730 = vector.broadcast %cst_262 : f32 to vector<8x32xf32>
    %731 = arith.subf %730, %726 : vector<8x32xf32>
    %732 = arith.mulf %731, %729 : vector<8x32xf32>
    %733 = arith.mulf %726, %100 : vector<8x32xf32>
    %734 = arith.addf %732, %733 : vector<8x32xf32>
    %cst_263 = arith.constant 0.000000e+00 : f32
    %735 = vector.shape_cast %32 : vector<8x1xi1> to vector<8x1xi1>
    %736 = vector.broadcast %735 : vector<8x1xi1> to vector<8x32xi1>
    %737 = vector.broadcast %cst_263 : f32 to vector<8x32xf32>
    %738 = arith.select %736, %734, %737 : vector<8x32xi1>, vector<8x32xf32>
    %739 = vector.extract_strided_slice %692 {offsets = [8, 0], sizes = [8, 32], strides = [1, 1]} : vector<64x32xf32> to vector<8x32xf32>
    %740 = vector.extract_strided_slice %699 {offsets = [8, 0], sizes = [8, 32], strides = [1, 1]} : vector<64x32xf32> to vector<8x32xf32>
    %741 = vector.extract_strided_slice %706 {offsets = [8, 0], sizes = [8, 32], strides = [1, 1]} : vector<64x32xf32> to vector<8x32xf32>
    %cst_264 = arith.constant dense<0.000000e+00> : vector<8x32xf32>
    %742 = tpu.matmul %734, %679, %cst_264 {dimension_numbers = #tpu.dot_dimension_numbers<[1], [0], [0], [1], [0, 0, 1, 1], [], []>} : vector<8x32xf32>, vector<32x32xf32>, vector<8x32xf32> -> vector<8x32xf32>
    %cst_265 = arith.constant dense<0.000000e+00> : vector<8x32xf32>
    %743 = tpu.matmul %734, %681, %cst_265 {dimension_numbers = #tpu.dot_dimension_numbers<[1], [0], [0], [1], [0, 0, 1, 1], [], []>} : vector<8x32xf32>, vector<32x32xf32>, vector<8x32xf32> -> vector<8x32xf32>
    %cst_266 = arith.constant dense<0.000000e+00> : vector<8x32xf32>
    %744 = tpu.matmul %734, %683, %cst_266 {dimension_numbers = #tpu.dot_dimension_numbers<[1], [0], [0], [1], [0, 0, 1, 1], [], []>} : vector<8x32xf32>, vector<32x32xf32>, vector<8x32xf32> -> vector<8x32xf32>
    %745 = vector.broadcast %685 : vector<1x32xf32> to vector<8x32xf32>
    %746 = arith.addf %744, %745 : vector<8x32xf32>
    %747 = arith.addf %739, %742 : vector<8x32xf32>
    %748 = arith.negf %747 : vector<8x32xf32>
    %749 = math.exp %748 : vector<8x32xf32>
    %cst_267 = arith.constant 1.000000e+00 : f32
    %750 = vector.broadcast %cst_267 : f32 to vector<8x32xf32>
    %751 = arith.addf %750, %749 : vector<8x32xf32>
    %752 = arith.divf %750, %751 : vector<8x32xf32>
    %753 = arith.addf %740, %743 : vector<8x32xf32>
    %754 = arith.negf %753 : vector<8x32xf32>
    %755 = math.exp %754 : vector<8x32xf32>
    %cst_268 = arith.constant 1.000000e+00 : f32
    %756 = vector.broadcast %cst_268 : f32 to vector<8x32xf32>
    %757 = arith.addf %756, %755 : vector<8x32xf32>
    %758 = arith.divf %756, %757 : vector<8x32xf32>
    %759 = arith.mulf %752, %746 : vector<8x32xf32>
    %760 = arith.addf %741, %759 : vector<8x32xf32>
    %761 = math.tanh %760 : vector<8x32xf32>
    %cst_269 = arith.constant 1.000000e+00 : f32
    %762 = vector.broadcast %cst_269 : f32 to vector<8x32xf32>
    %763 = arith.subf %762, %758 : vector<8x32xf32>
    %764 = arith.mulf %763, %761 : vector<8x32xf32>
    %765 = arith.mulf %758, %734 : vector<8x32xf32>
    %766 = arith.addf %764, %765 : vector<8x32xf32>
    %cst_270 = arith.constant 0.000000e+00 : f32
    %767 = vector.shape_cast %33 : vector<8x1xi1> to vector<8x1xi1>
    %768 = vector.broadcast %767 : vector<8x1xi1> to vector<8x32xi1>
    %769 = vector.broadcast %cst_270 : f32 to vector<8x32xf32>
    %770 = arith.select %768, %766, %769 : vector<8x32xi1>, vector<8x32xf32>
    %771 = vector.extract_strided_slice %692 {offsets = [16, 0], sizes = [8, 32], strides = [1, 1]} : vector<64x32xf32> to vector<8x32xf32>
    %772 = vector.extract_strided_slice %699 {offsets = [16, 0], sizes = [8, 32], strides = [1, 1]} : vector<64x32xf32> to vector<8x32xf32>
    %773 = vector.extract_strided_slice %706 {offsets = [16, 0], sizes = [8, 32], strides = [1, 1]} : vector<64x32xf32> to vector<8x32xf32>
    %cst_271 = arith.constant dense<0.000000e+00> : vector<8x32xf32>
    %774 = tpu.matmul %766, %679, %cst_271 {dimension_numbers = #tpu.dot_dimension_numbers<[1], [0], [0], [1], [0, 0, 1, 1], [], []>} : vector<8x32xf32>, vector<32x32xf32>, vector<8x32xf32> -> vector<8x32xf32>
    %cst_272 = arith.constant dense<0.000000e+00> : vector<8x32xf32>
    %775 = tpu.matmul %766, %681, %cst_272 {dimension_numbers = #tpu.dot_dimension_numbers<[1], [0], [0], [1], [0, 0, 1, 1], [], []>} : vector<8x32xf32>, vector<32x32xf32>, vector<8x32xf32> -> vector<8x32xf32>
    %cst_273 = arith.constant dense<0.000000e+00> : vector<8x32xf32>
    %776 = tpu.matmul %766, %683, %cst_273 {dimension_numbers = #tpu.dot_dimension_numbers<[1], [0], [0], [1], [0, 0, 1, 1], [], []>} : vector<8x32xf32>, vector<32x32xf32>, vector<8x32xf32> -> vector<8x32xf32>
    %777 = vector.broadcast %685 : vector<1x32xf32> to vector<8x32xf32>
    %778 = arith.addf %776, %777 : vector<8x32xf32>
    %779 = arith.addf %771, %774 : vector<8x32xf32>
    %780 = arith.negf %779 : vector<8x32xf32>
    %781 = math.exp %780 : vector<8x32xf32>
    %cst_274 = arith.constant 1.000000e+00 : f32
    %782 = vector.broadcast %cst_274 : f32 to vector<8x32xf32>
    %783 = arith.addf %782, %781 : vector<8x32xf32>
    %784 = arith.divf %782, %783 : vector<8x32xf32>
    %785 = arith.addf %772, %775 : vector<8x32xf32>
    %786 = arith.negf %785 : vector<8x32xf32>
    %787 = math.exp %786 : vector<8x32xf32>
    %cst_275 = arith.constant 1.000000e+00 : f32
    %788 = vector.broadcast %cst_275 : f32 to vector<8x32xf32>
    %789 = arith.addf %788, %787 : vector<8x32xf32>
    %790 = arith.divf %788, %789 : vector<8x32xf32>
    %791 = arith.mulf %784, %778 : vector<8x32xf32>
    %792 = arith.addf %773, %791 : vector<8x32xf32>
    %793 = math.tanh %792 : vector<8x32xf32>
    %cst_276 = arith.constant 1.000000e+00 : f32
    %794 = vector.broadcast %cst_276 : f32 to vector<8x32xf32>
    %795 = arith.subf %794, %790 : vector<8x32xf32>
    %796 = arith.mulf %795, %793 : vector<8x32xf32>
    %797 = arith.mulf %790, %766 : vector<8x32xf32>
    %798 = arith.addf %796, %797 : vector<8x32xf32>
    %cst_277 = arith.constant 0.000000e+00 : f32
    %799 = vector.shape_cast %34 : vector<8x1xi1> to vector<8x1xi1>
    %800 = vector.broadcast %799 : vector<8x1xi1> to vector<8x32xi1>
    %801 = vector.broadcast %cst_277 : f32 to vector<8x32xf32>
    %802 = arith.select %800, %798, %801 : vector<8x32xi1>, vector<8x32xf32>
    %803 = vector.extract_strided_slice %692 {offsets = [24, 0], sizes = [8, 32], strides = [1, 1]} : vector<64x32xf32> to vector<8x32xf32>
    %804 = vector.extract_strided_slice %699 {offsets = [24, 0], sizes = [8, 32], strides = [1, 1]} : vector<64x32xf32> to vector<8x32xf32>
    %805 = vector.extract_strided_slice %706 {offsets = [24, 0], sizes = [8, 32], strides = [1, 1]} : vector<64x32xf32> to vector<8x32xf32>
    %cst_278 = arith.constant dense<0.000000e+00> : vector<8x32xf32>
    %806 = tpu.matmul %798, %679, %cst_278 {dimension_numbers = #tpu.dot_dimension_numbers<[1], [0], [0], [1], [0, 0, 1, 1], [], []>} : vector<8x32xf32>, vector<32x32xf32>, vector<8x32xf32> -> vector<8x32xf32>
    %cst_279 = arith.constant dense<0.000000e+00> : vector<8x32xf32>
    %807 = tpu.matmul %798, %681, %cst_279 {dimension_numbers = #tpu.dot_dimension_numbers<[1], [0], [0], [1], [0, 0, 1, 1], [], []>} : vector<8x32xf32>, vector<32x32xf32>, vector<8x32xf32> -> vector<8x32xf32>
    %cst_280 = arith.constant dense<0.000000e+00> : vector<8x32xf32>
    %808 = tpu.matmul %798, %683, %cst_280 {dimension_numbers = #tpu.dot_dimension_numbers<[1], [0], [0], [1], [0, 0, 1, 1], [], []>} : vector<8x32xf32>, vector<32x32xf32>, vector<8x32xf32> -> vector<8x32xf32>
    %809 = vector.broadcast %685 : vector<1x32xf32> to vector<8x32xf32>
    %810 = arith.addf %808, %809 : vector<8x32xf32>
    %811 = arith.addf %803, %806 : vector<8x32xf32>
    %812 = arith.negf %811 : vector<8x32xf32>
    %813 = math.exp %812 : vector<8x32xf32>
    %cst_281 = arith.constant 1.000000e+00 : f32
    %814 = vector.broadcast %cst_281 : f32 to vector<8x32xf32>
    %815 = arith.addf %814, %813 : vector<8x32xf32>
    %816 = arith.divf %814, %815 : vector<8x32xf32>
    %817 = arith.addf %804, %807 : vector<8x32xf32>
    %818 = arith.negf %817 : vector<8x32xf32>
    %819 = math.exp %818 : vector<8x32xf32>
    %cst_282 = arith.constant 1.000000e+00 : f32
    %820 = vector.broadcast %cst_282 : f32 to vector<8x32xf32>
    %821 = arith.addf %820, %819 : vector<8x32xf32>
    %822 = arith.divf %820, %821 : vector<8x32xf32>
    %823 = arith.mulf %816, %810 : vector<8x32xf32>
    %824 = arith.addf %805, %823 : vector<8x32xf32>
    %825 = math.tanh %824 : vector<8x32xf32>
    %cst_283 = arith.constant 1.000000e+00 : f32
    %826 = vector.broadcast %cst_283 : f32 to vector<8x32xf32>
    %827 = arith.subf %826, %822 : vector<8x32xf32>
    %828 = arith.mulf %827, %825 : vector<8x32xf32>
    %829 = arith.mulf %822, %798 : vector<8x32xf32>
    %830 = arith.addf %828, %829 : vector<8x32xf32>
    %cst_284 = arith.constant 0.000000e+00 : f32
    %831 = vector.shape_cast %35 : vector<8x1xi1> to vector<8x1xi1>
    %832 = vector.broadcast %831 : vector<8x1xi1> to vector<8x32xi1>
    %833 = vector.broadcast %cst_284 : f32 to vector<8x32xf32>
    %834 = arith.select %832, %830, %833 : vector<8x32xi1>, vector<8x32xf32>
    %835 = vector.extract_strided_slice %692 {offsets = [32, 0], sizes = [8, 32], strides = [1, 1]} : vector<64x32xf32> to vector<8x32xf32>
    %836 = vector.extract_strided_slice %699 {offsets = [32, 0], sizes = [8, 32], strides = [1, 1]} : vector<64x32xf32> to vector<8x32xf32>
    %837 = vector.extract_strided_slice %706 {offsets = [32, 0], sizes = [8, 32], strides = [1, 1]} : vector<64x32xf32> to vector<8x32xf32>
    %cst_285 = arith.constant dense<0.000000e+00> : vector<8x32xf32>
    %838 = tpu.matmul %830, %679, %cst_285 {dimension_numbers = #tpu.dot_dimension_numbers<[1], [0], [0], [1], [0, 0, 1, 1], [], []>} : vector<8x32xf32>, vector<32x32xf32>, vector<8x32xf32> -> vector<8x32xf32>
    %cst_286 = arith.constant dense<0.000000e+00> : vector<8x32xf32>
    %839 = tpu.matmul %830, %681, %cst_286 {dimension_numbers = #tpu.dot_dimension_numbers<[1], [0], [0], [1], [0, 0, 1, 1], [], []>} : vector<8x32xf32>, vector<32x32xf32>, vector<8x32xf32> -> vector<8x32xf32>
    %cst_287 = arith.constant dense<0.000000e+00> : vector<8x32xf32>
    %840 = tpu.matmul %830, %683, %cst_287 {dimension_numbers = #tpu.dot_dimension_numbers<[1], [0], [0], [1], [0, 0, 1, 1], [], []>} : vector<8x32xf32>, vector<32x32xf32>, vector<8x32xf32> -> vector<8x32xf32>
    %841 = vector.broadcast %685 : vector<1x32xf32> to vector<8x32xf32>
    %842 = arith.addf %840, %841 : vector<8x32xf32>
    %843 = arith.addf %835, %838 : vector<8x32xf32>
    %844 = arith.negf %843 : vector<8x32xf32>
    %845 = math.exp %844 : vector<8x32xf32>
    %cst_288 = arith.constant 1.000000e+00 : f32
    %846 = vector.broadcast %cst_288 : f32 to vector<8x32xf32>
    %847 = arith.addf %846, %845 : vector<8x32xf32>
    %848 = arith.divf %846, %847 : vector<8x32xf32>
    %849 = arith.addf %836, %839 : vector<8x32xf32>
    %850 = arith.negf %849 : vector<8x32xf32>
    %851 = math.exp %850 : vector<8x32xf32>
    %cst_289 = arith.constant 1.000000e+00 : f32
    %852 = vector.broadcast %cst_289 : f32 to vector<8x32xf32>
    %853 = arith.addf %852, %851 : vector<8x32xf32>
    %854 = arith.divf %852, %853 : vector<8x32xf32>
    %855 = arith.mulf %848, %842 : vector<8x32xf32>
    %856 = arith.addf %837, %855 : vector<8x32xf32>
    %857 = math.tanh %856 : vector<8x32xf32>
    %cst_290 = arith.constant 1.000000e+00 : f32
    %858 = vector.broadcast %cst_290 : f32 to vector<8x32xf32>
    %859 = arith.subf %858, %854 : vector<8x32xf32>
    %860 = arith.mulf %859, %857 : vector<8x32xf32>
    %861 = arith.mulf %854, %830 : vector<8x32xf32>
    %862 = arith.addf %860, %861 : vector<8x32xf32>
    %cst_291 = arith.constant 0.000000e+00 : f32
    %863 = vector.shape_cast %36 : vector<8x1xi1> to vector<8x1xi1>
    %864 = vector.broadcast %863 : vector<8x1xi1> to vector<8x32xi1>
    %865 = vector.broadcast %cst_291 : f32 to vector<8x32xf32>
    %866 = arith.select %864, %862, %865 : vector<8x32xi1>, vector<8x32xf32>
    %867 = vector.extract_strided_slice %692 {offsets = [40, 0], sizes = [8, 32], strides = [1, 1]} : vector<64x32xf32> to vector<8x32xf32>
    %868 = vector.extract_strided_slice %699 {offsets = [40, 0], sizes = [8, 32], strides = [1, 1]} : vector<64x32xf32> to vector<8x32xf32>
    %869 = vector.extract_strided_slice %706 {offsets = [40, 0], sizes = [8, 32], strides = [1, 1]} : vector<64x32xf32> to vector<8x32xf32>
    %cst_292 = arith.constant dense<0.000000e+00> : vector<8x32xf32>
    %870 = tpu.matmul %862, %679, %cst_292 {dimension_numbers = #tpu.dot_dimension_numbers<[1], [0], [0], [1], [0, 0, 1, 1], [], []>} : vector<8x32xf32>, vector<32x32xf32>, vector<8x32xf32> -> vector<8x32xf32>
    %cst_293 = arith.constant dense<0.000000e+00> : vector<8x32xf32>
    %871 = tpu.matmul %862, %681, %cst_293 {dimension_numbers = #tpu.dot_dimension_numbers<[1], [0], [0], [1], [0, 0, 1, 1], [], []>} : vector<8x32xf32>, vector<32x32xf32>, vector<8x32xf32> -> vector<8x32xf32>
    %cst_294 = arith.constant dense<0.000000e+00> : vector<8x32xf32>
    %872 = tpu.matmul %862, %683, %cst_294 {dimension_numbers = #tpu.dot_dimension_numbers<[1], [0], [0], [1], [0, 0, 1, 1], [], []>} : vector<8x32xf32>, vector<32x32xf32>, vector<8x32xf32> -> vector<8x32xf32>
    %873 = vector.broadcast %685 : vector<1x32xf32> to vector<8x32xf32>
    %874 = arith.addf %872, %873 : vector<8x32xf32>
    %875 = arith.addf %867, %870 : vector<8x32xf32>
    %876 = arith.negf %875 : vector<8x32xf32>
    %877 = math.exp %876 : vector<8x32xf32>
    %cst_295 = arith.constant 1.000000e+00 : f32
    %878 = vector.broadcast %cst_295 : f32 to vector<8x32xf32>
    %879 = arith.addf %878, %877 : vector<8x32xf32>
    %880 = arith.divf %878, %879 : vector<8x32xf32>
    %881 = arith.addf %868, %871 : vector<8x32xf32>
    %882 = arith.negf %881 : vector<8x32xf32>
    %883 = math.exp %882 : vector<8x32xf32>
    %cst_296 = arith.constant 1.000000e+00 : f32
    %884 = vector.broadcast %cst_296 : f32 to vector<8x32xf32>
    %885 = arith.addf %884, %883 : vector<8x32xf32>
    %886 = arith.divf %884, %885 : vector<8x32xf32>
    %887 = arith.mulf %880, %874 : vector<8x32xf32>
    %888 = arith.addf %869, %887 : vector<8x32xf32>
    %889 = math.tanh %888 : vector<8x32xf32>
    %cst_297 = arith.constant 1.000000e+00 : f32
    %890 = vector.broadcast %cst_297 : f32 to vector<8x32xf32>
    %891 = arith.subf %890, %886 : vector<8x32xf32>
    %892 = arith.mulf %891, %889 : vector<8x32xf32>
    %893 = arith.mulf %886, %862 : vector<8x32xf32>
    %894 = arith.addf %892, %893 : vector<8x32xf32>
    %cst_298 = arith.constant 0.000000e+00 : f32
    %895 = vector.shape_cast %37 : vector<8x1xi1> to vector<8x1xi1>
    %896 = vector.broadcast %895 : vector<8x1xi1> to vector<8x32xi1>
    %897 = vector.broadcast %cst_298 : f32 to vector<8x32xf32>
    %898 = arith.select %896, %894, %897 : vector<8x32xi1>, vector<8x32xf32>
    %899 = vector.extract_strided_slice %692 {offsets = [48, 0], sizes = [8, 32], strides = [1, 1]} : vector<64x32xf32> to vector<8x32xf32>
    %900 = vector.extract_strided_slice %699 {offsets = [48, 0], sizes = [8, 32], strides = [1, 1]} : vector<64x32xf32> to vector<8x32xf32>
    %901 = vector.extract_strided_slice %706 {offsets = [48, 0], sizes = [8, 32], strides = [1, 1]} : vector<64x32xf32> to vector<8x32xf32>
    %cst_299 = arith.constant dense<0.000000e+00> : vector<8x32xf32>
    %902 = tpu.matmul %894, %679, %cst_299 {dimension_numbers = #tpu.dot_dimension_numbers<[1], [0], [0], [1], [0, 0, 1, 1], [], []>} : vector<8x32xf32>, vector<32x32xf32>, vector<8x32xf32> -> vector<8x32xf32>
    %cst_300 = arith.constant dense<0.000000e+00> : vector<8x32xf32>
    %903 = tpu.matmul %894, %681, %cst_300 {dimension_numbers = #tpu.dot_dimension_numbers<[1], [0], [0], [1], [0, 0, 1, 1], [], []>} : vector<8x32xf32>, vector<32x32xf32>, vector<8x32xf32> -> vector<8x32xf32>
    %cst_301 = arith.constant dense<0.000000e+00> : vector<8x32xf32>
    %904 = tpu.matmul %894, %683, %cst_301 {dimension_numbers = #tpu.dot_dimension_numbers<[1], [0], [0], [1], [0, 0, 1, 1], [], []>} : vector<8x32xf32>, vector<32x32xf32>, vector<8x32xf32> -> vector<8x32xf32>
    %905 = vector.broadcast %685 : vector<1x32xf32> to vector<8x32xf32>
    %906 = arith.addf %904, %905 : vector<8x32xf32>
    %907 = arith.addf %899, %902 : vector<8x32xf32>
    %908 = arith.negf %907 : vector<8x32xf32>
    %909 = math.exp %908 : vector<8x32xf32>
    %cst_302 = arith.constant 1.000000e+00 : f32
    %910 = vector.broadcast %cst_302 : f32 to vector<8x32xf32>
    %911 = arith.addf %910, %909 : vector<8x32xf32>
    %912 = arith.divf %910, %911 : vector<8x32xf32>
    %913 = arith.addf %900, %903 : vector<8x32xf32>
    %914 = arith.negf %913 : vector<8x32xf32>
    %915 = math.exp %914 : vector<8x32xf32>
    %cst_303 = arith.constant 1.000000e+00 : f32
    %916 = vector.broadcast %cst_303 : f32 to vector<8x32xf32>
    %917 = arith.addf %916, %915 : vector<8x32xf32>
    %918 = arith.divf %916, %917 : vector<8x32xf32>
    %919 = arith.mulf %912, %906 : vector<8x32xf32>
    %920 = arith.addf %901, %919 : vector<8x32xf32>
    %921 = math.tanh %920 : vector<8x32xf32>
    %cst_304 = arith.constant 1.000000e+00 : f32
    %922 = vector.broadcast %cst_304 : f32 to vector<8x32xf32>
    %923 = arith.subf %922, %918 : vector<8x32xf32>
    %924 = arith.mulf %923, %921 : vector<8x32xf32>
    %925 = arith.mulf %918, %894 : vector<8x32xf32>
    %926 = arith.addf %924, %925 : vector<8x32xf32>
    %cst_305 = arith.constant 0.000000e+00 : f32
    %927 = vector.shape_cast %38 : vector<8x1xi1> to vector<8x1xi1>
    %928 = vector.broadcast %927 : vector<8x1xi1> to vector<8x32xi1>
    %929 = vector.broadcast %cst_305 : f32 to vector<8x32xf32>
    %930 = arith.select %928, %926, %929 : vector<8x32xi1>, vector<8x32xf32>
    %931 = vector.extract_strided_slice %692 {offsets = [56, 0], sizes = [8, 32], strides = [1, 1]} : vector<64x32xf32> to vector<8x32xf32>
    %932 = vector.extract_strided_slice %699 {offsets = [56, 0], sizes = [8, 32], strides = [1, 1]} : vector<64x32xf32> to vector<8x32xf32>
    %933 = vector.extract_strided_slice %706 {offsets = [56, 0], sizes = [8, 32], strides = [1, 1]} : vector<64x32xf32> to vector<8x32xf32>
    %cst_306 = arith.constant dense<0.000000e+00> : vector<8x32xf32>
    %934 = tpu.matmul %926, %679, %cst_306 {dimension_numbers = #tpu.dot_dimension_numbers<[1], [0], [0], [1], [0, 0, 1, 1], [], []>} : vector<8x32xf32>, vector<32x32xf32>, vector<8x32xf32> -> vector<8x32xf32>
    %cst_307 = arith.constant dense<0.000000e+00> : vector<8x32xf32>
    %935 = tpu.matmul %926, %681, %cst_307 {dimension_numbers = #tpu.dot_dimension_numbers<[1], [0], [0], [1], [0, 0, 1, 1], [], []>} : vector<8x32xf32>, vector<32x32xf32>, vector<8x32xf32> -> vector<8x32xf32>
    %cst_308 = arith.constant dense<0.000000e+00> : vector<8x32xf32>
    %936 = tpu.matmul %926, %683, %cst_308 {dimension_numbers = #tpu.dot_dimension_numbers<[1], [0], [0], [1], [0, 0, 1, 1], [], []>} : vector<8x32xf32>, vector<32x32xf32>, vector<8x32xf32> -> vector<8x32xf32>
    %937 = vector.broadcast %685 : vector<1x32xf32> to vector<8x32xf32>
    %938 = arith.addf %936, %937 : vector<8x32xf32>
    %939 = arith.addf %931, %934 : vector<8x32xf32>
    %940 = arith.negf %939 : vector<8x32xf32>
    %941 = math.exp %940 : vector<8x32xf32>
    %cst_309 = arith.constant 1.000000e+00 : f32
    %942 = vector.broadcast %cst_309 : f32 to vector<8x32xf32>
    %943 = arith.addf %942, %941 : vector<8x32xf32>
    %944 = arith.divf %942, %943 : vector<8x32xf32>
    %945 = arith.addf %932, %935 : vector<8x32xf32>
    %946 = arith.negf %945 : vector<8x32xf32>
    %947 = math.exp %946 : vector<8x32xf32>
    %cst_310 = arith.constant 1.000000e+00 : f32
    %948 = vector.broadcast %cst_310 : f32 to vector<8x32xf32>
    %949 = arith.addf %948, %947 : vector<8x32xf32>
    %950 = arith.divf %948, %949 : vector<8x32xf32>
    %951 = arith.mulf %944, %938 : vector<8x32xf32>
    %952 = arith.addf %933, %951 : vector<8x32xf32>
    %953 = math.tanh %952 : vector<8x32xf32>
    %cst_311 = arith.constant 1.000000e+00 : f32
    %954 = vector.broadcast %cst_311 : f32 to vector<8x32xf32>
    %955 = arith.subf %954, %950 : vector<8x32xf32>
    %956 = arith.mulf %955, %953 : vector<8x32xf32>
    %957 = arith.mulf %950, %926 : vector<8x32xf32>
    %958 = arith.addf %956, %957 : vector<8x32xf32>
    %cst_312 = arith.constant 0.000000e+00 : f32
    %959 = vector.shape_cast %39 : vector<8x1xi1> to vector<8x1xi1>
    %960 = vector.broadcast %959 : vector<8x1xi1> to vector<8x32xi1>
    %961 = vector.broadcast %cst_312 : f32 to vector<8x32xf32>
    %962 = arith.select %960, %958, %961 : vector<8x32xi1>, vector<8x32xf32>
    %963 = tpu.concatenate %738, %770, %802, %834, %866, %898, %930, %962 in 0 : vector<8x32xf32>, vector<8x32xf32>, vector<8x32xf32>, vector<8x32xf32>, vector<8x32xf32>, vector<8x32xf32>, vector<8x32xf32>, vector<8x32xf32> -> vector<64x32xf32>
    %964 = tpu.concatenate %6, %6, %6, %6, %6, %6, %6, %6 in 0 : vector<8x32xf32>, vector<8x32xf32>, vector<8x32xf32>, vector<8x32xf32>, vector<8x32xf32>, vector<8x32xf32>, vector<8x32xf32>, vector<8x32xf32> -> vector<64x32xf32>
    %965 = arith.mulf %964, %963 : vector<64x32xf32>
    %cst_313 = arith.constant dense<0.000000e+00> : vector<64xf32>
    %966 = vector.multi_reduction <add>, %965, %cst_313 [1] : vector<64x32xf32> to vector<64xf32>
    %967 = vector.shape_cast %966 : vector<64xf32> to vector<64x1xf32>
    %968 = math.tanh %967 : vector<64x1xf32>
    %cst_314 = arith.constant -1.000000e+30 : f32
    %969 = vector.broadcast %cst_314 : f32 to vector<64x1xf32>
    %970 = arith.select %15, %968, %969 : vector<64x1xi1>, vector<64x1xf32>
    %971 = vector.extract_strided_slice %970 {offsets = [0, 0], sizes = [8, 1], strides = [1, 1]} : vector<64x1xf32> to vector<8x1xf32>
    %972 = vector.extract_strided_slice %970 {offsets = [8, 0], sizes = [8, 1], strides = [1, 1]} : vector<64x1xf32> to vector<8x1xf32>
    %973 = vector.extract_strided_slice %970 {offsets = [16, 0], sizes = [8, 1], strides = [1, 1]} : vector<64x1xf32> to vector<8x1xf32>
    %974 = vector.extract_strided_slice %970 {offsets = [24, 0], sizes = [8, 1], strides = [1, 1]} : vector<64x1xf32> to vector<8x1xf32>
    %975 = vector.extract_strided_slice %970 {offsets = [32, 0], sizes = [8, 1], strides = [1, 1]} : vector<64x1xf32> to vector<8x1xf32>
    %976 = vector.extract_strided_slice %970 {offsets = [40, 0], sizes = [8, 1], strides = [1, 1]} : vector<64x1xf32> to vector<8x1xf32>
    %977 = vector.extract_strided_slice %970 {offsets = [48, 0], sizes = [8, 1], strides = [1, 1]} : vector<64x1xf32> to vector<8x1xf32>
    %978 = vector.extract_strided_slice %970 {offsets = [56, 0], sizes = [8, 1], strides = [1, 1]} : vector<64x1xf32> to vector<8x1xf32>
    %979 = arith.maximumf %971, %972 : vector<8x1xf32>
    %980 = arith.maximumf %979, %973 : vector<8x1xf32>
    %981 = arith.maximumf %980, %974 : vector<8x1xf32>
    %982 = arith.maximumf %981, %975 : vector<8x1xf32>
    %983 = arith.maximumf %982, %976 : vector<8x1xf32>
    %984 = arith.maximumf %983, %977 : vector<8x1xf32>
    %985 = arith.maximumf %984, %978 : vector<8x1xf32>
    %986 = arith.subf %971, %985 : vector<8x1xf32>
    %987 = math.exp %986 : vector<8x1xf32>
    %988 = arith.subf %972, %985 : vector<8x1xf32>
    %989 = math.exp %988 : vector<8x1xf32>
    %990 = arith.subf %973, %985 : vector<8x1xf32>
    %991 = math.exp %990 : vector<8x1xf32>
    %992 = arith.subf %974, %985 : vector<8x1xf32>
    %993 = math.exp %992 : vector<8x1xf32>
    %994 = arith.subf %975, %985 : vector<8x1xf32>
    %995 = math.exp %994 : vector<8x1xf32>
    %996 = arith.subf %976, %985 : vector<8x1xf32>
    %997 = math.exp %996 : vector<8x1xf32>
    %998 = arith.subf %977, %985 : vector<8x1xf32>
    %999 = math.exp %998 : vector<8x1xf32>
    %1000 = arith.subf %978, %985 : vector<8x1xf32>
    %1001 = math.exp %1000 : vector<8x1xf32>
    %1002 = arith.addf %987, %989 : vector<8x1xf32>
    %1003 = arith.addf %1002, %991 : vector<8x1xf32>
    %1004 = arith.addf %1003, %993 : vector<8x1xf32>
    %1005 = arith.addf %1004, %995 : vector<8x1xf32>
    %1006 = arith.addf %1005, %997 : vector<8x1xf32>
    %1007 = arith.addf %1006, %999 : vector<8x1xf32>
    %1008 = arith.addf %1007, %1001 : vector<8x1xf32>
    %1009 = tpu.reciprocal %1008 {approx = true} : vector<8x1xf32> -> vector<8x1xf32>
    %cst_315 = arith.constant 0.000000e+00 : f32
    %1010 = vector.broadcast %cst_315 : f32 to vector<8x32xf32>
    %1011 = arith.mulf %987, %1009 : vector<8x1xf32>
    %cst_316 = arith.constant 0.000000e+00 : f32
    %1012 = vector.broadcast %cst_316 : f32 to vector<8x1xf32>
    %1013 = arith.select %32, %1011, %1012 : vector<8x1xi1>, vector<8x1xf32>
    %1014 = vector.broadcast %1013 : vector<8x1xf32> to vector<8x32xf32>
    %1015 = arith.mulf %1014, %738 : vector<8x32xf32>
    %1016 = arith.addf %1010, %1015 : vector<8x32xf32>
    %1017 = arith.mulf %989, %1009 : vector<8x1xf32>
    %cst_317 = arith.constant 0.000000e+00 : f32
    %1018 = vector.broadcast %cst_317 : f32 to vector<8x1xf32>
    %1019 = arith.select %33, %1017, %1018 : vector<8x1xi1>, vector<8x1xf32>
    %1020 = vector.broadcast %1019 : vector<8x1xf32> to vector<8x32xf32>
    %1021 = arith.mulf %1020, %770 : vector<8x32xf32>
    %1022 = arith.addf %1016, %1021 : vector<8x32xf32>
    %1023 = arith.mulf %991, %1009 : vector<8x1xf32>
    %cst_318 = arith.constant 0.000000e+00 : f32
    %1024 = vector.broadcast %cst_318 : f32 to vector<8x1xf32>
    %1025 = arith.select %34, %1023, %1024 : vector<8x1xi1>, vector<8x1xf32>
    %1026 = vector.broadcast %1025 : vector<8x1xf32> to vector<8x32xf32>
    %1027 = arith.mulf %1026, %802 : vector<8x32xf32>
    %1028 = arith.addf %1022, %1027 : vector<8x32xf32>
    %1029 = arith.mulf %993, %1009 : vector<8x1xf32>
    %cst_319 = arith.constant 0.000000e+00 : f32
    %1030 = vector.broadcast %cst_319 : f32 to vector<8x1xf32>
    %1031 = arith.select %35, %1029, %1030 : vector<8x1xi1>, vector<8x1xf32>
    %1032 = vector.broadcast %1031 : vector<8x1xf32> to vector<8x32xf32>
    %1033 = arith.mulf %1032, %834 : vector<8x32xf32>
    %1034 = arith.addf %1028, %1033 : vector<8x32xf32>
    %1035 = arith.mulf %995, %1009 : vector<8x1xf32>
    %cst_320 = arith.constant 0.000000e+00 : f32
    %1036 = vector.broadcast %cst_320 : f32 to vector<8x1xf32>
    %1037 = arith.select %36, %1035, %1036 : vector<8x1xi1>, vector<8x1xf32>
    %1038 = vector.broadcast %1037 : vector<8x1xf32> to vector<8x32xf32>
    %1039 = arith.mulf %1038, %866 : vector<8x32xf32>
    %1040 = arith.addf %1034, %1039 : vector<8x32xf32>
    %1041 = arith.mulf %997, %1009 : vector<8x1xf32>
    %cst_321 = arith.constant 0.000000e+00 : f32
    %1042 = vector.broadcast %cst_321 : f32 to vector<8x1xf32>
    %1043 = arith.select %37, %1041, %1042 : vector<8x1xi1>, vector<8x1xf32>
    %1044 = vector.broadcast %1043 : vector<8x1xf32> to vector<8x32xf32>
    %1045 = arith.mulf %1044, %898 : vector<8x32xf32>
    %1046 = arith.addf %1040, %1045 : vector<8x32xf32>
    %1047 = arith.mulf %999, %1009 : vector<8x1xf32>
    %cst_322 = arith.constant 0.000000e+00 : f32
    %1048 = vector.broadcast %cst_322 : f32 to vector<8x1xf32>
    %1049 = arith.select %38, %1047, %1048 : vector<8x1xi1>, vector<8x1xf32>
    %1050 = vector.broadcast %1049 : vector<8x1xf32> to vector<8x32xf32>
    %1051 = arith.mulf %1050, %930 : vector<8x32xf32>
    %1052 = arith.addf %1046, %1051 : vector<8x32xf32>
    %1053 = arith.mulf %1001, %1009 : vector<8x1xf32>
    %cst_323 = arith.constant 0.000000e+00 : f32
    %1054 = vector.broadcast %cst_323 : f32 to vector<8x1xf32>
    %1055 = arith.select %39, %1053, %1054 : vector<8x1xi1>, vector<8x1xf32>
    %1056 = vector.broadcast %1055 : vector<8x1xf32> to vector<8x32xf32>
    %1057 = arith.mulf %1056, %962 : vector<8x32xf32>
    %1058 = arith.addf %1052, %1057 : vector<8x32xf32>
    %1059 = arith.addf %6, %1058 : vector<8x32xf32>
    %1060 = math.tanh %1059 : vector<8x32xf32>
    %c1_324 = arith.constant 1 : index
    %c0_325 = arith.constant 0 : index
    %c0_326 = arith.constant 0 : index
    %c0_327 = arith.constant 0 : index
    %1061 = vector.load %arg12[%c1_324, %c0_325, %c0_326, %c0_327] : memref<2x3x32x32xf32, #tpu.memory_space<vmem>>, vector<1x1x32x32xf32>
    %1062 = vector.shape_cast %1061 : vector<1x1x32x32xf32> to vector<32x32xf32>
    %c1_328 = arith.constant 1 : index
    %c1_329 = arith.constant 1 : index
    %c0_330 = arith.constant 0 : index
    %c0_331 = arith.constant 0 : index
    %1063 = vector.load %arg12[%c1_328, %c1_329, %c0_330, %c0_331] : memref<2x3x32x32xf32, #tpu.memory_space<vmem>>, vector<1x1x32x32xf32>
    %1064 = vector.shape_cast %1063 : vector<1x1x32x32xf32> to vector<32x32xf32>
    %c1_332 = arith.constant 1 : index
    %c2_333 = arith.constant 2 : index
    %c0_334 = arith.constant 0 : index
    %c0_335 = arith.constant 0 : index
    %1065 = vector.load %arg12[%c1_332, %c2_333, %c0_334, %c0_335] : memref<2x3x32x32xf32, #tpu.memory_space<vmem>>, vector<1x1x32x32xf32>
    %1066 = vector.shape_cast %1065 : vector<1x1x32x32xf32> to vector<32x32xf32>
    %c1_336 = arith.constant 1 : index
    %c3_337 = arith.constant 3 : index
    %c0_338 = arith.constant 0 : index
    %c0_339 = arith.constant 0 : index
    %1067 = vector.load %arg13[%c1_336, %c3_337, %c0_338, %c0_339] : memref<2x4x1x32xf32, #tpu.memory_space<vmem>>, vector<1x1x1x32xf32>
    %1068 = vector.shape_cast %1067 : vector<1x1x1x32xf32> to vector<1x32xf32>
    %c1_340 = arith.constant 1 : index
    %c0_341 = arith.constant 0 : index
    %c0_342 = arith.constant 0 : index
    %c0_343 = arith.constant 0 : index
    %1069 = vector.load %arg11[%c1_340, %c0_341, %c0_342, %c0_343] : memref<2x3x32x32xf32, #tpu.memory_space<vmem>>, vector<1x1x32x32xf32>
    %1070 = vector.shape_cast %1069 : vector<1x1x32x32xf32> to vector<32x32xf32>
    %cst_344 = arith.constant dense<0.000000e+00> : vector<64x32xf32>
    %1071 = tpu.matmul %963, %1070, %cst_344 {dimension_numbers = #tpu.dot_dimension_numbers<[1], [0], [0], [1], [0, 0, 1, 1], [], []>} : vector<64x32xf32>, vector<32x32xf32>, vector<64x32xf32> -> vector<64x32xf32>
    %c1_345 = arith.constant 1 : index
    %c0_346 = arith.constant 0 : index
    %c0_347 = arith.constant 0 : index
    %c0_348 = arith.constant 0 : index
    %1072 = vector.load %arg13[%c1_345, %c0_346, %c0_347, %c0_348] : memref<2x4x1x32xf32, #tpu.memory_space<vmem>>, vector<1x1x1x32xf32>
    %1073 = vector.shape_cast %1072 : vector<1x1x1x32xf32> to vector<1x32xf32>
    %1074 = vector.broadcast %1073 : vector<1x32xf32> to vector<64x32xf32>
    %1075 = arith.addf %1071, %1074 : vector<64x32xf32>
    %c1_349 = arith.constant 1 : index
    %c1_350 = arith.constant 1 : index
    %c0_351 = arith.constant 0 : index
    %c0_352 = arith.constant 0 : index
    %1076 = vector.load %arg11[%c1_349, %c1_350, %c0_351, %c0_352] : memref<2x3x32x32xf32, #tpu.memory_space<vmem>>, vector<1x1x32x32xf32>
    %1077 = vector.shape_cast %1076 : vector<1x1x32x32xf32> to vector<32x32xf32>
    %cst_353 = arith.constant dense<0.000000e+00> : vector<64x32xf32>
    %1078 = tpu.matmul %963, %1077, %cst_353 {dimension_numbers = #tpu.dot_dimension_numbers<[1], [0], [0], [1], [0, 0, 1, 1], [], []>} : vector<64x32xf32>, vector<32x32xf32>, vector<64x32xf32> -> vector<64x32xf32>
    %c1_354 = arith.constant 1 : index
    %c1_355 = arith.constant 1 : index
    %c0_356 = arith.constant 0 : index
    %c0_357 = arith.constant 0 : index
    %1079 = vector.load %arg13[%c1_354, %c1_355, %c0_356, %c0_357] : memref<2x4x1x32xf32, #tpu.memory_space<vmem>>, vector<1x1x1x32xf32>
    %1080 = vector.shape_cast %1079 : vector<1x1x1x32xf32> to vector<1x32xf32>
    %1081 = vector.broadcast %1080 : vector<1x32xf32> to vector<64x32xf32>
    %1082 = arith.addf %1078, %1081 : vector<64x32xf32>
    %c1_358 = arith.constant 1 : index
    %c2_359 = arith.constant 2 : index
    %c0_360 = arith.constant 0 : index
    %c0_361 = arith.constant 0 : index
    %1083 = vector.load %arg11[%c1_358, %c2_359, %c0_360, %c0_361] : memref<2x3x32x32xf32, #tpu.memory_space<vmem>>, vector<1x1x32x32xf32>
    %1084 = vector.shape_cast %1083 : vector<1x1x32x32xf32> to vector<32x32xf32>
    %cst_362 = arith.constant dense<0.000000e+00> : vector<64x32xf32>
    %1085 = tpu.matmul %963, %1084, %cst_362 {dimension_numbers = #tpu.dot_dimension_numbers<[1], [0], [0], [1], [0, 0, 1, 1], [], []>} : vector<64x32xf32>, vector<32x32xf32>, vector<64x32xf32> -> vector<64x32xf32>
    %c1_363 = arith.constant 1 : index
    %c2_364 = arith.constant 2 : index
    %c0_365 = arith.constant 0 : index
    %c0_366 = arith.constant 0 : index
    %1086 = vector.load %arg13[%c1_363, %c2_364, %c0_365, %c0_366] : memref<2x4x1x32xf32, #tpu.memory_space<vmem>>, vector<1x1x1x32xf32>
    %1087 = vector.shape_cast %1086 : vector<1x1x1x32xf32> to vector<1x32xf32>
    %1088 = vector.broadcast %1087 : vector<1x32xf32> to vector<64x32xf32>
    %1089 = arith.addf %1085, %1088 : vector<64x32xf32>
    %1090 = vector.extract_strided_slice %1075 {offsets = [0, 0], sizes = [8, 32], strides = [1, 1]} : vector<64x32xf32> to vector<8x32xf32>
    %1091 = vector.extract_strided_slice %1082 {offsets = [0, 0], sizes = [8, 32], strides = [1, 1]} : vector<64x32xf32> to vector<8x32xf32>
    %1092 = vector.extract_strided_slice %1089 {offsets = [0, 0], sizes = [8, 32], strides = [1, 1]} : vector<64x32xf32> to vector<8x32xf32>
    %cst_367 = arith.constant dense<0.000000e+00> : vector<8x32xf32>
    %1093 = tpu.matmul %100, %1062, %cst_367 {dimension_numbers = #tpu.dot_dimension_numbers<[1], [0], [0], [1], [0, 0, 1, 1], [], []>} : vector<8x32xf32>, vector<32x32xf32>, vector<8x32xf32> -> vector<8x32xf32>
    %cst_368 = arith.constant dense<0.000000e+00> : vector<8x32xf32>
    %1094 = tpu.matmul %100, %1064, %cst_368 {dimension_numbers = #tpu.dot_dimension_numbers<[1], [0], [0], [1], [0, 0, 1, 1], [], []>} : vector<8x32xf32>, vector<32x32xf32>, vector<8x32xf32> -> vector<8x32xf32>
    %cst_369 = arith.constant dense<0.000000e+00> : vector<8x32xf32>
    %1095 = tpu.matmul %100, %1066, %cst_369 {dimension_numbers = #tpu.dot_dimension_numbers<[1], [0], [0], [1], [0, 0, 1, 1], [], []>} : vector<8x32xf32>, vector<32x32xf32>, vector<8x32xf32> -> vector<8x32xf32>
    %1096 = vector.broadcast %1068 : vector<1x32xf32> to vector<8x32xf32>
    %1097 = arith.addf %1095, %1096 : vector<8x32xf32>
    %1098 = arith.addf %1090, %1093 : vector<8x32xf32>
    %1099 = arith.negf %1098 : vector<8x32xf32>
    %1100 = math.exp %1099 : vector<8x32xf32>
    %cst_370 = arith.constant 1.000000e+00 : f32
    %1101 = vector.broadcast %cst_370 : f32 to vector<8x32xf32>
    %1102 = arith.addf %1101, %1100 : vector<8x32xf32>
    %1103 = arith.divf %1101, %1102 : vector<8x32xf32>
    %1104 = arith.addf %1091, %1094 : vector<8x32xf32>
    %1105 = arith.negf %1104 : vector<8x32xf32>
    %1106 = math.exp %1105 : vector<8x32xf32>
    %cst_371 = arith.constant 1.000000e+00 : f32
    %1107 = vector.broadcast %cst_371 : f32 to vector<8x32xf32>
    %1108 = arith.addf %1107, %1106 : vector<8x32xf32>
    %1109 = arith.divf %1107, %1108 : vector<8x32xf32>
    %1110 = arith.mulf %1103, %1097 : vector<8x32xf32>
    %1111 = arith.addf %1092, %1110 : vector<8x32xf32>
    %1112 = math.tanh %1111 : vector<8x32xf32>
    %cst_372 = arith.constant 1.000000e+00 : f32
    %1113 = vector.broadcast %cst_372 : f32 to vector<8x32xf32>
    %1114 = arith.subf %1113, %1109 : vector<8x32xf32>
    %1115 = arith.mulf %1114, %1112 : vector<8x32xf32>
    %1116 = arith.mulf %1109, %100 : vector<8x32xf32>
    %1117 = arith.addf %1115, %1116 : vector<8x32xf32>
    %cst_373 = arith.constant 0.000000e+00 : f32
    %1118 = vector.shape_cast %32 : vector<8x1xi1> to vector<8x1xi1>
    %1119 = vector.broadcast %1118 : vector<8x1xi1> to vector<8x32xi1>
    %1120 = vector.broadcast %cst_373 : f32 to vector<8x32xf32>
    %1121 = arith.select %1119, %1117, %1120 : vector<8x32xi1>, vector<8x32xf32>
    %1122 = vector.extract_strided_slice %1075 {offsets = [8, 0], sizes = [8, 32], strides = [1, 1]} : vector<64x32xf32> to vector<8x32xf32>
    %1123 = vector.extract_strided_slice %1082 {offsets = [8, 0], sizes = [8, 32], strides = [1, 1]} : vector<64x32xf32> to vector<8x32xf32>
    %1124 = vector.extract_strided_slice %1089 {offsets = [8, 0], sizes = [8, 32], strides = [1, 1]} : vector<64x32xf32> to vector<8x32xf32>
    %cst_374 = arith.constant dense<0.000000e+00> : vector<8x32xf32>
    %1125 = tpu.matmul %1117, %1062, %cst_374 {dimension_numbers = #tpu.dot_dimension_numbers<[1], [0], [0], [1], [0, 0, 1, 1], [], []>} : vector<8x32xf32>, vector<32x32xf32>, vector<8x32xf32> -> vector<8x32xf32>
    %cst_375 = arith.constant dense<0.000000e+00> : vector<8x32xf32>
    %1126 = tpu.matmul %1117, %1064, %cst_375 {dimension_numbers = #tpu.dot_dimension_numbers<[1], [0], [0], [1], [0, 0, 1, 1], [], []>} : vector<8x32xf32>, vector<32x32xf32>, vector<8x32xf32> -> vector<8x32xf32>
    %cst_376 = arith.constant dense<0.000000e+00> : vector<8x32xf32>
    %1127 = tpu.matmul %1117, %1066, %cst_376 {dimension_numbers = #tpu.dot_dimension_numbers<[1], [0], [0], [1], [0, 0, 1, 1], [], []>} : vector<8x32xf32>, vector<32x32xf32>, vector<8x32xf32> -> vector<8x32xf32>
    %1128 = vector.broadcast %1068 : vector<1x32xf32> to vector<8x32xf32>
    %1129 = arith.addf %1127, %1128 : vector<8x32xf32>
    %1130 = arith.addf %1122, %1125 : vector<8x32xf32>
    %1131 = arith.negf %1130 : vector<8x32xf32>
    %1132 = math.exp %1131 : vector<8x32xf32>
    %cst_377 = arith.constant 1.000000e+00 : f32
    %1133 = vector.broadcast %cst_377 : f32 to vector<8x32xf32>
    %1134 = arith.addf %1133, %1132 : vector<8x32xf32>
    %1135 = arith.divf %1133, %1134 : vector<8x32xf32>
    %1136 = arith.addf %1123, %1126 : vector<8x32xf32>
    %1137 = arith.negf %1136 : vector<8x32xf32>
    %1138 = math.exp %1137 : vector<8x32xf32>
    %cst_378 = arith.constant 1.000000e+00 : f32
    %1139 = vector.broadcast %cst_378 : f32 to vector<8x32xf32>
    %1140 = arith.addf %1139, %1138 : vector<8x32xf32>
    %1141 = arith.divf %1139, %1140 : vector<8x32xf32>
    %1142 = arith.mulf %1135, %1129 : vector<8x32xf32>
    %1143 = arith.addf %1124, %1142 : vector<8x32xf32>
    %1144 = math.tanh %1143 : vector<8x32xf32>
    %cst_379 = arith.constant 1.000000e+00 : f32
    %1145 = vector.broadcast %cst_379 : f32 to vector<8x32xf32>
    %1146 = arith.subf %1145, %1141 : vector<8x32xf32>
    %1147 = arith.mulf %1146, %1144 : vector<8x32xf32>
    %1148 = arith.mulf %1141, %1117 : vector<8x32xf32>
    %1149 = arith.addf %1147, %1148 : vector<8x32xf32>
    %cst_380 = arith.constant 0.000000e+00 : f32
    %1150 = vector.shape_cast %33 : vector<8x1xi1> to vector<8x1xi1>
    %1151 = vector.broadcast %1150 : vector<8x1xi1> to vector<8x32xi1>
    %1152 = vector.broadcast %cst_380 : f32 to vector<8x32xf32>
    %1153 = arith.select %1151, %1149, %1152 : vector<8x32xi1>, vector<8x32xf32>
    %1154 = vector.extract_strided_slice %1075 {offsets = [16, 0], sizes = [8, 32], strides = [1, 1]} : vector<64x32xf32> to vector<8x32xf32>
    %1155 = vector.extract_strided_slice %1082 {offsets = [16, 0], sizes = [8, 32], strides = [1, 1]} : vector<64x32xf32> to vector<8x32xf32>
    %1156 = vector.extract_strided_slice %1089 {offsets = [16, 0], sizes = [8, 32], strides = [1, 1]} : vector<64x32xf32> to vector<8x32xf32>
    %cst_381 = arith.constant dense<0.000000e+00> : vector<8x32xf32>
    %1157 = tpu.matmul %1149, %1062, %cst_381 {dimension_numbers = #tpu.dot_dimension_numbers<[1], [0], [0], [1], [0, 0, 1, 1], [], []>} : vector<8x32xf32>, vector<32x32xf32>, vector<8x32xf32> -> vector<8x32xf32>
    %cst_382 = arith.constant dense<0.000000e+00> : vector<8x32xf32>
    %1158 = tpu.matmul %1149, %1064, %cst_382 {dimension_numbers = #tpu.dot_dimension_numbers<[1], [0], [0], [1], [0, 0, 1, 1], [], []>} : vector<8x32xf32>, vector<32x32xf32>, vector<8x32xf32> -> vector<8x32xf32>
    %cst_383 = arith.constant dense<0.000000e+00> : vector<8x32xf32>
    %1159 = tpu.matmul %1149, %1066, %cst_383 {dimension_numbers = #tpu.dot_dimension_numbers<[1], [0], [0], [1], [0, 0, 1, 1], [], []>} : vector<8x32xf32>, vector<32x32xf32>, vector<8x32xf32> -> vector<8x32xf32>
    %1160 = vector.broadcast %1068 : vector<1x32xf32> to vector<8x32xf32>
    %1161 = arith.addf %1159, %1160 : vector<8x32xf32>
    %1162 = arith.addf %1154, %1157 : vector<8x32xf32>
    %1163 = arith.negf %1162 : vector<8x32xf32>
    %1164 = math.exp %1163 : vector<8x32xf32>
    %cst_384 = arith.constant 1.000000e+00 : f32
    %1165 = vector.broadcast %cst_384 : f32 to vector<8x32xf32>
    %1166 = arith.addf %1165, %1164 : vector<8x32xf32>
    %1167 = arith.divf %1165, %1166 : vector<8x32xf32>
    %1168 = arith.addf %1155, %1158 : vector<8x32xf32>
    %1169 = arith.negf %1168 : vector<8x32xf32>
    %1170 = math.exp %1169 : vector<8x32xf32>
    %cst_385 = arith.constant 1.000000e+00 : f32
    %1171 = vector.broadcast %cst_385 : f32 to vector<8x32xf32>
    %1172 = arith.addf %1171, %1170 : vector<8x32xf32>
    %1173 = arith.divf %1171, %1172 : vector<8x32xf32>
    %1174 = arith.mulf %1167, %1161 : vector<8x32xf32>
    %1175 = arith.addf %1156, %1174 : vector<8x32xf32>
    %1176 = math.tanh %1175 : vector<8x32xf32>
    %cst_386 = arith.constant 1.000000e+00 : f32
    %1177 = vector.broadcast %cst_386 : f32 to vector<8x32xf32>
    %1178 = arith.subf %1177, %1173 : vector<8x32xf32>
    %1179 = arith.mulf %1178, %1176 : vector<8x32xf32>
    %1180 = arith.mulf %1173, %1149 : vector<8x32xf32>
    %1181 = arith.addf %1179, %1180 : vector<8x32xf32>
    %cst_387 = arith.constant 0.000000e+00 : f32
    %1182 = vector.shape_cast %34 : vector<8x1xi1> to vector<8x1xi1>
    %1183 = vector.broadcast %1182 : vector<8x1xi1> to vector<8x32xi1>
    %1184 = vector.broadcast %cst_387 : f32 to vector<8x32xf32>
    %1185 = arith.select %1183, %1181, %1184 : vector<8x32xi1>, vector<8x32xf32>
    %1186 = vector.extract_strided_slice %1075 {offsets = [24, 0], sizes = [8, 32], strides = [1, 1]} : vector<64x32xf32> to vector<8x32xf32>
    %1187 = vector.extract_strided_slice %1082 {offsets = [24, 0], sizes = [8, 32], strides = [1, 1]} : vector<64x32xf32> to vector<8x32xf32>
    %1188 = vector.extract_strided_slice %1089 {offsets = [24, 0], sizes = [8, 32], strides = [1, 1]} : vector<64x32xf32> to vector<8x32xf32>
    %cst_388 = arith.constant dense<0.000000e+00> : vector<8x32xf32>
    %1189 = tpu.matmul %1181, %1062, %cst_388 {dimension_numbers = #tpu.dot_dimension_numbers<[1], [0], [0], [1], [0, 0, 1, 1], [], []>} : vector<8x32xf32>, vector<32x32xf32>, vector<8x32xf32> -> vector<8x32xf32>
    %cst_389 = arith.constant dense<0.000000e+00> : vector<8x32xf32>
    %1190 = tpu.matmul %1181, %1064, %cst_389 {dimension_numbers = #tpu.dot_dimension_numbers<[1], [0], [0], [1], [0, 0, 1, 1], [], []>} : vector<8x32xf32>, vector<32x32xf32>, vector<8x32xf32> -> vector<8x32xf32>
    %cst_390 = arith.constant dense<0.000000e+00> : vector<8x32xf32>
    %1191 = tpu.matmul %1181, %1066, %cst_390 {dimension_numbers = #tpu.dot_dimension_numbers<[1], [0], [0], [1], [0, 0, 1, 1], [], []>} : vector<8x32xf32>, vector<32x32xf32>, vector<8x32xf32> -> vector<8x32xf32>
    %1192 = vector.broadcast %1068 : vector<1x32xf32> to vector<8x32xf32>
    %1193 = arith.addf %1191, %1192 : vector<8x32xf32>
    %1194 = arith.addf %1186, %1189 : vector<8x32xf32>
    %1195 = arith.negf %1194 : vector<8x32xf32>
    %1196 = math.exp %1195 : vector<8x32xf32>
    %cst_391 = arith.constant 1.000000e+00 : f32
    %1197 = vector.broadcast %cst_391 : f32 to vector<8x32xf32>
    %1198 = arith.addf %1197, %1196 : vector<8x32xf32>
    %1199 = arith.divf %1197, %1198 : vector<8x32xf32>
    %1200 = arith.addf %1187, %1190 : vector<8x32xf32>
    %1201 = arith.negf %1200 : vector<8x32xf32>
    %1202 = math.exp %1201 : vector<8x32xf32>
    %cst_392 = arith.constant 1.000000e+00 : f32
    %1203 = vector.broadcast %cst_392 : f32 to vector<8x32xf32>
    %1204 = arith.addf %1203, %1202 : vector<8x32xf32>
    %1205 = arith.divf %1203, %1204 : vector<8x32xf32>
    %1206 = arith.mulf %1199, %1193 : vector<8x32xf32>
    %1207 = arith.addf %1188, %1206 : vector<8x32xf32>
    %1208 = math.tanh %1207 : vector<8x32xf32>
    %cst_393 = arith.constant 1.000000e+00 : f32
    %1209 = vector.broadcast %cst_393 : f32 to vector<8x32xf32>
    %1210 = arith.subf %1209, %1205 : vector<8x32xf32>
    %1211 = arith.mulf %1210, %1208 : vector<8x32xf32>
    %1212 = arith.mulf %1205, %1181 : vector<8x32xf32>
    %1213 = arith.addf %1211, %1212 : vector<8x32xf32>
    %cst_394 = arith.constant 0.000000e+00 : f32
    %1214 = vector.shape_cast %35 : vector<8x1xi1> to vector<8x1xi1>
    %1215 = vector.broadcast %1214 : vector<8x1xi1> to vector<8x32xi1>
    %1216 = vector.broadcast %cst_394 : f32 to vector<8x32xf32>
    %1217 = arith.select %1215, %1213, %1216 : vector<8x32xi1>, vector<8x32xf32>
    %1218 = vector.extract_strided_slice %1075 {offsets = [32, 0], sizes = [8, 32], strides = [1, 1]} : vector<64x32xf32> to vector<8x32xf32>
    %1219 = vector.extract_strided_slice %1082 {offsets = [32, 0], sizes = [8, 32], strides = [1, 1]} : vector<64x32xf32> to vector<8x32xf32>
    %1220 = vector.extract_strided_slice %1089 {offsets = [32, 0], sizes = [8, 32], strides = [1, 1]} : vector<64x32xf32> to vector<8x32xf32>
    %cst_395 = arith.constant dense<0.000000e+00> : vector<8x32xf32>
    %1221 = tpu.matmul %1213, %1062, %cst_395 {dimension_numbers = #tpu.dot_dimension_numbers<[1], [0], [0], [1], [0, 0, 1, 1], [], []>} : vector<8x32xf32>, vector<32x32xf32>, vector<8x32xf32> -> vector<8x32xf32>
    %cst_396 = arith.constant dense<0.000000e+00> : vector<8x32xf32>
    %1222 = tpu.matmul %1213, %1064, %cst_396 {dimension_numbers = #tpu.dot_dimension_numbers<[1], [0], [0], [1], [0, 0, 1, 1], [], []>} : vector<8x32xf32>, vector<32x32xf32>, vector<8x32xf32> -> vector<8x32xf32>
    %cst_397 = arith.constant dense<0.000000e+00> : vector<8x32xf32>
    %1223 = tpu.matmul %1213, %1066, %cst_397 {dimension_numbers = #tpu.dot_dimension_numbers<[1], [0], [0], [1], [0, 0, 1, 1], [], []>} : vector<8x32xf32>, vector<32x32xf32>, vector<8x32xf32> -> vector<8x32xf32>
    %1224 = vector.broadcast %1068 : vector<1x32xf32> to vector<8x32xf32>
    %1225 = arith.addf %1223, %1224 : vector<8x32xf32>
    %1226 = arith.addf %1218, %1221 : vector<8x32xf32>
    %1227 = arith.negf %1226 : vector<8x32xf32>
    %1228 = math.exp %1227 : vector<8x32xf32>
    %cst_398 = arith.constant 1.000000e+00 : f32
    %1229 = vector.broadcast %cst_398 : f32 to vector<8x32xf32>
    %1230 = arith.addf %1229, %1228 : vector<8x32xf32>
    %1231 = arith.divf %1229, %1230 : vector<8x32xf32>
    %1232 = arith.addf %1219, %1222 : vector<8x32xf32>
    %1233 = arith.negf %1232 : vector<8x32xf32>
    %1234 = math.exp %1233 : vector<8x32xf32>
    %cst_399 = arith.constant 1.000000e+00 : f32
    %1235 = vector.broadcast %cst_399 : f32 to vector<8x32xf32>
    %1236 = arith.addf %1235, %1234 : vector<8x32xf32>
    %1237 = arith.divf %1235, %1236 : vector<8x32xf32>
    %1238 = arith.mulf %1231, %1225 : vector<8x32xf32>
    %1239 = arith.addf %1220, %1238 : vector<8x32xf32>
    %1240 = math.tanh %1239 : vector<8x32xf32>
    %cst_400 = arith.constant 1.000000e+00 : f32
    %1241 = vector.broadcast %cst_400 : f32 to vector<8x32xf32>
    %1242 = arith.subf %1241, %1237 : vector<8x32xf32>
    %1243 = arith.mulf %1242, %1240 : vector<8x32xf32>
    %1244 = arith.mulf %1237, %1213 : vector<8x32xf32>
    %1245 = arith.addf %1243, %1244 : vector<8x32xf32>
    %cst_401 = arith.constant 0.000000e+00 : f32
    %1246 = vector.shape_cast %36 : vector<8x1xi1> to vector<8x1xi1>
    %1247 = vector.broadcast %1246 : vector<8x1xi1> to vector<8x32xi1>
    %1248 = vector.broadcast %cst_401 : f32 to vector<8x32xf32>
    %1249 = arith.select %1247, %1245, %1248 : vector<8x32xi1>, vector<8x32xf32>
    %1250 = vector.extract_strided_slice %1075 {offsets = [40, 0], sizes = [8, 32], strides = [1, 1]} : vector<64x32xf32> to vector<8x32xf32>
    %1251 = vector.extract_strided_slice %1082 {offsets = [40, 0], sizes = [8, 32], strides = [1, 1]} : vector<64x32xf32> to vector<8x32xf32>
    %1252 = vector.extract_strided_slice %1089 {offsets = [40, 0], sizes = [8, 32], strides = [1, 1]} : vector<64x32xf32> to vector<8x32xf32>
    %cst_402 = arith.constant dense<0.000000e+00> : vector<8x32xf32>
    %1253 = tpu.matmul %1245, %1062, %cst_402 {dimension_numbers = #tpu.dot_dimension_numbers<[1], [0], [0], [1], [0, 0, 1, 1], [], []>} : vector<8x32xf32>, vector<32x32xf32>, vector<8x32xf32> -> vector<8x32xf32>
    %cst_403 = arith.constant dense<0.000000e+00> : vector<8x32xf32>
    %1254 = tpu.matmul %1245, %1064, %cst_403 {dimension_numbers = #tpu.dot_dimension_numbers<[1], [0], [0], [1], [0, 0, 1, 1], [], []>} : vector<8x32xf32>, vector<32x32xf32>, vector<8x32xf32> -> vector<8x32xf32>
    %cst_404 = arith.constant dense<0.000000e+00> : vector<8x32xf32>
    %1255 = tpu.matmul %1245, %1066, %cst_404 {dimension_numbers = #tpu.dot_dimension_numbers<[1], [0], [0], [1], [0, 0, 1, 1], [], []>} : vector<8x32xf32>, vector<32x32xf32>, vector<8x32xf32> -> vector<8x32xf32>
    %1256 = vector.broadcast %1068 : vector<1x32xf32> to vector<8x32xf32>
    %1257 = arith.addf %1255, %1256 : vector<8x32xf32>
    %1258 = arith.addf %1250, %1253 : vector<8x32xf32>
    %1259 = arith.negf %1258 : vector<8x32xf32>
    %1260 = math.exp %1259 : vector<8x32xf32>
    %cst_405 = arith.constant 1.000000e+00 : f32
    %1261 = vector.broadcast %cst_405 : f32 to vector<8x32xf32>
    %1262 = arith.addf %1261, %1260 : vector<8x32xf32>
    %1263 = arith.divf %1261, %1262 : vector<8x32xf32>
    %1264 = arith.addf %1251, %1254 : vector<8x32xf32>
    %1265 = arith.negf %1264 : vector<8x32xf32>
    %1266 = math.exp %1265 : vector<8x32xf32>
    %cst_406 = arith.constant 1.000000e+00 : f32
    %1267 = vector.broadcast %cst_406 : f32 to vector<8x32xf32>
    %1268 = arith.addf %1267, %1266 : vector<8x32xf32>
    %1269 = arith.divf %1267, %1268 : vector<8x32xf32>
    %1270 = arith.mulf %1263, %1257 : vector<8x32xf32>
    %1271 = arith.addf %1252, %1270 : vector<8x32xf32>
    %1272 = math.tanh %1271 : vector<8x32xf32>
    %cst_407 = arith.constant 1.000000e+00 : f32
    %1273 = vector.broadcast %cst_407 : f32 to vector<8x32xf32>
    %1274 = arith.subf %1273, %1269 : vector<8x32xf32>
    %1275 = arith.mulf %1274, %1272 : vector<8x32xf32>
    %1276 = arith.mulf %1269, %1245 : vector<8x32xf32>
    %1277 = arith.addf %1275, %1276 : vector<8x32xf32>
    %cst_408 = arith.constant 0.000000e+00 : f32
    %1278 = vector.shape_cast %37 : vector<8x1xi1> to vector<8x1xi1>
    %1279 = vector.broadcast %1278 : vector<8x1xi1> to vector<8x32xi1>
    %1280 = vector.broadcast %cst_408 : f32 to vector<8x32xf32>
    %1281 = arith.select %1279, %1277, %1280 : vector<8x32xi1>, vector<8x32xf32>
    %1282 = vector.extract_strided_slice %1075 {offsets = [48, 0], sizes = [8, 32], strides = [1, 1]} : vector<64x32xf32> to vector<8x32xf32>
    %1283 = vector.extract_strided_slice %1082 {offsets = [48, 0], sizes = [8, 32], strides = [1, 1]} : vector<64x32xf32> to vector<8x32xf32>
    %1284 = vector.extract_strided_slice %1089 {offsets = [48, 0], sizes = [8, 32], strides = [1, 1]} : vector<64x32xf32> to vector<8x32xf32>
    %cst_409 = arith.constant dense<0.000000e+00> : vector<8x32xf32>
    %1285 = tpu.matmul %1277, %1062, %cst_409 {dimension_numbers = #tpu.dot_dimension_numbers<[1], [0], [0], [1], [0, 0, 1, 1], [], []>} : vector<8x32xf32>, vector<32x32xf32>, vector<8x32xf32> -> vector<8x32xf32>
    %cst_410 = arith.constant dense<0.000000e+00> : vector<8x32xf32>
    %1286 = tpu.matmul %1277, %1064, %cst_410 {dimension_numbers = #tpu.dot_dimension_numbers<[1], [0], [0], [1], [0, 0, 1, 1], [], []>} : vector<8x32xf32>, vector<32x32xf32>, vector<8x32xf32> -> vector<8x32xf32>
    %cst_411 = arith.constant dense<0.000000e+00> : vector<8x32xf32>
    %1287 = tpu.matmul %1277, %1066, %cst_411 {dimension_numbers = #tpu.dot_dimension_numbers<[1], [0], [0], [1], [0, 0, 1, 1], [], []>} : vector<8x32xf32>, vector<32x32xf32>, vector<8x32xf32> -> vector<8x32xf32>
    %1288 = vector.broadcast %1068 : vector<1x32xf32> to vector<8x32xf32>
    %1289 = arith.addf %1287, %1288 : vector<8x32xf32>
    %1290 = arith.addf %1282, %1285 : vector<8x32xf32>
    %1291 = arith.negf %1290 : vector<8x32xf32>
    %1292 = math.exp %1291 : vector<8x32xf32>
    %cst_412 = arith.constant 1.000000e+00 : f32
    %1293 = vector.broadcast %cst_412 : f32 to vector<8x32xf32>
    %1294 = arith.addf %1293, %1292 : vector<8x32xf32>
    %1295 = arith.divf %1293, %1294 : vector<8x32xf32>
    %1296 = arith.addf %1283, %1286 : vector<8x32xf32>
    %1297 = arith.negf %1296 : vector<8x32xf32>
    %1298 = math.exp %1297 : vector<8x32xf32>
    %cst_413 = arith.constant 1.000000e+00 : f32
    %1299 = vector.broadcast %cst_413 : f32 to vector<8x32xf32>
    %1300 = arith.addf %1299, %1298 : vector<8x32xf32>
    %1301 = arith.divf %1299, %1300 : vector<8x32xf32>
    %1302 = arith.mulf %1295, %1289 : vector<8x32xf32>
    %1303 = arith.addf %1284, %1302 : vector<8x32xf32>
    %1304 = math.tanh %1303 : vector<8x32xf32>
    %cst_414 = arith.constant 1.000000e+00 : f32
    %1305 = vector.broadcast %cst_414 : f32 to vector<8x32xf32>
    %1306 = arith.subf %1305, %1301 : vector<8x32xf32>
    %1307 = arith.mulf %1306, %1304 : vector<8x32xf32>
    %1308 = arith.mulf %1301, %1277 : vector<8x32xf32>
    %1309 = arith.addf %1307, %1308 : vector<8x32xf32>
    %cst_415 = arith.constant 0.000000e+00 : f32
    %1310 = vector.shape_cast %38 : vector<8x1xi1> to vector<8x1xi1>
    %1311 = vector.broadcast %1310 : vector<8x1xi1> to vector<8x32xi1>
    %1312 = vector.broadcast %cst_415 : f32 to vector<8x32xf32>
    %1313 = arith.select %1311, %1309, %1312 : vector<8x32xi1>, vector<8x32xf32>
    %1314 = vector.extract_strided_slice %1075 {offsets = [56, 0], sizes = [8, 32], strides = [1, 1]} : vector<64x32xf32> to vector<8x32xf32>
    %1315 = vector.extract_strided_slice %1082 {offsets = [56, 0], sizes = [8, 32], strides = [1, 1]} : vector<64x32xf32> to vector<8x32xf32>
    %1316 = vector.extract_strided_slice %1089 {offsets = [56, 0], sizes = [8, 32], strides = [1, 1]} : vector<64x32xf32> to vector<8x32xf32>
    %cst_416 = arith.constant dense<0.000000e+00> : vector<8x32xf32>
    %1317 = tpu.matmul %1309, %1062, %cst_416 {dimension_numbers = #tpu.dot_dimension_numbers<[1], [0], [0], [1], [0, 0, 1, 1], [], []>} : vector<8x32xf32>, vector<32x32xf32>, vector<8x32xf32> -> vector<8x32xf32>
    %cst_417 = arith.constant dense<0.000000e+00> : vector<8x32xf32>
    %1318 = tpu.matmul %1309, %1064, %cst_417 {dimension_numbers = #tpu.dot_dimension_numbers<[1], [0], [0], [1], [0, 0, 1, 1], [], []>} : vector<8x32xf32>, vector<32x32xf32>, vector<8x32xf32> -> vector<8x32xf32>
    %cst_418 = arith.constant dense<0.000000e+00> : vector<8x32xf32>
    %1319 = tpu.matmul %1309, %1066, %cst_418 {dimension_numbers = #tpu.dot_dimension_numbers<[1], [0], [0], [1], [0, 0, 1, 1], [], []>} : vector<8x32xf32>, vector<32x32xf32>, vector<8x32xf32> -> vector<8x32xf32>
    %1320 = vector.broadcast %1068 : vector<1x32xf32> to vector<8x32xf32>
    %1321 = arith.addf %1319, %1320 : vector<8x32xf32>
    %1322 = arith.addf %1314, %1317 : vector<8x32xf32>
    %1323 = arith.negf %1322 : vector<8x32xf32>
    %1324 = math.exp %1323 : vector<8x32xf32>
    %cst_419 = arith.constant 1.000000e+00 : f32
    %1325 = vector.broadcast %cst_419 : f32 to vector<8x32xf32>
    %1326 = arith.addf %1325, %1324 : vector<8x32xf32>
    %1327 = arith.divf %1325, %1326 : vector<8x32xf32>
    %1328 = arith.addf %1315, %1318 : vector<8x32xf32>
    %1329 = arith.negf %1328 : vector<8x32xf32>
    %1330 = math.exp %1329 : vector<8x32xf32>
    %cst_420 = arith.constant 1.000000e+00 : f32
    %1331 = vector.broadcast %cst_420 : f32 to vector<8x32xf32>
    %1332 = arith.addf %1331, %1330 : vector<8x32xf32>
    %1333 = arith.divf %1331, %1332 : vector<8x32xf32>
    %1334 = arith.mulf %1327, %1321 : vector<8x32xf32>
    %1335 = arith.addf %1316, %1334 : vector<8x32xf32>
    %1336 = math.tanh %1335 : vector<8x32xf32>
    %cst_421 = arith.constant 1.000000e+00 : f32
    %1337 = vector.broadcast %cst_421 : f32 to vector<8x32xf32>
    %1338 = arith.subf %1337, %1333 : vector<8x32xf32>
    %1339 = arith.mulf %1338, %1336 : vector<8x32xf32>
    %1340 = arith.mulf %1333, %1309 : vector<8x32xf32>
    %1341 = arith.addf %1339, %1340 : vector<8x32xf32>
    %cst_422 = arith.constant 0.000000e+00 : f32
    %1342 = vector.shape_cast %39 : vector<8x1xi1> to vector<8x1xi1>
    %1343 = vector.broadcast %1342 : vector<8x1xi1> to vector<8x32xi1>
    %1344 = vector.broadcast %cst_422 : f32 to vector<8x32xf32>
    %1345 = arith.select %1343, %1341, %1344 : vector<8x32xi1>, vector<8x32xf32>
    %1346 = tpu.concatenate %1121, %1153, %1185, %1217, %1249, %1281, %1313, %1345 in 0 : vector<8x32xf32>, vector<8x32xf32>, vector<8x32xf32>, vector<8x32xf32>, vector<8x32xf32>, vector<8x32xf32>, vector<8x32xf32>, vector<8x32xf32> -> vector<64x32xf32>
    %1347 = tpu.concatenate %1060, %1060, %1060, %1060, %1060, %1060, %1060, %1060 in 0 : vector<8x32xf32>, vector<8x32xf32>, vector<8x32xf32>, vector<8x32xf32>, vector<8x32xf32>, vector<8x32xf32>, vector<8x32xf32>, vector<8x32xf32> -> vector<64x32xf32>
    %1348 = arith.mulf %1347, %1346 : vector<64x32xf32>
    %cst_423 = arith.constant dense<0.000000e+00> : vector<64xf32>
    %1349 = vector.multi_reduction <add>, %1348, %cst_423 [1] : vector<64x32xf32> to vector<64xf32>
    %1350 = vector.shape_cast %1349 : vector<64xf32> to vector<64x1xf32>
    %1351 = math.tanh %1350 : vector<64x1xf32>
    %cst_424 = arith.constant -1.000000e+30 : f32
    %1352 = vector.broadcast %cst_424 : f32 to vector<64x1xf32>
    %1353 = arith.select %15, %1351, %1352 : vector<64x1xi1>, vector<64x1xf32>
    %1354 = vector.extract_strided_slice %1353 {offsets = [0, 0], sizes = [8, 1], strides = [1, 1]} : vector<64x1xf32> to vector<8x1xf32>
    %1355 = vector.extract_strided_slice %1353 {offsets = [8, 0], sizes = [8, 1], strides = [1, 1]} : vector<64x1xf32> to vector<8x1xf32>
    %1356 = vector.extract_strided_slice %1353 {offsets = [16, 0], sizes = [8, 1], strides = [1, 1]} : vector<64x1xf32> to vector<8x1xf32>
    %1357 = vector.extract_strided_slice %1353 {offsets = [24, 0], sizes = [8, 1], strides = [1, 1]} : vector<64x1xf32> to vector<8x1xf32>
    %1358 = vector.extract_strided_slice %1353 {offsets = [32, 0], sizes = [8, 1], strides = [1, 1]} : vector<64x1xf32> to vector<8x1xf32>
    %1359 = vector.extract_strided_slice %1353 {offsets = [40, 0], sizes = [8, 1], strides = [1, 1]} : vector<64x1xf32> to vector<8x1xf32>
    %1360 = vector.extract_strided_slice %1353 {offsets = [48, 0], sizes = [8, 1], strides = [1, 1]} : vector<64x1xf32> to vector<8x1xf32>
    %1361 = vector.extract_strided_slice %1353 {offsets = [56, 0], sizes = [8, 1], strides = [1, 1]} : vector<64x1xf32> to vector<8x1xf32>
    %1362 = arith.maximumf %1354, %1355 : vector<8x1xf32>
    %1363 = arith.maximumf %1362, %1356 : vector<8x1xf32>
    %1364 = arith.maximumf %1363, %1357 : vector<8x1xf32>
    %1365 = arith.maximumf %1364, %1358 : vector<8x1xf32>
    %1366 = arith.maximumf %1365, %1359 : vector<8x1xf32>
    %1367 = arith.maximumf %1366, %1360 : vector<8x1xf32>
    %1368 = arith.maximumf %1367, %1361 : vector<8x1xf32>
    %1369 = arith.subf %1354, %1368 : vector<8x1xf32>
    %1370 = math.exp %1369 : vector<8x1xf32>
    %1371 = arith.subf %1355, %1368 : vector<8x1xf32>
    %1372 = math.exp %1371 : vector<8x1xf32>
    %1373 = arith.subf %1356, %1368 : vector<8x1xf32>
    %1374 = math.exp %1373 : vector<8x1xf32>
    %1375 = arith.subf %1357, %1368 : vector<8x1xf32>
    %1376 = math.exp %1375 : vector<8x1xf32>
    %1377 = arith.subf %1358, %1368 : vector<8x1xf32>
    %1378 = math.exp %1377 : vector<8x1xf32>
    %1379 = arith.subf %1359, %1368 : vector<8x1xf32>
    %1380 = math.exp %1379 : vector<8x1xf32>
    %1381 = arith.subf %1360, %1368 : vector<8x1xf32>
    %1382 = math.exp %1381 : vector<8x1xf32>
    %1383 = arith.subf %1361, %1368 : vector<8x1xf32>
    %1384 = math.exp %1383 : vector<8x1xf32>
    %1385 = arith.addf %1370, %1372 : vector<8x1xf32>
    %1386 = arith.addf %1385, %1374 : vector<8x1xf32>
    %1387 = arith.addf %1386, %1376 : vector<8x1xf32>
    %1388 = arith.addf %1387, %1378 : vector<8x1xf32>
    %1389 = arith.addf %1388, %1380 : vector<8x1xf32>
    %1390 = arith.addf %1389, %1382 : vector<8x1xf32>
    %1391 = arith.addf %1390, %1384 : vector<8x1xf32>
    %1392 = tpu.reciprocal %1391 {approx = true} : vector<8x1xf32> -> vector<8x1xf32>
    %cst_425 = arith.constant 0.000000e+00 : f32
    %1393 = vector.broadcast %cst_425 : f32 to vector<8x32xf32>
    %1394 = arith.mulf %1370, %1392 : vector<8x1xf32>
    %cst_426 = arith.constant 0.000000e+00 : f32
    %1395 = vector.broadcast %cst_426 : f32 to vector<8x1xf32>
    %1396 = arith.select %32, %1394, %1395 : vector<8x1xi1>, vector<8x1xf32>
    %1397 = vector.broadcast %1396 : vector<8x1xf32> to vector<8x32xf32>
    %1398 = arith.mulf %1397, %1121 : vector<8x32xf32>
    %1399 = arith.addf %1393, %1398 : vector<8x32xf32>
    %1400 = arith.mulf %1372, %1392 : vector<8x1xf32>
    %cst_427 = arith.constant 0.000000e+00 : f32
    %1401 = vector.broadcast %cst_427 : f32 to vector<8x1xf32>
    %1402 = arith.select %33, %1400, %1401 : vector<8x1xi1>, vector<8x1xf32>
    %1403 = vector.broadcast %1402 : vector<8x1xf32> to vector<8x32xf32>
    %1404 = arith.mulf %1403, %1153 : vector<8x32xf32>
    %1405 = arith.addf %1399, %1404 : vector<8x32xf32>
    %1406 = arith.mulf %1374, %1392 : vector<8x1xf32>
    %cst_428 = arith.constant 0.000000e+00 : f32
    %1407 = vector.broadcast %cst_428 : f32 to vector<8x1xf32>
    %1408 = arith.select %34, %1406, %1407 : vector<8x1xi1>, vector<8x1xf32>
    %1409 = vector.broadcast %1408 : vector<8x1xf32> to vector<8x32xf32>
    %1410 = arith.mulf %1409, %1185 : vector<8x32xf32>
    %1411 = arith.addf %1405, %1410 : vector<8x32xf32>
    %1412 = arith.mulf %1376, %1392 : vector<8x1xf32>
    %cst_429 = arith.constant 0.000000e+00 : f32
    %1413 = vector.broadcast %cst_429 : f32 to vector<8x1xf32>
    %1414 = arith.select %35, %1412, %1413 : vector<8x1xi1>, vector<8x1xf32>
    %1415 = vector.broadcast %1414 : vector<8x1xf32> to vector<8x32xf32>
    %1416 = arith.mulf %1415, %1217 : vector<8x32xf32>
    %1417 = arith.addf %1411, %1416 : vector<8x32xf32>
    %1418 = arith.mulf %1378, %1392 : vector<8x1xf32>
    %cst_430 = arith.constant 0.000000e+00 : f32
    %1419 = vector.broadcast %cst_430 : f32 to vector<8x1xf32>
    %1420 = arith.select %36, %1418, %1419 : vector<8x1xi1>, vector<8x1xf32>
    %1421 = vector.broadcast %1420 : vector<8x1xf32> to vector<8x32xf32>
    %1422 = arith.mulf %1421, %1249 : vector<8x32xf32>
    %1423 = arith.addf %1417, %1422 : vector<8x32xf32>
    %1424 = arith.mulf %1380, %1392 : vector<8x1xf32>
    %cst_431 = arith.constant 0.000000e+00 : f32
    %1425 = vector.broadcast %cst_431 : f32 to vector<8x1xf32>
    %1426 = arith.select %37, %1424, %1425 : vector<8x1xi1>, vector<8x1xf32>
    %1427 = vector.broadcast %1426 : vector<8x1xf32> to vector<8x32xf32>
    %1428 = arith.mulf %1427, %1281 : vector<8x32xf32>
    %1429 = arith.addf %1423, %1428 : vector<8x32xf32>
    %1430 = arith.mulf %1382, %1392 : vector<8x1xf32>
    %cst_432 = arith.constant 0.000000e+00 : f32
    %1431 = vector.broadcast %cst_432 : f32 to vector<8x1xf32>
    %1432 = arith.select %38, %1430, %1431 : vector<8x1xi1>, vector<8x1xf32>
    %1433 = vector.broadcast %1432 : vector<8x1xf32> to vector<8x32xf32>
    %1434 = arith.mulf %1433, %1313 : vector<8x32xf32>
    %1435 = arith.addf %1429, %1434 : vector<8x32xf32>
    %1436 = arith.mulf %1384, %1392 : vector<8x1xf32>
    %cst_433 = arith.constant 0.000000e+00 : f32
    %1437 = vector.broadcast %cst_433 : f32 to vector<8x1xf32>
    %1438 = arith.select %39, %1436, %1437 : vector<8x1xi1>, vector<8x1xf32>
    %1439 = vector.broadcast %1438 : vector<8x1xf32> to vector<8x32xf32>
    %1440 = arith.mulf %1439, %1345 : vector<8x32xf32>
    %1441 = arith.addf %1435, %1440 : vector<8x32xf32>
    %1442 = arith.addf %1060, %1441 : vector<8x32xf32>
    %1443 = math.tanh %1442 : vector<8x32xf32>
    %c1_434 = arith.constant 1 : index
    %c0_435 = arith.constant 0 : index
    %c0_436 = arith.constant 0 : index
    %c0_437 = arith.constant 0 : index
    %1444 = vector.load %arg12[%c1_434, %c0_435, %c0_436, %c0_437] : memref<2x3x32x32xf32, #tpu.memory_space<vmem>>, vector<1x1x32x32xf32>
    %1445 = vector.shape_cast %1444 : vector<1x1x32x32xf32> to vector<32x32xf32>
    %c1_438 = arith.constant 1 : index
    %c1_439 = arith.constant 1 : index
    %c0_440 = arith.constant 0 : index
    %c0_441 = arith.constant 0 : index
    %1446 = vector.load %arg12[%c1_438, %c1_439, %c0_440, %c0_441] : memref<2x3x32x32xf32, #tpu.memory_space<vmem>>, vector<1x1x32x32xf32>
    %1447 = vector.shape_cast %1446 : vector<1x1x32x32xf32> to vector<32x32xf32>
    %c1_442 = arith.constant 1 : index
    %c2_443 = arith.constant 2 : index
    %c0_444 = arith.constant 0 : index
    %c0_445 = arith.constant 0 : index
    %1448 = vector.load %arg12[%c1_442, %c2_443, %c0_444, %c0_445] : memref<2x3x32x32xf32, #tpu.memory_space<vmem>>, vector<1x1x32x32xf32>
    %1449 = vector.shape_cast %1448 : vector<1x1x32x32xf32> to vector<32x32xf32>
    %c1_446 = arith.constant 1 : index
    %c3_447 = arith.constant 3 : index
    %c0_448 = arith.constant 0 : index
    %c0_449 = arith.constant 0 : index
    %1450 = vector.load %arg13[%c1_446, %c3_447, %c0_448, %c0_449] : memref<2x4x1x32xf32, #tpu.memory_space<vmem>>, vector<1x1x1x32xf32>
    %1451 = vector.shape_cast %1450 : vector<1x1x1x32xf32> to vector<1x32xf32>
    %c1_450 = arith.constant 1 : index
    %c0_451 = arith.constant 0 : index
    %c0_452 = arith.constant 0 : index
    %c0_453 = arith.constant 0 : index
    %1452 = vector.load %arg11[%c1_450, %c0_451, %c0_452, %c0_453] : memref<2x3x32x32xf32, #tpu.memory_space<vmem>>, vector<1x1x32x32xf32>
    %1453 = vector.shape_cast %1452 : vector<1x1x32x32xf32> to vector<32x32xf32>
    %cst_454 = arith.constant dense<0.000000e+00> : vector<64x32xf32>
    %1454 = tpu.matmul %1346, %1453, %cst_454 {dimension_numbers = #tpu.dot_dimension_numbers<[1], [0], [0], [1], [0, 0, 1, 1], [], []>} : vector<64x32xf32>, vector<32x32xf32>, vector<64x32xf32> -> vector<64x32xf32>
    %c1_455 = arith.constant 1 : index
    %c0_456 = arith.constant 0 : index
    %c0_457 = arith.constant 0 : index
    %c0_458 = arith.constant 0 : index
    %1455 = vector.load %arg13[%c1_455, %c0_456, %c0_457, %c0_458] : memref<2x4x1x32xf32, #tpu.memory_space<vmem>>, vector<1x1x1x32xf32>
    %1456 = vector.shape_cast %1455 : vector<1x1x1x32xf32> to vector<1x32xf32>
    %1457 = vector.broadcast %1456 : vector<1x32xf32> to vector<64x32xf32>
    %1458 = arith.addf %1454, %1457 : vector<64x32xf32>
    %c1_459 = arith.constant 1 : index
    %c1_460 = arith.constant 1 : index
    %c0_461 = arith.constant 0 : index
    %c0_462 = arith.constant 0 : index
    %1459 = vector.load %arg11[%c1_459, %c1_460, %c0_461, %c0_462] : memref<2x3x32x32xf32, #tpu.memory_space<vmem>>, vector<1x1x32x32xf32>
    %1460 = vector.shape_cast %1459 : vector<1x1x32x32xf32> to vector<32x32xf32>
    %cst_463 = arith.constant dense<0.000000e+00> : vector<64x32xf32>
    %1461 = tpu.matmul %1346, %1460, %cst_463 {dimension_numbers = #tpu.dot_dimension_numbers<[1], [0], [0], [1], [0, 0, 1, 1], [], []>} : vector<64x32xf32>, vector<32x32xf32>, vector<64x32xf32> -> vector<64x32xf32>
    %c1_464 = arith.constant 1 : index
    %c1_465 = arith.constant 1 : index
    %c0_466 = arith.constant 0 : index
    %c0_467 = arith.constant 0 : index
    %1462 = vector.load %arg13[%c1_464, %c1_465, %c0_466, %c0_467] : memref<2x4x1x32xf32, #tpu.memory_space<vmem>>, vector<1x1x1x32xf32>
    %1463 = vector.shape_cast %1462 : vector<1x1x1x32xf32> to vector<1x32xf32>
    %1464 = vector.broadcast %1463 : vector<1x32xf32> to vector<64x32xf32>
    %1465 = arith.addf %1461, %1464 : vector<64x32xf32>
    %c1_468 = arith.constant 1 : index
    %c2_469 = arith.constant 2 : index
    %c0_470 = arith.constant 0 : index
    %c0_471 = arith.constant 0 : index
    %1466 = vector.load %arg11[%c1_468, %c2_469, %c0_470, %c0_471] : memref<2x3x32x32xf32, #tpu.memory_space<vmem>>, vector<1x1x32x32xf32>
    %1467 = vector.shape_cast %1466 : vector<1x1x32x32xf32> to vector<32x32xf32>
    %cst_472 = arith.constant dense<0.000000e+00> : vector<64x32xf32>
    %1468 = tpu.matmul %1346, %1467, %cst_472 {dimension_numbers = #tpu.dot_dimension_numbers<[1], [0], [0], [1], [0, 0, 1, 1], [], []>} : vector<64x32xf32>, vector<32x32xf32>, vector<64x32xf32> -> vector<64x32xf32>
    %c1_473 = arith.constant 1 : index
    %c2_474 = arith.constant 2 : index
    %c0_475 = arith.constant 0 : index
    %c0_476 = arith.constant 0 : index
    %1469 = vector.load %arg13[%c1_473, %c2_474, %c0_475, %c0_476] : memref<2x4x1x32xf32, #tpu.memory_space<vmem>>, vector<1x1x1x32xf32>
    %1470 = vector.shape_cast %1469 : vector<1x1x1x32xf32> to vector<1x32xf32>
    %1471 = vector.broadcast %1470 : vector<1x32xf32> to vector<64x32xf32>
    %1472 = arith.addf %1468, %1471 : vector<64x32xf32>
    %1473 = vector.extract_strided_slice %1458 {offsets = [0, 0], sizes = [8, 32], strides = [1, 1]} : vector<64x32xf32> to vector<8x32xf32>
    %1474 = vector.extract_strided_slice %1465 {offsets = [0, 0], sizes = [8, 32], strides = [1, 1]} : vector<64x32xf32> to vector<8x32xf32>
    %1475 = vector.extract_strided_slice %1472 {offsets = [0, 0], sizes = [8, 32], strides = [1, 1]} : vector<64x32xf32> to vector<8x32xf32>
    %cst_477 = arith.constant dense<0.000000e+00> : vector<8x32xf32>
    %1476 = tpu.matmul %100, %1445, %cst_477 {dimension_numbers = #tpu.dot_dimension_numbers<[1], [0], [0], [1], [0, 0, 1, 1], [], []>} : vector<8x32xf32>, vector<32x32xf32>, vector<8x32xf32> -> vector<8x32xf32>
    %cst_478 = arith.constant dense<0.000000e+00> : vector<8x32xf32>
    %1477 = tpu.matmul %100, %1447, %cst_478 {dimension_numbers = #tpu.dot_dimension_numbers<[1], [0], [0], [1], [0, 0, 1, 1], [], []>} : vector<8x32xf32>, vector<32x32xf32>, vector<8x32xf32> -> vector<8x32xf32>
    %cst_479 = arith.constant dense<0.000000e+00> : vector<8x32xf32>
    %1478 = tpu.matmul %100, %1449, %cst_479 {dimension_numbers = #tpu.dot_dimension_numbers<[1], [0], [0], [1], [0, 0, 1, 1], [], []>} : vector<8x32xf32>, vector<32x32xf32>, vector<8x32xf32> -> vector<8x32xf32>
    %1479 = vector.broadcast %1451 : vector<1x32xf32> to vector<8x32xf32>
    %1480 = arith.addf %1478, %1479 : vector<8x32xf32>
    %1481 = arith.addf %1473, %1476 : vector<8x32xf32>
    %1482 = arith.negf %1481 : vector<8x32xf32>
    %1483 = math.exp %1482 : vector<8x32xf32>
    %cst_480 = arith.constant 1.000000e+00 : f32
    %1484 = vector.broadcast %cst_480 : f32 to vector<8x32xf32>
    %1485 = arith.addf %1484, %1483 : vector<8x32xf32>
    %1486 = arith.divf %1484, %1485 : vector<8x32xf32>
    %1487 = arith.addf %1474, %1477 : vector<8x32xf32>
    %1488 = arith.negf %1487 : vector<8x32xf32>
    %1489 = math.exp %1488 : vector<8x32xf32>
    %cst_481 = arith.constant 1.000000e+00 : f32
    %1490 = vector.broadcast %cst_481 : f32 to vector<8x32xf32>
    %1491 = arith.addf %1490, %1489 : vector<8x32xf32>
    %1492 = arith.divf %1490, %1491 : vector<8x32xf32>
    %1493 = arith.mulf %1486, %1480 : vector<8x32xf32>
    %1494 = arith.addf %1475, %1493 : vector<8x32xf32>
    %1495 = math.tanh %1494 : vector<8x32xf32>
    %cst_482 = arith.constant 1.000000e+00 : f32
    %1496 = vector.broadcast %cst_482 : f32 to vector<8x32xf32>
    %1497 = arith.subf %1496, %1492 : vector<8x32xf32>
    %1498 = arith.mulf %1497, %1495 : vector<8x32xf32>
    %1499 = arith.mulf %1492, %100 : vector<8x32xf32>
    %1500 = arith.addf %1498, %1499 : vector<8x32xf32>
    %cst_483 = arith.constant 0.000000e+00 : f32
    %1501 = vector.shape_cast %32 : vector<8x1xi1> to vector<8x1xi1>
    %1502 = vector.broadcast %1501 : vector<8x1xi1> to vector<8x32xi1>
    %1503 = vector.broadcast %cst_483 : f32 to vector<8x32xf32>
    %1504 = arith.select %1502, %1500, %1503 : vector<8x32xi1>, vector<8x32xf32>
    %1505 = vector.extract_strided_slice %1458 {offsets = [8, 0], sizes = [8, 32], strides = [1, 1]} : vector<64x32xf32> to vector<8x32xf32>
    %1506 = vector.extract_strided_slice %1465 {offsets = [8, 0], sizes = [8, 32], strides = [1, 1]} : vector<64x32xf32> to vector<8x32xf32>
    %1507 = vector.extract_strided_slice %1472 {offsets = [8, 0], sizes = [8, 32], strides = [1, 1]} : vector<64x32xf32> to vector<8x32xf32>
    %cst_484 = arith.constant dense<0.000000e+00> : vector<8x32xf32>
    %1508 = tpu.matmul %1500, %1445, %cst_484 {dimension_numbers = #tpu.dot_dimension_numbers<[1], [0], [0], [1], [0, 0, 1, 1], [], []>} : vector<8x32xf32>, vector<32x32xf32>, vector<8x32xf32> -> vector<8x32xf32>
    %cst_485 = arith.constant dense<0.000000e+00> : vector<8x32xf32>
    %1509 = tpu.matmul %1500, %1447, %cst_485 {dimension_numbers = #tpu.dot_dimension_numbers<[1], [0], [0], [1], [0, 0, 1, 1], [], []>} : vector<8x32xf32>, vector<32x32xf32>, vector<8x32xf32> -> vector<8x32xf32>
    %cst_486 = arith.constant dense<0.000000e+00> : vector<8x32xf32>
    %1510 = tpu.matmul %1500, %1449, %cst_486 {dimension_numbers = #tpu.dot_dimension_numbers<[1], [0], [0], [1], [0, 0, 1, 1], [], []>} : vector<8x32xf32>, vector<32x32xf32>, vector<8x32xf32> -> vector<8x32xf32>
    %1511 = vector.broadcast %1451 : vector<1x32xf32> to vector<8x32xf32>
    %1512 = arith.addf %1510, %1511 : vector<8x32xf32>
    %1513 = arith.addf %1505, %1508 : vector<8x32xf32>
    %1514 = arith.negf %1513 : vector<8x32xf32>
    %1515 = math.exp %1514 : vector<8x32xf32>
    %cst_487 = arith.constant 1.000000e+00 : f32
    %1516 = vector.broadcast %cst_487 : f32 to vector<8x32xf32>
    %1517 = arith.addf %1516, %1515 : vector<8x32xf32>
    %1518 = arith.divf %1516, %1517 : vector<8x32xf32>
    %1519 = arith.addf %1506, %1509 : vector<8x32xf32>
    %1520 = arith.negf %1519 : vector<8x32xf32>
    %1521 = math.exp %1520 : vector<8x32xf32>
    %cst_488 = arith.constant 1.000000e+00 : f32
    %1522 = vector.broadcast %cst_488 : f32 to vector<8x32xf32>
    %1523 = arith.addf %1522, %1521 : vector<8x32xf32>
    %1524 = arith.divf %1522, %1523 : vector<8x32xf32>
    %1525 = arith.mulf %1518, %1512 : vector<8x32xf32>
    %1526 = arith.addf %1507, %1525 : vector<8x32xf32>
    %1527 = math.tanh %1526 : vector<8x32xf32>
    %cst_489 = arith.constant 1.000000e+00 : f32
    %1528 = vector.broadcast %cst_489 : f32 to vector<8x32xf32>
    %1529 = arith.subf %1528, %1524 : vector<8x32xf32>
    %1530 = arith.mulf %1529, %1527 : vector<8x32xf32>
    %1531 = arith.mulf %1524, %1500 : vector<8x32xf32>
    %1532 = arith.addf %1530, %1531 : vector<8x32xf32>
    %cst_490 = arith.constant 0.000000e+00 : f32
    %1533 = vector.shape_cast %33 : vector<8x1xi1> to vector<8x1xi1>
    %1534 = vector.broadcast %1533 : vector<8x1xi1> to vector<8x32xi1>
    %1535 = vector.broadcast %cst_490 : f32 to vector<8x32xf32>
    %1536 = arith.select %1534, %1532, %1535 : vector<8x32xi1>, vector<8x32xf32>
    %1537 = vector.extract_strided_slice %1458 {offsets = [16, 0], sizes = [8, 32], strides = [1, 1]} : vector<64x32xf32> to vector<8x32xf32>
    %1538 = vector.extract_strided_slice %1465 {offsets = [16, 0], sizes = [8, 32], strides = [1, 1]} : vector<64x32xf32> to vector<8x32xf32>
    %1539 = vector.extract_strided_slice %1472 {offsets = [16, 0], sizes = [8, 32], strides = [1, 1]} : vector<64x32xf32> to vector<8x32xf32>
    %cst_491 = arith.constant dense<0.000000e+00> : vector<8x32xf32>
    %1540 = tpu.matmul %1532, %1445, %cst_491 {dimension_numbers = #tpu.dot_dimension_numbers<[1], [0], [0], [1], [0, 0, 1, 1], [], []>} : vector<8x32xf32>, vector<32x32xf32>, vector<8x32xf32> -> vector<8x32xf32>
    %cst_492 = arith.constant dense<0.000000e+00> : vector<8x32xf32>
    %1541 = tpu.matmul %1532, %1447, %cst_492 {dimension_numbers = #tpu.dot_dimension_numbers<[1], [0], [0], [1], [0, 0, 1, 1], [], []>} : vector<8x32xf32>, vector<32x32xf32>, vector<8x32xf32> -> vector<8x32xf32>
    %cst_493 = arith.constant dense<0.000000e+00> : vector<8x32xf32>
    %1542 = tpu.matmul %1532, %1449, %cst_493 {dimension_numbers = #tpu.dot_dimension_numbers<[1], [0], [0], [1], [0, 0, 1, 1], [], []>} : vector<8x32xf32>, vector<32x32xf32>, vector<8x32xf32> -> vector<8x32xf32>
    %1543 = vector.broadcast %1451 : vector<1x32xf32> to vector<8x32xf32>
    %1544 = arith.addf %1542, %1543 : vector<8x32xf32>
    %1545 = arith.addf %1537, %1540 : vector<8x32xf32>
    %1546 = arith.negf %1545 : vector<8x32xf32>
    %1547 = math.exp %1546 : vector<8x32xf32>
    %cst_494 = arith.constant 1.000000e+00 : f32
    %1548 = vector.broadcast %cst_494 : f32 to vector<8x32xf32>
    %1549 = arith.addf %1548, %1547 : vector<8x32xf32>
    %1550 = arith.divf %1548, %1549 : vector<8x32xf32>
    %1551 = arith.addf %1538, %1541 : vector<8x32xf32>
    %1552 = arith.negf %1551 : vector<8x32xf32>
    %1553 = math.exp %1552 : vector<8x32xf32>
    %cst_495 = arith.constant 1.000000e+00 : f32
    %1554 = vector.broadcast %cst_495 : f32 to vector<8x32xf32>
    %1555 = arith.addf %1554, %1553 : vector<8x32xf32>
    %1556 = arith.divf %1554, %1555 : vector<8x32xf32>
    %1557 = arith.mulf %1550, %1544 : vector<8x32xf32>
    %1558 = arith.addf %1539, %1557 : vector<8x32xf32>
    %1559 = math.tanh %1558 : vector<8x32xf32>
    %cst_496 = arith.constant 1.000000e+00 : f32
    %1560 = vector.broadcast %cst_496 : f32 to vector<8x32xf32>
    %1561 = arith.subf %1560, %1556 : vector<8x32xf32>
    %1562 = arith.mulf %1561, %1559 : vector<8x32xf32>
    %1563 = arith.mulf %1556, %1532 : vector<8x32xf32>
    %1564 = arith.addf %1562, %1563 : vector<8x32xf32>
    %cst_497 = arith.constant 0.000000e+00 : f32
    %1565 = vector.shape_cast %34 : vector<8x1xi1> to vector<8x1xi1>
    %1566 = vector.broadcast %1565 : vector<8x1xi1> to vector<8x32xi1>
    %1567 = vector.broadcast %cst_497 : f32 to vector<8x32xf32>
    %1568 = arith.select %1566, %1564, %1567 : vector<8x32xi1>, vector<8x32xf32>
    %1569 = vector.extract_strided_slice %1458 {offsets = [24, 0], sizes = [8, 32], strides = [1, 1]} : vector<64x32xf32> to vector<8x32xf32>
    %1570 = vector.extract_strided_slice %1465 {offsets = [24, 0], sizes = [8, 32], strides = [1, 1]} : vector<64x32xf32> to vector<8x32xf32>
    %1571 = vector.extract_strided_slice %1472 {offsets = [24, 0], sizes = [8, 32], strides = [1, 1]} : vector<64x32xf32> to vector<8x32xf32>
    %cst_498 = arith.constant dense<0.000000e+00> : vector<8x32xf32>
    %1572 = tpu.matmul %1564, %1445, %cst_498 {dimension_numbers = #tpu.dot_dimension_numbers<[1], [0], [0], [1], [0, 0, 1, 1], [], []>} : vector<8x32xf32>, vector<32x32xf32>, vector<8x32xf32> -> vector<8x32xf32>
    %cst_499 = arith.constant dense<0.000000e+00> : vector<8x32xf32>
    %1573 = tpu.matmul %1564, %1447, %cst_499 {dimension_numbers = #tpu.dot_dimension_numbers<[1], [0], [0], [1], [0, 0, 1, 1], [], []>} : vector<8x32xf32>, vector<32x32xf32>, vector<8x32xf32> -> vector<8x32xf32>
    %cst_500 = arith.constant dense<0.000000e+00> : vector<8x32xf32>
    %1574 = tpu.matmul %1564, %1449, %cst_500 {dimension_numbers = #tpu.dot_dimension_numbers<[1], [0], [0], [1], [0, 0, 1, 1], [], []>} : vector<8x32xf32>, vector<32x32xf32>, vector<8x32xf32> -> vector<8x32xf32>
    %1575 = vector.broadcast %1451 : vector<1x32xf32> to vector<8x32xf32>
    %1576 = arith.addf %1574, %1575 : vector<8x32xf32>
    %1577 = arith.addf %1569, %1572 : vector<8x32xf32>
    %1578 = arith.negf %1577 : vector<8x32xf32>
    %1579 = math.exp %1578 : vector<8x32xf32>
    %cst_501 = arith.constant 1.000000e+00 : f32
    %1580 = vector.broadcast %cst_501 : f32 to vector<8x32xf32>
    %1581 = arith.addf %1580, %1579 : vector<8x32xf32>
    %1582 = arith.divf %1580, %1581 : vector<8x32xf32>
    %1583 = arith.addf %1570, %1573 : vector<8x32xf32>
    %1584 = arith.negf %1583 : vector<8x32xf32>
    %1585 = math.exp %1584 : vector<8x32xf32>
    %cst_502 = arith.constant 1.000000e+00 : f32
    %1586 = vector.broadcast %cst_502 : f32 to vector<8x32xf32>
    %1587 = arith.addf %1586, %1585 : vector<8x32xf32>
    %1588 = arith.divf %1586, %1587 : vector<8x32xf32>
    %1589 = arith.mulf %1582, %1576 : vector<8x32xf32>
    %1590 = arith.addf %1571, %1589 : vector<8x32xf32>
    %1591 = math.tanh %1590 : vector<8x32xf32>
    %cst_503 = arith.constant 1.000000e+00 : f32
    %1592 = vector.broadcast %cst_503 : f32 to vector<8x32xf32>
    %1593 = arith.subf %1592, %1588 : vector<8x32xf32>
    %1594 = arith.mulf %1593, %1591 : vector<8x32xf32>
    %1595 = arith.mulf %1588, %1564 : vector<8x32xf32>
    %1596 = arith.addf %1594, %1595 : vector<8x32xf32>
    %cst_504 = arith.constant 0.000000e+00 : f32
    %1597 = vector.shape_cast %35 : vector<8x1xi1> to vector<8x1xi1>
    %1598 = vector.broadcast %1597 : vector<8x1xi1> to vector<8x32xi1>
    %1599 = vector.broadcast %cst_504 : f32 to vector<8x32xf32>
    %1600 = arith.select %1598, %1596, %1599 : vector<8x32xi1>, vector<8x32xf32>
    %1601 = vector.extract_strided_slice %1458 {offsets = [32, 0], sizes = [8, 32], strides = [1, 1]} : vector<64x32xf32> to vector<8x32xf32>
    %1602 = vector.extract_strided_slice %1465 {offsets = [32, 0], sizes = [8, 32], strides = [1, 1]} : vector<64x32xf32> to vector<8x32xf32>
    %1603 = vector.extract_strided_slice %1472 {offsets = [32, 0], sizes = [8, 32], strides = [1, 1]} : vector<64x32xf32> to vector<8x32xf32>
    %cst_505 = arith.constant dense<0.000000e+00> : vector<8x32xf32>
    %1604 = tpu.matmul %1596, %1445, %cst_505 {dimension_numbers = #tpu.dot_dimension_numbers<[1], [0], [0], [1], [0, 0, 1, 1], [], []>} : vector<8x32xf32>, vector<32x32xf32>, vector<8x32xf32> -> vector<8x32xf32>
    %cst_506 = arith.constant dense<0.000000e+00> : vector<8x32xf32>
    %1605 = tpu.matmul %1596, %1447, %cst_506 {dimension_numbers = #tpu.dot_dimension_numbers<[1], [0], [0], [1], [0, 0, 1, 1], [], []>} : vector<8x32xf32>, vector<32x32xf32>, vector<8x32xf32> -> vector<8x32xf32>
    %cst_507 = arith.constant dense<0.000000e+00> : vector<8x32xf32>
    %1606 = tpu.matmul %1596, %1449, %cst_507 {dimension_numbers = #tpu.dot_dimension_numbers<[1], [0], [0], [1], [0, 0, 1, 1], [], []>} : vector<8x32xf32>, vector<32x32xf32>, vector<8x32xf32> -> vector<8x32xf32>
    %1607 = vector.broadcast %1451 : vector<1x32xf32> to vector<8x32xf32>
    %1608 = arith.addf %1606, %1607 : vector<8x32xf32>
    %1609 = arith.addf %1601, %1604 : vector<8x32xf32>
    %1610 = arith.negf %1609 : vector<8x32xf32>
    %1611 = math.exp %1610 : vector<8x32xf32>
    %cst_508 = arith.constant 1.000000e+00 : f32
    %1612 = vector.broadcast %cst_508 : f32 to vector<8x32xf32>
    %1613 = arith.addf %1612, %1611 : vector<8x32xf32>
    %1614 = arith.divf %1612, %1613 : vector<8x32xf32>
    %1615 = arith.addf %1602, %1605 : vector<8x32xf32>
    %1616 = arith.negf %1615 : vector<8x32xf32>
    %1617 = math.exp %1616 : vector<8x32xf32>
    %cst_509 = arith.constant 1.000000e+00 : f32
    %1618 = vector.broadcast %cst_509 : f32 to vector<8x32xf32>
    %1619 = arith.addf %1618, %1617 : vector<8x32xf32>
    %1620 = arith.divf %1618, %1619 : vector<8x32xf32>
    %1621 = arith.mulf %1614, %1608 : vector<8x32xf32>
    %1622 = arith.addf %1603, %1621 : vector<8x32xf32>
    %1623 = math.tanh %1622 : vector<8x32xf32>
    %cst_510 = arith.constant 1.000000e+00 : f32
    %1624 = vector.broadcast %cst_510 : f32 to vector<8x32xf32>
    %1625 = arith.subf %1624, %1620 : vector<8x32xf32>
    %1626 = arith.mulf %1625, %1623 : vector<8x32xf32>
    %1627 = arith.mulf %1620, %1596 : vector<8x32xf32>
    %1628 = arith.addf %1626, %1627 : vector<8x32xf32>
    %cst_511 = arith.constant 0.000000e+00 : f32
    %1629 = vector.shape_cast %36 : vector<8x1xi1> to vector<8x1xi1>
    %1630 = vector.broadcast %1629 : vector<8x1xi1> to vector<8x32xi1>
    %1631 = vector.broadcast %cst_511 : f32 to vector<8x32xf32>
    %1632 = arith.select %1630, %1628, %1631 : vector<8x32xi1>, vector<8x32xf32>
    %1633 = vector.extract_strided_slice %1458 {offsets = [40, 0], sizes = [8, 32], strides = [1, 1]} : vector<64x32xf32> to vector<8x32xf32>
    %1634 = vector.extract_strided_slice %1465 {offsets = [40, 0], sizes = [8, 32], strides = [1, 1]} : vector<64x32xf32> to vector<8x32xf32>
    %1635 = vector.extract_strided_slice %1472 {offsets = [40, 0], sizes = [8, 32], strides = [1, 1]} : vector<64x32xf32> to vector<8x32xf32>
    %cst_512 = arith.constant dense<0.000000e+00> : vector<8x32xf32>
    %1636 = tpu.matmul %1628, %1445, %cst_512 {dimension_numbers = #tpu.dot_dimension_numbers<[1], [0], [0], [1], [0, 0, 1, 1], [], []>} : vector<8x32xf32>, vector<32x32xf32>, vector<8x32xf32> -> vector<8x32xf32>
    %cst_513 = arith.constant dense<0.000000e+00> : vector<8x32xf32>
    %1637 = tpu.matmul %1628, %1447, %cst_513 {dimension_numbers = #tpu.dot_dimension_numbers<[1], [0], [0], [1], [0, 0, 1, 1], [], []>} : vector<8x32xf32>, vector<32x32xf32>, vector<8x32xf32> -> vector<8x32xf32>
    %cst_514 = arith.constant dense<0.000000e+00> : vector<8x32xf32>
    %1638 = tpu.matmul %1628, %1449, %cst_514 {dimension_numbers = #tpu.dot_dimension_numbers<[1], [0], [0], [1], [0, 0, 1, 1], [], []>} : vector<8x32xf32>, vector<32x32xf32>, vector<8x32xf32> -> vector<8x32xf32>
    %1639 = vector.broadcast %1451 : vector<1x32xf32> to vector<8x32xf32>
    %1640 = arith.addf %1638, %1639 : vector<8x32xf32>
    %1641 = arith.addf %1633, %1636 : vector<8x32xf32>
    %1642 = arith.negf %1641 : vector<8x32xf32>
    %1643 = math.exp %1642 : vector<8x32xf32>
    %cst_515 = arith.constant 1.000000e+00 : f32
    %1644 = vector.broadcast %cst_515 : f32 to vector<8x32xf32>
    %1645 = arith.addf %1644, %1643 : vector<8x32xf32>
    %1646 = arith.divf %1644, %1645 : vector<8x32xf32>
    %1647 = arith.addf %1634, %1637 : vector<8x32xf32>
    %1648 = arith.negf %1647 : vector<8x32xf32>
    %1649 = math.exp %1648 : vector<8x32xf32>
    %cst_516 = arith.constant 1.000000e+00 : f32
    %1650 = vector.broadcast %cst_516 : f32 to vector<8x32xf32>
    %1651 = arith.addf %1650, %1649 : vector<8x32xf32>
    %1652 = arith.divf %1650, %1651 : vector<8x32xf32>
    %1653 = arith.mulf %1646, %1640 : vector<8x32xf32>
    %1654 = arith.addf %1635, %1653 : vector<8x32xf32>
    %1655 = math.tanh %1654 : vector<8x32xf32>
    %cst_517 = arith.constant 1.000000e+00 : f32
    %1656 = vector.broadcast %cst_517 : f32 to vector<8x32xf32>
    %1657 = arith.subf %1656, %1652 : vector<8x32xf32>
    %1658 = arith.mulf %1657, %1655 : vector<8x32xf32>
    %1659 = arith.mulf %1652, %1628 : vector<8x32xf32>
    %1660 = arith.addf %1658, %1659 : vector<8x32xf32>
    %cst_518 = arith.constant 0.000000e+00 : f32
    %1661 = vector.shape_cast %37 : vector<8x1xi1> to vector<8x1xi1>
    %1662 = vector.broadcast %1661 : vector<8x1xi1> to vector<8x32xi1>
    %1663 = vector.broadcast %cst_518 : f32 to vector<8x32xf32>
    %1664 = arith.select %1662, %1660, %1663 : vector<8x32xi1>, vector<8x32xf32>
    %1665 = vector.extract_strided_slice %1458 {offsets = [48, 0], sizes = [8, 32], strides = [1, 1]} : vector<64x32xf32> to vector<8x32xf32>
    %1666 = vector.extract_strided_slice %1465 {offsets = [48, 0], sizes = [8, 32], strides = [1, 1]} : vector<64x32xf32> to vector<8x32xf32>
    %1667 = vector.extract_strided_slice %1472 {offsets = [48, 0], sizes = [8, 32], strides = [1, 1]} : vector<64x32xf32> to vector<8x32xf32>
    %cst_519 = arith.constant dense<0.000000e+00> : vector<8x32xf32>
    %1668 = tpu.matmul %1660, %1445, %cst_519 {dimension_numbers = #tpu.dot_dimension_numbers<[1], [0], [0], [1], [0, 0, 1, 1], [], []>} : vector<8x32xf32>, vector<32x32xf32>, vector<8x32xf32> -> vector<8x32xf32>
    %cst_520 = arith.constant dense<0.000000e+00> : vector<8x32xf32>
    %1669 = tpu.matmul %1660, %1447, %cst_520 {dimension_numbers = #tpu.dot_dimension_numbers<[1], [0], [0], [1], [0, 0, 1, 1], [], []>} : vector<8x32xf32>, vector<32x32xf32>, vector<8x32xf32> -> vector<8x32xf32>
    %cst_521 = arith.constant dense<0.000000e+00> : vector<8x32xf32>
    %1670 = tpu.matmul %1660, %1449, %cst_521 {dimension_numbers = #tpu.dot_dimension_numbers<[1], [0], [0], [1], [0, 0, 1, 1], [], []>} : vector<8x32xf32>, vector<32x32xf32>, vector<8x32xf32> -> vector<8x32xf32>
    %1671 = vector.broadcast %1451 : vector<1x32xf32> to vector<8x32xf32>
    %1672 = arith.addf %1670, %1671 : vector<8x32xf32>
    %1673 = arith.addf %1665, %1668 : vector<8x32xf32>
    %1674 = arith.negf %1673 : vector<8x32xf32>
    %1675 = math.exp %1674 : vector<8x32xf32>
    %cst_522 = arith.constant 1.000000e+00 : f32
    %1676 = vector.broadcast %cst_522 : f32 to vector<8x32xf32>
    %1677 = arith.addf %1676, %1675 : vector<8x32xf32>
    %1678 = arith.divf %1676, %1677 : vector<8x32xf32>
    %1679 = arith.addf %1666, %1669 : vector<8x32xf32>
    %1680 = arith.negf %1679 : vector<8x32xf32>
    %1681 = math.exp %1680 : vector<8x32xf32>
    %cst_523 = arith.constant 1.000000e+00 : f32
    %1682 = vector.broadcast %cst_523 : f32 to vector<8x32xf32>
    %1683 = arith.addf %1682, %1681 : vector<8x32xf32>
    %1684 = arith.divf %1682, %1683 : vector<8x32xf32>
    %1685 = arith.mulf %1678, %1672 : vector<8x32xf32>
    %1686 = arith.addf %1667, %1685 : vector<8x32xf32>
    %1687 = math.tanh %1686 : vector<8x32xf32>
    %cst_524 = arith.constant 1.000000e+00 : f32
    %1688 = vector.broadcast %cst_524 : f32 to vector<8x32xf32>
    %1689 = arith.subf %1688, %1684 : vector<8x32xf32>
    %1690 = arith.mulf %1689, %1687 : vector<8x32xf32>
    %1691 = arith.mulf %1684, %1660 : vector<8x32xf32>
    %1692 = arith.addf %1690, %1691 : vector<8x32xf32>
    %cst_525 = arith.constant 0.000000e+00 : f32
    %1693 = vector.shape_cast %38 : vector<8x1xi1> to vector<8x1xi1>
    %1694 = vector.broadcast %1693 : vector<8x1xi1> to vector<8x32xi1>
    %1695 = vector.broadcast %cst_525 : f32 to vector<8x32xf32>
    %1696 = arith.select %1694, %1692, %1695 : vector<8x32xi1>, vector<8x32xf32>
    %1697 = vector.extract_strided_slice %1458 {offsets = [56, 0], sizes = [8, 32], strides = [1, 1]} : vector<64x32xf32> to vector<8x32xf32>
    %1698 = vector.extract_strided_slice %1465 {offsets = [56, 0], sizes = [8, 32], strides = [1, 1]} : vector<64x32xf32> to vector<8x32xf32>
    %1699 = vector.extract_strided_slice %1472 {offsets = [56, 0], sizes = [8, 32], strides = [1, 1]} : vector<64x32xf32> to vector<8x32xf32>
    %cst_526 = arith.constant dense<0.000000e+00> : vector<8x32xf32>
    %1700 = tpu.matmul %1692, %1445, %cst_526 {dimension_numbers = #tpu.dot_dimension_numbers<[1], [0], [0], [1], [0, 0, 1, 1], [], []>} : vector<8x32xf32>, vector<32x32xf32>, vector<8x32xf32> -> vector<8x32xf32>
    %cst_527 = arith.constant dense<0.000000e+00> : vector<8x32xf32>
    %1701 = tpu.matmul %1692, %1447, %cst_527 {dimension_numbers = #tpu.dot_dimension_numbers<[1], [0], [0], [1], [0, 0, 1, 1], [], []>} : vector<8x32xf32>, vector<32x32xf32>, vector<8x32xf32> -> vector<8x32xf32>
    %cst_528 = arith.constant dense<0.000000e+00> : vector<8x32xf32>
    %1702 = tpu.matmul %1692, %1449, %cst_528 {dimension_numbers = #tpu.dot_dimension_numbers<[1], [0], [0], [1], [0, 0, 1, 1], [], []>} : vector<8x32xf32>, vector<32x32xf32>, vector<8x32xf32> -> vector<8x32xf32>
    %1703 = vector.broadcast %1451 : vector<1x32xf32> to vector<8x32xf32>
    %1704 = arith.addf %1702, %1703 : vector<8x32xf32>
    %1705 = arith.addf %1697, %1700 : vector<8x32xf32>
    %1706 = arith.negf %1705 : vector<8x32xf32>
    %1707 = math.exp %1706 : vector<8x32xf32>
    %cst_529 = arith.constant 1.000000e+00 : f32
    %1708 = vector.broadcast %cst_529 : f32 to vector<8x32xf32>
    %1709 = arith.addf %1708, %1707 : vector<8x32xf32>
    %1710 = arith.divf %1708, %1709 : vector<8x32xf32>
    %1711 = arith.addf %1698, %1701 : vector<8x32xf32>
    %1712 = arith.negf %1711 : vector<8x32xf32>
    %1713 = math.exp %1712 : vector<8x32xf32>
    %cst_530 = arith.constant 1.000000e+00 : f32
    %1714 = vector.broadcast %cst_530 : f32 to vector<8x32xf32>
    %1715 = arith.addf %1714, %1713 : vector<8x32xf32>
    %1716 = arith.divf %1714, %1715 : vector<8x32xf32>
    %1717 = arith.mulf %1710, %1704 : vector<8x32xf32>
    %1718 = arith.addf %1699, %1717 : vector<8x32xf32>
    %1719 = math.tanh %1718 : vector<8x32xf32>
    %cst_531 = arith.constant 1.000000e+00 : f32
    %1720 = vector.broadcast %cst_531 : f32 to vector<8x32xf32>
    %1721 = arith.subf %1720, %1716 : vector<8x32xf32>
    %1722 = arith.mulf %1721, %1719 : vector<8x32xf32>
    %1723 = arith.mulf %1716, %1692 : vector<8x32xf32>
    %1724 = arith.addf %1722, %1723 : vector<8x32xf32>
    %cst_532 = arith.constant 0.000000e+00 : f32
    %1725 = vector.shape_cast %39 : vector<8x1xi1> to vector<8x1xi1>
    %1726 = vector.broadcast %1725 : vector<8x1xi1> to vector<8x32xi1>
    %1727 = vector.broadcast %cst_532 : f32 to vector<8x32xf32>
    %1728 = arith.select %1726, %1724, %1727 : vector<8x32xi1>, vector<8x32xf32>
    %1729 = tpu.concatenate %1504, %1536, %1568, %1600, %1632, %1664, %1696, %1728 in 0 : vector<8x32xf32>, vector<8x32xf32>, vector<8x32xf32>, vector<8x32xf32>, vector<8x32xf32>, vector<8x32xf32>, vector<8x32xf32>, vector<8x32xf32> -> vector<64x32xf32>
    %1730 = tpu.concatenate %1443, %1443, %1443, %1443, %1443, %1443, %1443, %1443 in 0 : vector<8x32xf32>, vector<8x32xf32>, vector<8x32xf32>, vector<8x32xf32>, vector<8x32xf32>, vector<8x32xf32>, vector<8x32xf32>, vector<8x32xf32> -> vector<64x32xf32>
    %1731 = arith.mulf %1730, %1729 : vector<64x32xf32>
    %cst_533 = arith.constant dense<0.000000e+00> : vector<64xf32>
    %1732 = vector.multi_reduction <add>, %1731, %cst_533 [1] : vector<64x32xf32> to vector<64xf32>
    %1733 = vector.shape_cast %1732 : vector<64xf32> to vector<64x1xf32>
    %1734 = math.tanh %1733 : vector<64x1xf32>
    %cst_534 = arith.constant -1.000000e+30 : f32
    %1735 = vector.broadcast %cst_534 : f32 to vector<64x1xf32>
    %1736 = arith.select %15, %1734, %1735 : vector<64x1xi1>, vector<64x1xf32>
    %1737 = vector.extract_strided_slice %1736 {offsets = [0, 0], sizes = [8, 1], strides = [1, 1]} : vector<64x1xf32> to vector<8x1xf32>
    %1738 = vector.extract_strided_slice %1736 {offsets = [8, 0], sizes = [8, 1], strides = [1, 1]} : vector<64x1xf32> to vector<8x1xf32>
    %1739 = vector.extract_strided_slice %1736 {offsets = [16, 0], sizes = [8, 1], strides = [1, 1]} : vector<64x1xf32> to vector<8x1xf32>
    %1740 = vector.extract_strided_slice %1736 {offsets = [24, 0], sizes = [8, 1], strides = [1, 1]} : vector<64x1xf32> to vector<8x1xf32>
    %1741 = vector.extract_strided_slice %1736 {offsets = [32, 0], sizes = [8, 1], strides = [1, 1]} : vector<64x1xf32> to vector<8x1xf32>
    %1742 = vector.extract_strided_slice %1736 {offsets = [40, 0], sizes = [8, 1], strides = [1, 1]} : vector<64x1xf32> to vector<8x1xf32>
    %1743 = vector.extract_strided_slice %1736 {offsets = [48, 0], sizes = [8, 1], strides = [1, 1]} : vector<64x1xf32> to vector<8x1xf32>
    %1744 = vector.extract_strided_slice %1736 {offsets = [56, 0], sizes = [8, 1], strides = [1, 1]} : vector<64x1xf32> to vector<8x1xf32>
    %1745 = arith.maximumf %1737, %1738 : vector<8x1xf32>
    %1746 = arith.maximumf %1745, %1739 : vector<8x1xf32>
    %1747 = arith.maximumf %1746, %1740 : vector<8x1xf32>
    %1748 = arith.maximumf %1747, %1741 : vector<8x1xf32>
    %1749 = arith.maximumf %1748, %1742 : vector<8x1xf32>
    %1750 = arith.maximumf %1749, %1743 : vector<8x1xf32>
    %1751 = arith.maximumf %1750, %1744 : vector<8x1xf32>
    %1752 = arith.subf %1737, %1751 : vector<8x1xf32>
    %1753 = math.exp %1752 : vector<8x1xf32>
    %1754 = arith.subf %1738, %1751 : vector<8x1xf32>
    %1755 = math.exp %1754 : vector<8x1xf32>
    %1756 = arith.subf %1739, %1751 : vector<8x1xf32>
    %1757 = math.exp %1756 : vector<8x1xf32>
    %1758 = arith.subf %1740, %1751 : vector<8x1xf32>
    %1759 = math.exp %1758 : vector<8x1xf32>
    %1760 = arith.subf %1741, %1751 : vector<8x1xf32>
    %1761 = math.exp %1760 : vector<8x1xf32>
    %1762 = arith.subf %1742, %1751 : vector<8x1xf32>
    %1763 = math.exp %1762 : vector<8x1xf32>
    %1764 = arith.subf %1743, %1751 : vector<8x1xf32>
    %1765 = math.exp %1764 : vector<8x1xf32>
    %1766 = arith.subf %1744, %1751 : vector<8x1xf32>
    %1767 = math.exp %1766 : vector<8x1xf32>
    %1768 = arith.addf %1753, %1755 : vector<8x1xf32>
    %1769 = arith.addf %1768, %1757 : vector<8x1xf32>
    %1770 = arith.addf %1769, %1759 : vector<8x1xf32>
    %1771 = arith.addf %1770, %1761 : vector<8x1xf32>
    %1772 = arith.addf %1771, %1763 : vector<8x1xf32>
    %1773 = arith.addf %1772, %1765 : vector<8x1xf32>
    %1774 = arith.addf %1773, %1767 : vector<8x1xf32>
    %1775 = tpu.reciprocal %1774 {approx = true} : vector<8x1xf32> -> vector<8x1xf32>
    %cst_535 = arith.constant 0.000000e+00 : f32
    %1776 = vector.broadcast %cst_535 : f32 to vector<8x32xf32>
    %1777 = arith.mulf %1753, %1775 : vector<8x1xf32>
    %cst_536 = arith.constant 0.000000e+00 : f32
    %1778 = vector.broadcast %cst_536 : f32 to vector<8x1xf32>
    %1779 = arith.select %32, %1777, %1778 : vector<8x1xi1>, vector<8x1xf32>
    %1780 = vector.broadcast %1779 : vector<8x1xf32> to vector<8x32xf32>
    %1781 = arith.mulf %1780, %1504 : vector<8x32xf32>
    %1782 = arith.addf %1776, %1781 : vector<8x32xf32>
    %1783 = arith.mulf %1755, %1775 : vector<8x1xf32>
    %cst_537 = arith.constant 0.000000e+00 : f32
    %1784 = vector.broadcast %cst_537 : f32 to vector<8x1xf32>
    %1785 = arith.select %33, %1783, %1784 : vector<8x1xi1>, vector<8x1xf32>
    %1786 = vector.broadcast %1785 : vector<8x1xf32> to vector<8x32xf32>
    %1787 = arith.mulf %1786, %1536 : vector<8x32xf32>
    %1788 = arith.addf %1782, %1787 : vector<8x32xf32>
    %1789 = arith.mulf %1757, %1775 : vector<8x1xf32>
    %cst_538 = arith.constant 0.000000e+00 : f32
    %1790 = vector.broadcast %cst_538 : f32 to vector<8x1xf32>
    %1791 = arith.select %34, %1789, %1790 : vector<8x1xi1>, vector<8x1xf32>
    %1792 = vector.broadcast %1791 : vector<8x1xf32> to vector<8x32xf32>
    %1793 = arith.mulf %1792, %1568 : vector<8x32xf32>
    %1794 = arith.addf %1788, %1793 : vector<8x32xf32>
    %1795 = arith.mulf %1759, %1775 : vector<8x1xf32>
    %cst_539 = arith.constant 0.000000e+00 : f32
    %1796 = vector.broadcast %cst_539 : f32 to vector<8x1xf32>
    %1797 = arith.select %35, %1795, %1796 : vector<8x1xi1>, vector<8x1xf32>
    %1798 = vector.broadcast %1797 : vector<8x1xf32> to vector<8x32xf32>
    %1799 = arith.mulf %1798, %1600 : vector<8x32xf32>
    %1800 = arith.addf %1794, %1799 : vector<8x32xf32>
    %1801 = arith.mulf %1761, %1775 : vector<8x1xf32>
    %cst_540 = arith.constant 0.000000e+00 : f32
    %1802 = vector.broadcast %cst_540 : f32 to vector<8x1xf32>
    %1803 = arith.select %36, %1801, %1802 : vector<8x1xi1>, vector<8x1xf32>
    %1804 = vector.broadcast %1803 : vector<8x1xf32> to vector<8x32xf32>
    %1805 = arith.mulf %1804, %1632 : vector<8x32xf32>
    %1806 = arith.addf %1800, %1805 : vector<8x32xf32>
    %1807 = arith.mulf %1763, %1775 : vector<8x1xf32>
    %cst_541 = arith.constant 0.000000e+00 : f32
    %1808 = vector.broadcast %cst_541 : f32 to vector<8x1xf32>
    %1809 = arith.select %37, %1807, %1808 : vector<8x1xi1>, vector<8x1xf32>
    %1810 = vector.broadcast %1809 : vector<8x1xf32> to vector<8x32xf32>
    %1811 = arith.mulf %1810, %1664 : vector<8x32xf32>
    %1812 = arith.addf %1806, %1811 : vector<8x32xf32>
    %1813 = arith.mulf %1765, %1775 : vector<8x1xf32>
    %cst_542 = arith.constant 0.000000e+00 : f32
    %1814 = vector.broadcast %cst_542 : f32 to vector<8x1xf32>
    %1815 = arith.select %38, %1813, %1814 : vector<8x1xi1>, vector<8x1xf32>
    %1816 = vector.broadcast %1815 : vector<8x1xf32> to vector<8x32xf32>
    %1817 = arith.mulf %1816, %1696 : vector<8x32xf32>
    %1818 = arith.addf %1812, %1817 : vector<8x32xf32>
    %1819 = arith.mulf %1767, %1775 : vector<8x1xf32>
    %cst_543 = arith.constant 0.000000e+00 : f32
    %1820 = vector.broadcast %cst_543 : f32 to vector<8x1xf32>
    %1821 = arith.select %39, %1819, %1820 : vector<8x1xi1>, vector<8x1xf32>
    %1822 = vector.broadcast %1821 : vector<8x1xf32> to vector<8x32xf32>
    %1823 = arith.mulf %1822, %1728 : vector<8x32xf32>
    %1824 = arith.addf %1818, %1823 : vector<8x32xf32>
    %1825 = arith.addf %1443, %1824 : vector<8x32xf32>
    %1826 = math.tanh %1825 : vector<8x32xf32>
    %c0_544 = arith.constant 0 : index
    %c0_545 = arith.constant 0 : index
    %1827 = vector.load %arg14[%c0_544, %c0_545] : memref<32x4xf32, #tpu.memory_space<vmem>>, vector<32x4xf32>
    %cst_546 = arith.constant dense<0.000000e+00> : vector<8x4xf32>
    %1828 = tpu.matmul %1826, %1827, %cst_546 {dimension_numbers = #tpu.dot_dimension_numbers<[1], [0], [0], [1], [0, 0, 1, 1], [], []>} : vector<8x32xf32>, vector<32x4xf32>, vector<8x4xf32> -> vector<8x4xf32>
    %c0_547 = arith.constant 0 : index
    %c0_548 = arith.constant 0 : index
    %1829 = vector.load %arg15[%c0_547, %c0_548] : memref<1x4xf32, #tpu.memory_space<vmem>>, vector<1x4xf32>
    %1830 = vector.broadcast %1829 : vector<1x4xf32> to vector<8x4xf32>
    %1831 = arith.addf %1828, %1830 : vector<8x4xf32>
    %c0_549 = arith.constant 0 : index
    %c0_550 = arith.constant 0 : index
    %1832 = vector.load %arg16[%c0_549, %c0_550] : memref<8x4xf32, #tpu.memory_space<vmem>>, vector<8x4xf32>
    tpu.vector_store %arg16[%c0_549, %c0_550], %1831 {strides = array<i32>} : memref<8x4xf32, #tpu.memory_space<vmem>>, vector<8x4xf32>,
    return
  }
}

</mosaic_0001>

<bundles_post_ra>
// kernel: tpu_custom_call.1
= control target key start
LH: loop header
LB: loop body
LE: loop exit
PB: predicated region body
PF: predicated region fallthrough
CT: control target
= control target key end

     0   :  { %s19049_s0 = inlined_call_operand.hbm [shape: f32[8,16], index: 0, kind: input, shape index: {}]   ;;  %s19050_s1 = inlined_call_operand.vmem [shape: f32[64,16], index: 1, kind: input, shape index: {}]   ;;  %s19051_s2 = inlined_call_operand.vmem [shape: f32[64,16], index: 2, kind: input, shape index: {}]   ;;  %s19052_s3 = inlined_call_operand.vmem [shape: f32[64,1], index: 3, kind: input, shape index: {}]   ;;  %s19053_s4 = inlined_call_operand.vmem [shape: f32[64,1], index: 4, kind: input, shape index: {}]   ;;  %s19054_s5 = inlined_call_operand.vmem [shape: f32[64,1], index: 5, kind: input, shape index: {}]   ;;  %s19055_s6 = inlined_call_operand.vmem [shape: f32[16,32], index: 6, kind: input, shape index: {}]   ;;  %s19056_s7 = inlined_call_operand.hbm [shape: f32[1,32], index: 7, kind: input, shape index: {}]   ;;  %s19057_s8 = inlined_call_operand.hbm [shape: f32[2,3,16,32], index: 8, kind: input, shape index: {}]   ;;  %s19058_s9 = inlined_call_operand.vmem [shape: f32[2,3,32,32], index: 9, kind: input, shape index: {}]   ;;  %s19059_s10 = inlined_call_operand.hbm [shape: f32[2,4,1,32], index: 10, kind: input, shape index: {}]   ;;  %s19060_s11 = inlined_call_operand.vmem [shape: f32[2,3,32,32], index: 11, kind: input, shape index: {}]   ;;  %s19061_s12 = inlined_call_operand.hbm [shape: f32[2,3,32,32], index: 12, kind: input, shape index: {}]   ;;  %s19062_s13 = inlined_call_operand.vmem [shape: f32[2,4,1,32], index: 13, kind: input, shape index: {}]   ;;  %s19063_s14 = inlined_call_operand.vmem [shape: f32[32,4], index: 14, kind: input, shape index: {}]   ;;  %s19064_s15 = inlined_call_operand.vmem [shape: f32[1,4], index: 15, kind: input, shape index: {}]   ;;  %s19065_s16 = inlined_call_operand.vmem [shape: f32[8,4], index: 16, kind: output, shape index: {}]  }
   0x1   :  { %19103 = sst [smem:[#allocation52_spill]] %s19049_s0 }
   0x2   :  { %21 = vsyncpa [#allocation3], 0 }
   0x3   :  { %22 = vsyncpa [#allocation5], 0 }
   0x4   :  { %23 = vsyncpa [#allocation8], 0  ;;  %s15561_s21 = smov [#allocation4]   ;;  %s15562_s23 = smov [#allocation7]  }
   0x5   :  { %s52_s22 = sshll.u32 %s15561_s21, 4  ;;  %s75_s24 = sshll.u32 %s15562_s23, 4  ;;  %s53_s22 = int_to_ptr.vmem [resolvable:$true] %s52_s22  ;;  %s76_s24 = int_to_ptr.vmem [resolvable:$true] %s75_s24 }
   0x6   :  { %s15463_s25 = scalar_lea.vmem %s53_s22, 16  ;;  %s15467_s26 = scalar_lea.vmem %s53_s22, 32 }
   0x7   :  { %p15464_p0 = scmp.ne.s32.totalorder %s53_s22, %s15463_s25  ;;  %p15468_p1 = scmp.lt.s32.totalorder %s53_s22, %s53_s22 }
   0x8   :  { %p15469_p2 = scmp.lt.s32.totalorder %s15467_s26, %s15463_s25 }
   0xa   :  { %p15470_p3 = por %p15469_p2, %p15468_p1 }
   0xc   :  { %p15471_p4 = pnand %p15470_p3, %p15464_p0 }
   0xe   :  { %15474 = shalt.err (!%p15471_p4)
}
   0xf   :  { %55 = dma.hbm_to_vmem [thread:$0]  %s19056_s7, 16, %s53_s22, [#allocation5]  }
  0x10   :  { %s15483_s29 = scalar_lea.vmem %s76_s24, 128  ;;  %p15488_p6 = scmp.lt.s32.totalorder %s76_s24, %s76_s24 }
  0x11   :  { %p15484_p5 = scmp.ne.s32.totalorder %s76_s24, %s15483_s29  ;;  %p15489_p7 = scmp.lt.s32.totalorder %s15483_s29, %s15483_s29 }
  0x13   :  { %p15490_p8 = por %p15489_p7, %p15488_p6 }
  0x15   :  { %p15491_p9 = pnand %p15490_p8, %p15484_p5 }
  0x17   :  { %15494 = shalt.err (!%p15491_p9)
}
  0x18   :  { %s15563_s30 = smov 16   ;;  %s15564_s0 = smov 1  }
  0x19   :  { %81 = dma.hbm_to_vmem [thread:$0]  %s19059_s10, 128, %s76_s24, [#allocation8], %s15563_s30, %s15563_s30, %s15564_s0  }
  0x1a   :  { %s15565_s19 = smov [#allocation2]   ;;  %s15566_s21 = smov [#allocation6]  }
  0x1b   :  { %s30_s20 = sshll.u32 %s15565_s19, 4  ;;  %s61_s23 = sshll.u32 %s15566_s21, 4  ;;  %s31_s20 = int_to_ptr.vmem [resolvable:$true] %s30_s20  ;;  %s62_s23 = int_to_ptr.vmem [resolvable:$true] %s61_s23 }
  0x1c   :  { %s15503_s7 = scalar_lea.vmem %s31_s20, 128  ;;  %p15508_p11 = scmp.lt.s32.totalorder %s31_s20, %s31_s20 }
  0x1d   :  { %p15504_p10 = scmp.ne.s32.totalorder %s31_s20, %s15503_s7  ;;  %p15509_p12 = scmp.lt.s32.totalorder %s15503_s7, %s15503_s7 }
  0x1f   :  { %p15510_p13 = por %p15509_p12, %p15508_p11 }
  0x21   :  { %p15511_p0 = pnand %p15510_p13, %p15504_p10 }
  0x23   :  { %15514 = shalt.err (!%p15511_p0)
}
  0x24   :  { %s19104_s26 = sld [smem:[#allocation52_spill]]  ;;  %s15523_s27 = scalar_lea.vmem %s62_s23, 1536 }
  0x25   :  { %p15524_p1 = scmp.ne.s32.totalorder %s62_s23, %s15523_s27  ;;  %p15528_p2 = scmp.lt.s32.totalorder %s62_s23, %s62_s23 }
  0x26   :  { %p15529_p3 = scmp.lt.s32.totalorder %s15523_s27, %s15523_s27 }
  0x28   :  { %p15530_p4 = por %p15529_p3, %p15528_p2 }
  0x2a   :  { %33 = dma.hbm_to_vmem [thread:$0]  %s19104_s26, 128, %s31_s20, [#allocation3]  }
  0x2b   :  { %p15531_p5 = pnand %p15530_p4, %p15524_p1 }
  0x2d   :  { %15534 = shalt.err (!%p15531_p5)
}
  0x2e   :  { %s15567_s10 = smov 128   ;;  %s15568_s24 = smov 8  }
  0x2f   :  { %67 = dma.hbm_to_vmem [thread:$0]  %s19057_s8, 1536, %s62_s23, [#allocation5], %s15567_s10, %s15567_s10, %s15568_s24  }
  0x30   :  { %s15569_s30 = smov [#allocation9]  }
  0x31   :  { %s89_s0 = sshll.u32 %s15569_s30, 4  ;;  %s90_s0 = int_to_ptr.vmem [resolvable:$true] %s89_s0 }
  0x32   :  { %s15543_s17 = scalar_lea.vmem %s90_s0, 3072  ;;  %p15548_p7 = scmp.lt.s32.totalorder %s90_s0, %s90_s0 }
  0x33   :  { %p15544_p6 = scmp.ne.s32.totalorder %s90_s0, %s15543_s17  ;;  %p15549_p8 = scmp.lt.s32.totalorder %s15543_s17, %s15543_s17 }
  0x35   :  { %p15550_p9 = por %p15549_p8, %p15548_p7 }
  0x37   :  { %p15551_p10 = pnand %p15550_p9, %p15544_p6 }
  0x39   :  { %15554 = shalt.err (!%p15551_p10)
}
  0x3a   :  { %95 = dma.hbm_to_vmem [thread:$0]  %s19061_s12, 3072, %s90_s0, [#allocation8], %s15567_s10, %s15567_s10, %s15568_s24  }
  0x3b   :  { %15555 = dma.done.wait [#allocation3], 128  }
  0x3c   :  { %15556 = vsyncadd [#allocation3], 4294967168 }
  0x3d   :  { %15557 = dma.done.wait [#allocation5], 1552  }
  0x3e   :  { %15558 = vsyncadd [#allocation5], 4294965744 }
  0x3f   :  { %15559 = dma.done.wait [#allocation8], 3200  }
  0x40   :  { %15560 = vsyncadd [#allocation8], 4294964096  ;;  %v19066_v0 = vmov 0.0   ;;  %vm15571_vm0 = vmmov 0   ;;  %v19076_v1 = vmov 0   ;;  %v119_v2 = vld [vmem:[%s19055_s6 + $0x8] sm:$0xff] }
  0x41   :  { %13227 = vmatprep.subr.mxu0 %v19066_v0  ;;  %13231 = vmatprep.mubr.msk.f32.mxu0 %vm15571_vm0, %v19066_v0  ;;  %v267_v3 = vld [vmem:[#allocation6 + $0x8] sm:$0xff]  ;;  %v118_v4 = vld [vmem:[%s19055_s6] sm:$0xff]  ;;  %v266_v5 = vld [vmem:[#allocation6] sm:$0xff]  ;;  %vm127_vm1 = vcmask 130048  }
  0x42   :  { %14820 = vset.pattern.permute.xlu0 %v19076_v1  ;;  %14821 = vset.pattern.permute.xlu1 %v19076_v1  ;;  %v117_v6 = vld [vmem:[#allocation2] sm:$0xff]  ;;  %v251_v9 = vld [vmem:[%s19050_s1 + $0x8] sm:$0xff]  ;;  %v252_v11 = vld [vmem:[%s19050_s1 + $0x10] sm:$0xff] }
  0x43   :  { %13228 = vmatpush3.msra.mxu0 %v119_v2  ;;  %13234 = vmatprep.subr.mxu1 %v267_v3  ;;  %v250_v7 = vld [vmem:[%s19050_s1] sm:$0xff]  ;;  %v522_v12 = vld [vmem:[#allocation6 + $0x28] sm:$0xff]  ;;  %v521_v16 = vld [vmem:[#allocation6 + $0x20] sm:$0xff] }
  0x44   :  { %13229 = vmatprep.subr.mxu0 %v19066_v0  ;;  %13235 = vmatpush3.msra.mxu1 %v267_v3  ;;  %v406_v8 = vld [vmem:[#allocation6 + $0x18] sm:$0xff]  ;;  %v405_v10 = vld [vmem:[#allocation6 + $0x10] sm:$0xff]  ;;  %v256_v18 = vld [vmem:[%s19050_s1 + $0x30] sm:$0xff] }
  0x45   :  { %13230 = vmatpush3.msra.mxu0 %v118_v4  ;;  %13236 = vmatprep.subr.mxu1 %v266_v5  ;;  %v638_v13 = vld [vmem:[#allocation6 + $0x38] sm:$0xff]  ;;  %v253_v14 = vld [vmem:[%s19050_s1 + $0x18] sm:$0xff]  ;;  %v777_v27 = vld [vmem:[#allocation6 + $0x40] sm:$0xff] }
  0x46   :  { %13232 = vmatmul.mubr.msk.f32.vlgmr.msra.gmra.mxu0 %vm127_vm1, %v117_v6  ;;  %13237 = vmatpush3.msra.mxu1 %v266_v5  ;;  %v254_v15 = vld [vmem:[%s19050_s1 + $0x20] sm:$0xff]  ;;  %v255_v17 = vld [vmem:[%s19050_s1 + $0x28] sm:$0xff]  ;;  %v778_v20 = vld [vmem:[#allocation6 + $0x48] sm:$0xff] }
  0x47   :  { %13238 = vmatprep.mubr.msk.f32.mxu1 %vm127_vm1, %v250_v7  ;;  %13250 = vmatprep.subr.mxu0 %v406_v8  ;;  %v637_v19 = vld [vmem:[#allocation6 + $0x30] sm:$0xff]  ;;  %v894_v22 = vld [vmem:[#allocation6 + $0x58] sm:$0xff]  ;;  %v260_v29 = vld [vmem:[%s19051_s2 + $0x10] sm:$0xff] }
  0x48   :  { %13239 = vmatmul.mubr.msk.f32.vlgmr.msra.gmra.mxu1 %vm127_vm1, %v251_v9  ;;  %13251 = vmatpush3.msra.mxu0 %v406_v8  ;;  %v257_v21 = vld [vmem:[%s19050_s1 + $0x38] sm:$0xff]  ;;  %v202_v23 = vld [vmem:[%s19052_s3] sm:$0xff]  ;;  %v259_v28 = vld [vmem:[%s19051_s2 + $0x8] sm:$0xff] }
  0x49   :  { %13252 = vmatprep.subr.mxu0 %v405_v10  ;;  %13254 = vmatprep.mubr.msk.f32.mxu0 %vm127_vm1, %v250_v7  ;;  %v258_v24 = vld [vmem:[%s19051_s2] sm:$0xff]  ;;  %vm210_vm2 = vcmp.gt.f32.partialorder %v202_v23, 0.0  ;;  %v204_v30 = vld [vmem:[%s19052_s3 + $0x10] sm:$0xff]  ;;  %v261_v32 = vld [vmem:[%s19051_s2 + $0x18] sm:$0xff] }
  0x4a   :  { %13253 = vmatpush3.msra.mxu0 %v405_v10  ;;  %13241 = vmatprep.mubr.msk.f32.mxu1 %vm127_vm1, %v252_v11  ;;  %v1519_v25 = vsel %vm210_vm2, 1, %v19076_v1  ;;  %v218_v26 = vld [vmem:[%s19053_s4] sm:$0xff]  ;;  %vm212_vm4 = vcmp.gt.f32.partialorder %v204_v30, 0.0  ;;  %v205_v35 = vld [vmem:[%s19052_s3 + $0x18] sm:$0xff]  ;;  %v263_v36 = vld [vmem:[%s19051_s2 + $0x28] sm:$0xff] }
  0x4b   :  { %13255 = vmatmul.mubr.msk.f32.vlgmr.msra.gmra.mxu0 %vm127_vm1, %v251_v9  ;;  %13266 = vmatprep.subr.mxu1 %v522_v12  ;;  %vm226_vm3 = vcmp.gt.f32.partialorder %v218_v26, 0.0  ;;  %v893_v31 = vld [vmem:[#allocation6 + $0x50] sm:$0xff]  ;;  %v2485_v37 = vsel %vm212_vm4, 1, %v19076_v1  ;;  %v264_v38 = vld [vmem:[%s19051_s2 + $0x30] sm:$0xff]  ;;  %vm213_vm5 = vcmp.gt.f32.partialorder %v205_v35, 0.0  ;;  %v15812_v44 = vld [vmem:[%s19058_s9 + $0x8] sm:$0xff] }
  0x4c   :  { %13282 = vmatprep.subr.mxu0 %v638_v13  ;;  %13242 = vmatmul.mubr.msk.f32.gmra.mxu1 %vm127_vm1, %v253_v14  ;;  %v1525_v33 = vsel %vm226_vm3, 1, %v19076_v1  ;;  %v262_v34 = vld [vmem:[%s19051_s2 + $0x20] sm:$0xff]  ;;  %v265_v39 = vld [vmem:[%s19051_s2 + $0x38] sm:$0xff]  ;;  %v2969_v40 = vsel %vm213_vm5, 1, %v19076_v1  ;;  %v15795_v42 = vld [vmem:[%s19058_s9 + $0x10] sm:$0xff] }
  0x4d   :  { %13267 = vmatpush3.msra.mxu1 %v522_v12  ;;  %13283 = vmatpush3.msra.mxu0 %v638_v13  ;;  %v15787_v41 = vld [vmem:[%s19058_s9 + $0x18] sm:$0xff]  ;;  %v15819_v45 = vld [vmem:[%s19058_s9 + $0x30] sm:$0xff]  ;;  %v206_v46 = vld [vmem:[%s19052_s3 + $0x20] sm:$0xff] }
  0x4e   :  { %13257 = vmatprep.mubr.msk.f32.mxu0 %vm127_vm1, %v252_v11  ;;  %13244 = vmatprep.mubr.msk.f32.mxu1 %vm127_vm1, %v254_v15  ;;  %v15802_v43 = vld [vmem:[%s19058_s9 + $0x38] sm:$0xff]  ;;  %v15833_v47 = vld [vmem:[%s19058_s9] sm:$0xff]  ;;  %v15840_v48 = vld [vmem:[%s19058_s9 + $0x28] sm:$0xff]  ;;  %vm214_vm6 = vcmp.gt.f32.partialorder %v206_v46, 0.0 }
  0x4f   :  { %13258 = vmatmul.mubr.msk.f32.gmra.mxu0 %vm127_vm1, %v253_v14  ;;  %13268 = vmatprep.subr.mxu1 %v521_v16  ;;  %v3453_v49 = vsel %vm214_vm6, 1, %v19076_v1  ;;  %v15855_v50 = vld [vmem:[%s19058_s9 + $0x20] sm:$0xff]  ;;  %v15862_v51 = vld [vmem:[%s19058_s9 + $0x58] sm:$0xff]  ;;  %v15870_v52 = vld [vmem:[%s19058_s9 + $0x50] sm:$0xff] }
  0x50   :  { %13245 = vmatmul.mubr.msk.f32.gmra.mxu1 %vm127_vm1, %v255_v17  ;;  %13260 = vmatprep.mubr.msk.f32.mxu0 %vm127_vm1, %v254_v15  ;;  %v15878_v53 = vld [vmem:[%s19058_s9 + $0x78] sm:$0xff]  ;;  %v15885_v54 = vld [vmem:[%s19058_s9 + $0x48] sm:$0xff]  ;;  %v15892_v55 = vld [vmem:[%s19058_s9 + $0x70] sm:$0xff] }
  0x51   :  { %13247 = vmatprep.mubr.msk.f32.mxu1 %vm127_vm1, %v256_v18  ;;  %13284 = vmatprep.subr.mxu0 %v637_v19  ;;  %v15899_v56 = vld [vmem:[%s19058_s9 + $0x40] sm:$0xff]  ;;  %v15906_v57 = vld [vmem:[%s19058_s9 + $0x68] sm:$0xff]  ;;  %v15915_v58 = vld [vmem:[%s19058_s9 + $0x98] sm:$0xff] }
  0x52   :  { %13269 = vmatpush3.msra.mxu1 %v521_v16  ;;  %13285 = vmatpush3.msra.mxu0 %v637_v19  ;;  %v15923_v59 = vld [vmem:[%s19058_s9 + $0x60] sm:$0xff]  ;;  %v15932_v60 = vld [vmem:[%s19058_s9 + $0x90] sm:$0xff]  ;;  %v207_v61 = vld [vmem:[%s19052_s3 + $0x28] sm:$0xff] }
  0x53   :  { %13261 = vmatmul.mubr.msk.f32.gmra.mxu0 %vm127_vm1, %v255_v17  ;;  %13298 = vmatprep.subr.mxu1 %v778_v20  ;;  %v15945_v62 = vld [vmem:[%s19058_s9 + $0x88] sm:$0xff]  ;;  %v15950_v63 = vld [vmem:[%s19058_s9 + $0xb8] sm:$0xff]  ;;  %v15959_v2 = vld [vmem:[%s19058_s9 + $0x80] sm:$0xff]  ;;  %vm215_vm7 = vcmp.gt.f32.partialorder %v207_v61, 0.0 }
  0x54   :  { %13248 = vmatmul.mubr.msk.f32.gmra.mxu1 %vm127_vm1, %v257_v21  ;;  %13263 = vmatprep.mubr.msk.f32.mxu0 %vm127_vm1, %v256_v18  ;;  %v15965_v3 = vld [vmem:[%s19058_s9 + $0xb0] sm:$0xff]  ;;  %v15977_v5 = vld [vmem:[%s19058_s9 + $0xa8] sm:$0xff]  ;;  %v3937_v6 = vsel %vm215_vm7, 1, %v19076_v1  ;;  %v209_v8 = vld [vmem:[%s19052_s3 + $0x38] sm:$0xff] }
  0x55   :  { %13270 = vmatprep.mubr.msk.f32.mxu1 %vm127_vm1, %v250_v7  ;;  %13314 = vmatprep.subr.mxu0 %v894_v22  ;;  %v208_v4 = vld [vmem:[%s19052_s3 + $0x30] sm:$0xff]  ;;  %v15987_v7 = vld [vmem:[%s19058_s9 + $0xa0] sm:$0xff]  ;;  %vm217_vm9 = vcmp.gt.f32.partialorder %v209_v8, 0.0 }
  0x56   :  { %1521 = vperm.xlu0 %14820, %v1519_v25   ;;  %vm216_vm8 = vcmp.gt.f32.partialorder %v208_v4, 0.0  ;;  %v16004_v10 = vld [vmem:[%s19054_s5] sm:$0xff]  ;;  %v16018_v12 = vld [vmem:[%s19054_s5 + $0x10] sm:$0xff] }
  0x57   :  { %13264 = vmatmul.mubr.msk.f32.gmra.mxu0 %vm127_vm1, %v257_v21  ;;  %19105 = vst [vmem:[#allocation13_spill] sm:$0xff] %v16004_v10  ;;  %vm242_vm10 = vcmp.gt.f32.partialorder %v16004_v10, 0.0  ;;  %19106 = vst [vmem:[#allocation14_spill] sm:$0xff] %v16018_v12  ;;  %vm244_vm11 = vcmp.gt.f32.partialorder %v16018_v12, 0.0  ;;  %v16049_v16 = vld [vmem:[%s19054_s5 + $0x30] sm:$0xff]  ;;  %v16177_v10 = vld [vmem:[%s19054_s5 + $0x18] sm:$0xff] }
  0x58   :  { %13271 = vmatmul.mubr.msk.f32.vlgmr.msra.gmra.mxu1 %vm127_vm1, %v251_v9  ;;  %13286 = vmatprep.mubr.msk.f32.mxu0 %vm127_vm1, %v258_v24  ;;  %v4421_v9 = vsel %vm216_vm8, 1, %v19076_v1  ;;  %v5548_v13 = vsel %vm242_vm10, 1, %v19076_v1  ;;  %19108 = vst [vmem:[#allocation16_spill] sm:$0xff] %v16049_v16  ;;  %vm248_vm13 = vcmp.gt.f32.partialorder %v16049_v16, 0.0  ;;  %v220_v26 = vld [vmem:[%s19053_s4 + $0x10] sm:$0xff]  ;;  %19126 = vst [vmem:[#allocation34_spill] sm:$0xff] %v16177_v10 }
  0x59   :  { %13273 = vmatprep.mubr.msk.f32.mxu1 %vm127_vm1, %v252_v11  ;;  %13299 = vmatpush3.msra.mxu1 %v778_v20  ;;  %v4905_v11 = vsel %vm217_vm9, 1, %v19076_v1  ;;  %v16060_v20 = vld [vmem:[#allocation7] ss:$0 sm:$0xff]  ;;  %vm245_vm8 = vcmp.gt.f32.partialorder %v16177_v10, 0.0 }
  0x5a   :  { %13300 = vmatprep.subr.mxu1 %v777_v27  ;;  %1527 = vperm.xlu0 %14820, %v1525_v33  }
  0x5b   :  { %13287 = vmatmul.mubr.msk.f32.vlgmr.msra.gmra.mxu0 %vm127_vm1, %v259_v28  ;;  %13301 = vmatpush3.msra.mxu1 %v777_v27 }
  0x5c   :  { %13274 = vmatmul.mubr.msk.f32.gmra.mxu1 %vm127_vm1, %v253_v14  ;;  %13315 = vmatpush3.msra.mxu0 %v894_v22  ;;  %v16035_v14 = vld [vmem:[%s19054_s5 + $0x20] sm:$0xff]  ;;  %v219_v22 = vld [vmem:[%s19053_s4 + $0x8] sm:$0xff] }
  0x5d   :  { %13289 = vmatprep.mubr.msk.f32.mxu0 %vm127_vm1, %v260_v29  ;;  %13276 = vmatprep.mubr.msk.f32.mxu1 %vm127_vm1, %v254_v15  ;;  %19107 = vst [vmem:[#allocation15_spill] sm:$0xff] %v16035_v14  ;;  %v6028_v15 = vsel %vm244_vm11, 1, %v19076_v1  ;;  %vm246_vm12 = vcmp.gt.f32.partialorder %v16035_v14, 0.0  ;;  %vm227_vm15 = vcmp.gt.f32.partialorder %v219_v22, 0.0  ;;  %v16121_v22 = vld [vmem:[#allocation7 + $0x2] ss:$0 sm:$0xff] }
  0x5e   :  { %13316 = vmatprep.subr.mxu0 %v893_v31  ;;  %13330 = vmatprep.subr.mxu1 %v19066_v0  ;;  %v2007_v30 = vsel %vm227_vm15, 1, %v19076_v1 }
  0x5f   :  { %13290 = vmatmul.mubr.msk.f32.gmra.mxu0 %vm127_vm1, %v261_v32  ;;  %2487 = vperm.xlu0 %14820, %v2485_v37  }
  0x60   :  { %13277 = vmatmul.mubr.msk.f32.gmra.mxu1 %vm127_vm1, %v255_v17  ;;  %13292 = vmatprep.mubr.msk.f32.mxu0 %vm127_vm1, %v262_v34  ;;  %v6508_v17 = vsel %vm246_vm12, 1, %v19076_v1 }
  0x61   :  { %13279 = vmatprep.mubr.msk.f32.mxu1 %vm127_vm1, %v256_v18  ;;  %13317 = vmatpush3.msra.mxu0 %v893_v31  ;;  %v6988_v18 = vsel %vm248_vm13, 1, %v19076_v1 }
  0x62   :  { %13341 = vmatprep.subr.mxu0 %v19066_v0 }
  0x63   :  { %13293 = vmatmul.mubr.msk.f32.gmra.mxu0 %vm127_vm1, %v263_v36  ;;  %2971 = vperm.xlu0 %14820, %v2969_v40  }
  0x64   :  { %13280 = vmatmul.mubr.msk.f32.gmra.mxu1 %vm127_vm1, %v257_v21  ;;  %13295 = vmatprep.mubr.msk.f32.mxu0 %vm127_vm1, %v264_v38  ;;  %v203_v21 = vld [vmem:[%s19052_s3 + $0x8] sm:$0xff] }
  0x65   :  { %13302 = vmatprep.mubr.msk.f32.mxu1 %vm127_vm1, %v258_v24  ;;  %vm211_vm14 = vcmp.gt.f32.partialorder %v203_v21, 0.0 }
  0x66   :  { %v2001_v25 = vsel %vm211_vm14, 1, %v19076_v1 }
  0x67   :  { %13296 = vmatmul.mubr.msk.f32.gmra.mxu0 %vm127_vm1, %v265_v39  ;;  %3455 = vperm.xlu0 %14820, %v3453_v49   ;;  %v222_v49 = vld [vmem:[%s19053_s4 + $0x20] sm:$0xff] }
  0x68   :  { %13303 = vmatmul.mubr.msk.f32.vlgmr.msra.gmra.mxu1 %vm127_vm1, %v259_v28  ;;  %13318 = vmatprep.mubr.msk.f32.mxu0 %vm127_vm1, %v258_v24  ;;  %vm230_vm3 = vcmp.gt.f32.partialorder %v222_v49, 0.0 }
  0x69   :  { %13305 = vmatprep.mubr.msk.f32.mxu1 %vm127_vm1, %v260_v29  ;;  %13331 = vmatpush3.msra.mxu1 %v15787_v41 }
  0x6a   :  { %13332 = vmatprep.subr.mxu1 %v19066_v0  ;;  %2003 = vperm.xlu1 %14821, %v2001_v25  }
  0x6b   :  { %13319 = vmatmul.mubr.msk.f32.vlgmr.msra.gmra.mxu0 %vm127_vm1, %v259_v28  ;;  %13333 = vmatpush3.msra.mxu1 %v15795_v42  ;;  %v16075_v28 = vld [vmem:[#allocation7 + $0x1] ss:$0 sm:$0xff] }
  0x6c   :  { %13306 = vmatmul.mubr.msk.f32.gmra.mxu1 %vm127_vm1, %v261_v32  ;;  %13342 = vmatpush3.msra.mxu0 %v15802_v43 }
  0x6d   :  { %13321 = vmatprep.mubr.msk.f32.mxu0 %vm127_vm1, %v260_v29  ;;  %13308 = vmatprep.mubr.msk.f32.mxu1 %vm127_vm1, %v262_v34 }
  0x6e   :  { %13343 = vmatprep.subr.mxu0 %v19066_v0  ;;  %13334 = vmatprep.subr.mxu1 %v19066_v0 }
  0x6f   :  { %13322 = vmatmul.mubr.msk.f32.gmra.mxu0 %vm127_vm1, %v261_v32  ;;  %13335 = vmatpush3.msra.mxu1 %v15812_v44 }
  0x70   :  { %13309 = vmatmul.mubr.msk.f32.gmra.mxu1 %vm127_vm1, %v263_v36  ;;  %13344 = vmatpush3.msra.mxu0 %v15819_v45 }
  0x71   :  { %13324 = vmatprep.mubr.msk.f32.mxu0 %vm127_vm1, %v262_v34  ;;  %13311 = vmatprep.mubr.msk.f32.mxu1 %vm127_vm1, %v264_v38  ;;  %v221_v34 = vld [vmem:[%s19053_s4 + $0x18] sm:$0xff] }
  0x72   :  { %13345 = vmatprep.subr.mxu0 %v19066_v0  ;;  %13336 = vmatprep.subr.mxu1 %v19066_v0  ;;  %vm229_vm2 = vcmp.gt.f32.partialorder %v221_v34, 0.0  ;;  %v16135_v34 = vld [vmem:[#allocation7 + $0x4] ss:$0 sm:$0xff] }
  0x73   :  { %13325 = vmatmul.mubr.msk.f32.gmra.mxu0 %vm127_vm1, %v263_v36  ;;  %13337 = vmatpush3.msra.mxu1 %v15833_v47  ;;  %v2975_v8 = vsel %vm229_vm2, 1, %v19076_v1 }
  0x74   :  { %13312 = vmatmul.mubr.msk.f32.gmra.mxu1 %vm127_vm1, %v265_v39  ;;  %13346 = vmatpush3.msra.mxu0 %v15840_v48 }
  0x75   :  { %13327 = vmatprep.mubr.msk.f32.mxu0 %vm127_vm1, %v264_v38  ;;  %13338 = vmatprep.mubr.msk.f32.mxu1 %vm15571_vm0, %v19066_v0 }
  0x76   :  { %13347 = vmatprep.subr.mxu0 %v19066_v0  ;;  %13352 = vmatprep.subr.mxu1 %v19066_v0 }
  0x77   :  { %13328 = vmatmul.mubr.msk.f32.gmra.mxu0 %vm127_vm1, %v265_v39  ;;  %3939 = vperm.xlu0 %14820, %v3937_v6   ;;  %vm228_vm1 = vcmp.gt.f32.partialorder %v220_v26, 0.0 }
  0x78   :  { %13339 = vmatmul.mubr.f32.vlgmr.msra.gmra.mxu1 %v19066_v0  ;;  %13348 = vmatpush3.msra.mxu0 %v15855_v50  ;;  %v2491_v38 = vsel %vm228_vm1, 1, %v19076_v1  ;;  %vm1041_vm1 = vcmask 261120  }
  0x79   :  { %13353 = vmatpush3.msra.mxu1 %v15862_v51  ;;  %13349 = vmatprep.mubr.msk.f32.mxu0 %vm15571_vm0, %v19066_v0 }
  0x7a   :  { %13354 = vmatprep.subr.mxu1 %v19066_v0  ;;  %13363 = vmatprep.subr.mxu0 %v19066_v0 }
  0x7b   :  { %13355 = vmatpush3.msra.mxu1 %v15870_v52  ;;  %13350 = vmatmul.mubr.f32.vlgmr.msra.gmra.mxu0 %v19066_v0 }
  0x7c   :  { %13356 = vmatprep.subr.mxu1 %v19066_v0  ;;  %13364 = vmatpush3.msra.mxu0 %v15878_v53 }
  0x7d   :  { %13357 = vmatpush3.msra.mxu1 %v15885_v54  ;;  %13365 = vmatprep.subr.mxu0 %v19066_v0 }
  0x7e   :  { %13358 = vmatprep.subr.mxu1 %v19066_v0  ;;  %13366 = vmatpush3.msra.mxu0 %v15892_v55 }
  0x7f   :  { %13359 = vmatpush3.msra.mxu1 %v15899_v56  ;;  %13367 = vmatprep.subr.mxu0 %v19066_v0 }
  0x80   :  { %13360 = vmatprep.mubr.msk.f32.mxu1 %vm15571_vm0, %v19066_v0  ;;  %13368 = vmatpush3.msra.mxu0 %v15906_v57 }
  0x81   :  { %13374 = vmatprep.subr.mxu1 %v19066_v0  ;;  %13361 = vmatmul.mubr.f32.vlgmr.msra.gmra.mxu1 %v19066_v0 }
  0x82   :  { %13369 = vmatprep.subr.mxu0 %v19066_v0  ;;  %13375 = vmatpush3.msra.mxu1 %v15915_v58 }
  0x83   :  { %13370 = vmatpush3.msra.mxu0 %v15923_v59  ;;  %13371 = vmatprep.mubr.msk.f32.mxu0 %vm15571_vm0, %v19066_v0 }
  0x84   :  { %13376 = vmatprep.subr.mxu1 %v19066_v0  ;;  %13372 = vmatmul.mubr.f32.vlgmr.msra.gmra.mxu0 %v19066_v0 }
  0x85   :  { %13377 = vmatpush3.msra.mxu1 %v15932_v60  ;;  %13382 = vmatprep.mubr.msk.f32.mxu1 %vm15571_vm0, %v19066_v0 }
  0x86   :  { %13378 = vmatprep.subr.mxu1 %v19066_v0  ;;  %13385 = vmatprep.subr.mxu0 %v19066_v0 }
  0x87   :  { %13379 = vmatpush3.msra.mxu1 %v15945_v62  ;;  %13386 = vmatpush3.msra.mxu0 %v15950_v63 }
  0x88   :  { %13380 = vmatprep.subr.mxu1 %v19066_v0  ;;  %13387 = vmatprep.subr.mxu0 %v19066_v0 }
  0x89   :  { %13381 = vmatpush3.msra.mxu1 %v15959_v2  ;;  %13388 = vmatpush3.msra.mxu0 %v15965_v3 }
  0x8a   :  { %13383 = vmatmul.mubr.f32.vlgmr.msra.gmra.mxu1 %v19066_v0  ;;  %13389 = vmatprep.subr.mxu0 %v19066_v0 }
  0x8b   :  { %13390 = vmatpush3.msra.mxu0 %v15977_v5  ;;  %13393 = vmatprep.mubr.msk.f32.mxu0 %vm15571_vm0, %v19066_v0 }
  0x8c   :  { %13391 = vmatprep.subr.mxu0 %v19066_v0  ;;  %13396 = vmatprep.subr.mxu1 %v19066_v0 }
  0x8d   :  { %13392 = vmatpush3.msra.mxu0 %v15987_v7  ;;  %13397 = vmatpush3.msra.mxu1 %v15787_v41 }
  0x8e   :  { %13394 = vmatmul.mubr.f32.vlgmr.msra.gmra.mxu0 %v19066_v0  ;;  %13407 = vmatprep.subr.mxu0 %v19066_v0 }
  0x8f   :  { %13398 = vmatprep.subr.mxu1 %v19066_v0  ;;  %4423 = vperm.xlu0 %14820, %v4421_v9  }
  0x90   :  { %13408 = vmatpush3.msra.mxu0 %v15802_v43  ;;  %13399 = vmatpush3.msra.mxu1 %v15795_v42 }
  0x91   :  { %13409 = vmatprep.subr.mxu0 %v19066_v0  ;;  %13400 = vmatprep.subr.mxu1 %v19066_v0 }
  0x92   :  { %13410 = vmatpush3.msra.mxu0 %v15819_v45  ;;  %13401 = vmatpush3.msra.mxu1 %v15812_v44 }
  0x93   :  { %13411 = vmatprep.subr.mxu0 %v19066_v0  ;;  %4907 = vperm.xlu0 %14820, %v4905_v11  }
  0x94   :  { %13402 = vmatprep.subr.mxu1 %v19066_v0  ;;  %13412 = vmatpush3.msra.mxu0 %v15840_v48 }
  0x95   :  { %13403 = vmatpush3.msra.mxu1 %v15833_v47  ;;  %13413 = vmatprep.subr.mxu0 %v19066_v0 }
  0x96   :  { %13404 = vmatprep.mubr.msk.f32.mxu1 %vm15571_vm0, %v19066_v0  ;;  %13414 = vmatpush3.msra.mxu0 %v15855_v50 }
  0x97   :  { %13415 = vmatprep.mubr.msk.f32.mxu0 %vm15571_vm0, %v19066_v0  ;;  %5550 = vperm.xlu0 %14820, %v5548_v13  }
  0x98   :  { %13418 = vmatprep.subr.mxu1 %v19066_v0  ;;  %13429 = vmatprep.subr.mxu0 %v19066_v0  ;;  %v16160_v0 = vld [vmem:[%s19054_s5 + $0x8] sm:$0xff] }
  0x99   :  { %2009 = vperm.xlu1 %14821, %v2007_v30   ;;  %v224_v30 = vld [vmem:[%s19053_s4 + $0x30] sm:$0xff]  ;;  %19122 = vst [vmem:[#allocation30_spill] sm:$0xff] %v16160_v0  ;;  %vm243_vm7 = vcmp.gt.f32.partialorder %v16160_v0, 0.0 }
  0x9a   :  { %vm232_vm5 = vcmp.gt.f32.partialorder %v224_v30, 0.0 }
  0x9b   :  { %6030 = vperm.xlu0 %14820, %v6028_v15   ;;  %v223_v15 = vld [vmem:[%s19053_s4 + $0x28] sm:$0xff] }
  0x9c   :  { %vm231_vm4 = vcmp.gt.f32.partialorder %v223_v15, 0.0 }
  0x9d   :  { %2493 = vperm.xlu1 %14821, %v2491_v38  }
  0x9f   :  { %6510 = vperm.xlu0 %14820, %v6508_v17  }
  0xa1   :  { %2977 = vperm.xlu1 %14821, %v2975_v8  }
  0xa3   :  { %6990 = vperm.xlu0 %14820, %v6988_v18  }
 0x106   :  { %v16058_v19 = vpop.f32.mrf.mxu0 }
 0x107   :  { %19109 = vst [vmem:[#allocation17_spill] sm:$0xff] %v16058_v19 }
 0x108   :  { %v13240_v23 = vpop.f32.mrf.mxu1  ;;  %v13233_v24 = vpop.f32.mrf.mxu0 }
 0x109   :  { %v16073_v27 = vadd.f32 %v13240_v23, %v16060_v20  ;;  %v3459_v23 = vsel %vm230_vm3, 1, %v19076_v1 }
 0x10a   :  { %v16077_v29 = vpop.f32.mrf.mxu1  ;;  %3461 = vperm.xlu1 %14821, %v3459_v23  }
 0x10b   :  { %v13256_v31 = vpop.f32.mrf.mxu0 }
 0x10c   :  { %v16081_v32 = vadd.f32 %v13256_v31, %v16075_v28  ;;  %v13243_v33 = vpop.f32.mrf.mxu1 }
 0x10d   :  { %v16087_v35 = vadd.f32 %v13243_v33, %v16060_v20  ;;  %v16089_v36 = vpop.f32.mrf.mxu0 }
 0x10e   :  { %v16091_v37 = vpop.f32.mrf.mxu1 }
 0x10f   :  { %19110 = vst [vmem:[#allocation18_spill] sm:$0xff] %v16087_v35  ;;  %v13259_v39 = vpop.f32.mrf.mxu0 }
 0x110   :  { %v16095_v40 = vadd.f32 %v13259_v39, %v16075_v28  ;;  %v13246_v46 = vpop.f32.mrf.mxu1  ;;  %v3943_v39 = vsel %vm231_vm4, 1, %v19076_v1 }
 0x111   :  { %v16101_v61 = vadd.f32 %v13246_v46, %v16060_v20  ;;  %v16103_v4 = vpop.f32.mrf.mxu0  ;;  %3945 = vperm.xlu1 %14821, %v3943_v39  }
 0x112   :  { %19111 = vst [vmem:[#allocation19_spill] sm:$0xff] %v16095_v40  ;;  %v16105_v6 = vpop.f32.mrf.mxu1 }
 0x113   :  { %19112 = vst [vmem:[#allocation20_spill] sm:$0xff] %v16101_v61  ;;  %19113 = vst [vmem:[#allocation21_spill] sm:$0xff] %v16105_v6  ;;  %v13262_v9 = vpop.f32.mrf.mxu0 }
 0x114   :  { %v16109_v11 = vadd.f32 %v13262_v9, %v16075_v28  ;;  %v13249_v13 = vpop.f32.mrf.mxu1  ;;  %v225_v9 = vld [vmem:[%s19053_s4 + $0x38] sm:$0xff] }
 0x115   :  { %v16115_v17 = vadd.f32 %v13249_v13, %v16060_v20  ;;  %v16117_v18 = vpop.f32.mrf.mxu0  ;;  %vm233_vm6 = vcmp.gt.f32.partialorder %v225_v9, 0.0 }
 0x116   :  { %19114 = vst [vmem:[#allocation22_spill] sm:$0xff] %v16109_v11  ;;  %19116 = vst [vmem:[#allocation24_spill] sm:$0xff] %v16117_v18  ;;  %v16119_v21 = vpop.f32.mrf.mxu1  ;;  %v4910_v14 = vsel %vm233_vm6, 1, %v19076_v1 }
 0x117   :  { %19115 = vst [vmem:[#allocation23_spill] sm:$0xff] %v16115_v17  ;;  %19117 = vst [vmem:[#allocation25_spill] sm:$0xff] %v16119_v21  ;;  %v13265_v24 = vpop.f32.mrf.mxu0 }
 0x118   :  { %v16125_v25 = vadd.f32 %v13265_v24, %v16075_v28  ;;  %v13272_v26 = vpop.f32.mrf.mxu1  ;;  %v4427_v24 = vsel %vm232_vm5, 1, %v19076_v1  ;;  %v16186_v1 = vld [vmem:[#allocation7 + $0x5] ss:$0 sm:$0xff] }
 0x119   :  { %v16131_v31 = vadd.f32 %v13272_v26, %v16121_v22  ;;  %v16133_v33 = vpop.f32.mrf.mxu0  ;;  %4429 = vperm.xlu1 %14821, %v4427_v24  }
 0x11a   :  { %19118 = vst [vmem:[#allocation26_spill] sm:$0xff] %v16125_v25  ;;  %19119 = vst [vmem:[#allocation27_spill] sm:$0xff] %v16133_v33  ;;  %v16137_v38 = vpop.f32.mrf.mxu1  ;;  %v19130_v25 = vmov 0  }
 0x11b   :  { %v13288_v46 = vpop.f32.mrf.mxu0 }
 0x11c   :  { %v16141_v49 = vadd.f32 %v13288_v46, %v16135_v34  ;;  %v13275_v8 = vpop.f32.mrf.mxu1 }
 0x11d   :  { %v16147_v13 = vadd.f32 %v13275_v8, %v16121_v22  ;;  %v16149_v15 = vpop.f32.mrf.mxu0  ;;  %4912 = vperm.xlu1 %14821, %v4910_v14  }
 0x11e   :  { %v16151_v23 = vpop.f32.mrf.mxu1 }
 0x11f   :  { %19120 = vst [vmem:[#allocation28_spill] sm:$0xff] %v16147_v13  ;;  %v13291_v26 = vpop.f32.mrf.mxu0 }
 0x120   :  { %v16155_v30 = vadd.f32 %v13291_v26, %v16135_v34  ;;  %v13278_v46 = vpop.f32.mrf.mxu1 }
 0x121   :  { %v16163_v8 = vadd.f32 %v13278_v46, %v16121_v22  ;;  %v16165_v16 = vpop.f32.mrf.mxu0 }
 0x122   :  { %19121 = vst [vmem:[#allocation29_spill] sm:$0xff] %v16155_v30  ;;  %v16167_v39 = vpop.f32.mrf.mxu1 }
 0x123   :  { %19123 = vst [vmem:[#allocation31_spill] sm:$0xff] %v16163_v8  ;;  %19124 = vst [vmem:[#allocation32_spill] sm:$0xff] %v16167_v39  ;;  %v13294_v9 = vpop.f32.mrf.mxu0 }
 0x124   :  { %v16172_v26 = vadd.f32 %v13294_v9, %v16135_v34  ;;  %v13281_v12 = vpop.f32.mrf.mxu1  ;;  %v5788_v9 = vsel %vm243_vm7, 1, %v19130_v25 }
 0x125   :  { %v16180_v46 = vadd.f32 %v13281_v12, %v16121_v22  ;;  %v16182_v24 = vpop.f32.mrf.mxu0  ;;  %v16198_v12 = vld [vmem:[%s19054_s5 + $0x28] sm:$0xff]  ;;  %5790 = vperm.xlu1 %14821, %v5788_v9  }
 0x126   :  { %19125 = vst [vmem:[#allocation33_spill] sm:$0xff] %v16172_v26  ;;  %19128 = vst [vmem:[#allocation36_spill] sm:$0xff] %v16182_v24  ;;  %v16184_v19 = vpop.f32.mrf.mxu1  ;;  %vm247_vm9 = vcmp.gt.f32.partialorder %v16198_v12, 0.0 }
 0x127   :  { %19127 = vst [vmem:[#allocation35_spill] sm:$0xff] %v16180_v46  ;;  %19129 = vst [vmem:[#allocation37_spill] sm:$0xff] %v16184_v19  ;;  %v13297_v17 = vpop.f32.mrf.mxu0  ;;  %v16205_v19 = vld [vmem:[#allocation7 + $0x6] ss:$0 sm:$0xff]  ;;  %v6748_v11 = vsel %vm247_vm9, 1, %v19130_v25 }
 0x128   :  { %v16193_v33 = vadd.f32 %v13297_v17, %v16135_v34  ;;  %v13304_v21 = vpop.f32.mrf.mxu1  ;;  %19132 = vst [vmem:[#allocation39_spill] sm:$0xff] %v16198_v12  ;;  %v6268_v17 = vsel %vm245_vm8, 1, %v19130_v25 }
 0x129   :  { %v16201_v14 = vadd.f32 %v13304_v21, %v16186_v1  ;;  %v16203_v46 = vpop.f32.mrf.mxu0  ;;  %v16217_v21 = vld [vmem:[%s19054_s5 + $0x38] sm:$0xff]  ;;  %6270 = vperm.xlu1 %14821, %v6268_v17  }
 0x12a   :  { %19131 = vst [vmem:[#allocation38_spill] sm:$0xff] %v16193_v33  ;;  %19133 = vst [vmem:[#allocation40_spill] sm:$0xff] %v16203_v46  ;;  %v853_v0 = vpop.f32.mrf.mxu1  ;;  %vm249_vm14 = vcmp.gt.f32.partialorder %v16217_v21, 0.0 }
 0x12b   :  { %v13320_v33 = vpop.f32.mrf.mxu0  ;;  %19134 = vst [vmem:[#allocation41_spill] sm:$0xff] %v16217_v21  ;;  %v7228_v12 = vsel %vm249_vm14, 1, %v19130_v25 }
 0x12c   :  { %v16212_v8 = vadd.f32 %v13320_v33, %v16205_v19  ;;  %v13307_v26 = vpop.f32.mrf.mxu1 }
 0x12d   :  { %v16220_v46 = vadd.f32 %v13307_v26, %v16186_v1  ;;  %v16222_v9 = vpop.f32.mrf.mxu0  ;;  %6750 = vperm.xlu1 %14821, %v6748_v11   ;;  %v366_v11 = vadd.f32 %v16060_v20, %v16077_v29  ;;  %v738_v29 = vadd.f32 %v16135_v34, %v16149_v15 }
 0x12e   :  { %v16224_v10 = vpop.f32.mrf.mxu1 }
 0x12f   :  { %19135 = vst [vmem:[#allocation42_spill] sm:$0xff] %v16220_v46  ;;  %v13323_v33 = vpop.f32.mrf.mxu0 }
 0x130   :  { %v16231_v61 = vadd.f32 %v13323_v33, %v16205_v19  ;;  %v13310_v39 = vpop.f32.mrf.mxu1 }
 0x131   :  { %v16234_v24 = vadd.f32 %v13310_v39, %v16186_v1  ;;  %v16236_v26 = vpop.f32.mrf.mxu0  ;;  %7230 = vperm.xlu1 %14821, %v7228_v12  }
 0x132   :  { %19136 = vst [vmem:[#allocation43_spill] sm:$0xff] %v16231_v61  ;;  %v16238_v17 = vpop.f32.mrf.mxu1 }
 0x133   :  { %19137 = vst [vmem:[#allocation44_spill] sm:$0xff] %v16234_v24  ;;  %19138 = vst [vmem:[#allocation45_spill] sm:$0xff] %v16238_v17  ;;  %v13326_v18 = vpop.f32.mrf.mxu0 }
 0x134   :  { %v16244_v6 = vadd.f32 %v13326_v18, %v16205_v19  ;;  %v13313_v13 = vpop.f32.mrf.mxu1 }
 0x135   :  { %v16247_v33 = vadd.f32 %v13313_v13, %v16186_v1  ;;  %v16249_v61 = vpop.f32.mrf.mxu0 }
 0x136   :  { %19139 = vst [vmem:[#allocation46_spill] sm:$0xff] %v16244_v6  ;;  %19141 = vst [vmem:[#allocation48_spill] sm:$0xff] %v16249_v61  ;;  %v16251_v39 = vpop.f32.mrf.mxu1 }
 0x137   :  { %19140 = vst [vmem:[#allocation47_spill] sm:$0xff] %v16247_v33  ;;  %19142 = vst [vmem:[#allocation49_spill] sm:$0xff] %v16251_v39  ;;  %v13329_v24 = vpop.f32.mrf.mxu0  ;;  %v482_v33 = vadd.f32 %v16075_v28, %v16089_v36 }
 0x138   :  { %v16256_v21 = vadd.f32 %v13329_v24, %v16205_v19  ;;  %v1111_v25 = vpop.f32.mrf.mxu1 }
 0x139   :  { %v1261_v17 = vadd.f32 %v1111_v25, %v366_v11  ;;  %v16258_v18 = vpop.f32.mrf.mxu0 }
 0x13a   :  { %19143 = vst [vmem:[#allocation50_spill] sm:$0xff] %v16256_v21  ;;  %19144 = vst [vmem:[#allocation51_spill] sm:$0xff] %v16258_v18  ;;  %v13340_v6 = vpop.f32.mrf.mxu1 }
 0x13b   :  { %v12171_v46 = vmul.f32 -1.442695, %v1261_v17  ;;  %v1181_v13 = vpop.f32.mrf.mxu0  ;;  %v854_v6 = vadd.f32 %v16186_v1, %v853_v0 }
 0x13c   :  { %v1268_v39 = vadd.f32 %v1181_v13, %v482_v33 }
 0x13d   :  { %14822 = vpow2.f32 %v12171_v46  ;;  %v13351_v12 = vpop.f32.mrf.mxu0 }
 0x13e   :  { %v12172_v30 = vmul.f32 -1.442695, %v1268_v39 }
 0x140   :  { %14824 = vpow2.f32 %v12172_v30 }
 0x141   :  { %v1257_v61 = vpop.f32.mrf.mxu1 }
 0x143   :  { %v13362_v24 = vpop.f32.mrf.mxu1 }
 0x144   :  { %v1348_v21 = vpop.f32.mrf.mxu0  ;;  %v16265_v24 = vld [vmem:[#allocation7 + $0x3] ss:$0 sm:$0xff] }
 0x145   :  { %v1498_v40 = vadd.f32 %v1348_v21, %v738_v29  ;;  %v1258_v0 = vadd.f32 %v16265_v24, %v1257_v61  ;;  %v598_v29 = vadd.f32 %v16121_v22, %v16137_v38 }
 0x146   :  { %v13373_v11 = vpop.f32.mrf.mxu0 }
 0x147   :  { %v12174_v25 = vmul.f32 -1.442695, %v1498_v40 }
 0x149   :  { %14826 = vpow2.f32 %v12174_v25 }
 0x14a   :  { %v14823_v17 = vpop.eup %14822  ;;  %v1418_v18 = vpop.f32.mrf.mxu1 }
 0x14b   :  { %v1265_v36 = vadd.f32 1.0, %v14823_v17  ;;  %v1505_v46 = vadd.f32 %v1418_v18, %v854_v6 }
 0x14c   :  { %v13384_v12 = vpop.f32.mrf.mxu1 }
 0x14d   :  { %14828 = vrcp.f32 %v1265_v36  ;;  %v12175_v13 = vmul.f32 -1.442695, %v1505_v46  ;;  %v14825_v15 = vpop.eup %14824  ;;  %v970_v46 = vadd.f32 %v16205_v19, %v16222_v9 }
 0x14e   :  { %v1494_v33 = vpop.f32.mrf.mxu0  ;;  %v1272_v21 = vadd.f32 1.0, %v14825_v15 }
 0x14f   :  { %14830 = vpow2.f32 %v12175_v13 }
 0x150   :  { %v13395_v35 = vpop.f32.mrf.mxu0 }
 0x151   :  { %v16270_v35 = vld [vmem:[#allocation7 + $0x7] ss:$0 sm:$0xff] }
 0x152   :  { %v1495_v17 = vadd.f32 %v16270_v35, %v1494_v33  ;;  %v19145_v33 = vmov 0.0  }
 0x156   :  { %v14827_v39 = vpop.eup %14826 }
 0x157   :  { %v1502_v30 = vadd.f32 1.0, %v14827_v39  ;;  %v1522_v39 = vpop.permute.xlu0 %1521 }
 0x158   :  { %vm1523_vm15 = vcmp.eq.s32.totalorder %v1522_v39, 1 }
 0x159   :  { %14832 = vrcp.f32 %v1502_v30 }
 0x15a   :  { %v14829_v40 = vpop.eup %14828  ;;  %14834 = vrcp.f32 %v1272_v21 }
 0x15b   :  { %v1275_v18 = vmul.f32 %v14829_v40, %v1258_v0 }
 0x15c   :  { %v14831_v25 = vpop.eup %14830 }
 0x15d   :  { %v1276_v11 = vadd.f32 %v1275_v18, %v598_v29  ;;  %v1509_v6 = vadd.f32 1.0, %v14831_v25 }
 0x15f   :  { %14836 = vtanh.f32 %v1276_v11 }
 0x160   :  { %14838 = vrcp.f32 %v1509_v6  ;;  %v1528_v6 = vpop.permute.xlu0 %1527 }
 0x161   :  { %vm1529_vm2 = vcmp.eq.s32.totalorder %v1528_v6, 1 }
 0x166   :  { %v14833_v36 = vpop.eup %14832 }
 0x167   :  { %v1512_v61 = vmul.f32 %v14833_v36, %v1495_v17  ;;  %v14835_v12 = vpop.eup %14834 }
 0x168   :  { %v1278_v15 = vsub.f32 1.0, %v14835_v12  ;;  %v1280_v30 = vmul.f32 0.0, %v14835_v12 }
 0x169   :  { %v1513_v13 = vadd.f32 %v1512_v61, %v970_v46 }
 0x16b   :  { %14840 = vtanh.f32 %v1513_v13 }
 0x16c   :  { %v14837_v38 = vpop.eup %14836 }
 0x16d   :  { %v1279_v21 = vmul.f32 %v14837_v38, %v1278_v15  ;;  %v14839_v9 = vpop.eup %14838 }
 0x16e   :  { %v1515_v29 = vsub.f32 1.0, %v14839_v9  ;;  %v1517_v25 = vmul.f32 0.0, %v14839_v9 }
 0x16f   :  { %v1281_v0 = vadd.f32 %v1280_v30, %v1279_v21 }
 0x171   :  { %v16275_v40 = vsel %vm1523_vm15, %v1281_v0, 0.0 }
 0x172   :  { %13405 = vmatmul.mubr.msk.f32.vlgmr.msra.gmra.mxu1 %vm1041_vm1, %v16275_v40  ;;  %13416 = vmatmul.mubr.msk.f32.vlgmr.msra.gmra.mxu0 %vm1041_vm1, %v16275_v40 }
 0x173   :  { %13419 = vmatpush3.msra.mxu1 %v15862_v51  ;;  %13430 = vmatpush3.msra.mxu0 %v15878_v53 }
 0x174   :  { %13420 = vmatprep.subr.mxu1 %v19145_v33  ;;  %13431 = vmatprep.subr.mxu0 %v19145_v33 }
 0x175   :  { %13421 = vmatpush3.msra.mxu1 %v15870_v52  ;;  %13432 = vmatpush3.msra.mxu0 %v15892_v55 }
 0x176   :  { %13422 = vmatprep.subr.mxu1 %v19145_v33  ;;  %13433 = vmatprep.subr.mxu0 %v19145_v33 }
 0x177   :  { %13423 = vmatpush3.msra.mxu1 %v15885_v54  ;;  %13426 = vmatprep.mubr.msk.f32.mxu1 %vm15571_vm0, %v19145_v33 }
 0x178   :  { %v14841_v18 = vpop.eup %14840  ;;  %13424 = vmatprep.subr.mxu1 %v19145_v33  ;;  %13434 = vmatpush3.msra.mxu0 %v15906_v57 }
 0x179   :  { %13425 = vmatpush3.msra.mxu1 %v15899_v56  ;;  %13435 = vmatprep.subr.mxu0 %v19145_v33  ;;  %v1516_v11 = vmul.f32 %v14841_v18, %v1515_v29 }
 0x17a   :  { %13427 = vmatmul.mubr.msk.f32.vlgmr.msra.gmra.mxu1 %vm1041_vm1, %v16275_v40  ;;  %13440 = vmatprep.subr.mxu1 %v19145_v33 }
 0x17b   :  { %13436 = vmatpush3.msra.mxu0 %v15923_v59  ;;  %13441 = vmatpush3.msra.mxu1 %v15915_v58  ;;  %v1518_v17 = vadd.f32 %v1517_v25, %v1516_v11 }
 0x17c   :  { %13437 = vmatprep.mubr.msk.f32.mxu0 %vm15571_vm0, %v19145_v33  ;;  %13442 = vmatprep.subr.mxu1 %v19145_v33 }
 0x17d   :  { %13451 = vmatprep.subr.mxu0 %v19145_v33  ;;  %v16305_v36 = vsel %vm1529_vm2, %v1518_v17, 0.0  ;;  %13443 = vmatpush3.msra.mxu1 %v15932_v60 }
 0x17e   :  { %13438 = vmatmul.mubr.msk.f32.vlgmr.msra.gmra.mxu0 %vm1041_vm1, %v16305_v36  ;;  %13444 = vmatprep.subr.mxu1 %v19145_v33 }
 0x17f   :  { %13452 = vmatpush3.msra.mxu0 %v15950_v63  ;;  %13445 = vmatpush3.msra.mxu1 %v15945_v62 }
 0x180   :  { %13453 = vmatprep.subr.mxu0 %v19145_v33  ;;  %13446 = vmatprep.subr.mxu1 %v19145_v33 }
 0x181   :  { %13454 = vmatpush3.msra.mxu0 %v15965_v3  ;;  %13447 = vmatpush3.msra.mxu1 %v15959_v2 }
 0x182   :  { %13455 = vmatprep.subr.mxu0 %v19145_v33  ;;  %13448 = vmatprep.mubr.msk.f32.mxu1 %vm15571_vm0, %v19145_v33 }
 0x183   :  { %13456 = vmatpush3.msra.mxu0 %v15977_v5  ;;  %13449 = vmatmul.mubr.msk.f32.vlgmr.msra.gmra.mxu1 %vm1041_vm1, %v16305_v36 }
 0x184   :  { %13457 = vmatprep.subr.mxu0 %v19145_v33  ;;  %13459 = vmatprep.mubr.msk.f32.mxu0 %vm15571_vm0, %v19145_v33 }
 0x185   :  { %13458 = vmatpush3.msra.mxu0 %v15987_v7  ;;  %13462 = vmatprep.subr.mxu1 %v19145_v33 }
 0x186   :  { %13460 = vmatmul.mubr.msk.f32.vlgmr.msra.gmra.mxu0 %vm1041_vm1, %v16305_v36  ;;  %13463 = vmatpush3.msra.mxu1 %v15787_v41 }
 0x187   :  { %13473 = vmatprep.subr.mxu0 %v19145_v33  ;;  %13464 = vmatprep.subr.mxu1 %v19145_v33 }
 0x188   :  { %13474 = vmatpush3.msra.mxu0 %v15802_v43  ;;  %13465 = vmatpush3.msra.mxu1 %v15795_v42 }
 0x189   :  { %13475 = vmatprep.subr.mxu0 %v19145_v33  ;;  %13466 = vmatprep.subr.mxu1 %v19145_v33 }
 0x18a   :  { %13476 = vmatpush3.msra.mxu0 %v15819_v45  ;;  %13467 = vmatpush3.msra.mxu1 %v15812_v44 }
 0x18b   :  { %13477 = vmatprep.subr.mxu0 %v19145_v33  ;;  %13468 = vmatprep.subr.mxu1 %v19145_v33 }
 0x18c   :  { %13478 = vmatpush3.msra.mxu0 %v15840_v48  ;;  %13469 = vmatpush3.msra.mxu1 %v15833_v47 }
 0x18d   :  { %13479 = vmatprep.subr.mxu0 %v19145_v33  ;;  %13470 = vmatprep.mubr.msk.f32.mxu1 %vm15571_vm0, %v19145_v33 }
 0x18e   :  { %13480 = vmatpush3.msra.mxu0 %v15855_v50  ;;  %13481 = vmatprep.mubr.msk.f32.mxu0 %vm15571_vm0, %v19145_v33 }
 0x18f   :  { %13484 = vmatprep.subr.mxu1 %v19145_v33  ;;  %13495 = vmatprep.subr.mxu0 %v19145_v33 }
 0x232   :  { %v1602_v41 = vpop.f32.mrf.mxu1  ;;  %v1672_v42 = vpop.f32.mrf.mxu0 }
 0x233   :  { %v1746_v43 = vadd.f32 %v1602_v41, %v16073_v27  ;;  %v1753_v12 = vadd.f32 %v1672_v42, %v16081_v32 }
 0x234   :  { %v13406_v44 = vpop.f32.mrf.mxu1  ;;  %v13417_v46 = vpop.f32.mrf.mxu0 }
 0x235   :  { %v12179_v61 = vmul.f32 -1.442695, %v1746_v43  ;;  %v12180_v38 = vmul.f32 -1.442695, %v1753_v12 }
 0x237   :  { %14842 = vpow2.f32 %v12179_v61 }
 0x238   :  { %14844 = vpow2.f32 %v12180_v38 }
 0x23a   :  { %v1742_v13 = vpop.f32.mrf.mxu1 }
 0x23c   :  { %v13428_v15 = vpop.f32.mrf.mxu1 }
 0x23e   :  { %v1836_v39 = vpop.f32.mrf.mxu0 }
 0x23f   :  { %v1980_v21 = vadd.f32 %v1836_v39, %v16141_v49  ;;  %v1743_v49 = vadd.f32 %v16265_v24, %v1742_v13 }
 0x240   :  { %v13439_v30 = vpop.f32.mrf.mxu0 }
 0x241   :  { %v12184_v0 = vmul.f32 -1.442695, %v1980_v21 }
 0x243   :  { %14846 = vpow2.f32 %v12184_v0  ;;  %v1906_v9 = vpop.f32.mrf.mxu1 }
 0x244   :  { %v14843_v29 = vpop.eup %14842  ;;  %v1987_v27 = vadd.f32 %v1906_v9, %v16201_v14  ;;  %v2004_v9 = vpop.permute.xlu1 %2003 }
 0x245   :  { %v1750_v18 = vadd.f32 1.0, %v14843_v29  ;;  %v13450_v11 = vpop.f32.mrf.mxu1  ;;  %v14845_v17 = vpop.eup %14844  ;;  %vm2005_vm3 = vcmp.eq.s32.totalorder %v2004_v9, 1 }
 0x246   :  { %v1976_v25 = vpop.f32.mrf.mxu0  ;;  %v12185_v32 = vmul.f32 -1.442695, %v1987_v27  ;;  %v1757_v42 = vadd.f32 1.0, %v14845_v17 }
 0x247   :  { %14848 = vrcp.f32 %v1750_v18  ;;  %v1977_v15 = vadd.f32 %v16270_v35, %v1976_v25 }
 0x248   :  { %v13461_v6 = vpop.f32.mrf.mxu0  ;;  %14850 = vpow2.f32 %v12185_v32 }
 0x250   :  { %v14847_v41 = vpop.eup %14846 }
 0x251   :  { %v1984_v43 = vadd.f32 1.0, %v14847_v41  ;;  %v748_v41 = vadd.f32 %v16135_v34, %v16165_v16 }
 0x253   :  { %14852 = vrcp.f32 %v1984_v43 }
 0x254   :  { %v14849_v44 = vpop.eup %14848  ;;  %14854 = vrcp.f32 %v1757_v42 }
 0x255   :  { %v1760_v46 = vmul.f32 %v14849_v44, %v1743_v49  ;;  %v14851_v14 = vpop.eup %14850  ;;  %v864_v44 = vadd.f32 %v16186_v1, %v16224_v10  ;;  %v608_v1 = vadd.f32 %v16121_v22, %v16151_v23 }
 0x256   :  { %v1991_v12 = vadd.f32 1.0, %v14851_v14 }
 0x257   :  { %v1761_v61 = vadd.f32 %v1760_v46, %v16131_v31 }
 0x259   :  { %14856 = vtanh.f32 %v1761_v61 }
 0x25a   :  { %14858 = vrcp.f32 %v1991_v12 }
 0x260   :  { %v14853_v38 = vpop.eup %14852 }
 0x261   :  { %v1994_v39 = vmul.f32 %v14853_v38, %v1977_v15  ;;  %v14855_v21 = vpop.eup %14854 }
 0x262   :  { %v1763_v0 = vsub.f32 1.0, %v14855_v21  ;;  %v1765_v18 = vmul.f32 %v14855_v21, %v16275_v40 }
 0x263   :  { %v1995_v30 = vadd.f32 %v1994_v39, %v16212_v8 }
 0x265   :  { %14860 = vtanh.f32 %v1995_v30 }
 0x266   :  { %v14857_v13 = vpop.eup %14856 }
 0x267   :  { %v1764_v29 = vmul.f32 %v14857_v13, %v1763_v0  ;;  %v14859_v8 = vpop.eup %14858 }
 0x268   :  { %v1997_v25 = vsub.f32 1.0, %v14859_v8 }
 0x269   :  { %v1766_v31 = vadd.f32 %v1765_v18, %v1764_v29 }
 0x26b   :  { %v16361_v27 = vsel %vm2005_vm3, %v1766_v31, %v16275_v40  ;;  %v2013_v11 = vsel %vm2005_vm3, %v1766_v31, 0.0 }
 0x26c   :  { %13471 = vmatmul.mubr.msk.f32.vlgmr.msra.gmra.mxu1 %vm1041_vm1, %v16361_v27  ;;  %13482 = vmatmul.mubr.msk.f32.vlgmr.msra.gmra.mxu0 %vm1041_vm1, %v16361_v27 }
 0x26d   :  { %13485 = vmatpush3.msra.mxu1 %v15862_v51  ;;  %13496 = vmatpush3.msra.mxu0 %v15878_v53 }
 0x26e   :  { %13486 = vmatprep.subr.mxu1 %v19145_v33  ;;  %13497 = vmatprep.subr.mxu0 %v19145_v33 }
 0x26f   :  { %13487 = vmatpush3.msra.mxu1 %v15870_v52  ;;  %13498 = vmatpush3.msra.mxu0 %v15892_v55  ;;  %v1999_v52 = vmul.f32 %v14859_v8, %v16305_v36 }
 0x270   :  { %13488 = vmatprep.subr.mxu1 %v19145_v33  ;;  %13499 = vmatprep.subr.mxu0 %v19145_v33 }
 0x271   :  { %13489 = vmatpush3.msra.mxu1 %v15885_v54  ;;  %13492 = vmatprep.mubr.msk.f32.mxu1 %vm15571_vm0, %v19145_v33  ;;  %v2010_v54 = vpop.permute.xlu1 %2009 }
 0x272   :  { %v14861_v51 = vpop.eup %14860  ;;  %13490 = vmatprep.subr.mxu1 %v19145_v33  ;;  %13500 = vmatpush3.msra.mxu0 %v15906_v57  ;;  %vm2011_vm4 = vcmp.eq.s32.totalorder %v2010_v54, 1  ;;  %v2488_v54 = vpop.permute.xlu0 %2487 }
 0x273   :  { %v1998_v53 = vmul.f32 %v14861_v51, %v1997_v25  ;;  %13491 = vmatpush3.msra.mxu1 %v15899_v56  ;;  %13501 = vmatprep.subr.mxu0 %v19145_v33  ;;  %vm2489_vm5 = vcmp.eq.s32.totalorder %v2488_v54, 1  ;;  %v19149_v54 = vld [vmem:[#allocation42_spill] sm:$0xff] }
 0x274   :  { %13493 = vmatmul.mubr.msk.f32.vlgmr.msra.gmra.mxu1 %vm1041_vm1, %v16361_v27  ;;  %13506 = vmatprep.subr.mxu1 %v19145_v33 }
 0x275   :  { %v2000_v55 = vadd.f32 %v1999_v52, %v1998_v53  ;;  %13502 = vmatpush3.msra.mxu0 %v15923_v59  ;;  %13507 = vmatpush3.msra.mxu1 %v15915_v58  ;;  %v16423_v58 = vld [vmem:[%s19058_s9 + $0x18] sm:$0xff] }
 0x276   :  { %13503 = vmatprep.mubr.msk.f32.mxu0 %vm15571_vm0, %v19145_v33  ;;  %13508 = vmatprep.subr.mxu1 %v19145_v33  ;;  %v16431_v59 = vld [vmem:[%s19058_s9 + $0x38] sm:$0xff] }
 0x277   :  { %v16392_v56 = vsel %vm2011_vm4, %v2000_v55, %v16305_v36  ;;  %v2014_v57 = vsel %vm2011_vm4, %v2000_v55, 0.0  ;;  %13517 = vmatprep.subr.mxu0 %v19145_v33  ;;  %13509 = vmatpush3.msra.mxu1 %v15932_v60  ;;  %v16437_v60 = vld [vmem:[%s19058_s9 + $0x10] sm:$0xff] }
 0x278   :  { %v16396_v6 = vadd.f32 %v2014_v57, %v2013_v11  ;;  %13504 = vmatmul.mubr.msk.f32.vlgmr.msra.gmra.mxu0 %vm1041_vm1, %v16392_v56  ;;  %13510 = vmatprep.subr.mxu1 %v19145_v33  ;;  %v980_v11 = vadd.f32 %v16205_v19, %v16236_v26  ;;  %v16486_v19 = vld [vmem:[%s19058_s9 + $0x58] sm:$0xff] }
 0x279   :  { %13518 = vmatpush3.msra.mxu0 %v15950_v63  ;;  %13511 = vmatpush3.msra.mxu1 %v15945_v62  ;;  %v16446_v62 = vld [vmem:[%s19058_s9 + $0x8] sm:$0xff]  ;;  %v16492_v26 = vld [vmem:[%s19058_s9 + $0x78] sm:$0xff] }
 0x27a   :  { %13519 = vmatprep.subr.mxu0 %v19145_v33  ;;  %13512 = vmatprep.subr.mxu1 %v19145_v33 }
 0x27b   :  { %13520 = vmatpush3.msra.mxu0 %v15965_v3  ;;  %13513 = vmatpush3.msra.mxu1 %v15959_v2 }
 0x27c   :  { %13521 = vmatprep.subr.mxu0 %v19145_v33  ;;  %13514 = vmatprep.mubr.msk.f32.mxu1 %vm15571_vm0, %v19145_v33 }
 0x27d   :  { %13522 = vmatpush3.msra.mxu0 %v15977_v5  ;;  %13515 = vmatmul.mubr.msk.f32.vlgmr.msra.gmra.mxu1 %vm1041_vm1, %v16392_v56 }
 0x27e   :  { %13523 = vmatprep.subr.mxu0 %v19145_v33  ;;  %13525 = vmatprep.mubr.msk.f32.mxu0 %vm15571_vm0, %v19145_v33 }
 0x27f   :  { %13524 = vmatpush3.msra.mxu0 %v15987_v7  ;;  %13528 = vmatprep.subr.mxu1 %v19145_v33  ;;  %v492_v7 = vadd.f32 %v16075_v28, %v16103_v4 }
 0x280   :  { %13526 = vmatmul.mubr.msk.f32.vlgmr.msra.gmra.mxu0 %vm1041_vm1, %v16392_v56  ;;  %13529 = vmatpush3.msra.mxu1 %v16423_v58 }
 0x281   :  { %13539 = vmatprep.subr.mxu0 %v19145_v33  ;;  %13530 = vmatprep.subr.mxu1 %v19145_v33 }
 0x282   :  { %13540 = vmatpush3.msra.mxu0 %v16431_v59  ;;  %13531 = vmatpush3.msra.mxu1 %v16437_v60 }
 0x283   :  { %13541 = vmatprep.subr.mxu0 %v19145_v33  ;;  %13532 = vmatprep.subr.mxu1 %v19145_v33 }
 0x284   :  { %13542 = vmatpush3.msra.mxu0 %v15819_v45  ;;  %13533 = vmatpush3.msra.mxu1 %v16446_v62  ;;  %v376_v45 = vadd.f32 %v16060_v20, %v16091_v37 }
 0x285   :  { %13543 = vmatprep.subr.mxu0 %v19145_v33  ;;  %13534 = vmatprep.subr.mxu1 %v19145_v33 }
 0x286   :  { %13544 = vmatpush3.msra.mxu0 %v15840_v48  ;;  %13535 = vmatpush3.msra.mxu1 %v15833_v47 }
 0x287   :  { %13545 = vmatprep.subr.mxu0 %v19145_v33  ;;  %13536 = vmatprep.mubr.msk.f32.mxu1 %vm15571_vm0, %v19145_v33 }
 0x288   :  { %13546 = vmatpush3.msra.mxu0 %v15855_v50  ;;  %13547 = vmatprep.mubr.msk.f32.mxu0 %vm15571_vm0, %v19145_v33 }
 0x289   :  { %13550 = vmatprep.subr.mxu1 %v19145_v33  ;;  %13561 = vmatprep.subr.mxu0 %v19145_v33 }
 0x32c   :  { %v2086_v48 = vpop.f32.mrf.mxu1  ;;  %v2156_v63 = vpop.f32.mrf.mxu0 }
 0x32d   :  { %v2230_v47 = vadd.f32 %v2086_v48, %v376_v45  ;;  %v2237_v50 = vadd.f32 %v2156_v63, %v492_v7  ;;  %v16500_v48 = vld [vmem:[%s19058_s9 + $0x50] sm:$0xff]  ;;  %v16529_v7 = vld [vmem:[%s19058_s9 + $0x40] sm:$0xff] }
 0x32e   :  { %v13472_v2 = vpop.f32.mrf.mxu1  ;;  %v13483_v3 = vpop.f32.mrf.mxu0  ;;  %v16506_v63 = vld [vmem:[%s19058_s9 + $0x70] sm:$0xff] }
 0x32f   :  { %v12189_v5 = vmul.f32 -1.442695, %v2230_v47  ;;  %v12190_v42 = vmul.f32 -1.442695, %v2237_v50  ;;  %v16514_v47 = vld [vmem:[%s19058_s9 + $0x48] sm:$0xff] }
 0x331   :  { %14862 = vpow2.f32 %v12189_v5  ;;  %v16523_v5 = vld [vmem:[%s19058_s9 + $0x68] sm:$0xff] }
 0x332   :  { %14864 = vpow2.f32 %v12190_v42  ;;  %v16546_v42 = vld [vmem:[%s19058_s9 + $0x98] sm:$0xff] }
 0x334   :  { %v2226_v32 = vpop.f32.mrf.mxu1 }
 0x335   :  { %v2227_v30 = vadd.f32 %v16265_v24, %v2226_v32 }
 0x336   :  { %v13494_v17 = vpop.f32.mrf.mxu1 }
 0x337   :  { %v2494_v17 = vpop.permute.xlu1 %2493 }
 0x338   :  { %v2320_v43 = vpop.f32.mrf.mxu0  ;;  %vm2495_vm6 = vcmp.eq.s32.totalorder %v2494_v17, 1 }
 0x339   :  { %v2464_v49 = vadd.f32 %v2320_v43, %v748_v41  ;;  %v16540_v41 = vld [vmem:[%s19058_s9 + $0x60] sm:$0xff] }
 0x33a   :  { %v13505_v20 = vpop.f32.mrf.mxu0 }
 0x33b   :  { %v12194_v37 = vmul.f32 -1.442695, %v2464_v49 }
 0x33d   :  { %14866 = vpow2.f32 %v12194_v37  ;;  %v2390_v46 = vpop.f32.mrf.mxu1  ;;  %v16559_v37 = vld [vmem:[%s19058_s9 + $0x90] sm:$0xff] }
 0x33e   :  { %v14863_v61 = vpop.eup %14862  ;;  %v2471_v4 = vadd.f32 %v2390_v46, %v864_v44  ;;  %v16576_v46 = vld [vmem:[%s19058_s9 + $0x88] sm:$0xff] }
 0x33f   :  { %v2234_v28 = vadd.f32 1.0, %v14863_v61  ;;  %v13516_v14 = vpop.f32.mrf.mxu1  ;;  %v14865_v16 = vpop.eup %14864  ;;  %v16584_v61 = vld [vmem:[%s19058_s9 + $0xb0] sm:$0xff] }
 0x340   :  { %v2460_v12 = vpop.f32.mrf.mxu0  ;;  %v12195_v38 = vmul.f32 -1.442695, %v2471_v4  ;;  %v2241_v39 = vadd.f32 1.0, %v14865_v16  ;;  %v16599_v4 = vld [vmem:[%s19058_s9 + $0xa8] sm:$0xff]  ;;  %v16610_v14 = vld [vmem:[%s19058_s9 + $0xa0] sm:$0xff] }
 0x341   :  { %14868 = vrcp.f32 %v2234_v28  ;;  %v2461_v18 = vadd.f32 %v16270_v35, %v2460_v12  ;;  %v16590_v28 = vld [vmem:[%s19058_s9 + $0x80] sm:$0xff]  ;;  %v16626_v12 = vld [vmem:[%s19058_s9 + $0x30] sm:$0xff] }
 0x342   :  { %v13527_v15 = vpop.f32.mrf.mxu0  ;;  %14870 = vpow2.f32 %v12195_v38  ;;  %v16641_v38 = vld [vmem:[%s19058_s9] sm:$0xff] }
 0x343   :  { %v16635_v15 = vld [vmem:[%s19058_s9 + $0x28] sm:$0xff]  ;;  %v16650_v16 = vld [vmem:[%s19058_s9 + $0x20] sm:$0xff] }
 0x34a   :  { %v14867_v34 = vpop.eup %14866 }
 0x34b   :  { %v2468_v21 = vadd.f32 1.0, %v14867_v34 }
 0x34d   :  { %14872 = vrcp.f32 %v2468_v21  ;;  %v19146_v21 = vld [vmem:[#allocation18_spill] sm:$0xff] }
 0x34e   :  { %v14869_v0 = vpop.eup %14868  ;;  %14874 = vrcp.f32 %v2241_v39 }
 0x34f   :  { %v2244_v10 = vmul.f32 %v14869_v0, %v2227_v30  ;;  %v14871_v9 = vpop.eup %14870 }
 0x350   :  { %v2475_v29 = vadd.f32 1.0, %v14871_v9 }
 0x351   :  { %v2245_v13 = vadd.f32 %v2244_v10, %v608_v1 }
 0x353   :  { %14876 = vtanh.f32 %v2245_v13  ;;  %v19147_v13 = vld [vmem:[#allocation19_spill] sm:$0xff] }
 0x354   :  { %14878 = vrcp.f32 %v2475_v29 }
 0x35a   :  { %v14873_v31 = vpop.eup %14872 }
 0x35b   :  { %v2478_v8 = vmul.f32 %v14873_v31, %v2461_v18  ;;  %v14875_v25 = vpop.eup %14874 }
 0x35c   :  { %v2247_v53 = vsub.f32 1.0, %v14875_v25  ;;  %v2249_v23 = vmul.f32 %v14875_v25, %v16361_v27 }
 0x35d   :  { %v2479_v51 = vadd.f32 %v2478_v8, %v980_v11  ;;  %v19148_v8 = vld [vmem:[#allocation29_spill] sm:$0xff] }
 0x35f   :  { %14880 = vtanh.f32 %v2479_v51 }
 0x360   :  { %v14877_v52 = vpop.eup %14876 }
 0x361   :  { %v2248_v22 = vmul.f32 %v14877_v52, %v2247_v53 }
 0x363   :  { %v2250_v55 = vadd.f32 %v2249_v23, %v2248_v22 }
 0x365   :  { %v16477_v57 = vsel %vm2489_vm5, %v2250_v55, %v16361_v27  ;;  %v2497_v45 = vsel %vm2489_vm5, %v2250_v55, 0.0  ;;  %v14879_v27 = vpop.eup %14878 }
 0x366   :  { %13537 = vmatmul.mubr.msk.f32.vlgmr.msra.gmra.mxu1 %vm1041_vm1, %v16477_v57  ;;  %13548 = vmatmul.mubr.msk.f32.vlgmr.msra.gmra.mxu0 %vm1041_vm1, %v16477_v57  ;;  %v2481_v2 = vsub.f32 1.0, %v14879_v27  ;;  %v2483_v32 = vmul.f32 %v14879_v27, %v16392_v56 }
 0x367   :  { %13551 = vmatpush3.msra.mxu1 %v16486_v19  ;;  %13562 = vmatpush3.msra.mxu0 %v16492_v26 }
 0x368   :  { %13552 = vmatprep.subr.mxu1 %v19145_v33  ;;  %13563 = vmatprep.subr.mxu0 %v19145_v33 }
 0x369   :  { %13553 = vmatpush3.msra.mxu1 %v16500_v48  ;;  %13564 = vmatpush3.msra.mxu0 %v16506_v63 }
 0x36a   :  { %13554 = vmatprep.subr.mxu1 %v19145_v33  ;;  %13565 = vmatprep.subr.mxu0 %v19145_v33 }
 0x36b   :  { %13555 = vmatpush3.msra.mxu1 %v16514_v47  ;;  %13558 = vmatprep.mubr.msk.f32.mxu1 %vm15571_vm0, %v19145_v33 }
 0x36c   :  { %v14881_v3 = vpop.eup %14880  ;;  %13556 = vmatprep.subr.mxu1 %v19145_v33  ;;  %13566 = vmatpush3.msra.mxu0 %v16523_v5 }
 0x36d   :  { %13557 = vmatpush3.msra.mxu1 %v16529_v7  ;;  %13567 = vmatprep.subr.mxu0 %v19145_v33  ;;  %v2482_v50 = vmul.f32 %v14881_v3, %v2481_v2 }
 0x36e   :  { %13559 = vmatmul.mubr.msk.f32.vlgmr.msra.gmra.mxu1 %vm1041_vm1, %v16477_v57  ;;  %13572 = vmatprep.subr.mxu1 %v19145_v33 }
 0x36f   :  { %13568 = vmatpush3.msra.mxu0 %v16540_v41  ;;  %13573 = vmatpush3.msra.mxu1 %v16546_v42  ;;  %v2484_v43 = vadd.f32 %v2483_v32, %v2482_v50 }
 0x370   :  { %13569 = vmatprep.mubr.msk.f32.mxu0 %vm15571_vm0, %v19145_v33  ;;  %13574 = vmatprep.subr.mxu1 %v19145_v33 }
 0x371   :  { %13583 = vmatprep.subr.mxu0 %v19145_v33  ;;  %v16554_v49 = vsel %vm2495_vm6, %v2484_v43, %v16392_v56  ;;  %v2498_v20 = vsel %vm2495_vm6, %v2484_v43, 0.0  ;;  %13575 = vmatpush3.msra.mxu1 %v16559_v37  ;;  %v16570_v56 = vld [vmem:[%s19058_s9 + $0xb8] sm:$0xff] }
 0x372   :  { %v16562_v44 = vadd.f32 %v2498_v20, %v2497_v45  ;;  %13570 = vmatmul.mubr.msk.f32.vlgmr.msra.gmra.mxu0 %vm1041_vm1, %v16554_v49  ;;  %13576 = vmatprep.subr.mxu1 %v19145_v33 }
 0x373   :  { %13584 = vmatpush3.msra.mxu0 %v16570_v56  ;;  %13577 = vmatpush3.msra.mxu1 %v16576_v46 }
 0x374   :  { %13585 = vmatprep.subr.mxu0 %v19145_v33  ;;  %13578 = vmatprep.subr.mxu1 %v19145_v33 }
 0x375   :  { %13586 = vmatpush3.msra.mxu0 %v16584_v61  ;;  %13579 = vmatpush3.msra.mxu1 %v16590_v28 }
 0x376   :  { %13587 = vmatprep.subr.mxu0 %v19145_v33  ;;  %13580 = vmatprep.mubr.msk.f32.mxu1 %vm15571_vm0, %v19145_v33 }
 0x377   :  { %13588 = vmatpush3.msra.mxu0 %v16599_v4  ;;  %13581 = vmatmul.mubr.msk.f32.vlgmr.msra.gmra.mxu1 %vm1041_vm1, %v16554_v49 }
 0x378   :  { %13589 = vmatprep.subr.mxu0 %v19145_v33  ;;  %13591 = vmatprep.mubr.msk.f32.mxu0 %vm15571_vm0, %v19145_v33 }
 0x379   :  { %13590 = vmatpush3.msra.mxu0 %v16610_v14  ;;  %13594 = vmatprep.subr.mxu1 %v19145_v33 }
 0x37a   :  { %13592 = vmatmul.mubr.msk.f32.vlgmr.msra.gmra.mxu0 %vm1041_vm1, %v16554_v49  ;;  %13595 = vmatpush3.msra.mxu1 %v16423_v58 }
 0x37b   :  { %13605 = vmatprep.subr.mxu0 %v19145_v33  ;;  %13596 = vmatprep.subr.mxu1 %v19145_v33 }
 0x37c   :  { %13606 = vmatpush3.msra.mxu0 %v16431_v59  ;;  %13597 = vmatpush3.msra.mxu1 %v16437_v60 }
 0x37d   :  { %13607 = vmatprep.subr.mxu0 %v19145_v33  ;;  %13598 = vmatprep.subr.mxu1 %v19145_v33 }
 0x37e   :  { %13608 = vmatpush3.msra.mxu0 %v16626_v12  ;;  %13599 = vmatpush3.msra.mxu1 %v16446_v62 }
 0x37f   :  { %13609 = vmatprep.subr.mxu0 %v19145_v33  ;;  %13600 = vmatprep.subr.mxu1 %v19145_v33 }
 0x380   :  { %13610 = vmatpush3.msra.mxu0 %v16635_v15  ;;  %13601 = vmatpush3.msra.mxu1 %v16641_v38 }
 0x381   :  { %13611 = vmatprep.subr.mxu0 %v19145_v33  ;;  %13602 = vmatprep.mubr.msk.f32.mxu1 %vm15571_vm0, %v19145_v33 }
 0x382   :  { %13612 = vmatpush3.msra.mxu0 %v16650_v16  ;;  %13613 = vmatprep.mubr.msk.f32.mxu0 %vm15571_vm0, %v19145_v33 }
 0x383   :  { %13616 = vmatprep.subr.mxu1 %v19145_v33  ;;  %13627 = vmatprep.subr.mxu0 %v19145_v33 }
 0x426   :  { %v2570_v34 = vpop.f32.mrf.mxu1  ;;  %v2640_v39 = vpop.f32.mrf.mxu0 }
 0x427   :  { %v2714_v30 = vadd.f32 %v2570_v34, %v19146_v21  ;;  %v2721_v9 = vadd.f32 %v2640_v39, %v19147_v13  ;;  %v19150_v21 = vld [vmem:[#allocation28_spill] sm:$0xff] }
 0x428   :  { %v13538_v0 = vpop.f32.mrf.mxu1  ;;  %v13549_v1 = vpop.f32.mrf.mxu0 }
 0x429   :  { %v12199_v10 = vmul.f32 -1.442695, %v2714_v30  ;;  %v12200_v31 = vmul.f32 -1.442695, %v2721_v9 }
 0x42b   :  { %14882 = vpow2.f32 %v12199_v10 }
 0x42c   :  { %14884 = vpow2.f32 %v12200_v31  ;;  %v19151_v31 = vld [vmem:[#allocation43_spill] sm:$0xff] }
 0x42e   :  { %v2710_v29 = vpop.f32.mrf.mxu1 }
 0x42f   :  { %v2711_v20 = vadd.f32 %v16265_v24, %v2710_v29 }
 0x430   :  { %v13560_v18 = vpop.f32.mrf.mxu1 }
 0x432   :  { %v2804_v11 = vpop.f32.mrf.mxu0 }
 0x433   :  { %v2948_v25 = vadd.f32 %v2804_v11, %v19148_v8 }
 0x434   :  { %v13571_v51 = vpop.f32.mrf.mxu0 }
 0x435   :  { %v12204_v53 = vmul.f32 -1.442695, %v2948_v25  ;;  %v2972_v51 = vpop.permute.xlu0 %2971 }
 0x436   :  { %vm2973_vm15 = vcmp.eq.s32.totalorder %v2972_v51, 1 }
 0x437   :  { %14886 = vpow2.f32 %v12204_v53  ;;  %v2874_v52 = vpop.f32.mrf.mxu1 }
 0x438   :  { %v14883_v22 = vpop.eup %14882  ;;  %v2955_v55 = vadd.f32 %v2874_v52, %v19149_v54 }
 0x439   :  { %v2718_v23 = vadd.f32 1.0, %v14883_v22  ;;  %v13582_v45 = vpop.f32.mrf.mxu1  ;;  %v14885_v50 = vpop.eup %14884 }
 0x43a   :  { %v2944_v27 = vpop.f32.mrf.mxu0  ;;  %v12205_v3 = vmul.f32 -1.442695, %v2955_v55  ;;  %v2725_v17 = vadd.f32 1.0, %v14885_v50  ;;  %v2978_v45 = vpop.permute.xlu1 %2977 }
 0x43b   :  { %14888 = vrcp.f32 %v2718_v23  ;;  %v2945_v10 = vadd.f32 %v16270_v35, %v2944_v27  ;;  %vm2979_vm2 = vcmp.eq.s32.totalorder %v2978_v45, 1 }
 0x43c   :  { %v13593_v2 = vpop.f32.mrf.mxu0  ;;  %14890 = vpow2.f32 %v12205_v3 }
 0x444   :  { %v14887_v32 = vpop.eup %14886 }
 0x445   :  { %v2952_v43 = vadd.f32 1.0, %v14887_v32  ;;  %v19152_v32 = vld [vmem:[#allocation21_spill] sm:$0xff] }
 0x447   :  { %14892 = vrcp.f32 %v2952_v43 }
 0x448   :  { %v14889_v34 = vpop.eup %14888  ;;  %14894 = vrcp.f32 %v2725_v17 }
 0x449   :  { %v2728_v39 = vmul.f32 %v14889_v34, %v2711_v20  ;;  %v14891_v0 = vpop.eup %14890 }
 0x44a   :  { %v2959_v1 = vadd.f32 1.0, %v14891_v0  ;;  %v16751_v0 = vld [vmem:[#allocation7 + $0x1] ss:$0 sm:$0xff] }
 0x44b   :  { %v2729_v30 = vadd.f32 %v2728_v39, %v19150_v21 }
 0x44d   :  { %14896 = vtanh.f32 %v2729_v30 }
 0x44e   :  { %14898 = vrcp.f32 %v2959_v1  ;;  %v19153_v1 = vld [vmem:[#allocation24_spill] sm:$0xff] }
 0x454   :  { %v14893_v13 = vpop.eup %14892 }
 0x455   :  { %v2962_v9 = vmul.f32 %v14893_v13, %v2945_v10  ;;  %v14895_v18 = vpop.eup %14894  ;;  %v502_v10 = vadd.f32 %v16751_v0, %v19153_v1 }
 0x456   :  { %v2731_v8 = vsub.f32 1.0, %v14895_v18  ;;  %v2733_v25 = vmul.f32 %v14895_v18, %v16477_v57 }
 0x457   :  { %v2963_v11 = vadd.f32 %v2962_v9, %v19151_v31  ;;  %v16755_v31 = vld [vmem:[#allocation7 + $0x4] ss:$0 sm:$0xff] }
 0x459   :  { %14900 = vtanh.f32 %v2963_v11  ;;  %v19154_v11 = vld [vmem:[#allocation36_spill] sm:$0xff] }
 0x45a   :  { %v14897_v24 = vpop.eup %14896 }
 0x45b   :  { %v2732_v29 = vmul.f32 %v14897_v24, %v2731_v8  ;;  %v14899_v35 = vpop.eup %14898  ;;  %v758_v8 = vadd.f32 %v16755_v31, %v19154_v11 }
 0x45c   :  { %v2967_v55 = vmul.f32 %v14899_v35, %v16554_v49 }
 0x45d   :  { %v2734_v53 = vadd.f32 %v2733_v25, %v2732_v29 }
 0x45f   :  { %v16667_v52 = vsel %vm2973_vm15, %v2734_v53, %v16477_v57  ;;  %v2981_v22 = vsel %vm2973_vm15, %v2734_v53, 0.0  ;;  %v2965_v57 = vsub.f32 1.0, %v14899_v35  ;;  %v19155_v35 = vld [vmem:[#allocation45_spill] sm:$0xff] }
 0x460   :  { %13603 = vmatmul.mubr.msk.f32.vlgmr.msra.gmra.mxu1 %vm1041_vm1, %v16667_v52  ;;  %13614 = vmatmul.mubr.msk.f32.vlgmr.msra.gmra.mxu0 %vm1041_vm1, %v16667_v52 }
 0x461   :  { %13617 = vmatpush3.msra.mxu1 %v16486_v19  ;;  %13628 = vmatpush3.msra.mxu0 %v16492_v26 }
 0x462   :  { %13618 = vmatprep.subr.mxu1 %v19145_v33  ;;  %13629 = vmatprep.subr.mxu0 %v19145_v33 }
 0x463   :  { %13619 = vmatpush3.msra.mxu1 %v16500_v48  ;;  %13630 = vmatpush3.msra.mxu0 %v16506_v63 }
 0x464   :  { %13620 = vmatprep.subr.mxu1 %v19145_v33  ;;  %13631 = vmatprep.subr.mxu0 %v19145_v33 }
 0x465   :  { %13621 = vmatpush3.msra.mxu1 %v16514_v47  ;;  %13624 = vmatprep.mubr.msk.f32.mxu1 %vm15571_vm0, %v19145_v33 }
 0x466   :  { %v14901_v23 = vpop.eup %14900  ;;  %13622 = vmatprep.subr.mxu1 %v19145_v33  ;;  %13632 = vmatpush3.msra.mxu0 %v16523_v5 }
 0x467   :  { %13623 = vmatpush3.msra.mxu1 %v16529_v7  ;;  %13633 = vmatprep.subr.mxu0 %v19145_v33  ;;  %v2966_v54 = vmul.f32 %v14901_v23, %v2965_v57 }
 0x468   :  { %13625 = vmatmul.mubr.msk.f32.vlgmr.msra.gmra.mxu1 %vm1041_vm1, %v16667_v52  ;;  %13638 = vmatprep.subr.mxu1 %v19145_v33 }
 0x469   :  { %13634 = vmatpush3.msra.mxu0 %v16540_v41  ;;  %13639 = vmatpush3.msra.mxu1 %v16546_v42  ;;  %v2968_v27 = vadd.f32 %v2967_v55, %v2966_v54 }
 0x46a   :  { %13635 = vmatprep.mubr.msk.f32.mxu0 %vm15571_vm0, %v19145_v33  ;;  %13640 = vmatprep.subr.mxu1 %v19145_v33 }
 0x46b   :  { %13649 = vmatprep.subr.mxu0 %v19145_v33  ;;  %v16699_v2 = vsel %vm2979_vm2, %v2968_v27, %v16554_v49  ;;  %v2982_v3 = vsel %vm2979_vm2, %v2968_v27, 0.0  ;;  %13641 = vmatpush3.msra.mxu1 %v16559_v37  ;;  %v16747_v49 = vld [vmem:[#allocation7] ss:$0 sm:$0xff] }
 0x46c   :  { %v16702_v50 = vadd.f32 %v2982_v3, %v2981_v22  ;;  %13636 = vmatmul.mubr.msk.f32.vlgmr.msra.gmra.mxu0 %vm1041_vm1, %v16699_v2  ;;  %13642 = vmatprep.subr.mxu1 %v19145_v33  ;;  %v386_v17 = vadd.f32 %v16747_v49, %v19152_v32  ;;  %v16759_v22 = vld [vmem:[#allocation7 + $0x5] ss:$0 sm:$0xff] }
 0x46d   :  { %13650 = vmatpush3.msra.mxu0 %v16570_v56  ;;  %13643 = vmatpush3.msra.mxu1 %v16576_v46  ;;  %v874_v57 = vadd.f32 %v16759_v22, %v19155_v35  ;;  %v16773_v35 = vld [vmem:[#allocation7 + $0x6] ss:$0 sm:$0xff] }
 0x46e   :  { %13651 = vmatprep.subr.mxu0 %v19145_v33  ;;  %13644 = vmatprep.subr.mxu1 %v19145_v33 }
 0x46f   :  { %13652 = vmatpush3.msra.mxu0 %v16584_v61  ;;  %13645 = vmatpush3.msra.mxu1 %v16590_v28 }
 0x470   :  { %13653 = vmatprep.subr.mxu0 %v19145_v33  ;;  %13646 = vmatprep.mubr.msk.f32.mxu1 %vm15571_vm0, %v19145_v33 }
 0x471   :  { %13654 = vmatpush3.msra.mxu0 %v16599_v4  ;;  %13647 = vmatmul.mubr.msk.f32.vlgmr.msra.gmra.mxu1 %vm1041_vm1, %v16699_v2 }
 0x472   :  { %13655 = vmatprep.subr.mxu0 %v19145_v33  ;;  %13657 = vmatprep.mubr.msk.f32.mxu0 %vm15571_vm0, %v19145_v33 }
 0x473   :  { %13656 = vmatpush3.msra.mxu0 %v16610_v14  ;;  %13660 = vmatprep.subr.mxu1 %v19145_v33 }
 0x474   :  { %13658 = vmatmul.mubr.msk.f32.vlgmr.msra.gmra.mxu0 %vm1041_vm1, %v16699_v2  ;;  %13661 = vmatpush3.msra.mxu1 %v16423_v58 }
 0x475   :  { %13671 = vmatprep.subr.mxu0 %v19145_v33  ;;  %13662 = vmatprep.subr.mxu1 %v19145_v33 }
 0x476   :  { %13672 = vmatpush3.msra.mxu0 %v16431_v59  ;;  %13663 = vmatpush3.msra.mxu1 %v16437_v60 }
 0x477   :  { %13673 = vmatprep.subr.mxu0 %v19145_v33  ;;  %13664 = vmatprep.subr.mxu1 %v19145_v33 }
 0x478   :  { %13674 = vmatpush3.msra.mxu0 %v16626_v12  ;;  %13665 = vmatpush3.msra.mxu1 %v16446_v62 }
 0x479   :  { %13675 = vmatprep.subr.mxu0 %v19145_v33  ;;  %13666 = vmatprep.subr.mxu1 %v19145_v33 }
 0x47a   :  { %13676 = vmatpush3.msra.mxu0 %v16635_v15  ;;  %13667 = vmatpush3.msra.mxu1 %v16641_v38 }
 0x47b   :  { %13677 = vmatprep.subr.mxu0 %v19145_v33  ;;  %13668 = vmatprep.mubr.msk.f32.mxu1 %vm15571_vm0, %v19145_v33 }
 0x47c   :  { %13678 = vmatpush3.msra.mxu0 %v16650_v16  ;;  %13679 = vmatprep.mubr.msk.f32.mxu0 %vm15571_vm0, %v19145_v33 }
 0x47d   :  { %13682 = vmatprep.subr.mxu1 %v19145_v33  ;;  %13693 = vmatprep.subr.mxu0 %v19145_v33 }
 0x520   :  { %v3054_v43 = vpop.f32.mrf.mxu1  ;;  %v3124_v20 = vpop.f32.mrf.mxu0 }
 0x521   :  { %v3198_v34 = vadd.f32 %v3054_v43, %v386_v17  ;;  %v3205_v13 = vadd.f32 %v3124_v20, %v502_v10  ;;  %v16766_v10 = vld [vmem:[#allocation7 + $0x2] ss:$0 sm:$0xff] }
 0x522   :  { %v13604_v39 = vpop.f32.mrf.mxu1  ;;  %v13615_v21 = vpop.f32.mrf.mxu0 }
 0x523   :  { %v12209_v30 = vmul.f32 -1.442695, %v3198_v34  ;;  %v12210_v24 = vmul.f32 -1.442695, %v3205_v13  ;;  %v16763_v21 = vld [vmem:[#allocation7 + $0x3] ss:$0 sm:$0xff] }
 0x524   :  { %v19156_v13 = vld [vmem:[#allocation32_spill] sm:$0xff] }
 0x525   :  { %14902 = vpow2.f32 %v12209_v30 }
 0x526   :  { %14904 = vpow2.f32 %v12210_v24 }
 0x528   :  { %v3194_v9 = vpop.f32.mrf.mxu1 }
 0x529   :  { %v3195_v30 = vadd.f32 %v16763_v21, %v3194_v9  ;;  %v19157_v9 = vld [vmem:[#allocation48_spill] sm:$0xff] }
 0x52a   :  { %v13626_v18 = vpop.f32.mrf.mxu1 }
 0x52b   :  { %v618_v18 = vadd.f32 %v16766_v10, %v19156_v13 }
 0x52c   :  { %v3288_v29 = vpop.f32.mrf.mxu0 }
 0x52d   :  { %v3432_v25 = vadd.f32 %v3288_v29, %v758_v8 }
 0x52e   :  { %v13637_v51 = vpop.f32.mrf.mxu0 }
 0x52f   :  { %v12214_v53 = vmul.f32 -1.442695, %v3432_v25  ;;  %v16770_v25 = vld [vmem:[#allocation7 + $0x7] ss:$0 sm:$0xff] }
 0x531   :  { %14906 = vpow2.f32 %v12214_v53  ;;  %v3358_v23 = vpop.f32.mrf.mxu1 }
 0x532   :  { %v14903_v54 = vpop.eup %14902  ;;  %v3439_v45 = vadd.f32 %v3358_v23, %v874_v57  ;;  %v990_v57 = vadd.f32 %v16773_v35, %v19157_v9  ;;  %v19159_v9 = vld [vmem:[#allocation22_spill] sm:$0xff] }
 0x533   :  { %v3202_v55 = vadd.f32 1.0, %v14903_v54  ;;  %v13648_v27 = vpop.f32.mrf.mxu1  ;;  %v14905_v43 = vpop.eup %14904 }
 0x534   :  { %v3428_v3 = vpop.f32.mrf.mxu0  ;;  %v12215_v17 = vmul.f32 -1.442695, %v3439_v45  ;;  %v3209_v34 = vadd.f32 1.0, %v14905_v43  ;;  %v3456_v43 = vpop.permute.xlu0 %3455 }
 0x535   :  { %14908 = vrcp.f32 %v3202_v55  ;;  %v3429_v51 = vadd.f32 %v16770_v25, %v3428_v3  ;;  %vm3457_vm3 = vcmp.eq.s32.totalorder %v3456_v43, 1 }
 0x536   :  { %v13659_v32 = vpop.f32.mrf.mxu0  ;;  %14910 = vpow2.f32 %v12215_v17 }
 0x53e   :  { %v14907_v20 = vpop.eup %14906 }
 0x53f   :  { %v3436_v39 = vadd.f32 1.0, %v14907_v20 }
 0x541   :  { %14912 = vrcp.f32 %v3436_v39 }
 0x542   :  { %v14909_v1 = vpop.eup %14908  ;;  %14914 = vrcp.f32 %v3209_v34 }
 0x543   :  { %v3212_v11 = vmul.f32 %v14909_v1, %v3195_v30  ;;  %v14911_v24 = vpop.eup %14910 }
 0x544   :  { %v3443_v29 = vadd.f32 1.0, %v14911_v24 }
 0x545   :  { %v3213_v8 = vadd.f32 %v3212_v11, %v618_v18  ;;  %v3462_v18 = vpop.permute.xlu1 %3461 }
 0x546   :  { %vm3463_vm4 = vcmp.eq.s32.totalorder %v3462_v18, 1 }
 0x547   :  { %14916 = vtanh.f32 %v3213_v8 }
 0x548   :  { %14918 = vrcp.f32 %v3443_v29 }
 0x54e   :  { %v14913_v53 = vpop.eup %14912 }
 0x54f   :  { %v3446_v23 = vmul.f32 %v14913_v53, %v3429_v51  ;;  %v14915_v54 = vpop.eup %14914 }
 0x550   :  { %v3215_v45 = vsub.f32 1.0, %v14915_v54  ;;  %v3217_v17 = vmul.f32 %v14915_v54, %v16667_v52 }
 0x551   :  { %v3447_v55 = vadd.f32 %v3446_v23, %v990_v57 }
 0x553   :  { %14920 = vtanh.f32 %v3447_v55 }
 0x554   :  { %v14917_v27 = vpop.eup %14916 }
 0x555   :  { %v3216_v32 = vmul.f32 %v14917_v27, %v3215_v45  ;;  %v14919_v39 = vpop.eup %14918  ;;  %v19160_v27 = vld [vmem:[#allocation33_spill] sm:$0xff] }
 0x556   :  { %v3451_v13 = vmul.f32 %v14919_v39, %v16699_v2 }
 0x557   :  { %v3218_v20 = vadd.f32 %v3217_v17, %v3216_v32 }
 0x559   :  { %v16779_v3 = vsel %vm3457_vm3, %v3218_v20, %v16667_v52  ;;  %v3465_v34 = vsel %vm3457_vm3, %v3218_v20, 0.0  ;;  %v3449_v52 = vsub.f32 1.0, %v14919_v39 }
 0x55a   :  { %13669 = vmatmul.mubr.msk.f32.vlgmr.msra.gmra.mxu1 %vm1041_vm1, %v16779_v3  ;;  %13680 = vmatmul.mubr.msk.f32.vlgmr.msra.gmra.mxu0 %vm1041_vm1, %v16779_v3 }
 0x55b   :  { %13683 = vmatpush3.msra.mxu1 %v16486_v19  ;;  %13694 = vmatpush3.msra.mxu0 %v16492_v26 }
 0x55c   :  { %13684 = vmatprep.subr.mxu1 %v19145_v33  ;;  %13695 = vmatprep.subr.mxu0 %v19145_v33 }
 0x55d   :  { %13685 = vmatpush3.msra.mxu1 %v16500_v48  ;;  %13696 = vmatpush3.msra.mxu0 %v16506_v63 }
 0x55e   :  { %13686 = vmatprep.subr.mxu1 %v19145_v33  ;;  %13697 = vmatprep.subr.mxu0 %v19145_v33 }
 0x55f   :  { %13687 = vmatpush3.msra.mxu1 %v16514_v47  ;;  %13690 = vmatprep.mubr.msk.f32.mxu1 %vm15571_vm0, %v19145_v33 }
 0x560   :  { %v14921_v30 = vpop.eup %14920  ;;  %13688 = vmatprep.subr.mxu1 %v19145_v33  ;;  %13698 = vmatpush3.msra.mxu0 %v16523_v5 }
 0x561   :  { %13689 = vmatpush3.msra.mxu1 %v16529_v7  ;;  %13699 = vmatprep.subr.mxu0 %v19145_v33  ;;  %v3450_v1 = vmul.f32 %v14921_v30, %v3449_v52  ;;  %v19161_v52 = vld [vmem:[#allocation44_spill] sm:$0xff] }
 0x562   :  { %13691 = vmatmul.mubr.msk.f32.vlgmr.msra.gmra.mxu1 %vm1041_vm1, %v16779_v3  ;;  %13704 = vmatprep.subr.mxu1 %v19145_v33 }
 0x563   :  { %13700 = vmatpush3.msra.mxu0 %v16540_v41  ;;  %13705 = vmatpush3.msra.mxu1 %v16546_v42  ;;  %v3452_v11 = vadd.f32 %v3451_v13, %v3450_v1 }
 0x564   :  { %13701 = vmatprep.mubr.msk.f32.mxu0 %vm15571_vm0, %v19145_v33  ;;  %13706 = vmatprep.subr.mxu1 %v19145_v33 }
 0x565   :  { %13715 = vmatprep.subr.mxu0 %v19145_v33  ;;  %v16811_v8 = vsel %vm3463_vm4, %v3452_v11, %v16699_v2  ;;  %v3466_v24 = vsel %vm3463_vm4, %v3452_v11, 0.0  ;;  %13707 = vmatpush3.msra.mxu1 %v16559_v37 }
 0x566   :  { %v16814_v29 = vadd.f32 %v3466_v24, %v3465_v34  ;;  %13702 = vmatmul.mubr.msk.f32.vlgmr.msra.gmra.mxu0 %vm1041_vm1, %v16811_v8  ;;  %13708 = vmatprep.subr.mxu1 %v19145_v33 }
 0x567   :  { %13716 = vmatpush3.msra.mxu0 %v16570_v56  ;;  %13709 = vmatpush3.msra.mxu1 %v16576_v46 }
 0x568   :  { %13717 = vmatprep.subr.mxu0 %v19145_v33  ;;  %13710 = vmatprep.subr.mxu1 %v19145_v33 }
 0x569   :  { %13718 = vmatpush3.msra.mxu0 %v16584_v61  ;;  %13711 = vmatpush3.msra.mxu1 %v16590_v28 }
 0x56a   :  { %13719 = vmatprep.subr.mxu0 %v19145_v33  ;;  %13712 = vmatprep.mubr.msk.f32.mxu1 %vm15571_vm0, %v19145_v33 }
 0x56b   :  { %13720 = vmatpush3.msra.mxu0 %v16599_v4  ;;  %13713 = vmatmul.mubr.msk.f32.vlgmr.msra.gmra.mxu1 %vm1041_vm1, %v16811_v8 }
 0x56c   :  { %13721 = vmatprep.subr.mxu0 %v19145_v33  ;;  %13723 = vmatprep.mubr.msk.f32.mxu0 %vm15571_vm0, %v19145_v33 }
 0x56d   :  { %13722 = vmatpush3.msra.mxu0 %v16610_v14  ;;  %13726 = vmatprep.subr.mxu1 %v19145_v33 }
 0x56e   :  { %13724 = vmatmul.mubr.msk.f32.vlgmr.msra.gmra.mxu0 %vm1041_vm1, %v16811_v8  ;;  %13727 = vmatpush3.msra.mxu1 %v16423_v58 }
 0x56f   :  { %13737 = vmatprep.subr.mxu0 %v19145_v33  ;;  %13728 = vmatprep.subr.mxu1 %v19145_v33 }
 0x570   :  { %13738 = vmatpush3.msra.mxu0 %v16431_v59  ;;  %13729 = vmatpush3.msra.mxu1 %v16437_v60  ;;  %v19158_v60 = vld [vmem:[#allocation20_spill] sm:$0xff] }
 0x571   :  { %13739 = vmatprep.subr.mxu0 %v19145_v33  ;;  %13730 = vmatprep.subr.mxu1 %v19145_v33 }
 0x572   :  { %13740 = vmatpush3.msra.mxu0 %v16626_v12  ;;  %13731 = vmatpush3.msra.mxu1 %v16446_v62 }
 0x573   :  { %13741 = vmatprep.subr.mxu0 %v19145_v33  ;;  %13732 = vmatprep.subr.mxu1 %v19145_v33 }
 0x574   :  { %13742 = vmatpush3.msra.mxu0 %v16635_v15  ;;  %13733 = vmatpush3.msra.mxu1 %v16641_v38 }
 0x575   :  { %13743 = vmatprep.subr.mxu0 %v19145_v33  ;;  %13734 = vmatprep.mubr.msk.f32.mxu1 %vm15571_vm0, %v19145_v33 }
 0x576   :  { %13744 = vmatpush3.msra.mxu0 %v16650_v16  ;;  %13745 = vmatprep.mubr.msk.f32.mxu0 %vm15571_vm0, %v19145_v33 }
 0x577   :  { %13748 = vmatprep.subr.mxu1 %v19145_v33  ;;  %13759 = vmatprep.subr.mxu0 %v19145_v33 }
 0x61a   :  { %v3538_v58 = vpop.f32.mrf.mxu1  ;;  %v3608_v59 = vpop.f32.mrf.mxu0 }
 0x61b   :  { %v3682_v62 = vadd.f32 %v3538_v58, %v19158_v60  ;;  %v3689_v57 = vadd.f32 %v3608_v59, %v19159_v9 }
 0x61c   :  { %v13670_v2 = vpop.f32.mrf.mxu1  ;;  %v13681_v51 = vpop.f32.mrf.mxu0 }
 0x61d   :  { %v12219_v53 = vmul.f32 -1.442695, %v3682_v62  ;;  %v12220_v55 = vmul.f32 -1.442695, %v3689_v57 }
 0x61f   :  { %14922 = vpow2.f32 %v12219_v53  ;;  %v19162_v53 = vld [vmem:[#allocation31_spill] sm:$0xff] }
 0x620   :  { %14924 = vpow2.f32 %v12220_v55 }
 0x622   :  { %v3678_v23 = vpop.f32.mrf.mxu1 }
 0x623   :  { %v3679_v62 = vadd.f32 %v16763_v21, %v3678_v23 }
 0x624   :  { %v13692_v54 = vpop.f32.mrf.mxu1 }
 0x626   :  { %v3772_v45 = vpop.f32.mrf.mxu0 }
 0x627   :  { %v3916_v32 = vadd.f32 %v3772_v45, %v19160_v27 }
 0x628   :  { %v13703_v17 = vpop.f32.mrf.mxu0 }
 0x629   :  { %v12224_v43 = vmul.f32 -1.442695, %v3916_v32  ;;  %v19163_v17 = vld [vmem:[#allocation46_spill] sm:$0xff] }
 0x62b   :  { %14926 = vpow2.f32 %v12224_v43  ;;  %v3842_v20 = vpop.f32.mrf.mxu1 }
 0x62c   :  { %v14923_v34 = vpop.eup %14922  ;;  %v3923_v30 = vadd.f32 %v3842_v20, %v19161_v52  ;;  %v3940_v52 = vpop.permute.xlu0 %3939 }
 0x62d   :  { %v3686_v39 = vadd.f32 1.0, %v14923_v34  ;;  %v13714_v1 = vpop.f32.mrf.mxu1  ;;  %v14925_v24 = vpop.eup %14924  ;;  %vm3941_vm5 = vcmp.eq.s32.totalorder %v3940_v52, 1 }
 0x62e   :  { %v3912_v13 = vpop.f32.mrf.mxu0  ;;  %v12225_v11 = vmul.f32 -1.442695, %v3923_v30  ;;  %v3693_v59 = vadd.f32 1.0, %v14925_v24 }
 0x62f   :  { %14928 = vrcp.f32 %v3686_v39  ;;  %v3913_v55 = vadd.f32 %v16770_v25, %v3912_v13 }
 0x630   :  { %v13725_v18 = vpop.f32.mrf.mxu0  ;;  %14930 = vpow2.f32 %v12225_v11 }
 0x638   :  { %v14927_v58 = vpop.eup %14926 }
 0x639   :  { %v3920_v60 = vadd.f32 1.0, %v14927_v58 }
 0x63b   :  { %14932 = vrcp.f32 %v3920_v60  ;;  %v19166_v60 = vld [vmem:[#allocation40_spill] sm:$0xff] }
 0x63c   :  { %v14929_v2 = vpop.eup %14928  ;;  %14934 = vrcp.f32 %v3693_v59 }
 0x63d   :  { %v3696_v51 = vmul.f32 %v14929_v2, %v3679_v62  ;;  %v14931_v57 = vpop.eup %14930  ;;  %v768_v62 = vadd.f32 %v16755_v31, %v19166_v60 }
 0x63e   :  { %v3927_v54 = vadd.f32 1.0, %v14931_v57  ;;  %v19167_v57 = vld [vmem:[#allocation49_spill] sm:$0xff] }
 0x63f   :  { %v3697_v9 = vadd.f32 %v3696_v51, %v19162_v53 }
 0x641   :  { %14936 = vtanh.f32 %v3697_v9 }
 0x642   :  { %14938 = vrcp.f32 %v3927_v54  ;;  %v884_v54 = vadd.f32 %v16759_v22, %v19167_v57  ;;  %v19168_v22 = vld [vmem:[#allocation37_spill] sm:$0xff] }
 0x648   :  { %v14933_v45 = vpop.eup %14932 }
 0x649   :  { %v3930_v27 = vmul.f32 %v14933_v45, %v3913_v55  ;;  %v14935_v32 = vpop.eup %14934 }
 0x64a   :  { %v3699_v20 = vsub.f32 1.0, %v14935_v32  ;;  %v3701_v39 = vmul.f32 %v14935_v32, %v16779_v3 }
 0x64b   :  { %v3931_v43 = vadd.f32 %v3930_v27, %v19163_v17 }
 0x64d   :  { %14940 = vtanh.f32 %v3931_v43 }
 0x64e   :  { %v14937_v23 = vpop.eup %14936 }
 0x64f   :  { %v3700_v34 = vmul.f32 %v14937_v23, %v3699_v20  ;;  %v14939_v13 = vpop.eup %14938 }
 0x651   :  { %v3702_v30 = vadd.f32 %v3701_v39, %v3700_v34 }
 0x653   :  { %v16869_v1 = vsel %vm3941_vm5, %v3702_v30, %v16779_v3  ;;  %v3949_v18 = vsel %vm3941_vm5, %v3702_v30, 0.0 }
 0x654   :  { %13735 = vmatmul.mubr.msk.f32.vlgmr.msra.gmra.mxu1 %vm1041_vm1, %v16869_v1  ;;  %13746 = vmatmul.mubr.msk.f32.vlgmr.msra.gmra.mxu0 %vm1041_vm1, %v16869_v1 }
 0x655   :  { %13749 = vmatpush3.msra.mxu1 %v16486_v19  ;;  %13760 = vmatpush3.msra.mxu0 %v16492_v26  ;;  %v3933_v19 = vsub.f32 1.0, %v14939_v13 }
 0x656   :  { %13750 = vmatprep.subr.mxu1 %v19145_v33  ;;  %13761 = vmatprep.subr.mxu0 %v19145_v33 }
 0x657   :  { %13751 = vmatpush3.msra.mxu1 %v16500_v48  ;;  %13762 = vmatpush3.msra.mxu0 %v16506_v63  ;;  %v3935_v63 = vmul.f32 %v14939_v13, %v16811_v8 }
 0x658   :  { %13752 = vmatprep.subr.mxu1 %v19145_v33  ;;  %13763 = vmatprep.subr.mxu0 %v19145_v33 }
 0x659   :  { %13753 = vmatpush3.msra.mxu1 %v16514_v47  ;;  %13756 = vmatprep.mubr.msk.f32.mxu1 %vm15571_vm0, %v19145_v33  ;;  %v3946_v47 = vpop.permute.xlu1 %3945 }
 0x65a   :  { %v14941_v26 = vpop.eup %14940  ;;  %13754 = vmatprep.subr.mxu1 %v19145_v33  ;;  %13764 = vmatpush3.msra.mxu0 %v16523_v5  ;;  %vm3947_vm6 = vcmp.eq.s32.totalorder %v3946_v47, 1 }
 0x65b   :  { %13755 = vmatpush3.msra.mxu1 %v16529_v7  ;;  %13765 = vmatprep.subr.mxu0 %v19145_v33  ;;  %v3934_v48 = vmul.f32 %v14941_v26, %v3933_v19 }
 0x65c   :  { %13757 = vmatmul.mubr.msk.f32.vlgmr.msra.gmra.mxu1 %vm1041_vm1, %v16869_v1  ;;  %13770 = vmatprep.subr.mxu1 %v19145_v33 }
 0x65d   :  { %13766 = vmatpush3.msra.mxu0 %v16540_v41  ;;  %13771 = vmatpush3.msra.mxu1 %v16546_v42  ;;  %v3936_v3 = vadd.f32 %v3935_v63, %v3934_v48  ;;  %v15380_v41 = vld [vmem:[%s19058_s9 + $0x18] sm:$0xff] }
 0x65e   :  { %13767 = vmatprep.mubr.msk.f32.mxu0 %vm15571_vm0, %v19145_v33  ;;  %13772 = vmatprep.subr.mxu1 %v19145_v33  ;;  %v15381_v42 = vld [vmem:[%s19058_s9 + $0x38] sm:$0xff] }
 0x65f   :  { %13781 = vmatprep.subr.mxu0 %v19145_v33  ;;  %v16901_v5 = vsel %vm3947_vm6, %v3936_v3, %v16811_v8  ;;  %v3950_v7 = vsel %vm3947_vm6, %v3936_v3, 0.0  ;;  %13773 = vmatpush3.msra.mxu1 %v16559_v37  ;;  %v15382_v37 = vld [vmem:[%s19058_s9 + $0x10] sm:$0xff]  ;;  %v19165_v8 = vld [vmem:[#allocation27_spill] sm:$0xff] }
 0x660   :  { %v16904_v11 = vadd.f32 %v3950_v7, %v3949_v18  ;;  %13768 = vmatmul.mubr.msk.f32.vlgmr.msra.gmra.mxu0 %vm1041_vm1, %v16901_v5  ;;  %13774 = vmatprep.subr.mxu1 %v19145_v33  ;;  %v512_v24 = vadd.f32 %v16751_v0, %v19165_v8  ;;  %v628_v18 = vadd.f32 %v16766_v10, %v19168_v22  ;;  %v19169_v3 = vld [vmem:[#allocation51_spill] sm:$0xff]  ;;  %v15387_v8 = vld [vmem:[%s19058_s9 + $0x70] sm:$0xff] }
 0x661   :  { %13782 = vmatpush3.msra.mxu0 %v16570_v56  ;;  %13775 = vmatpush3.msra.mxu1 %v16576_v46  ;;  %v15383_v56 = vld [vmem:[%s19058_s9 + $0x8] sm:$0xff]  ;;  %v19164_v46 = vld [vmem:[#allocation25_spill] sm:$0xff]  ;;  %v1000_v7 = vadd.f32 %v16773_v35, %v19169_v3 }
 0x662   :  { %13783 = vmatprep.subr.mxu0 %v19145_v33  ;;  %13776 = vmatprep.subr.mxu1 %v19145_v33  ;;  %v15384_v35 = vld [vmem:[%s19058_s9 + $0x58] sm:$0xff] }
 0x663   :  { %13784 = vmatpush3.msra.mxu0 %v16584_v61  ;;  %13777 = vmatpush3.msra.mxu1 %v16590_v28  ;;  %v396_v61 = vadd.f32 %v16747_v49, %v19164_v46  ;;  %v17158_v3 = vld [vmem:[#allocation9] sm:$0xff] }
 0x664   :  { %13785 = vmatprep.subr.mxu0 %v19145_v33  ;;  %13778 = vmatprep.mubr.msk.f32.mxu1 %vm15571_vm0, %v19145_v33 }
 0x665   :  { %13786 = vmatpush3.msra.mxu0 %v16599_v4  ;;  %13779 = vmatmul.mubr.msk.f32.vlgmr.msra.gmra.mxu1 %vm1041_vm1, %v16901_v5 }
 0x666   :  { %13787 = vmatprep.subr.mxu0 %v19145_v33  ;;  %13789 = vmatprep.mubr.msk.f32.mxu0 %vm15571_vm0, %v19145_v33 }
 0x667   :  { %13788 = vmatpush3.msra.mxu0 %v16610_v14  ;;  %13792 = vmatprep.subr.mxu1 %v19145_v33 }
 0x668   :  { %13790 = vmatmul.mubr.msk.f32.vlgmr.msra.gmra.mxu0 %vm1041_vm1, %v16901_v5  ;;  %13793 = vmatpush3.msra.mxu1 %v15380_v41 }
 0x669   :  { %13803 = vmatprep.subr.mxu0 %v19145_v33  ;;  %13794 = vmatprep.subr.mxu1 %v19145_v33 }
 0x66a   :  { %13804 = vmatpush3.msra.mxu0 %v15381_v42  ;;  %13795 = vmatpush3.msra.mxu1 %v15382_v37 }
 0x66b   :  { %13805 = vmatprep.subr.mxu0 %v19145_v33  ;;  %13796 = vmatprep.subr.mxu1 %v19145_v33 }
 0x66c   :  { %13806 = vmatpush3.msra.mxu0 %v16626_v12  ;;  %13797 = vmatpush3.msra.mxu1 %v15383_v56 }
 0x66d   :  { %13807 = vmatprep.subr.mxu0 %v19145_v33  ;;  %13798 = vmatprep.subr.mxu1 %v19145_v33 }
 0x66e   :  { %13808 = vmatpush3.msra.mxu0 %v16635_v15  ;;  %13799 = vmatpush3.msra.mxu1 %v16641_v38 }
 0x66f   :  { %13809 = vmatprep.subr.mxu0 %v19145_v33  ;;  %13800 = vmatprep.mubr.msk.f32.mxu1 %vm15571_vm0, %v19145_v33 }
 0x670   :  { %13810 = vmatpush3.msra.mxu0 %v16650_v16  ;;  %13811 = vmatprep.mubr.msk.f32.mxu0 %vm15571_vm0, %v19145_v33 }
 0x671   :  { %13814 = vmatprep.subr.mxu1 %v19145_v33  ;;  %13825 = vmatprep.subr.mxu0 %v19145_v33 }
 0x714   :  { %v4022_v28 = vpop.f32.mrf.mxu1  ;;  %v4092_v4 = vpop.f32.mrf.mxu0 }
 0x715   :  { %v4166_v14 = vadd.f32 %v4022_v28, %v396_v61  ;;  %v4173_v16 = vadd.f32 %v4092_v4, %v512_v24  ;;  %v4424_v28 = vpop.permute.xlu0 %4423 }
 0x716   :  { %v13736_v12 = vpop.f32.mrf.mxu1  ;;  %v13747_v15 = vpop.f32.mrf.mxu0  ;;  %vm4425_vm15 = vcmp.eq.s32.totalorder %v4424_v28, 1  ;;  %v19171_v28 = vld [vmem:[#allocation26_spill] sm:$0xff] }
 0x717   :  { %v12229_v38 = vmul.f32 -1.442695, %v4166_v14  ;;  %v12230_v2 = vmul.f32 -1.442695, %v4173_v16  ;;  %v15385_v12 = vld [vmem:[%s19058_s9 + $0x78] sm:$0xff]  ;;  %v15389_v16 = vld [vmem:[%s19058_s9 + $0x68] sm:$0xff] }
 0x719   :  { %14942 = vpow2.f32 %v12229_v38  ;;  %v15386_v38 = vld [vmem:[%s19058_s9 + $0x50] sm:$0xff] }
 0x71a   :  { %14944 = vpow2.f32 %v12230_v2  ;;  %v15391_v2 = vld [vmem:[%s19058_s9 + $0x60] sm:$0xff] }
 0x71c   :  { %v4162_v58 = vpop.f32.mrf.mxu1 }
 0x71d   :  { %v4163_v52 = vadd.f32 %v16763_v21, %v4162_v58  ;;  %v15390_v58 = vld [vmem:[%s19058_s9 + $0x40] sm:$0xff] }
 0x71e   :  { %v13758_v59 = vpop.f32.mrf.mxu1 }
 0x720   :  { %v4256_v51 = vpop.f32.mrf.mxu0 }
 0x721   :  { %v4400_v53 = vadd.f32 %v4256_v51, %v768_v62  ;;  %v4430_v62 = vpop.permute.xlu1 %4429  ;;  %v15392_v51 = vld [vmem:[%s19058_s9 + $0x98] sm:$0xff] }
 0x722   :  { %v13769_v49 = vpop.f32.mrf.mxu0  ;;  %vm4431_vm2 = vcmp.eq.s32.totalorder %v4430_v62, 1 }
 0x723   :  { %v12234_v9 = vmul.f32 -1.442695, %v4400_v53 }
 0x725   :  { %14946 = vpow2.f32 %v12234_v9  ;;  %v4326_v55 = vpop.f32.mrf.mxu1 }
 0x726   :  { %v14943_v45 = vpop.eup %14942  ;;  %v4407_v27 = vadd.f32 %v4326_v55, %v884_v54  ;;  %v15393_v54 = vld [vmem:[%s19058_s9 + $0x90] sm:$0xff] }
 0x727   :  { %v4170_v0 = vadd.f32 1.0, %v14943_v45  ;;  %v13780_v32 = vpop.f32.mrf.mxu1  ;;  %v14945_v31 = vpop.eup %14944  ;;  %v15394_v45 = vld [vmem:[%s19058_s9 + $0xb8] sm:$0xff] }
 0x728   :  { %v4396_v17 = vpop.f32.mrf.mxu0  ;;  %v12235_v20 = vmul.f32 -1.442695, %v4407_v27  ;;  %v4177_v34 = vadd.f32 1.0, %v14945_v31  ;;  %v15397_v27 = vld [vmem:[%s19058_s9 + $0x80] sm:$0xff]  ;;  %v4937_v32 = vld [vmem:[%s19060_s11 + $0x10] sm:$0xff] }
 0x729   :  { %14948 = vrcp.f32 %v4170_v0  ;;  %v4397_v63 = vadd.f32 %v16770_v25, %v4396_v17  ;;  %v15396_v0 = vld [vmem:[%s19058_s9 + $0xb0] sm:$0xff]  ;;  %v4935_v31 = vld [vmem:[%s19060_s11] sm:$0xff] }
 0x72a   :  { %v13791_v43 = vpop.f32.mrf.mxu0  ;;  %14950 = vpow2.f32 %v12235_v20  ;;  %v12258_v20 = vld [vmem:[%s19060_s11 + $0x30] sm:$0xff] }
 0x72b   :  { %v15399_v43 = vld [vmem:[%s19058_s9 + $0xa0] sm:$0xff] }
 0x732   :  { %v14947_v23 = vpop.eup %14946 }
 0x733   :  { %v4404_v39 = vadd.f32 1.0, %v14947_v23  ;;  %v12257_v23 = vld [vmem:[%s19060_s11 + $0x28] sm:$0xff] }
 0x735   :  { %14952 = vrcp.f32 %v4404_v39 }
 0x736   :  { %v14949_v30 = vpop.eup %14948  ;;  %14954 = vrcp.f32 %v4177_v34 }
 0x737   :  { %v4180_v13 = vmul.f32 %v14949_v30, %v4163_v52  ;;  %v14951_v26 = vpop.eup %14950 }
 0x738   :  { %v4411_v48 = vadd.f32 1.0, %v14951_v26  ;;  %v12273_v26 = vld [vmem:[%s19060_s11 + $0x58] sm:$0xff] }
 0x739   :  { %v4181_v19 = vadd.f32 %v4180_v13, %v628_v18  ;;  %v17137_v13 = vld [vmem:[#allocation9 + $0x18] sm:$0xff] }
 0x73b   :  { %14956 = vtanh.f32 %v4181_v19  ;;  %v17139_v19 = vld [vmem:[#allocation9 + $0x10] sm:$0xff] }
 0x73c   :  { %14958 = vrcp.f32 %v4411_v48  ;;  %v12272_v48 = vld [vmem:[%s19060_s11 + $0x50] sm:$0xff] }
 0x742   :  { %v14953_v47 = vpop.eup %14952 }
 0x743   :  { %v4414_v41 = vmul.f32 %v14953_v47, %v4397_v63  ;;  %v14955_v42 = vpop.eup %14954  ;;  %v17149_v63 = vld [vmem:[#allocation9 + $0x8] sm:$0xff]  ;;  %v12271_v47 = vld [vmem:[%s19060_s11 + $0x48] sm:$0xff] }
 0x744   :  { %v4183_v56 = vsub.f32 1.0, %v14955_v42  ;;  %v4185_v61 = vmul.f32 %v14955_v42, %v16869_v1 }
 0x745   :  { %v4415_v37 = vadd.f32 %v4414_v41, %v1000_v7  ;;  %v12270_v7 = vld [vmem:[%s19060_s11 + $0x40] sm:$0xff] }
 0x747   :  { %14960 = vtanh.f32 %v4415_v37  ;;  %v19170_v37 = vld [vmem:[#allocation23_spill] sm:$0xff] }
 0x748   :  { %v14957_v46 = vpop.eup %14956 }
 0x749   :  { %v4184_v10 = vmul.f32 %v14957_v46, %v4183_v56  ;;  %v14959_v15 = vpop.eup %14958 }
 0x74a   :  { %v4419_v60 = vmul.f32 %v14959_v15, %v16901_v5 }
 0x74b   :  { %v4186_v4 = vadd.f32 %v4185_v61, %v4184_v10 }
 0x74d   :  { %v16974_v14 = vsel %vm4425_vm15, %v4186_v4, %v16869_v1  ;;  %v1531_v1 = vadd.f32 %v16305_v36, %v16275_v40  ;;  %v15388_v40 = vld [vmem:[%s19058_s9 + $0x48] sm:$0xff]  ;;  %v4417_v36 = vsub.f32 1.0, %v14959_v15  ;;  %v4433_v49 = vsel %vm4425_vm15, %v4186_v4, 0.0 }
 0x74e   :  { %13801 = vmatmul.mubr.msk.f32.vlgmr.msra.gmra.mxu1 %vm1041_vm1, %v16974_v14  ;;  %13812 = vmatmul.mubr.msk.f32.vlgmr.msra.gmra.mxu0 %vm1041_vm1, %v16974_v14 }
 0x74f   :  { %13815 = vmatpush3.msra.mxu1 %v15384_v35  ;;  %13826 = vmatpush3.msra.mxu0 %v15385_v12  ;;  %14962 = vtanh.f32 %v1531_v1 }
 0x750   :  { %13816 = vmatprep.subr.mxu1 %v19145_v33  ;;  %13827 = vmatprep.subr.mxu0 %v19145_v33  ;;  %14964 = vtanh.f32 %v16396_v6  ;;  %v4938_v6 = vld [vmem:[%s19060_s11 + $0x18] sm:$0xff] }
 0x751   :  { %13817 = vmatpush3.msra.mxu1 %v15386_v38  ;;  %13828 = vmatpush3.msra.mxu0 %v15387_v8  ;;  %14966 = vtanh.f32 %v16562_v44  ;;  %v15398_v44 = vld [vmem:[%s19058_s9 + $0xa8] sm:$0xff]  ;;  %v19172_v38 = vld [vmem:[#allocation38_spill] sm:$0xff] }
 0x752   :  { %13818 = vmatprep.subr.mxu1 %v19145_v33  ;;  %13829 = vmatprep.subr.mxu0 %v19145_v33  ;;  %14968 = vtanh.f32 %v16702_v50  ;;  %v12259_v50 = vld [vmem:[%s19060_s11 + $0x38] sm:$0xff] }
 0x753   :  { %13819 = vmatpush3.msra.mxu1 %v15388_v40  ;;  %13822 = vmatprep.mubr.msk.f32.mxu1 %vm15571_vm0, %v19145_v33  ;;  %14970 = vtanh.f32 %v16814_v29  ;;  %v4936_v29 = vld [vmem:[%s19060_s11 + $0x8] sm:$0xff] }
 0x754   :  { %v14961_v24 = vpop.eup %14960  ;;  %13820 = vmatprep.subr.mxu1 %v19145_v33  ;;  %13830 = vmatpush3.msra.mxu0 %v15389_v16  ;;  %14972 = vtanh.f32 %v16904_v11  ;;  %v12256_v11 = vld [vmem:[%s19060_s11 + $0x20] sm:$0xff] }
 0x755   :  { %13821 = vmatpush3.msra.mxu1 %v15390_v58  ;;  %13831 = vmatprep.subr.mxu0 %v19145_v33  ;;  %v4418_v59 = vmul.f32 %v14961_v24, %v4417_v36 }
 0x756   :  { %13823 = vmatmul.mubr.msk.f32.vlgmr.msra.gmra.mxu1 %vm1041_vm1, %v16974_v14  ;;  %13836 = vmatprep.subr.mxu1 %v19145_v33 }
 0x757   :  { %13832 = vmatpush3.msra.mxu0 %v15391_v2  ;;  %13837 = vmatpush3.msra.mxu1 %v15392_v51  ;;  %v4420_v53 = vadd.f32 %v4419_v60, %v4418_v59  ;;  %v19173_v59 = vld [vmem:[#allocation47_spill] sm:$0xff] }
 0x758   :  { %13833 = vmatprep.mubr.msk.f32.mxu0 %vm15571_vm0, %v19145_v33  ;;  %13838 = vmatprep.subr.mxu1 %v19145_v33 }
 0x759   :  { %13847 = vmatprep.subr.mxu0 %v19145_v33  ;;  %v17027_v9 = vsel %vm4431_vm2, %v4420_v53, %v16901_v5  ;;  %v4434_v57 = vsel %vm4431_vm2, %v4420_v53, 0.0  ;;  %13839 = vmatpush3.msra.mxu1 %v15393_v54  ;;  %v15395_v5 = vld [vmem:[%s19058_s9 + $0x88] sm:$0xff] }
 0x75a   :  { %v4435_v55 = vadd.f32 %v4434_v57, %v4433_v49  ;;  %13834 = vmatmul.mubr.msk.f32.vlgmr.msra.gmra.mxu0 %vm1041_vm1, %v17027_v9  ;;  %13840 = vmatprep.subr.mxu1 %v19145_v33 }
 0x75b   :  { %13848 = vmatpush3.msra.mxu0 %v15394_v45  ;;  %13841 = vmatpush3.msra.mxu1 %v15395_v5 }
 0x75c   :  { %13849 = vmatprep.subr.mxu0 %v19145_v33  ;;  %13842 = vmatprep.subr.mxu1 %v19145_v33  ;;  %v17067_v17 = vpop.eup %14962  ;;  %14974 = vtanh.f32 %v4435_v55 }
 0x75d   :  { %13850 = vmatpush3.msra.mxu0 %v15396_v0  ;;  %13843 = vmatpush3.msra.mxu1 %v15397_v27  ;;  %v17100_v34 = vpop.eup %14964  ;;  %v19174_v27 = vld [vmem:[#allocation35_spill] sm:$0xff] }
 0x75e   :  { %13851 = vmatprep.subr.mxu0 %v19145_v33  ;;  %13844 = vmatprep.mubr.msk.f32.mxu1 %vm15571_vm0, %v19145_v33  ;;  %v17102_v39 = vpop.eup %14966 }
 0x75f   :  { %13852 = vmatpush3.msra.mxu0 %v15398_v44  ;;  %13845 = vmatmul.mubr.msk.f32.vlgmr.msra.gmra.mxu1 %vm1041_vm1, %v17027_v9  ;;  %v17111_v52 = vpop.eup %14968 }
 0x760   :  { %13853 = vmatprep.subr.mxu0 %v19145_v33  ;;  %13858 = vmatprep.subr.mxu1 %v4938_v6  ;;  %v17115_v30 = vpop.eup %14970 }
 0x761   :  { %13854 = vmatpush3.msra.mxu0 %v15399_v43  ;;  %13855 = vmatprep.mubr.msk.f32.mxu0 %vm15571_vm0, %v19145_v33  ;;  %v17123_v22 = vpop.eup %14972 }
 0x762   :  { %13859 = vmatpush3.msra.mxu1 %v4938_v6  ;;  %13866 = vmatprep.mubr.msk.f32.mxu1 %vm1041_vm1, %v17067_v17 }
 0x763   :  { %13856 = vmatmul.mubr.msk.f32.vlgmr.msra.gmra.mxu0 %vm1041_vm1, %v17027_v9  ;;  %13860 = vmatprep.subr.mxu1 %v4937_v32 }
 0x764   :  { %13878 = vmatprep.subr.mxu0 %v12259_v50  ;;  %13861 = vmatpush3.msra.mxu1 %v4937_v32 }
 0x765   :  { %13879 = vmatpush3.msra.mxu0 %v12259_v50  ;;  %13886 = vmatprep.mubr.msk.f32.mxu0 %vm1041_vm1, %v17067_v17 }
 0x766   :  { %13862 = vmatprep.subr.mxu1 %v4936_v29  ;;  %13880 = vmatprep.subr.mxu0 %v12258_v20 }
 0x767   :  { %13863 = vmatpush3.msra.mxu1 %v4936_v29  ;;  %13881 = vmatpush3.msra.mxu0 %v12258_v20 }
 0x768   :  { %13864 = vmatprep.subr.mxu1 %v4935_v31  ;;  %13882 = vmatprep.subr.mxu0 %v12257_v23 }
 0x769   :  { %13865 = vmatpush3.msra.mxu1 %v4935_v31  ;;  %13883 = vmatpush3.msra.mxu0 %v12257_v23  ;;  %v17127_v18 = vpop.eup %14974  ;;  %v19175_v31 = vld [vmem:[#allocation50_spill] sm:$0xff] }
 0x76a   :  { %13867 = vmatmul.mubr.msk.f32.vlgmr.msra.gmra.mxu1 %vm1041_vm1, %v17100_v34  ;;  %13884 = vmatprep.subr.mxu0 %v12256_v11 }
 0x76b   :  { %13869 = vmatprep.mubr.msk.f32.mxu1 %vm1041_vm1, %v17102_v39  ;;  %13885 = vmatpush3.msra.mxu0 %v12256_v11 }
 0x76c   :  { %13887 = vmatmul.mubr.msk.f32.vlgmr.msra.gmra.mxu0 %vm1041_vm1, %v17100_v34  ;;  %13918 = vmatprep.subr.mxu0 %v19145_v33 }
 0x76d   :  { %13889 = vmatprep.mubr.msk.f32.mxu0 %vm1041_vm1, %v17102_v39  ;;  %13919 = vmatpush3.msra.mxu0 %v17137_v13 }
 0x76e   :  { %13870 = vmatmul.mubr.msk.f32.gmra.mxu1 %vm1041_vm1, %v17111_v52  ;;  %13898 = vmatprep.subr.mxu1 %v12273_v26 }
 0x76f   :  { %13872 = vmatprep.mubr.msk.f32.mxu1 %vm1041_vm1, %v17115_v30  ;;  %13920 = vmatprep.subr.mxu0 %v19145_v33 }
 0x770   :  { %13890 = vmatmul.mubr.msk.f32.gmra.mxu0 %vm1041_vm1, %v17111_v52  ;;  %13899 = vmatpush3.msra.mxu1 %v12273_v26 }
 0x771   :  { %13892 = vmatprep.mubr.msk.f32.mxu0 %vm1041_vm1, %v17115_v30  ;;  %13921 = vmatpush3.msra.mxu0 %v17139_v19 }
 0x772   :  { %13873 = vmatmul.mubr.msk.f32.gmra.mxu1 %vm1041_vm1, %v17123_v22  ;;  %13900 = vmatprep.subr.mxu1 %v12272_v48 }
 0x773   :  { %13875 = vmatprep.mubr.msk.f32.mxu1 %vm1041_vm1, %v17127_v18  ;;  %13922 = vmatprep.subr.mxu0 %v19145_v33 }
 0x774   :  { %13893 = vmatmul.mubr.msk.f32.gmra.mxu0 %vm1041_vm1, %v17123_v22  ;;  %13901 = vmatpush3.msra.mxu1 %v12272_v48 }
 0x775   :  { %13895 = vmatprep.mubr.msk.f32.mxu0 %vm1041_vm1, %v17127_v18  ;;  %13923 = vmatpush3.msra.mxu0 %v17149_v63 }
 0x776   :  { %13924 = vmatprep.subr.mxu0 %v19145_v33  ;;  %13902 = vmatprep.subr.mxu1 %v12271_v47 }
 0x777   :  { %13903 = vmatpush3.msra.mxu1 %v12271_v47  ;;  %13925 = vmatpush3.msra.mxu0 %v17158_v3 }
 0x778   :  { %13904 = vmatprep.subr.mxu1 %v12270_v7  ;;  %13929 = vmatprep.subr.mxu0 %v19145_v33 }
 0x779   :  { %13905 = vmatpush3.msra.mxu1 %v12270_v7 }
 0x77a   :  { %13940 = vmatprep.subr.mxu1 %v19145_v33 }
 0x80e   :  { %v4506_v41 = vpop.f32.mrf.mxu1  ;;  %v4576_v42 = vpop.f32.mrf.mxu0 }
 0x80f   :  { %v4650_v56 = vadd.f32 %v4506_v41, %v19170_v37  ;;  %v4657_v4 = vadd.f32 %v4576_v42, %v19171_v28 }
 0x810   :  { %v13802_v46 = vpop.f32.mrf.mxu1  ;;  %v13813_v10 = vpop.f32.mrf.mxu0 }
 0x811   :  { %v12239_v61 = vmul.f32 -1.442695, %v4650_v56  ;;  %v12240_v15 = vmul.f32 -1.442695, %v4657_v4  ;;  %v4913_v46 = vpop.permute.xlu1 %4912 }
 0x812   :  { %vm4914_vm4 = vcmp.eq.s32.totalorder %v4913_v46, 1 }
 0x813   :  { %14976 = vpow2.f32 %v12239_v61 }
 0x814   :  { %14978 = vpow2.f32 %v12240_v15  ;;  %v17206_v15 = vld [vmem:[#allocation9 + $0x50] sm:$0xff] }
 0x816   :  { %v4646_v35 = vpop.f32.mrf.mxu1 }
 0x817   :  { %v4647_v45 = vadd.f32 %v16763_v21, %v4646_v35 }
 0x818   :  { %v13824_v12 = vpop.f32.mrf.mxu1 }
 0x819   :  { %v17189_v12 = vld [vmem:[#allocation9 + $0x58] sm:$0xff] }
 0x81a   :  { %v4740_v1 = vpop.f32.mrf.mxu0 }
 0x81b   :  { %v4884_v8 = vadd.f32 %v4740_v1, %v19172_v38 }
 0x81c   :  { %v13835_v40 = vpop.f32.mrf.mxu0 }
 0x81d   :  { %v12244_v36 = vmul.f32 -1.442695, %v4884_v8 }
 0x81f   :  { %14980 = vpow2.f32 %v12244_v36  ;;  %v4810_v24 = vpop.f32.mrf.mxu1 }
 0x820   :  { %v14977_v16 = vpop.eup %14976  ;;  %v4891_v60 = vadd.f32 %v4810_v24, %v19173_v59 }
 0x821   :  { %v4654_v58 = vadd.f32 1.0, %v14977_v16  ;;  %v13846_v62 = vpop.f32.mrf.mxu1  ;;  %v14979_v49 = vpop.eup %14978 }
 0x822   :  { %v12245_v51 = vmul.f32 -1.442695, %v4891_v60  ;;  %v4661_v54 = vadd.f32 1.0, %v14979_v49  ;;  %v12275_v49 = vld [vmem:[%s19062_s13 + $0x2] ss:$0 sm:$0xff] }
 0x823   :  { %14982 = vrcp.f32 %v4654_v58  ;;  %v4880_v2 = vpop.f32.mrf.mxu0 }
 0x824   :  { %14984 = vpow2.f32 %v12245_v51  ;;  %v4881_v43 = vadd.f32 %v16770_v25, %v4880_v2  ;;  %v4908_v25 = vpop.permute.xlu0 %4907  ;;  %v17281_v2 = vld [vmem:[%s19062_s13] ss:$0 sm:$0xff] }
 0x825   :  { %v13857_v53 = vpop.f32.mrf.mxu0  ;;  %vm4909_vm3 = vcmp.eq.s32.totalorder %v4908_v25, 1 }
 0x82c   :  { %v14981_v57 = vpop.eup %14980 }
 0x82d   :  { %v4888_v55 = vadd.f32 1.0, %v14981_v57 }
 0x82f   :  { %14986 = vrcp.f32 %v4888_v55 }
 0x830   :  { %v14983_v5 = vpop.eup %14982  ;;  %14988 = vrcp.f32 %v4661_v54 }
 0x831   :  { %v4664_v0 = vmul.f32 %v14983_v5, %v4647_v45  ;;  %v14985_v44 = vpop.eup %14984 }
 0x832   :  { %v4895_v32 = vadd.f32 1.0, %v14985_v44 }
 0x833   :  { %v4665_v6 = vadd.f32 %v4664_v0, %v19174_v27 }
 0x835   :  { %14990 = vtanh.f32 %v4665_v6 }
 0x836   :  { %14992 = vrcp.f32 %v4895_v32 }
 0x83c   :  { %v14987_v50 = vpop.eup %14986 }
 0x83d   :  { %v4898_v29 = vmul.f32 %v14987_v50, %v4881_v43  ;;  %v14989_v20 = vpop.eup %14988  ;;  %v17298_v43 = vld [vmem:[%s19062_s13 + $0x1] ss:$0 sm:$0xff] }
 0x83e   :  { %v4667_v11 = vsub.f32 1.0, %v14989_v20  ;;  %v4669_v26 = vmul.f32 %v14989_v20, %v16974_v14  ;;  %v17182_v14 = vld [vmem:[#allocation9 + $0x38] sm:$0xff] }
 0x83f   :  { %v4899_v23 = vadd.f32 %v4898_v29, %v19175_v31 }
 0x841   :  { %14994 = vtanh.f32 %v4899_v23 }
 0x842   :  { %v14991_v21 = vpop.eup %14990 }
 0x843   :  { %v4668_v48 = vmul.f32 %v14991_v21, %v4667_v11  ;;  %v14993_v7 = vpop.eup %14992 }
 0x844   :  { %v4901_v41 = vsub.f32 1.0, %v14993_v7  ;;  %v4903_v37 = vmul.f32 %v14993_v7, %v17027_v9  ;;  %v17187_v9 = vld [vmem:[#allocation9 + $0x30] sm:$0xff] }
 0x845   :  { %v4670_v47 = vadd.f32 %v4669_v26, %v4668_v48 }
 0x847   :  { %v4915_v61 = vsel %vm4909_vm3, %v4670_v47, 0.0 }
 0x84e   :  { %v14995_v42 = vpop.eup %14994 }
 0x84f   :  { %v4902_v56 = vmul.f32 %v14995_v42, %v4901_v41 }
 0x851   :  { %v4904_v10 = vadd.f32 %v4903_v37, %v4902_v56 }
 0x853   :  { %v4916_v28 = vsel %vm4914_vm4, %v4904_v10, 0.0 }
 0x854   :  { %v4917_v4 = vadd.f32 %v4916_v28, %v4915_v61 }
 0x856   :  { %14996 = vtanh.f32 %v4917_v4  ;;  %v17314_v4 = vld [vmem:[%s19062_s13 + $0x3] ss:$0 sm:$0xff] }
 0x863   :  { %v14997_v35 = vpop.eup %14996 }
 0x864   :  { %13876 = vmatmul.mubr.msk.f32.gmra.mxu1 %vm1041_vm1, %v14997_v35  ;;  %13896 = vmatmul.mubr.msk.f32.gmra.mxu0 %vm1041_vm1, %v14997_v35 }
 0x865   :  { %13906 = vmatprep.mubr.msk.f32.mxu1 %vm1041_vm1, %v17067_v17  ;;  %13926 = vmatprep.mubr.msk.f32.mxu0 %vm15571_vm0, %v19145_v33  ;;  %v17195_v17 = vld [vmem:[#allocation9 + $0x28] sm:$0xff] }
 0x868   :  { %13907 = vmatmul.mubr.msk.f32.vlgmr.msra.gmra.mxu1 %vm1041_vm1, %v17100_v34  ;;  %13927 = vmatmul.mubr.f32.vlgmr.msra.gmra.mxu0 %v19145_v33  ;;  %v17204_v34 = vld [vmem:[#allocation9 + $0x20] sm:$0xff] }
 0x869   :  { %13930 = vmatpush3.msra.mxu0 %v17182_v14  ;;  %13909 = vmatprep.mubr.msk.f32.mxu1 %vm1041_vm1, %v17102_v39  ;;  %v17215_v39 = vld [vmem:[#allocation9 + $0x48] sm:$0xff] }
 0x86a   :  { %13931 = vmatprep.subr.mxu0 %v19145_v33  ;;  %13937 = vmatprep.mubr.msk.f32.mxu0 %vm15571_vm0, %v19145_v33 }
 0x86b   :  { %13932 = vmatpush3.msra.mxu0 %v17187_v9  ;;  %13941 = vmatpush3.msra.mxu1 %v17189_v12 }
 0x86c   :  { %13933 = vmatprep.subr.mxu0 %v19145_v33  ;;  %13910 = vmatmul.mubr.msk.f32.gmra.mxu1 %vm1041_vm1, %v17111_v52  ;;  %v17224_v52 = vld [vmem:[#allocation9 + $0x40] sm:$0xff] }
 0x86d   :  { %13934 = vmatpush3.msra.mxu0 %v17195_v17  ;;  %13912 = vmatprep.mubr.msk.f32.mxu1 %vm1041_vm1, %v17115_v30  ;;  %v17254_v30 = vpop.f32.mrf.mxu1 }
 0x86e   :  { %13935 = vmatprep.subr.mxu0 %v19145_v33  ;;  %13942 = vmatprep.subr.mxu1 %v19145_v33 }
 0x86f   :  { %13936 = vmatpush3.msra.mxu0 %v17204_v34  ;;  %13943 = vmatpush3.msra.mxu1 %v17206_v15 }
 0x870   :  { %13938 = vmatmul.mubr.f32.vlgmr.msra.gmra.mxu0 %v19145_v33  ;;  %13913 = vmatmul.mubr.msk.f32.gmra.mxu1 %vm1041_vm1, %v17123_v22  ;;  %v17256_v22 = vpop.f32.mrf.mxu0 }
 0x871   :  { %13915 = vmatprep.mubr.msk.f32.mxu1 %vm1041_vm1, %v17127_v18  ;;  %13944 = vmatprep.subr.mxu1 %v19145_v33  ;;  %v5036_v18 = vpop.f32.mrf.mxu1 }
 0x872   :  { %13945 = vmatpush3.msra.mxu1 %v17215_v39  ;;  %13951 = vmatprep.subr.mxu0 %v19145_v33  ;;  %v5154_v1 = vpop.f32.mrf.mxu0  ;;  %v5037_v57 = vadd.f32 %v17281_v2, %v5036_v18 }
 0x873   :  { %13946 = vmatprep.subr.mxu1 %v19145_v33  ;;  %13952 = vmatpush3.msra.mxu0 %v17137_v13  ;;  %v17258_v38 = vpop.f32.mrf.mxu1  ;;  %v5155_v29 = vadd.f32 %v17298_v43, %v5154_v1 }
 0x874   :  { %13916 = vmatmul.mubr.msk.f32.gmra.mxu1 %vm1041_vm1, %v14997_v35  ;;  %13953 = vmatprep.subr.mxu0 %v19145_v33  ;;  %v17260_v8 = vpop.f32.mrf.mxu0 }
 0x875   :  { %13947 = vmatpush3.msra.mxu1 %v17224_v52  ;;  %13948 = vmatprep.mubr.msk.f32.mxu1 %vm15571_vm0, %v19145_v33  ;;  %v17262_v40 = vpop.f32.mrf.mxu1 }
 0x876   :  { %13962 = vmatprep.subr.mxu1 %v19145_v33  ;;  %13954 = vmatpush3.msra.mxu0 %v17139_v19  ;;  %v17264_v36 = vpop.f32.mrf.mxu0 }
 0x877   :  { %13955 = vmatprep.subr.mxu0 %v19145_v33  ;;  %13959 = vmatprep.mubr.msk.f32.mxu0 %vm15571_vm0, %v19145_v33  ;;  %v17266_v24 = vpop.f32.mrf.mxu1 }
 0x878   :  { %13949 = vmatmul.mubr.f32.vlgmr.msra.gmra.mxu1 %v19145_v33  ;;  %13956 = vmatpush3.msra.mxu0 %v17149_v63  ;;  %v17268_v16 = vpop.f32.mrf.mxu0 }
 0x879   :  { %13963 = vmatpush3.msra.mxu1 %v17182_v14  ;;  %13957 = vmatprep.subr.mxu0 %v19145_v33  ;;  %v17270_v58 = vpop.f32.mrf.mxu1 }
 0x87a   :  { %13964 = vmatprep.subr.mxu1 %v19145_v33  ;;  %13958 = vmatpush3.msra.mxu0 %v17158_v3  ;;  %v17272_v59 = vpop.f32.mrf.mxu0 }
 0x87b   :  { %13965 = vmatpush3.msra.mxu1 %v17187_v9  ;;  %13970 = vmatprep.mubr.msk.f32.mxu1 %vm15571_vm0, %v19145_v33 }
 0x87c   :  { %13966 = vmatprep.subr.mxu1 %v19145_v33  ;;  %13973 = vmatprep.subr.mxu0 %v19145_v33 }
 0x87d   :  { %13967 = vmatpush3.msra.mxu1 %v17195_v17 }
 0x87e   :  { %13968 = vmatprep.subr.mxu1 %v19145_v33 }
 0x87f   :  { %13969 = vmatpush3.msra.mxu1 %v17204_v34 }
 0x880   :  { %13984 = vmatprep.subr.mxu1 %v19145_v33 }
 0x924   :  { %v17274_v60 = vpop.f32.mrf.mxu1  ;;  %v17276_v62 = vpop.f32.mrf.mxu0 }
 0x926   :  { %v17283_v51 = vpop.f32.mrf.mxu1  ;;  %v17285_v53 = vpop.f32.mrf.mxu0 }
 0x928   :  { %v13908_v54 = vpop.f32.mrf.mxu1  ;;  %v5377_v55 = vpop.f32.mrf.mxu0 }
 0x929   :  { %v17291_v45 = vadd.f32 %v13908_v54, %v12275_v49  ;;  %v5527_v5 = vadd.f32 %v5377_v55, %v5037_v57  ;;  %v12094_v55 = vld [vmem:[#allocation4] ss:$0 sm:$0xff] }
 0x92a   :  { %v5272_v0 = vpop.f32.mrf.mxu1  ;;  %v13928_v27 = vpop.f32.mrf.mxu0 }
 0x92b   :  { %v12285_v6 = vmul.f32 -1.442695, %v5527_v5  ;;  %v5273_v57 = vadd.f32 %v12275_v49, %v5272_v0  ;;  %v19176_v27 = vld [vmem:[#allocation17_spill] sm:$0xff] }
 0x92c   :  { %v13911_v44 = vpop.f32.mrf.mxu1 }
 0x92d   :  { %14998 = vpow2.f32 %v12285_v6  ;;  %v17293_v32 = vadd.f32 %v13911_v44, %v12275_v49  ;;  %v198_v6 = vadd.f32 %v12094_v55, %v19176_v27 }
 0x92e   :  { %v5282_v50 = vpop.f32.mrf.mxu1 }
 0x92f   :  { %v17301_v20 = vadd.f32 %v12275_v49, %v5282_v50 }
 0x930   :  { %v5447_v31 = vpop.f32.mrf.mxu0  ;;  %v13914_v23 = vpop.f32.mrf.mxu1 }
 0x931   :  { %v5534_v11 = vadd.f32 %v5447_v31, %v5155_v29  ;;  %v17303_v21 = vadd.f32 %v13914_v23, %v12275_v49 }
 0x932   :  { %v5292_v26 = vpop.f32.mrf.mxu1  ;;  %v13939_v48 = vpop.f32.mrf.mxu0 }
 0x933   :  { %v12286_v47 = vmul.f32 -1.442695, %v5534_v11  ;;  %v17305_v7 = vadd.f32 %v12275_v49, %v5292_v26  ;;  %v17318_v11 = vpop.permute.xlu0 %5550 }
 0x934   :  { %v13917_v41 = vpop.f32.mrf.mxu1  ;;  %vm5552_vm5 = vcmp.eq.s32.totalorder %v17318_v11, 1 }
 0x935   :  { %v17307_v42 = vadd.f32 %v13917_v41, %v12275_v49  ;;  %15000 = vpow2.f32 %v12286_v47  ;;  %v5042_v41 = vadd.f32 %v17254_v30, %v17281_v2 }
 0x936   :  { %v5302_v37 = vpop.f32.mrf.mxu1 }
 0x937   :  { %v17309_v56 = vadd.f32 %v12275_v49, %v5302_v37 }
 0x938   :  { %v5523_v25 = vpop.f32.mrf.mxu1 }
 0x939   :  { %v5524_v18 = vadd.f32 %v17314_v4, %v5523_v25 }
 0x93a   :  { %v14999_v46 = vpop.eup %14998  ;;  %v13950_v10 = vpop.f32.mrf.mxu1 }
 0x93b   :  { %v5531_v61 = vadd.f32 1.0, %v14999_v46 }
 0x93d   :  { %15002 = vrcp.f32 %v5531_v61 }
 0x942   :  { %v15001_v28 = vpop.eup %15000 }
 0x943   :  { %v5538_v35 = vadd.f32 1.0, %v15001_v28 }
 0x945   :  { %15004 = vrcp.f32 %v5538_v35  ;;  %v5160_v35 = vadd.f32 %v17256_v22, %v17298_v43 }
 0x94a   :  { %v15003_v1 = vpop.eup %15002 }
 0x94b   :  { %v5541_v54 = vmul.f32 %v15003_v1, %v5524_v18 }
 0x94d   :  { %v5542_v5 = vadd.f32 %v5541_v54, %v5273_v57 }
 0x94f   :  { %15006 = vtanh.f32 %v5542_v5 }
 0x950   :  { %15008 = vtanh.f32 %v198_v6 }
 0x952   :  { %v15005_v44 = vpop.eup %15004 }
 0x953   :  { %v5544_v50 = vsub.f32 1.0, %v15005_v44  ;;  %v5546_v23 = vmul.f32 0.0, %v15005_v44 }
 0x95c   :  { %v15007_v29 = vpop.eup %15006 }
 0x95d   :  { %v5545_v31 = vmul.f32 %v15007_v29, %v5544_v50  ;;  %v17323_v49 = vpop.eup %15008 }
 0x95f   :  { %v17320_v26 = vadd.f32 %v5546_v23, %v5545_v31 }
 0x961   :  { %13960 = vmatmul.mubr.msk.f32.vlgmr.msra.gmra.mxu0 %vm1041_vm1, %v17320_v26  ;;  %13971 = vmatmul.mubr.msk.f32.vlgmr.msra.gmra.mxu1 %vm1041_vm1, %v17320_v26  ;;  %v17332_v0 = vsel %vm5552_vm5, %v17320_v26, 0.0 }
 0x962   :  { %13974 = vmatpush3.msra.mxu0 %v17189_v12  ;;  %v7234_v48 = vmul.f32 %v17323_v49, %v17332_v0  ;;  %13981 = vmatprep.mubr.msk.f32.mxu0 %vm15571_vm0, %v19145_v33 }
 0x963   :  { %13975 = vmatprep.subr.mxu0 %v19145_v33  ;;  %13985 = vmatpush3.msra.mxu1 %v17137_v13 }
 0x964   :  { %13976 = vmatpush3.msra.mxu0 %v17206_v15  ;;  %v7242_v47 = vsel %vm1041_vm1, %v7234_v48, 0.0  ;;  %13986 = vmatprep.subr.mxu1 %v19145_v33 }
 0x965   :  { %13977 = vmatprep.subr.mxu0 %v19145_v33  ;;  %7243 = vadd.xlane.f32.xlu0 %v7242_v47 }
 0x966   :  { %13978 = vmatpush3.msra.mxu0 %v17215_v39  ;;  %13987 = vmatpush3.msra.mxu1 %v17139_v19 }
 0x967   :  { %13979 = vmatprep.subr.mxu0 %v19145_v33  ;;  %13988 = vmatprep.subr.mxu1 %v19145_v33 }
 0x968   :  { %13980 = vmatpush3.msra.mxu0 %v17224_v52  ;;  %13989 = vmatpush3.msra.mxu1 %v17149_v63 }
 0x969   :  { %13982 = vmatmul.mubr.msk.f32.vlgmr.msra.gmra.mxu0 %vm1041_vm1, %v17320_v26  ;;  %13995 = vmatprep.subr.mxu0 %v19145_v33 }
 0x96a   :  { %13996 = vmatpush3.msra.mxu0 %v17182_v14  ;;  %13990 = vmatprep.subr.mxu1 %v19145_v33 }
 0x96b   :  { %13997 = vmatprep.subr.mxu0 %v19145_v33  ;;  %13991 = vmatpush3.msra.mxu1 %v17158_v3 }
 0x96c   :  { %13998 = vmatpush3.msra.mxu0 %v17187_v9  ;;  %13992 = vmatprep.mubr.msk.f32.mxu1 %vm15571_vm0, %v19145_v33 }
 0x96d   :  { %13999 = vmatprep.subr.mxu0 %v19145_v33  ;;  %14003 = vmatprep.mubr.msk.f32.mxu0 %vm15571_vm0, %v19145_v33 }
 0x96e   :  { %14000 = vmatpush3.msra.mxu0 %v17195_v17  ;;  %14006 = vmatprep.subr.mxu1 %v19145_v33 }
 0x96f   :  { %14001 = vmatprep.subr.mxu0 %v19145_v33 }
 0x970   :  { %14002 = vmatpush3.msra.mxu0 %v17204_v34 }
 0x971   :  { %14017 = vmatprep.subr.mxu0 %v19145_v33 }
 0xa21   :  { %v5623_v37 = vpop.f32.mrf.mxu0  ;;  %v5693_v25 = vpop.f32.mrf.mxu1 }
 0xa22   :  { %v5767_v46 = vadd.f32 %v5623_v37, %v5042_v41  ;;  %v5774_v18 = vadd.f32 %v5693_v25, %v5160_v35  ;;  %v17376_v41 = vpop.permute.xlu1 %5790 }
 0xa23   :  { %v13961_v10 = vpop.f32.mrf.mxu0  ;;  %v13972_v61 = vpop.f32.mrf.mxu1  ;;  %vm5792_vm6 = vcmp.eq.s32.totalorder %v17376_v41, 1 }
 0xa24   :  { %v12290_v28 = vmul.f32 -1.442695, %v5767_v46  ;;  %v12291_v54 = vmul.f32 -1.442695, %v5774_v18  ;;  %v5047_v46 = vadd.f32 %v17281_v2, %v17262_v40 }
 0xa26   :  { %15010 = vpow2.f32 %v12290_v28 }
 0xa27   :  { %15012 = vpow2.f32 %v12291_v54 }
 0xa29   :  { %v5763_v1 = vpop.f32.mrf.mxu0 }
 0xa2a   :  { %v5764_v6 = vadd.f32 %v17314_v4, %v5763_v1 }
 0xa2b   :  { %v13983_v57 = vpop.f32.mrf.mxu0 }
 0xa2c   :  { %v5165_v57 = vadd.f32 %v17298_v43, %v17264_v36 }
 0xa33   :  { %v15011_v55 = vpop.eup %15010 }
 0xa34   :  { %v5771_v5 = vadd.f32 1.0, %v15011_v55  ;;  %v15013_v27 = vpop.eup %15012 }
 0xa35   :  { %v5778_v30 = vadd.f32 1.0, %v15013_v27 }
 0xa36   :  { %15014 = vrcp.f32 %v5771_v5 }
 0xa37   :  { %15016 = vrcp.f32 %v5778_v30 }
 0xa43   :  { %v15015_v44 = vpop.eup %15014 }
 0xa44   :  { %v5781_v50 = vmul.f32 %v15015_v44, %v5764_v6  ;;  %v15017_v22 = vpop.eup %15016 }
 0xa45   :  { %v5784_v31 = vsub.f32 1.0, %v15017_v22  ;;  %v5786_v47 = vmul.f32 %v15017_v22, %v17320_v26 }
 0xa46   :  { %v5782_v29 = vadd.f32 %v5781_v50, %v17291_v45 }
 0xa48   :  { %15018 = vtanh.f32 %v5782_v29 }
 0xa55   :  { %v15019_v23 = vpop.eup %15018 }
 0xa56   :  { %v5785_v48 = vmul.f32 %v15019_v23, %v5784_v31 }
 0xa58   :  { %v17378_v37 = vadd.f32 %v5786_v47, %v5785_v48 }
 0xa5a   :  { %13993 = vmatmul.mubr.msk.f32.vlgmr.msra.gmra.mxu1 %vm1041_vm1, %v17378_v37  ;;  %14004 = vmatmul.mubr.msk.f32.vlgmr.msra.gmra.mxu0 %vm1041_vm1, %v17378_v37  ;;  %v17388_v45 = vsel %vm5792_vm6, %v17378_v37, 0.0 }
 0xa5b   :  { %14007 = vmatpush3.msra.mxu1 %v17189_v12  ;;  %v7235_v26 = vmul.f32 %v17323_v49, %v17388_v45  ;;  %14014 = vmatprep.mubr.msk.f32.mxu1 %vm15571_vm0, %v19145_v33 }
 0xa5c   :  { %14008 = vmatprep.subr.mxu1 %v19145_v33  ;;  %14018 = vmatpush3.msra.mxu0 %v17137_v13 }
 0xa5d   :  { %14009 = vmatpush3.msra.mxu1 %v17206_v15  ;;  %v7245_v25 = vsel %vm1041_vm1, %v7235_v26, 0.0  ;;  %14019 = vmatprep.subr.mxu0 %v19145_v33 }
 0xa5e   :  { %14010 = vmatprep.subr.mxu1 %v19145_v33  ;;  %7246 = vadd.xlane.f32.xlu1 %v7245_v25  ;;  %v17432_v25 = vpop.permute.xlu0 %6030 }
 0xa5f   :  { %14011 = vmatpush3.msra.mxu1 %v17215_v39  ;;  %14020 = vmatpush3.msra.mxu0 %v17139_v19  ;;  %19177 = vst [vmem:[#allocation18_spill] sm:$0xff] %v17432_v25  ;;  %vm6032_vm15 = vcmp.eq.s32.totalorder %v17432_v25, 1 }
 0xa60   :  { %14012 = vmatprep.subr.mxu1 %v19145_v33  ;;  %14021 = vmatprep.subr.mxu0 %v19145_v33 }
 0xa61   :  { %14013 = vmatpush3.msra.mxu1 %v17224_v52  ;;  %14022 = vmatpush3.msra.mxu0 %v17149_v63 }
 0xa62   :  { %14015 = vmatmul.mubr.msk.f32.vlgmr.msra.gmra.mxu1 %vm1041_vm1, %v17378_v37  ;;  %14028 = vmatprep.subr.mxu1 %v19145_v33 }
 0xa63   :  { %14029 = vmatpush3.msra.mxu1 %v17182_v14  ;;  %14023 = vmatprep.subr.mxu0 %v19145_v33 }
 0xa64   :  { %14030 = vmatprep.subr.mxu1 %v19145_v33  ;;  %14024 = vmatpush3.msra.mxu0 %v17158_v3 }
 0xa65   :  { %14031 = vmatpush3.msra.mxu1 %v17187_v9  ;;  %14025 = vmatprep.mubr.msk.f32.mxu0 %vm15571_vm0, %v19145_v33 }
 0xa66   :  { %14032 = vmatprep.subr.mxu1 %v19145_v33  ;;  %14036 = vmatprep.mubr.msk.f32.mxu1 %vm15571_vm0, %v19145_v33 }
 0xa67   :  { %14033 = vmatpush3.msra.mxu1 %v17195_v17  ;;  %14039 = vmatprep.subr.mxu0 %v19145_v33 }
 0xa68   :  { %14034 = vmatprep.subr.mxu1 %v19145_v33 }
 0xa69   :  { %14035 = vmatpush3.msra.mxu1 %v17204_v34 }
 0xa6a   :  { %14050 = vmatprep.subr.mxu1 %v19145_v33 }
 0xb1a   :  { %v5863_v10 = vpop.f32.mrf.mxu1  ;;  %v5933_v61 = vpop.f32.mrf.mxu0 }
 0xb1b   :  { %v6007_v28 = vadd.f32 %v5863_v10, %v5047_v46  ;;  %v6014_v54 = vadd.f32 %v5933_v61, %v5165_v57  ;;  %v5052_v61 = vadd.f32 %v17258_v38, %v17281_v2 }
 0xb1c   :  { %v13994_v35 = vpop.f32.mrf.mxu1  ;;  %v14005_v18 = vpop.f32.mrf.mxu0 }
 0xb1d   :  { %v12295_v1 = vmul.f32 -1.442695, %v6007_v28  ;;  %v12296_v27 = vmul.f32 -1.442695, %v6014_v54 }
 0xb1f   :  { %15020 = vpow2.f32 %v12295_v1 }
 0xb20   :  { %15022 = vpow2.f32 %v12296_v27 }
 0xb22   :  { %v6003_v55 = vpop.f32.mrf.mxu1 }
 0xb23   :  { %v6004_v50 = vadd.f32 %v17314_v4, %v6003_v55  ;;  %v5170_v55 = vadd.f32 %v17260_v8, %v17298_v43 }
 0xb24   :  { %v14016_v5 = vpop.f32.mrf.mxu1 }
 0xb2c   :  { %v15021_v30 = vpop.eup %15020 }
 0xb2d   :  { %v6011_v6 = vadd.f32 1.0, %v15021_v30  ;;  %v15023_v44 = vpop.eup %15022 }
 0xb2e   :  { %v6018_v40 = vadd.f32 1.0, %v15023_v44 }
 0xb2f   :  { %15024 = vrcp.f32 %v6011_v6 }
 0xb30   :  { %15026 = vrcp.f32 %v6018_v40 }
 0xb3c   :  { %v15025_v29 = vpop.eup %15024 }
 0xb3d   :  { %v6021_v22 = vmul.f32 %v15025_v29, %v6004_v50  ;;  %v15027_v36 = vpop.eup %15026 }
 0xb3e   :  { %v6024_v23 = vsub.f32 1.0, %v15027_v36  ;;  %v6026_v26 = vmul.f32 %v15027_v36, %v17378_v37 }
 0xb3f   :  { %v6022_v31 = vadd.f32 %v6021_v22, %v17301_v20 }
 0xb41   :  { %15028 = vtanh.f32 %v6022_v31 }
 0xb4e   :  { %v15029_v48 = vpop.eup %15028 }
 0xb4f   :  { %v6025_v47 = vmul.f32 %v15029_v48, %v6024_v23 }
 0xb51   :  { %v17434_v46 = vadd.f32 %v6026_v26, %v6025_v47 }
 0xb53   :  { %14026 = vmatmul.mubr.msk.f32.vlgmr.msra.gmra.mxu0 %vm1041_vm1, %v17434_v46  ;;  %14037 = vmatmul.mubr.msk.f32.vlgmr.msra.gmra.mxu1 %vm1041_vm1, %v17434_v46  ;;  %v17444_v20 = vsel %vm6032_vm15, %v17434_v46, 0.0 }
 0xb54   :  { %14040 = vmatpush3.msra.mxu0 %v17189_v12  ;;  %v7236_v37 = vmul.f32 %v17323_v49, %v17444_v20  ;;  %14047 = vmatprep.mubr.msk.f32.mxu0 %vm15571_vm0, %v19145_v33 }
 0xb55   :  { %14041 = vmatprep.subr.mxu0 %v19145_v33  ;;  %14051 = vmatpush3.msra.mxu1 %v17137_v13 }
 0xb56   :  { %14042 = vmatpush3.msra.mxu0 %v17206_v15  ;;  %v7248_v10 = vsel %vm1041_vm1, %v7236_v37, 0.0  ;;  %14052 = vmatprep.subr.mxu1 %v19145_v33  ;;  %v17488_v37 = vpop.permute.xlu1 %6270 }
 0xb57   :  { %14043 = vmatprep.subr.mxu0 %v19145_v33  ;;  %7249 = vadd.xlane.f32.xlu0 %v7248_v10  ;;  %19178 = vst [vmem:[#allocation19_spill] sm:$0xff] %v17488_v37  ;;  %vm6272_vm2 = vcmp.eq.s32.totalorder %v17488_v37, 1 }
 0xb58   :  { %14044 = vmatpush3.msra.mxu0 %v17215_v39  ;;  %14053 = vmatpush3.msra.mxu1 %v17139_v19 }
 0xb59   :  { %14045 = vmatprep.subr.mxu0 %v19145_v33  ;;  %14054 = vmatprep.subr.mxu1 %v19145_v33 }
 0xb5a   :  { %14046 = vmatpush3.msra.mxu0 %v17224_v52  ;;  %14055 = vmatpush3.msra.mxu1 %v17149_v63 }
 0xb5b   :  { %14048 = vmatmul.mubr.msk.f32.vlgmr.msra.gmra.mxu0 %vm1041_vm1, %v17434_v46  ;;  %14061 = vmatprep.subr.mxu0 %v19145_v33 }
 0xb5c   :  { %14062 = vmatpush3.msra.mxu0 %v17182_v14  ;;  %14056 = vmatprep.subr.mxu1 %v19145_v33 }
 0xb5d   :  { %14063 = vmatprep.subr.mxu0 %v19145_v33  ;;  %14057 = vmatpush3.msra.mxu1 %v17158_v3 }
 0xb5e   :  { %14064 = vmatpush3.msra.mxu0 %v17187_v9  ;;  %14058 = vmatprep.mubr.msk.f32.mxu1 %vm15571_vm0, %v19145_v33 }
 0xb5f   :  { %14065 = vmatprep.subr.mxu0 %v19145_v33  ;;  %14069 = vmatprep.mubr.msk.f32.mxu0 %vm15571_vm0, %v19145_v33 }
 0xb60   :  { %14066 = vmatpush3.msra.mxu0 %v17195_v17  ;;  %14072 = vmatprep.subr.mxu1 %v19145_v33 }
 0xb61   :  { %14067 = vmatprep.subr.mxu0 %v19145_v33 }
 0xb62   :  { %14068 = vmatpush3.msra.mxu0 %v17204_v34 }
 0xb63   :  { %14083 = vmatprep.subr.mxu0 %v19145_v33 }
 0xc13   :  { %v6103_v28 = vpop.f32.mrf.mxu0  ;;  %v6173_v35 = vpop.f32.mrf.mxu1 }
 0xc14   :  { %v6247_v18 = vadd.f32 %v6103_v28, %v5052_v61  ;;  %v6254_v5 = vadd.f32 %v6173_v35, %v5170_v55  ;;  %v5057_v28 = vadd.f32 %v17281_v2, %v17270_v58 }
 0xc15   :  { %v14027_v1 = vpop.f32.mrf.mxu0  ;;  %v14038_v57 = vpop.f32.mrf.mxu1 }
 0xc16   :  { %v12300_v54 = vmul.f32 -1.442695, %v6247_v18  ;;  %v12301_v6 = vmul.f32 -1.442695, %v6254_v5  ;;  %v5175_v5 = vadd.f32 %v17298_v43, %v17272_v59 }
 0xc18   :  { %15030 = vpow2.f32 %v12300_v54 }
 0xc19   :  { %15032 = vpow2.f32 %v12301_v6 }
 0xc1b   :  { %v6243_v27 = vpop.f32.mrf.mxu0 }
 0xc1c   :  { %v6244_v29 = vadd.f32 %v17314_v4, %v6243_v27 }
 0xc1d   :  { %v14049_v30 = vpop.f32.mrf.mxu0 }
 0xc25   :  { %v15031_v44 = vpop.eup %15030 }
 0xc26   :  { %v6251_v40 = vadd.f32 1.0, %v15031_v44  ;;  %v15033_v50 = vpop.eup %15032 }
 0xc27   :  { %v6258_v38 = vadd.f32 1.0, %v15033_v50 }
 0xc28   :  { %15034 = vrcp.f32 %v6251_v40 }
 0xc29   :  { %15036 = vrcp.f32 %v6258_v38 }
 0xc35   :  { %v15035_v22 = vpop.eup %15034 }
 0xc36   :  { %v6261_v31 = vmul.f32 %v15035_v22, %v6244_v29  ;;  %v15037_v8 = vpop.eup %15036 }
 0xc37   :  { %v6264_v23 = vsub.f32 1.0, %v15037_v8  ;;  %v6266_v26 = vmul.f32 %v15037_v8, %v17434_v46 }
 0xc38   :  { %v6262_v36 = vadd.f32 %v6261_v31, %v17293_v32 }
 0xc3a   :  { %15038 = vtanh.f32 %v6262_v36 }
 0xc47   :  { %v15039_v48 = vpop.eup %15038 }
 0xc48   :  { %v6265_v47 = vmul.f32 %v15039_v48, %v6264_v23 }
 0xc4a   :  { %v17490_v10 = vadd.f32 %v6266_v26, %v6265_v47  ;;  %v17544_v26 = vpop.permute.xlu0 %6510 }
 0xc4b   :  { %19179 = vst [vmem:[#allocation29_spill] sm:$0xff] %v17544_v26  ;;  %vm19101_vm3 = vcmp.eq.s32.totalorder %v17544_v26, 1 }
 0xc4c   :  { %14059 = vmatmul.mubr.msk.f32.vlgmr.msra.gmra.mxu1 %vm1041_vm1, %v17490_v10  ;;  %14070 = vmatmul.mubr.msk.f32.vlgmr.msra.gmra.mxu0 %vm1041_vm1, %v17490_v10  ;;  %v17500_v32 = vsel %vm6272_vm2, %v17490_v10, 0.0 }
 0xc4d   :  { %14073 = vmatpush3.msra.mxu1 %v17189_v12  ;;  %v7237_v46 = vmul.f32 %v17323_v49, %v17500_v32  ;;  %14080 = vmatprep.mubr.msk.f32.mxu1 %vm15571_vm0, %v19145_v33 }
 0xc4e   :  { %14074 = vmatprep.subr.mxu1 %v19145_v33  ;;  %14084 = vmatpush3.msra.mxu0 %v17137_v13 }
 0xc4f   :  { %14075 = vmatpush3.msra.mxu1 %v17206_v15  ;;  %v7251_v61 = vsel %vm1041_vm1, %v7237_v46, 0.0  ;;  %14085 = vmatprep.subr.mxu0 %v19145_v33 }
 0xc50   :  { %14076 = vmatprep.subr.mxu1 %v19145_v33  ;;  %7252 = vadd.xlane.f32.xlu0 %v7251_v61 }
 0xc51   :  { %14077 = vmatpush3.msra.mxu1 %v17215_v39  ;;  %14086 = vmatpush3.msra.mxu0 %v17139_v19 }
 0xc52   :  { %14078 = vmatprep.subr.mxu1 %v19145_v33  ;;  %14087 = vmatprep.subr.mxu0 %v19145_v33 }
 0xc53   :  { %14079 = vmatpush3.msra.mxu1 %v17224_v52  ;;  %14088 = vmatpush3.msra.mxu0 %v17149_v63 }
 0xc54   :  { %14081 = vmatmul.mubr.msk.f32.vlgmr.msra.gmra.mxu1 %vm1041_vm1, %v17490_v10  ;;  %14094 = vmatprep.subr.mxu1 %v19145_v33 }
 0xc55   :  { %14095 = vmatpush3.msra.mxu1 %v17182_v14  ;;  %14089 = vmatprep.subr.mxu0 %v19145_v33 }
 0xc56   :  { %14096 = vmatprep.subr.mxu1 %v19145_v33  ;;  %14090 = vmatpush3.msra.mxu0 %v17158_v3 }
 0xc57   :  { %14097 = vmatpush3.msra.mxu1 %v17187_v9  ;;  %14091 = vmatprep.mubr.msk.f32.mxu0 %vm15571_vm0, %v19145_v33 }
 0xc58   :  { %14098 = vmatprep.subr.mxu1 %v19145_v33  ;;  %14102 = vmatprep.mubr.msk.f32.mxu1 %vm15571_vm0, %v19145_v33 }
 0xc59   :  { %14099 = vmatpush3.msra.mxu1 %v17195_v17  ;;  %14105 = vmatprep.subr.mxu0 %v19145_v33 }
 0xc5a   :  { %14100 = vmatprep.subr.mxu1 %v19145_v33 }
 0xc5b   :  { %14101 = vmatpush3.msra.mxu1 %v17204_v34 }
 0xc5c   :  { %14116 = vmatprep.subr.mxu1 %v19145_v33 }
 0xd0c   :  { %v6343_v35 = vpop.f32.mrf.mxu1  ;;  %v6413_v18 = vpop.f32.mrf.mxu0 }
 0xd0d   :  { %v6487_v1 = vadd.f32 %v6343_v35, %v5057_v28  ;;  %v6494_v27 = vadd.f32 %v6413_v18, %v5175_v5 }
 0xd0e   :  { %v14060_v57 = vpop.f32.mrf.mxu1  ;;  %v14071_v54 = vpop.f32.mrf.mxu0 }
 0xd0f   :  { %v12305_v55 = vmul.f32 -1.442695, %v6487_v1  ;;  %v12306_v44 = vmul.f32 -1.442695, %v6494_v27  ;;  %v5180_v1 = vadd.f32 %v17268_v16, %v17298_v43 }
 0xd11   :  { %15040 = vpow2.f32 %v12305_v55 }
 0xd12   :  { %15042 = vpow2.f32 %v12306_v44 }
 0xd14   :  { %v6483_v30 = vpop.f32.mrf.mxu1 }
 0xd15   :  { %v6484_v29 = vadd.f32 %v17314_v4, %v6483_v30 }
 0xd16   :  { %v14082_v6 = vpop.f32.mrf.mxu1 }
 0xd1e   :  { %v15041_v40 = vpop.eup %15040 }
 0xd1f   :  { %v6491_v50 = vadd.f32 1.0, %v15041_v40  ;;  %v15043_v38 = vpop.eup %15042 }
 0xd20   :  { %v6498_v58 = vadd.f32 1.0, %v15043_v38 }
 0xd21   :  { %15044 = vrcp.f32 %v6491_v50 }
 0xd22   :  { %15046 = vrcp.f32 %v6498_v58 }
 0xd2e   :  { %v15045_v22 = vpop.eup %15044 }
 0xd2f   :  { %v6501_v31 = vmul.f32 %v15045_v22, %v6484_v29  ;;  %v15047_v59 = vpop.eup %15046 }
 0xd30   :  { %v6504_v8 = vsub.f32 1.0, %v15047_v59  ;;  %v6506_v47 = vmul.f32 %v15047_v59, %v17490_v10 }
 0xd31   :  { %v6502_v36 = vadd.f32 %v6501_v31, %v17305_v7 }
 0xd33   :  { %15048 = vtanh.f32 %v6502_v36  ;;  %v17600_v36 = vpop.permute.xlu1 %6750 }
 0xd34   :  { %19180 = vst [vmem:[#allocation42_spill] sm:$0xff] %v17600_v36  ;;  %vm19086_vm4 = vcmp.eq.s32.totalorder %v17600_v36, 1 }
 0xd40   :  { %v15049_v23 = vpop.eup %15048 }
 0xd41   :  { %v6505_v48 = vmul.f32 %v15049_v23, %v6504_v8  ;;  %v15400_v23 = vld [vmem:[#allocation9 + $0x18] sm:$0xff] }
 0xd43   :  { %v17546_v46 = vadd.f32 %v6506_v47, %v6505_v48  ;;  %v15402_v47 = vld [vmem:[#allocation9 + $0x8] sm:$0xff] }
 0xd45   :  { %14092 = vmatmul.mubr.msk.f32.vlgmr.msra.gmra.mxu0 %vm1041_vm1, %v17546_v46  ;;  %14103 = vmatmul.mubr.msk.f32.vlgmr.msra.gmra.mxu1 %vm1041_vm1, %v17546_v46  ;;  %v17556_v7 = vsel %vm19101_vm3, %v17546_v46, 0.0 }
 0xd46   :  { %14106 = vmatpush3.msra.mxu0 %v17189_v12  ;;  %v7238_v10 = vmul.f32 %v17323_v49, %v17556_v7  ;;  %14113 = vmatprep.mubr.msk.f32.mxu0 %vm15571_vm0, %v19145_v33 }
 0xd47   :  { %14107 = vmatprep.subr.mxu0 %v19145_v33  ;;  %14117 = vmatpush3.msra.mxu1 %v17137_v13  ;;  %v5062_v13 = vadd.f32 %v17266_v24, %v17281_v2 }
 0xd48   :  { %14108 = vmatpush3.msra.mxu0 %v17206_v15  ;;  %v7254_v61 = vsel %vm1041_vm1, %v7238_v10, 0.0  ;;  %14118 = vmatprep.subr.mxu1 %v19145_v33 }
 0xd49   :  { %14109 = vmatprep.subr.mxu0 %v19145_v33  ;;  %7255 = vadd.xlane.f32.xlu1 %v7254_v61 }
 0xd4a   :  { %14110 = vmatpush3.msra.mxu0 %v17215_v39  ;;  %14119 = vmatpush3.msra.mxu1 %v17139_v19 }
 0xd4b   :  { %14111 = vmatprep.subr.mxu0 %v19145_v33  ;;  %14120 = vmatprep.subr.mxu1 %v19145_v33 }
 0xd4c   :  { %14112 = vmatpush3.msra.mxu0 %v17224_v52  ;;  %14121 = vmatpush3.msra.mxu1 %v17149_v63 }
 0xd4d   :  { %14114 = vmatmul.mubr.msk.f32.vlgmr.msra.gmra.mxu0 %vm1041_vm1, %v17546_v46  ;;  %14127 = vmatprep.subr.mxu0 %v19145_v33 }
 0xd4e   :  { %14128 = vmatpush3.msra.mxu0 %v17182_v14  ;;  %14122 = vmatprep.subr.mxu1 %v19145_v33 }
 0xd4f   :  { %14129 = vmatprep.subr.mxu0 %v19145_v33  ;;  %14123 = vmatpush3.msra.mxu1 %v17158_v3 }
 0xd50   :  { %14130 = vmatpush3.msra.mxu0 %v17187_v9  ;;  %14124 = vmatprep.mubr.msk.f32.mxu1 %vm15571_vm0, %v19145_v33 }
 0xd51   :  { %14131 = vmatprep.subr.mxu0 %v19145_v33  ;;  %14135 = vmatprep.mubr.msk.f32.mxu0 %vm15571_vm0, %v19145_v33 }
 0xd52   :  { %14132 = vmatpush3.msra.mxu0 %v17195_v17  ;;  %14138 = vmatprep.subr.mxu1 %v19145_v33 }
 0xd53   :  { %14133 = vmatprep.subr.mxu0 %v19145_v33 }
 0xd54   :  { %14134 = vmatpush3.msra.mxu0 %v17204_v34 }
 0xd55   :  { %14149 = vmatprep.subr.mxu0 %v19145_v33 }
 0xe05   :  { %v6583_v19 = vpop.f32.mrf.mxu0  ;;  %v6653_v63 = vpop.f32.mrf.mxu1 }
 0xe06   :  { %v6727_v3 = vadd.f32 %v6583_v19, %v5062_v13  ;;  %v6734_v57 = vadd.f32 %v6653_v63, %v5180_v1  ;;  %v5185_v13 = vadd.f32 %v17298_v43, %v17285_v53 }
 0xe07   :  { %v14093_v28 = vpop.f32.mrf.mxu0  ;;  %v14104_v35 = vpop.f32.mrf.mxu1 }
 0xe08   :  { %v12310_v18 = vmul.f32 -1.442695, %v6727_v3  ;;  %v12311_v5 = vmul.f32 -1.442695, %v6734_v57 }
 0xe0a   :  { %15050 = vpow2.f32 %v12310_v18 }
 0xe0b   :  { %15052 = vpow2.f32 %v12311_v5  ;;  %v17653_v5 = vpop.permute.xlu0 %6990 }
 0xe0c   :  { %19181 = vst [vmem:[#allocation28_spill] sm:$0xff] %v17653_v5 }
 0xe0d   :  { %v6723_v54 = vpop.f32.mrf.mxu0 }
 0xe0e   :  { %v6724_v44 = vadd.f32 %v17314_v4, %v6723_v54 }
 0xe0f   :  { %v14115_v55 = vpop.f32.mrf.mxu0 }
 0xe17   :  { %v15051_v27 = vpop.eup %15050 }
 0xe18   :  { %v6731_v30 = vadd.f32 1.0, %v15051_v27  ;;  %v15053_v6 = vpop.eup %15052 }
 0xe19   :  { %v6738_v24 = vadd.f32 1.0, %v15053_v6 }
 0xe1a   :  { %15054 = vrcp.f32 %v6731_v30 }
 0xe1b   :  { %15056 = vrcp.f32 %v6738_v24  ;;  %v15404_v24 = vld [vmem:[#allocation9 + $0x58] sm:$0xff] }
 0xe27   :  { %v15055_v40 = vpop.eup %15054 }
 0xe28   :  { %v6741_v50 = vmul.f32 %v15055_v40, %v6724_v44  ;;  %v15057_v16 = vpop.eup %15056  ;;  %v12324_v40 = vld [vmem:[%s19060_s11 + $0x68] sm:$0xff] }
 0xe29   :  { %v6744_v58 = vsub.f32 1.0, %v15057_v16  ;;  %v6746_v31 = vmul.f32 %v15057_v16, %v17546_v46  ;;  %v12323_v16 = vld [vmem:[%s19060_s11 + $0x60] sm:$0xff] }
 0xe2a   :  { %v6742_v38 = vadd.f32 %v6741_v50, %v17303_v21  ;;  %v15405_v50 = vld [vmem:[#allocation9 + $0x50] sm:$0xff] }
 0xe2c   :  { %15058 = vtanh.f32 %v6742_v38 }
 0xe39   :  { %v15059_v29 = vpop.eup %15058 }
 0xe3a   :  { %v6745_v22 = vmul.f32 %v15059_v29, %v6744_v58  ;;  %v15406_v58 = vld [vmem:[#allocation9 + $0x48] sm:$0xff] }
 0xe3b   :  { %v12340_v29 = vld [vmem:[%s19060_s11 + $0x98] sm:$0xff] }
 0xe3c   :  { %v17602_v59 = vadd.f32 %v6746_v31, %v6745_v22  ;;  %v15407_v22 = vld [vmem:[#allocation9 + $0x40] sm:$0xff] }
 0xe3d   :  { %v12339_v31 = vld [vmem:[%s19060_s11 + $0x90] sm:$0xff] }
 0xe3e   :  { %14125 = vmatmul.mubr.msk.f32.vlgmr.msra.gmra.mxu1 %vm1041_vm1, %v17602_v59  ;;  %14136 = vmatmul.mubr.msk.f32.vlgmr.msra.gmra.mxu0 %vm1041_vm1, %v17602_v59  ;;  %v17612_v21 = vsel %vm19086_vm4, %v17602_v59, 0.0  ;;  %vm19087_vm4 = vcmp.eq.s32.totalorder %v17653_v5, 1  ;;  %v17904_v5 = vld [vmem:[%s19062_s13 + $0x4] ss:$0 sm:$0xff] }
 0xe3f   :  { %14139 = vmatpush3.msra.mxu1 %v17189_v12  ;;  %v7239_v8 = vmul.f32 %v17323_v49, %v17612_v21  ;;  %14146 = vmatprep.mubr.msk.f32.mxu1 %vm15571_vm0, %v19145_v33  ;;  %v15401_v12 = vld [vmem:[#allocation9 + $0x10] sm:$0xff] }
 0xe40   :  { %14140 = vmatprep.subr.mxu1 %v19145_v33  ;;  %14150 = vmatpush3.msra.mxu0 %v15400_v23  ;;  %v17728_v23 = vld [vmem:[#allocation9 + $0x78] sm:$0xff] }
 0xe41   :  { %14141 = vmatpush3.msra.mxu1 %v17206_v15  ;;  %v7257_v48 = vsel %vm1041_vm1, %v7239_v8, 0.0  ;;  %14151 = vmatprep.subr.mxu0 %v19145_v33  ;;  %v15403_v15 = vld [vmem:[#allocation9] sm:$0xff]  ;;  %v12337_v8 = vld [vmem:[%s19060_s11 + $0x80] sm:$0xff] }
 0xe42   :  { %14142 = vmatprep.subr.mxu1 %v19145_v33  ;;  %7258 = vadd.xlane.f32.xlu0 %v7257_v48  ;;  %v17730_v48 = vld [vmem:[#allocation9 + $0x70] sm:$0xff] }
 0xe43   :  { %14143 = vmatpush3.msra.mxu1 %v17215_v39  ;;  %14152 = vmatpush3.msra.mxu0 %v15401_v12  ;;  %v12354_v12 = vld [vmem:[%s19060_s11 + $0xb8] sm:$0xff] }
 0xe44   :  { %14144 = vmatprep.subr.mxu1 %v19145_v33  ;;  %14153 = vmatprep.subr.mxu0 %v19145_v33 }
 0xe45   :  { %14145 = vmatpush3.msra.mxu1 %v17224_v52  ;;  %14154 = vmatpush3.msra.mxu0 %v15402_v47  ;;  %v12353_v47 = vld [vmem:[%s19060_s11 + $0xb0] sm:$0xff] }
 0xe46   :  { %14147 = vmatmul.mubr.msk.f32.vlgmr.msra.gmra.mxu1 %vm1041_vm1, %v17602_v59  ;;  %14160 = vmatprep.subr.mxu1 %v19145_v33 }
 0xe47   :  { %14161 = vmatpush3.msra.mxu1 %v17182_v14  ;;  %14155 = vmatprep.subr.mxu0 %v19145_v33  ;;  %v12326_v14 = vld [vmem:[%s19060_s11 + $0x78] sm:$0xff] }
 0xe48   :  { %14162 = vmatprep.subr.mxu1 %v19145_v33  ;;  %14156 = vmatpush3.msra.mxu0 %v15403_v15  ;;  %v17740_v15 = vld [vmem:[#allocation9 + $0x68] sm:$0xff] }
 0xe49   :  { %14163 = vmatpush3.msra.mxu1 %v17187_v9  ;;  %14157 = vmatprep.mubr.msk.f32.mxu0 %vm15571_vm0, %v19145_v33  ;;  %v5067_v9 = vadd.f32 %v17281_v2, %v17283_v51 }
 0xe4a   :  { %14164 = vmatprep.subr.mxu1 %v19145_v33  ;;  %14168 = vmatprep.mubr.msk.f32.mxu1 %vm15571_vm0, %v19145_v33 }
 0xe4b   :  { %14165 = vmatpush3.msra.mxu1 %v17195_v17  ;;  %14171 = vmatprep.subr.mxu0 %v19145_v33 }
 0xe4c   :  { %14166 = vmatprep.subr.mxu1 %v19145_v33 }
 0xe4d   :  { %14167 = vmatpush3.msra.mxu1 %v17204_v34 }
 0xe4e   :  { %14182 = vmatprep.subr.mxu1 %v12326_v14 }
 0xefe   :  { %v6823_v39 = vpop.f32.mrf.mxu1  ;;  %v6893_v52 = vpop.f32.mrf.mxu0 }
 0xeff   :  { %v6967_v46 = vadd.f32 %v6823_v39, %v5067_v9  ;;  %v6974_v19 = vadd.f32 %v6893_v52, %v5185_v13  ;;  %v17749_v9 = vld [vmem:[#allocation9 + $0x60] sm:$0xff]  ;;  %v12351_v39 = vld [vmem:[%s19060_s11 + $0xa0] sm:$0xff] }
 0xf00   :  { %v14126_v10 = vpop.f32.mrf.mxu1  ;;  %v14137_v61 = vpop.f32.mrf.mxu0  ;;  %v15408_v52 = vld [vmem:[%s19062_s13] ss:$0 sm:$0xff] }
 0xf01   :  { %v12315_v17 = vmul.f32 -1.442695, %v6967_v46  ;;  %v12316_v3 = vmul.f32 -1.442695, %v6974_v19  ;;  %v5072_v46 = vadd.f32 %v15408_v52, %v17274_v60 }
 0xf03   :  { %15060 = vpow2.f32 %v12315_v17 }
 0xf04   :  { %15062 = vpow2.f32 %v12316_v3 }
 0xf06   :  { %v6963_v34 = vpop.f32.mrf.mxu1 }
 0xf07   :  { %v6964_v51 = vadd.f32 %v17314_v4, %v6963_v34  ;;  %v12325_v4 = vld [vmem:[%s19060_s11 + $0x70] sm:$0xff] }
 0xf08   :  { %v14148_v63 = vpop.f32.mrf.mxu1 }
 0xf09   :  { %v15409_v63 = vld [vmem:[%s19062_s13 + $0x1] ss:$0 sm:$0xff] }
 0xf0a   :  { %v5190_v3 = vadd.f32 %v15409_v63, %v17276_v62 }
 0xf10   :  { %v15061_v28 = vpop.eup %15060 }
 0xf11   :  { %v6971_v35 = vadd.f32 1.0, %v15061_v28  ;;  %v15063_v18 = vpop.eup %15062 }
 0xf12   :  { %v6978_v2 = vadd.f32 1.0, %v15063_v18 }
 0xf13   :  { %15064 = vrcp.f32 %v6971_v35 }
 0xf14   :  { %15066 = vrcp.f32 %v6978_v2 }
 0xf20   :  { %v15065_v1 = vpop.eup %15064 }
 0xf21   :  { %v6981_v57 = vmul.f32 %v15065_v1, %v6964_v51  ;;  %v15067_v53 = vpop.eup %15066 }
 0xf22   :  { %v6984_v43 = vsub.f32 1.0, %v15067_v53  ;;  %v6986_v30 = vmul.f32 %v15067_v53, %v17602_v59  ;;  %v12338_v59 = vld [vmem:[%s19060_s11 + $0x88] sm:$0xff] }
 0xf23   :  { %v6982_v54 = vadd.f32 %v6981_v57, %v17309_v56 }
 0xf25   :  { %15068 = vtanh.f32 %v6982_v54  ;;  %v15410_v54 = vld [vmem:[%s19062_s13 + $0x3] ss:$0 sm:$0xff] }
 0xf32   :  { %v15069_v55 = vpop.eup %15068 }
 0xf33   :  { %v6985_v27 = vmul.f32 %v15069_v55, %v6984_v43 }
 0xf35   :  { %v17656_v6 = vadd.f32 %v6986_v30, %v6985_v27 }
 0xf37   :  { %14158 = vmatmul.mubr.msk.f32.vlgmr.msra.gmra.mxu0 %vm1041_vm1, %v17656_v6  ;;  %14169 = vmatmul.mubr.msk.f32.vlgmr.msra.gmra.mxu1 %vm1041_vm1, %v17656_v6  ;;  %v17669_v56 = vsel %vm19087_vm4, %v17656_v6, 0.0 }
 0xf38   :  { %14172 = vmatpush3.msra.mxu0 %v15404_v24  ;;  %14183 = vmatpush3.msra.mxu1 %v12326_v14  ;;  %v7240_v44 = vmul.f32 %v17323_v49, %v17669_v56  ;;  %v12352_v14 = vld [vmem:[%s19060_s11 + $0xa8] sm:$0xff]  ;;  %v17769_v24 = vpop.permute.xlu1 %7230 }
 0xf39   :  { %14173 = vmatprep.subr.mxu0 %v19145_v33  ;;  %14184 = vmatprep.subr.mxu1 %v12325_v4  ;;  %19182 = vst [vmem:[#allocation43_spill] sm:$0xff] %v17769_v24  ;;  %vm7232_vm4 = vcmp.eq.s32.totalorder %v17769_v24, 1 }
 0xf3a   :  { %14190 = vmatprep.mubr.msk.f32.mxu1 %vm1041_vm1, %v17332_v0  ;;  %14174 = vmatpush3.msra.mxu0 %v15405_v50  ;;  %v7260_v38 = vsel %vm1041_vm1, %v7240_v44, 0.0 }
 0xf3b   :  { %14185 = vmatpush3.msra.mxu1 %v12325_v4  ;;  %14175 = vmatprep.subr.mxu0 %v19145_v33 }
 0xf3c   :  { %14186 = vmatprep.subr.mxu1 %v12324_v40  ;;  %14176 = vmatpush3.msra.mxu0 %v15406_v58  ;;  %v17793_v58 = vld [vmem:[#allocation9 + $0x90] sm:$0xff] }
 0xf3d   :  { %14187 = vmatpush3.msra.mxu1 %v12324_v40  ;;  %7261 = vadd.xlane.f32.xlu1 %v7260_v38 }
 0xf3e   :  { %14177 = vmatprep.subr.mxu0 %v19145_v33  ;;  %14188 = vmatprep.subr.mxu1 %v12323_v16 }
 0xf3f   :  { %14178 = vmatpush3.msra.mxu0 %v15407_v22  ;;  %14179 = vmatprep.mubr.msk.f32.mxu0 %vm15571_vm0, %v19145_v33  ;;  %v17801_v22 = vld [vmem:[#allocation9 + $0x88] sm:$0xff] }
 0xf40   :  { %14189 = vmatpush3.msra.mxu1 %v12323_v16  ;;  %14180 = vmatmul.mubr.msk.f32.vlgmr.msra.gmra.mxu0 %vm1041_vm1, %v17656_v6  ;;  %v17788_v16 = vld [vmem:[#allocation9 + $0x98] sm:$0xff] }
 0xf41   :  { %14191 = vmatmul.mubr.msk.f32.vlgmr.msra.gmra.mxu1 %vm1041_vm1, %v17388_v45  ;;  %14202 = vmatprep.subr.mxu0 %v12340_v29 }
 0xf42   :  { %14193 = vmatprep.mubr.msk.f32.mxu1 %vm1041_vm1, %v17444_v20  ;;  %14203 = vmatpush3.msra.mxu0 %v12340_v29  ;;  %v17795_v29 = vld [vmem:[#allocation9 + $0xb8] sm:$0xff] }
 0xf43   :  { %14210 = vmatprep.mubr.msk.f32.mxu0 %vm1041_vm1, %v17332_v0  ;;  %14204 = vmatprep.subr.mxu0 %v12339_v31 }
 0xf44   :  { %14205 = vmatpush3.msra.mxu0 %v12339_v31  ;;  %14222 = vmatprep.subr.mxu1 %v12354_v12  ;;  %v17810_v31 = vld [vmem:[#allocation9 + $0x80] sm:$0xff] }
 0xf45   :  { %14194 = vmatmul.mubr.msk.f32.gmra.mxu1 %vm1041_vm1, %v17500_v32  ;;  %14206 = vmatprep.subr.mxu0 %v12338_v59 }
 0xf46   :  { %14196 = vmatprep.mubr.msk.f32.mxu1 %vm1041_vm1, %v17556_v7  ;;  %14207 = vmatpush3.msra.mxu0 %v12338_v59  ;;  %v17812_v59 = vld [vmem:[#allocation9 + $0xb0] sm:$0xff] }
 0xf47   :  { %14208 = vmatprep.subr.mxu0 %v12337_v8  ;;  %14223 = vmatpush3.msra.mxu1 %v12354_v12  ;;  %v17830_v12 = vld [vmem:[#allocation9 + $0xa0] sm:$0xff] }
 0xf48   :  { %14209 = vmatpush3.msra.mxu0 %v12337_v8  ;;  %14224 = vmatprep.subr.mxu1 %v12353_v47  ;;  %v17821_v8 = vld [vmem:[#allocation9 + $0xa8] sm:$0xff] }
 0xf49   :  { %14197 = vmatmul.mubr.msk.f32.gmra.mxu1 %vm1041_vm1, %v17612_v21  ;;  %14211 = vmatmul.mubr.msk.f32.vlgmr.msra.gmra.mxu0 %vm1041_vm1, %v17388_v45 }
 0xf4a   :  { %14199 = vmatprep.mubr.msk.f32.mxu1 %vm1041_vm1, %v17669_v56  ;;  %14213 = vmatprep.mubr.msk.f32.mxu0 %vm1041_vm1, %v17444_v20 }
 0xf4b   :  { %14242 = vmatprep.subr.mxu0 %v19145_v33  ;;  %14225 = vmatpush3.msra.mxu1 %v12353_v47  ;;  %v7244_v47 = vpop.xlane.xlu0 %7243 }
 0xf4c   :  { %14243 = vmatpush3.msra.mxu0 %v17728_v23  ;;  %14226 = vmatprep.subr.mxu1 %v12352_v14 }
 0xf4d   :  { %14214 = vmatmul.mubr.msk.f32.gmra.mxu0 %vm1041_vm1, %v17500_v32  ;;  %14244 = vmatprep.subr.mxu0 %v19145_v33 }
 0xf4e   :  { %14216 = vmatprep.mubr.msk.f32.mxu0 %vm1041_vm1, %v17556_v7  ;;  %14245 = vmatpush3.msra.mxu0 %v17730_v48 }
 0xf4f   :  { %14246 = vmatprep.subr.mxu0 %v19145_v33  ;;  %14227 = vmatpush3.msra.mxu1 %v12352_v14  ;;  %v7247_v14 = vpop.xlane.xlu1 %7246 }
 0xf50   :  { %14247 = vmatpush3.msra.mxu0 %v17740_v15  ;;  %14228 = vmatprep.subr.mxu1 %v12351_v39 }
 0xf51   :  { %14217 = vmatmul.mubr.msk.f32.gmra.mxu0 %vm1041_vm1, %v17612_v21  ;;  %14248 = vmatprep.subr.mxu0 %v19145_v33 }
 0xf52   :  { %14219 = vmatprep.mubr.msk.f32.mxu0 %vm1041_vm1, %v17669_v56  ;;  %14249 = vmatpush3.msra.mxu0 %v17749_v9 }
 0xf53   :  { %14253 = vmatprep.subr.mxu0 %v19145_v33  ;;  %14229 = vmatpush3.msra.mxu1 %v12351_v39  ;;  %v7250_v39 = vpop.xlane.xlu0 %7249 }
 0xf54   :  { %14264 = vmatprep.subr.mxu1 %v19145_v33 }
 0xf57   :  { %v7253_v52 = vpop.xlane.xlu0 %7252 }
 0xff7   :  { %v7063_v10 = vpop.f32.mrf.mxu0  ;;  %v7133_v61 = vpop.f32.mrf.mxu1 }
 0xff8   :  { %v7207_v17 = vadd.f32 %v7063_v10, %v5072_v46  ;;  %v7214_v28 = vadd.f32 %v7133_v61, %v5190_v3  ;;  %v7256_v46 = vpop.xlane.xlu1 %7255  ;;  %v7259_v10 = vpop.xlane.xlu0 %7258 }
 0xff9   :  { %v14159_v13 = vpop.f32.mrf.mxu0  ;;  %v14170_v19 = vpop.f32.mrf.mxu1 }
 0xffa   :  { %v12320_v34 = vmul.f32 -1.442695, %v7207_v17  ;;  %v12321_v18 = vmul.f32 -1.442695, %v7214_v28 }
 0xffc   :  { %15070 = vpow2.f32 %v12320_v34  ;;  %v7262_v61 = vpop.xlane.xlu1 %7261 }
 0xffd   :  { %15072 = vpow2.f32 %v12321_v18 }
0x1000   :  { %v7203_v35 = vpop.f32.mrf.mxu0 }
0x1001   :  { %v7204_v53 = vadd.f32 %v15410_v54, %v7203_v35 }
0x1002   :  { %v14181_v2 = vpop.f32.mrf.mxu0 }
0x1009   :  { %v15071_v51 = vpop.eup %15070 }
0x100a   :  { %v7211_v60 = vadd.f32 1.0, %v15071_v51  ;;  %v15073_v1 = vpop.eup %15072 }
0x100b   :  { %v7218_v57 = vadd.f32 1.0, %v15073_v1 }
0x100c   :  { %15074 = vrcp.f32 %v7211_v60 }
0x100d   :  { %15076 = vrcp.f32 %v7218_v57  ;;  %v12003_v57 = vld [vmem:[%s19063_s14 + $0x10] sm:$0xff] }
0x1019   :  { %v15075_v43 = vpop.eup %15074 }
0x101a   :  { %v7221_v55 = vmul.f32 %v15075_v43, %v7204_v53  ;;  %v15077_v27 = vpop.eup %15076 }
0x101b   :  { %v7224_v30 = vsub.f32 1.0, %v15077_v27  ;;  %v7226_v40 = vmul.f32 %v15077_v27, %v17656_v6 }
0x101c   :  { %v7222_v62 = vadd.f32 %v7221_v55, %v17307_v42 }
0x101e   :  { %15078 = vtanh.f32 %v7222_v62 }
0x101f   :  { %15080 = vtanh.f32 %v7247_v14 }
0x1020   :  { %15082 = vtanh.f32 %v7244_v47 }
0x1021   :  { %15084 = vtanh.f32 %v7250_v39  ;;  %v12001_v39 = vld [vmem:[%s19063_s14] sm:$0xff] }
0x1022   :  { %15086 = vtanh.f32 %v7253_v52 }
0x1023   :  { %15088 = vtanh.f32 %v7256_v46 }
0x1024   :  { %15090 = vtanh.f32 %v7259_v10 }
0x1025   :  { %15092 = vtanh.f32 %v7262_v61 }
0x102b   :  { %v15079_v4 = vpop.eup %15078 }
0x102c   :  { %v7225_v44 = vmul.f32 %v15079_v4, %v7224_v30  ;;  %v15081_v17 = vpop.eup %15080  ;;  %v12002_v4 = vld [vmem:[%s19063_s14 + $0x8] sm:$0xff] }
0x102d   :  { %v15083_v13 = vpop.eup %15082  ;;  %v7275_v3 = vsel %vm243_vm7, %v15081_v17, -1e+30 }
0x102e   :  { %v7227_v50 = vadd.f32 %v7226_v40, %v7225_v44  ;;  %v15085_v19 = vpop.eup %15084  ;;  %v7274_v18 = vsel %vm242_vm10, %v15083_v13, -1e+30 }
0x102f   :  { %v15087_v28 = vpop.eup %15086  ;;  %v7276_v51 = vsel %vm244_vm11, %v15085_v19, -1e+30  ;;  %v7282_v1 = vmax.f32 %v7274_v18, %v7275_v3 }
0x1030   :  { %v17775_v38 = vsel %vm7232_vm4, %v7227_v50, 0.0  ;;  %v15089_v60 = vpop.eup %15088  ;;  %v7277_v54 = vsel %vm245_vm8, %v15087_v28, -1e+30  ;;  %v12004_v50 = vld [vmem:[%s19063_s14 + $0x18] sm:$0xff] }
0x1031   :  { %14200 = vmatmul.mubr.msk.f32.gmra.mxu1 %vm1041_vm1, %v17775_v38  ;;  %14220 = vmatmul.mubr.msk.f32.gmra.mxu0 %vm1041_vm1, %v17775_v38  ;;  %v7241_v42 = vmul.f32 %v17323_v49, %v17775_v38  ;;  %v15091_v53 = vpop.eup %15090  ;;  %v7283_v43 = vmax.f32 %v7282_v1, %v7276_v51  ;;  %v7278_v62 = vsel %vm246_vm12, %v15089_v60, -1e+30 }
0x1032   :  { %14230 = vmatprep.mubr.msk.f32.mxu1 %vm1041_vm1, %v17332_v0  ;;  %14250 = vmatprep.mubr.msk.f32.mxu0 %vm15571_vm0, %v19145_v33  ;;  %v15093_v27 = vpop.eup %15092  ;;  %v7279_v44 = vsel %vm247_vm9, %v15091_v53, -1e+30 }
0x1033   :  { %v7263_v6 = vsel %vm1041_vm1, %v7241_v42, 0.0  ;;  %v7284_v30 = vmax.f32 %v7283_v43, %v7277_v54  ;;  %v7280_v42 = vsel %vm248_vm13, %v15093_v27, -1e+30  ;;  %v17877_v43 = vpop.f32.mrf.mxu1  ;;  %v17879_v27 = vpop.f32.mrf.mxu0 }
0x1034   :  { %7264 = vadd.xlane.f32.xlu0 %v7263_v6 }
0x1035   :  { %14231 = vmatmul.mubr.msk.f32.vlgmr.msra.gmra.mxu1 %vm1041_vm1, %v17388_v45  ;;  %14251 = vmatmul.mubr.f32.vlgmr.msra.gmra.mxu0 %v19145_v33  ;;  %v7285_v40 = vmax.f32 %v7284_v30, %v7278_v62 }
0x1036   :  { %14254 = vmatpush3.msra.mxu0 %v17788_v16  ;;  %14233 = vmatprep.mubr.msk.f32.mxu1 %vm1041_vm1, %v17444_v20 }
0x1037   :  { %14255 = vmatprep.subr.mxu0 %v19145_v33  ;;  %14261 = vmatprep.mubr.msk.f32.mxu0 %vm15571_vm0, %v19145_v33  ;;  %v7286_v6 = vmax.f32 %v7285_v40, %v7279_v44 }
0x1038   :  { %14256 = vmatpush3.msra.mxu0 %v17793_v58  ;;  %14265 = vmatpush3.msra.mxu1 %v17795_v29 }
0x1039   :  { %14257 = vmatprep.subr.mxu0 %v19145_v33  ;;  %14234 = vmatmul.mubr.msk.f32.gmra.mxu1 %vm1041_vm1, %v17500_v32  ;;  %v7287_v14 = vmax.f32 %v7286_v6, %v7280_v42  ;;  %v7633_v6 = vpop.f32.mrf.mxu0 }
0x103a   :  { %14258 = vmatpush3.msra.mxu0 %v17801_v22  ;;  %14236 = vmatprep.mubr.msk.f32.mxu1 %vm1041_vm1, %v17556_v7 }
0x103b   :  { %14259 = vmatprep.subr.mxu0 %v19145_v33  ;;  %14266 = vmatprep.subr.mxu1 %v19145_v33 }
0x103c   :  { %14260 = vmatpush3.msra.mxu0 %v17810_v31  ;;  %14267 = vmatpush3.msra.mxu1 %v17812_v59 }
0x103d   :  { %14262 = vmatmul.mubr.f32.vlgmr.msra.gmra.mxu0 %v19145_v33  ;;  %14237 = vmatmul.mubr.msk.f32.gmra.mxu1 %vm1041_vm1, %v17612_v21 }
0x103e   :  { %14239 = vmatprep.mubr.msk.f32.mxu1 %vm1041_vm1, %v17669_v56  ;;  %14268 = vmatprep.subr.mxu1 %v19145_v33 }
0x103f   :  { %14269 = vmatpush3.msra.mxu1 %v17821_v8  ;;  %14275 = vmatprep.subr.mxu0 %v19145_v33 }
0x1040   :  { %14270 = vmatprep.subr.mxu1 %v19145_v33  ;;  %14276 = vmatpush3.msra.mxu0 %v17728_v23 }
0x1041   :  { %14240 = vmatmul.mubr.msk.f32.gmra.mxu1 %vm1041_vm1, %v17775_v38  ;;  %14277 = vmatprep.subr.mxu0 %v19145_v33 }
0x1042   :  { %14271 = vmatpush3.msra.mxu1 %v17830_v12  ;;  %14272 = vmatprep.mubr.msk.f32.mxu1 %vm15571_vm0, %v19145_v33 }
0x1043   :  { %14286 = vmatprep.subr.mxu1 %v19145_v33  ;;  %14278 = vmatpush3.msra.mxu0 %v17730_v48 }
0x1044   :  { %14279 = vmatprep.subr.mxu0 %v19145_v33  ;;  %14283 = vmatprep.mubr.msk.f32.mxu0 %vm15571_vm0, %v19145_v33 }
0x1045   :  { %14273 = vmatmul.mubr.f32.vlgmr.msra.gmra.mxu1 %v19145_v33  ;;  %14280 = vmatpush3.msra.mxu0 %v17740_v15 }
0x1046   :  { %14287 = vmatpush3.msra.mxu1 %v17788_v16  ;;  %14281 = vmatprep.subr.mxu0 %v19145_v33 }
0x1047   :  { %14288 = vmatprep.subr.mxu1 %v19145_v33  ;;  %14282 = vmatpush3.msra.mxu0 %v17749_v9 }
0x1048   :  { %14289 = vmatpush3.msra.mxu1 %v17793_v58  ;;  %14294 = vmatprep.mubr.msk.f32.mxu1 %vm15571_vm0, %v19145_v33 }
0x1049   :  { %14290 = vmatprep.subr.mxu1 %v19145_v33  ;;  %14297 = vmatprep.subr.mxu0 %v19145_v33 }
0x104a   :  { %14291 = vmatpush3.msra.mxu1 %v17801_v22 }
0x104b   :  { %14292 = vmatprep.subr.mxu1 %v19145_v33 }
0x104c   :  { %14293 = vmatpush3.msra.mxu1 %v17810_v31 }
0x104d   :  { %14308 = vmatprep.subr.mxu1 %v19145_v33 }
0x10bd   :  { %v7265_v34 = vpop.xlane.xlu0 %7264 }
0x10be   :  { %15094 = vtanh.f32 %v7265_v34 }
0x10cb   :  { %v15095_v47 = vpop.eup %15094 }
0x10cc   :  { %v7281_v52 = vsel %vm249_vm14, %v15095_v47, -1e+30 }
0x10cd   :  { %v7288_v46 = vmax.f32 %v7287_v14, %v7281_v52 }
0x10cf   :  { %v7289_v10 = vsub.f32 %v7274_v18, %v7288_v46  ;;  %v7292_v61 = vsub.f32 %v7275_v3, %v7288_v46  ;;  %v7295_v17 = vsub.f32 %v7276_v51, %v7288_v46  ;;  %v7298_v19 = vsub.f32 %v7277_v54, %v7288_v46  ;;  %v7515_v51 = vpop.f32.mrf.mxu1 }
0x10d0   :  { %v7301_v60 = vsub.f32 %v7278_v62, %v7288_v46  ;;  %v7304_v53 = vsub.f32 %v7279_v44, %v7288_v46  ;;  %v7307_v40 = vsub.f32 %v7280_v42, %v7288_v46  ;;  %v7310_v3 = vsub.f32 %v7281_v52, %v7288_v46  ;;  %v17883_v44 = vpop.f32.mrf.mxu0 }
0x10d1   :  { %v7290_v13 = vmul.f32 1.442695, %v7289_v10  ;;  %v7293_v34 = vmul.f32 1.442695, %v7292_v61  ;;  %v7296_v28 = vmul.f32 1.442695, %v7295_v17  ;;  %v17881_v47 = vpop.f32.mrf.mxu1 }
0x10d2   :  { %v7299_v1 = vmul.f32 1.442695, %v7298_v19  ;;  %v7302_v30 = vmul.f32 1.442695, %v7301_v60  ;;  %v7305_v18 = vmul.f32 1.442695, %v7304_v53  ;;  %v17887_v42 = vpop.f32.mrf.mxu0 }
0x10d3   :  { %15096 = vpow2.f32 %v7290_v13  ;;  %v7308_v54 = vmul.f32 1.442695, %v7307_v40  ;;  %v7311_v62 = vmul.f32 1.442695, %v7310_v3  ;;  %19191 = vst [vmem:[#allocation21_spill] sm:$0xff] %v17881_v47  ;;  %19192 = vst [vmem:[#allocation24_spill] sm:$0xff] %v17883_v44  ;;  %v17885_v61 = vpop.f32.mrf.mxu1 }
0x10d4   :  { %15098 = vpow2.f32 %v7293_v34  ;;  %v17891_v34 = vpop.f32.mrf.mxu0 }
0x10d5   :  { %15100 = vpow2.f32 %v7296_v28  ;;  %v17889_v19 = vpop.f32.mrf.mxu1  ;;  %19194 = vst [vmem:[#allocation45_spill] sm:$0xff] %v17891_v34  ;;  %v7516_v34 = vadd.f32 %v17904_v5, %v7515_v51 }
0x10d6   :  { %15102 = vpow2.f32 %v7299_v1  ;;  %19193 = vst [vmem:[#allocation36_spill] sm:$0xff] %v17889_v19  ;;  %v17895_v40 = vpop.f32.mrf.mxu0 }
0x10d7   :  { %15104 = vpow2.f32 %v7302_v30  ;;  %v17893_v30 = vpop.f32.mrf.mxu1  ;;  %19196 = vst [vmem:[#allocation48_spill] sm:$0xff] %v17895_v40 }
0x10d8   :  { %15106 = vpow2.f32 %v7305_v18  ;;  %19195 = vst [vmem:[#allocation32_spill] sm:$0xff] %v17893_v30 }
0x10d9   :  { %15108 = vpow2.f32 %v7308_v54 }
0x10da   :  { %15110 = vpow2.f32 %v7311_v62 }
0x10e0   :  { %v15097_v14 = vpop.eup %15096 }
0x10e1   :  { %v15099_v10 = vpop.eup %15098 }
0x10e2   :  { %v7313_v17 = vadd.f32 %v15099_v10, %v15097_v14  ;;  %v15101_v52 = vpop.eup %15100 }
0x10e3   :  { %v15103_v13 = vpop.eup %15102 }
0x10e4   :  { %v7314_v46 = vadd.f32 %v15101_v52, %v7313_v17  ;;  %v15105_v60 = vpop.eup %15104 }
0x10e5   :  { %v15107_v53 = vpop.eup %15106 }
0x10e6   :  { %v7315_v28 = vadd.f32 %v15103_v13, %v7314_v46  ;;  %v15109_v3 = vpop.eup %15108 }
0x10e7   :  { %v15111_v24 = vpop.eup %15110 }
0x10e8   :  { %v7316_v1 = vadd.f32 %v15105_v60, %v7315_v28 }
0x10ea   :  { %v7317_v18 = vadd.f32 %v15107_v53, %v7316_v1 }
0x10ec   :  { %v7318_v17 = vadd.f32 %v15109_v3, %v7317_v18 }
0x10ee   :  { %v7319_v36 = vadd.f32 %v15111_v24, %v7318_v17 }
0x10f0   :  { %15112 = vrcp.f32 %v7319_v36 }
0x10f1   :  { %v17897_v54 = vpop.f32.mrf.mxu1  ;;  %v17899_v62 = vpop.f32.mrf.mxu0 }
0x10f2   :  { %19197 = vst [vmem:[#allocation20_spill] sm:$0xff] %v17897_v54  ;;  %19198 = vst [vmem:[#allocation22_spill] sm:$0xff] %v17899_v62 }
0x10f3   :  { %v17906_v46 = vpop.f32.mrf.mxu1  ;;  %v17908_v28 = vpop.f32.mrf.mxu0 }
0x10f4   :  { %19199 = vst [vmem:[#allocation33_spill] sm:$0xff] %v17906_v46  ;;  %19200 = vst [vmem:[#allocation44_spill] sm:$0xff] %v17908_v28  ;;  %v17921_v28 = vld [vmem:[%s19062_s13 + $0x5] ss:$0 sm:$0xff] }
0x10f5   :  { %v17911_v1 = vpop.f32.mrf.mxu1  ;;  %v17913_v19 = vpop.f32.mrf.mxu0  ;;  %v7634_v51 = vadd.f32 %v17921_v28, %v7633_v6 }
0x10f6   :  { %19201 = vst [vmem:[#allocation31_spill] sm:$0xff] %v17913_v19  ;;  %v8006_v18 = vadd.f32 %v17913_v19, %v7516_v34 }
0x10f7   :  { %v7751_v62 = vpop.f32.mrf.mxu1  ;;  %v14252_v54 = vpop.f32.mrf.mxu0 }
0x10f8   :  { %v12366_v26 = vmul.f32 -1.442695, %v8006_v18 }
0x10f9   :  { %v17916_v40 = vpop.f32.mrf.mxu1 }
0x10fa   :  { %19202 = vst [vmem:[#allocation46_spill] sm:$0xff] %v17916_v40  ;;  %15114 = vpow2.f32 %v12366_v26 }
0x10fb   :  { %v17923_v17 = vpop.f32.mrf.mxu1 }
0x10fd   :  { %v17926_v46 = vpop.f32.mrf.mxu0  ;;  %v17928_v36 = vpop.f32.mrf.mxu1 }
0x10fe   :  { %19203 = vst [vmem:[#allocation25_spill] sm:$0xff] %v17926_v46  ;;  %19204 = vst [vmem:[#allocation27_spill] sm:$0xff] %v17928_v36  ;;  %v8013_v34 = vadd.f32 %v17926_v46, %v7634_v51  ;;  %v15113_v30 = vpop.eup %15112 }
0x10ff   :  { %v17931_v54 = vpop.f32.mrf.mxu1  ;;  %v14263_v18 = vpop.f32.mrf.mxu0  ;;  %v7330_v37 = vmul.f32 %v15113_v30, %v15099_v10  ;;  %v7321_v40 = vmul.f32 %v15113_v30, %v15097_v14  ;;  %v7357_v47 = vmul.f32 %v15113_v30, %v15105_v60  ;;  %v7339_v51 = vmul.f32 %v15113_v30, %v15101_v52 }
0x1100   :  { %v12367_v19 = vmul.f32 -1.442695, %v8013_v34  ;;  %v7348_v63 = vmul.f32 %v15113_v30, %v15103_v13  ;;  %v7366_v60 = vmul.f32 %v15113_v30, %v15107_v53  ;;  %v17954_v13 = vld [vmem:[%s19062_s13 + $0x7] ss:$0 sm:$0xff] }
0x1101   :  { %v17933_v26 = vpop.f32.mrf.mxu1  ;;  %v7331_v6 = vsel %vm243_vm7, %v7330_v37, 0.0  ;;  %v7322_v36 = vsel %vm242_vm10, %v7321_v40, 0.0  ;;  %v7358_v14 = vsel %vm246_vm12, %v7357_v47, 0.0  ;;  %v7340_v10 = vsel %vm244_vm11, %v7339_v51, 0.0 }
0x1102   :  { %19205 = vst [vmem:[#allocation40_spill] sm:$0xff] %v17933_v26  ;;  %15116 = vpow2.f32 %v12367_v19  ;;  %7334 = vperm.xlu0 %14820, %v7331_v6   ;;  %7325 = vperm.xlu1 %14821, %v7322_v36   ;;  %v7375_v19 = vmul.f32 %v15113_v30, %v15109_v3  ;;  %v7349_v52 = vsel %vm245_vm8, %v7348_v63, 0.0  ;;  %v7367_v47 = vsel %vm247_vm9, %v7366_v60, 0.0  ;;  %v17964_v6 = vld [vmem:[%s19062_s13 + $0x6] ss:$0 sm:$0xff] }
0x1103   :  { %v17935_v44 = vpop.f32.mrf.mxu1  ;;  %v7384_v36 = vmul.f32 %v15113_v30, %v15111_v24  ;;  %v7752_v24 = vadd.f32 %v17964_v6, %v7751_v62 }
0x1104   :  { %v7376_v37 = vsel %vm248_vm13, %v7375_v19, 0.0 }
0x1105   :  { %v8002_v46 = vpop.f32.mrf.mxu1  ;;  %v7385_v63 = vsel %vm249_vm14, %v7384_v36, 0.0 }
0x1106   :  { %7361 = vperm.xlu0 %14820, %v7358_v14   ;;  %7343 = vperm.xlu1 %14821, %v7340_v10  }
0x1107   :  { %v15115_v34 = vpop.eup %15114  ;;  %v14274_v18 = vpop.f32.mrf.mxu1 }
0x1108   :  { %v8010_v26 = vadd.f32 1.0, %v15115_v34 }
0x110a   :  { %15118 = vrcp.f32 %v8010_v26  ;;  %7379 = vperm.xlu0 %14820, %v7376_v37   ;;  %7352 = vperm.xlu1 %14821, %v7349_v52   ;;  %v17957_v26 = vadd.f32 %v17954_v13, %v8002_v46 }
0x110e   :  { %7370 = vperm.xlu1 %14821, %v7367_v47  }
0x110f   :  { %v15117_v40 = vpop.eup %15116 }
0x1110   :  { %v8017_v3 = vadd.f32 1.0, %v15117_v40 }
0x1112   :  { %7388 = vperm.xlu1 %14821, %v7385_v63   ;;  %15120 = vrcp.f32 %v8017_v3 }
0x1117   :  { %v15119_v53 = vpop.eup %15118 }
0x1118   :  { %v8020_v30 = vmul.f32 %v15119_v53, %v17957_v26 }
0x111a   :  { %v8021_v51 = vadd.f32 %v8020_v30, %v7752_v24 }
0x111c   :  { %15122 = vtanh.f32 %v8021_v51 }
0x111f   :  { %v15121_v34 = vpop.eup %15120 }
0x1120   :  { %v8023_v46 = vsub.f32 1.0, %v15121_v34  ;;  %v8025_v10 = vmul.f32 0.0, %v15121_v34 }
0x1129   :  { %v15123_v18 = vpop.eup %15122 }
0x112a   :  { %v8024_v14 = vmul.f32 %v15123_v18, %v8023_v46 }
0x112c   :  { %v17968_v19 = vadd.f32 %v8025_v10, %v8024_v14 }
0x112e   :  { %14284 = vmatmul.mubr.msk.f32.vlgmr.msra.gmra.mxu0 %vm1041_vm1, %v17968_v19  ;;  %14295 = vmatmul.mubr.msk.f32.vlgmr.msra.gmra.mxu1 %vm1041_vm1, %v17968_v19 }
0x112f   :  { %14298 = vmatpush3.msra.mxu0 %v17795_v29  ;;  %14305 = vmatprep.mubr.msk.f32.mxu0 %vm15571_vm0, %v19145_v33 }
0x1130   :  { %14299 = vmatprep.subr.mxu0 %v19145_v33  ;;  %14309 = vmatpush3.msra.mxu1 %v17728_v23 }
0x1131   :  { %14300 = vmatpush3.msra.mxu0 %v17812_v59  ;;  %14310 = vmatprep.subr.mxu1 %v19145_v33 }
0x1132   :  { %14301 = vmatprep.subr.mxu0 %v19145_v33  ;;  %14311 = vmatpush3.msra.mxu1 %v17730_v48 }
0x1133   :  { %14302 = vmatpush3.msra.mxu0 %v17821_v8  ;;  %14312 = vmatprep.subr.mxu1 %v19145_v33 }
0x1134   :  { %14303 = vmatprep.subr.mxu0 %v19145_v33  ;;  %14313 = vmatpush3.msra.mxu1 %v17740_v15 }
0x1135   :  { %14304 = vmatpush3.msra.mxu0 %v17830_v12  ;;  %14314 = vmatprep.subr.mxu1 %v19145_v33 }
0x1136   :  { %14306 = vmatmul.mubr.msk.f32.vlgmr.msra.gmra.mxu0 %vm1041_vm1, %v17968_v19  ;;  %14319 = vmatprep.subr.mxu0 %v19145_v33 }
0x1137   :  { %14320 = vmatpush3.msra.mxu0 %v17788_v16  ;;  %14315 = vmatpush3.msra.mxu1 %v17749_v9 }
0x1138   :  { %14321 = vmatprep.subr.mxu0 %v19145_v33  ;;  %14316 = vmatprep.mubr.msk.f32.mxu1 %vm15571_vm0, %v19145_v33 }
0x1139   :  { %14322 = vmatpush3.msra.mxu0 %v17793_v58  ;;  %14327 = vmatprep.mubr.msk.f32.mxu0 %vm15571_vm0, %v19145_v33 }
0x113a   :  { %14323 = vmatprep.subr.mxu0 %v19145_v33  ;;  %14330 = vmatprep.subr.mxu1 %v19145_v33 }
0x113b   :  { %14324 = vmatpush3.msra.mxu0 %v17801_v22 }
0x113c   :  { %14325 = vmatprep.subr.mxu0 %v19145_v33 }
0x113d   :  { %14326 = vmatpush3.msra.mxu0 %v17810_v31 }
0x113e   :  { %14341 = vmatprep.subr.mxu0 %v19145_v33 }
0x117d   :  { %v7335_v62 = vpop.permute.xlu0 %7334  ;;  %v7326_v37 = vpop.permute.xlu1 %7325 }
0x117e   :  { %v7337_v52 = vmul.f32 %v7335_v62, %v17388_v45  ;;  %v7328_v60 = vmul.f32 %v7326_v37, %v17332_v0 }
0x1180   :  { %v7338_v3 = vadd.f32 %v7337_v52, %v7328_v60 }
0x1181   :  { %v7344_v40 = vpop.permute.xlu1 %7343  ;;  %v7362_v36 = vpop.permute.xlu0 %7361 }
0x1182   :  { %v7346_v47 = vmul.f32 %v7344_v40, %v17444_v20  ;;  %v7364_v30 = vmul.f32 %v7362_v36, %v17556_v7  ;;  %v18020_v7 = vsel %vm5552_vm5, %v17968_v19, 0.0 }
0x1184   :  { %v7347_v53 = vadd.f32 %v7346_v47, %v7338_v3 }
0x1185   :  { %v7353_v63 = vpop.permute.xlu1 %7352  ;;  %v7380_v34 = vpop.permute.xlu0 %7379 }
0x1186   :  { %v7355_v24 = vmul.f32 %v7353_v63, %v17500_v32  ;;  %v7382_v45 = vmul.f32 %v7380_v34, %v17669_v56  ;;  %v7639_v63 = vadd.f32 %v17879_v27, %v17921_v28 }
0x1188   :  { %v7356_v51 = vadd.f32 %v7355_v24, %v7347_v53 }
0x1189   :  { %v7371_v46 = vpop.permute.xlu1 %7370 }
0x118a   :  { %v7365_v18 = vadd.f32 %v7364_v30, %v7356_v51  ;;  %v7373_v14 = vmul.f32 %v7371_v46, %v17612_v21 }
0x118c   :  { %v7374_v0 = vadd.f32 %v7373_v14, %v7365_v18 }
0x118d   :  { %v7389_v10 = vpop.permute.xlu1 %7388 }
0x118e   :  { %v7383_v62 = vadd.f32 %v7382_v45, %v7374_v0  ;;  %v7391_v20 = vmul.f32 %v7389_v10, %v17775_v38  ;;  %v7521_v38 = vadd.f32 %v17877_v43, %v17904_v5  ;;  %v7757_v0 = vadd.f32 %v17911_v1, %v17964_v6 }
0x1190   :  { %v7392_v37 = vadd.f32 %v7391_v20, %v7383_v62 }
0x1192   :  { %v7393_v52 = vadd.f32 %v17323_v49, %v7392_v37 }
0x1194   :  { %15124 = vtanh.f32 %v7393_v52 }
0x11a1   :  { %v18015_v32 = vpop.eup %15124 }
0x11a2   :  { %v9673_v21 = vmul.f32 %v18015_v32, %v18020_v7 }
0x11a4   :  { %v9681_v56 = vsel %vm1041_vm1, %v9673_v21, 0.0 }
0x11a5   :  { %9682 = vadd.xlane.f32.xlu0 %v9681_v56 }
0x11ee   :  { %v8097_v60 = vpop.f32.mrf.mxu0  ;;  %v8167_v40 = vpop.f32.mrf.mxu1 }
0x11ef   :  { %v8241_v49 = vadd.f32 %v8097_v60, %v7521_v38  ;;  %v8248_v53 = vadd.f32 %v8167_v40, %v7639_v63  ;;  %v7526_v60 = vadd.f32 %v17904_v5, %v17885_v61 }
0x11f0   :  { %v14285_v47 = vpop.f32.mrf.mxu0  ;;  %v14296_v36 = vpop.f32.mrf.mxu1 }
0x11f1   :  { %v12371_v3 = vmul.f32 -1.442695, %v8241_v49  ;;  %v12372_v51 = vmul.f32 -1.442695, %v8248_v53  ;;  %v7644_v53 = vadd.f32 %v17921_v28, %v17887_v42 }
0x11f3   :  { %15126 = vpow2.f32 %v12371_v3 }
0x11f4   :  { %15128 = vpow2.f32 %v12372_v51 }
0x11f6   :  { %v8237_v24 = vpop.f32.mrf.mxu0 }
0x11f7   :  { %v8238_v14 = vadd.f32 %v17954_v13, %v8237_v24 }
0x11f8   :  { %v14307_v30 = vpop.f32.mrf.mxu0 }
0x1200   :  { %v15127_v34 = vpop.eup %15126 }
0x1201   :  { %v8245_v46 = vadd.f32 1.0, %v15127_v34  ;;  %v15129_v18 = vpop.eup %15128 }
0x1202   :  { %v8252_v43 = vadd.f32 1.0, %v15129_v18 }
0x1203   :  { %15130 = vrcp.f32 %v8245_v46 }
0x1204   :  { %15132 = vrcp.f32 %v8252_v43 }
0x1210   :  { %v15131_v45 = vpop.eup %15130 }
0x1211   :  { %v8255_v10 = vmul.f32 %v15131_v45, %v8238_v14  ;;  %v15133_v62 = vpop.eup %15132 }
0x1212   :  { %v8258_v20 = vsub.f32 1.0, %v15133_v62  ;;  %v8260_v21 = vmul.f32 %v15133_v62, %v17968_v19 }
0x1213   :  { %v8256_v27 = vadd.f32 %v8255_v10, %v7757_v0  ;;  %v7762_v0 = vadd.f32 %v17964_v6, %v17923_v17 }
0x1215   :  { %15134 = vtanh.f32 %v8256_v27 }
0x1222   :  { %v15135_v37 = vpop.eup %15134 }
0x1223   :  { %v8259_v52 = vmul.f32 %v15135_v37, %v8258_v20 }
0x1225   :  { %v18033_v56 = vadd.f32 %v8260_v21, %v8259_v52 }
0x1227   :  { %14317 = vmatmul.mubr.msk.f32.vlgmr.msra.gmra.mxu1 %vm1041_vm1, %v18033_v56  ;;  %14328 = vmatmul.mubr.msk.f32.vlgmr.msra.gmra.mxu0 %vm1041_vm1, %v18033_v56  ;;  %v18042_v1 = vsel %vm5792_vm6, %v18033_v56, 0.0 }
0x1228   :  { %14331 = vmatpush3.msra.mxu1 %v17795_v29  ;;  %v9674_v38 = vmul.f32 %v18015_v32, %v18042_v1  ;;  %14338 = vmatprep.mubr.msk.f32.mxu1 %vm15571_vm0, %v19145_v33 }
0x1229   :  { %14332 = vmatprep.subr.mxu1 %v19145_v33  ;;  %14342 = vmatpush3.msra.mxu0 %v17728_v23 }
0x122a   :  { %14333 = vmatpush3.msra.mxu1 %v17812_v59  ;;  %v9684_v19 = vsel %vm1041_vm1, %v9674_v38, 0.0  ;;  %14343 = vmatprep.subr.mxu0 %v19145_v33 }
0x122b   :  { %14334 = vmatprep.subr.mxu1 %v19145_v33  ;;  %9685 = vadd.xlane.f32.xlu1 %v9684_v19 }
0x122c   :  { %14335 = vmatpush3.msra.mxu1 %v17821_v8  ;;  %14344 = vmatpush3.msra.mxu0 %v17730_v48 }
0x122d   :  { %14336 = vmatprep.subr.mxu1 %v19145_v33  ;;  %14345 = vmatprep.subr.mxu0 %v19145_v33 }
0x122e   :  { %14337 = vmatpush3.msra.mxu1 %v17830_v12  ;;  %14346 = vmatpush3.msra.mxu0 %v17740_v15 }
0x122f   :  { %14339 = vmatmul.mubr.msk.f32.vlgmr.msra.gmra.mxu1 %vm1041_vm1, %v18033_v56  ;;  %14352 = vmatprep.subr.mxu1 %v19145_v33 }
0x1230   :  { %14353 = vmatpush3.msra.mxu1 %v17788_v16  ;;  %14347 = vmatprep.subr.mxu0 %v19145_v33 }
0x1231   :  { %14354 = vmatprep.subr.mxu1 %v19145_v33  ;;  %14348 = vmatpush3.msra.mxu0 %v17749_v9 }
0x1232   :  { %14355 = vmatpush3.msra.mxu1 %v17793_v58  ;;  %14349 = vmatprep.mubr.msk.f32.mxu0 %vm15571_vm0, %v19145_v33 }
0x1233   :  { %14356 = vmatprep.subr.mxu1 %v19145_v33  ;;  %14360 = vmatprep.mubr.msk.f32.mxu1 %vm15571_vm0, %v19145_v33 }
0x1234   :  { %14357 = vmatpush3.msra.mxu1 %v17801_v22  ;;  %14363 = vmatprep.subr.mxu0 %v19145_v33 }
0x1235   :  { %14358 = vmatprep.subr.mxu1 %v19145_v33 }
0x1236   :  { %14359 = vmatpush3.msra.mxu1 %v17810_v31 }
0x1237   :  { %14374 = vmatprep.subr.mxu1 %v19145_v33 }
0x12e7   :  { %v8332_v40 = vpop.f32.mrf.mxu1  ;;  %v8402_v49 = vpop.f32.mrf.mxu0 }
0x12e8   :  { %v8476_v47 = vadd.f32 %v8332_v40, %v7526_v60  ;;  %v8483_v24 = vadd.f32 %v8402_v49, %v7644_v53 }
0x12e9   :  { %v14318_v36 = vpop.f32.mrf.mxu1  ;;  %v14329_v3 = vpop.f32.mrf.mxu0 }
0x12ea   :  { %v12376_v63 = vmul.f32 -1.442695, %v8476_v47  ;;  %v12377_v34 = vmul.f32 -1.442695, %v8483_v24  ;;  %v19207_v47 = vld [vmem:[#allocation24_spill] sm:$0xff] }
0x12eb   :  { %v7649_v36 = vadd.f32 %v19207_v47, %v17921_v28 }
0x12ec   :  { %15136 = vpow2.f32 %v12376_v63 }
0x12ed   :  { %15138 = vpow2.f32 %v12377_v34 }
0x12ef   :  { %v8472_v30 = vpop.f32.mrf.mxu1 }
0x12f0   :  { %v8473_v14 = vadd.f32 %v17954_v13, %v8472_v30 }
0x12f1   :  { %v14340_v51 = vpop.f32.mrf.mxu1 }
0x12f9   :  { %v15137_v46 = vpop.eup %15136 }
0x12fa   :  { %v8480_v18 = vadd.f32 1.0, %v15137_v46  ;;  %v15139_v43 = vpop.eup %15138 }
0x12fb   :  { %v8487_v61 = vadd.f32 1.0, %v15139_v43 }
0x12fc   :  { %15140 = vrcp.f32 %v8480_v18 }
0x12fd   :  { %15142 = vrcp.f32 %v8487_v61  ;;  %v19208_v61 = vld [vmem:[#allocation46_spill] sm:$0xff] }
0x1309   :  { %v15141_v45 = vpop.eup %15140 }
0x130a   :  { %v8490_v10 = vmul.f32 %v15141_v45, %v8473_v14  ;;  %v15143_v27 = vpop.eup %15142  ;;  %v7767_v14 = vadd.f32 %v19208_v61, %v17964_v6  ;;  %v7772_v61 = vadd.f32 %v17964_v6, %v17931_v54 }
0x130b   :  { %v8493_v62 = vsub.f32 1.0, %v15143_v27  ;;  %v8495_v52 = vmul.f32 %v15143_v27, %v18033_v56 }
0x130c   :  { %v8491_v42 = vadd.f32 %v8490_v10, %v7762_v0 }
0x130e   :  { %15144 = vtanh.f32 %v8491_v42 }
0x131b   :  { %v15145_v20 = vpop.eup %15144 }
0x131c   :  { %v8494_v37 = vmul.f32 %v15145_v20, %v8493_v62 }
0x131e   :  { %v18087_v21 = vadd.f32 %v8495_v52, %v8494_v37 }
0x1320   :  { %14350 = vmatmul.mubr.msk.f32.vlgmr.msra.gmra.mxu0 %vm1041_vm1, %v18087_v21  ;;  %14361 = vmatmul.mubr.msk.f32.vlgmr.msra.gmra.mxu1 %vm1041_vm1, %v18087_v21  ;;  %v18096_v17 = vsel %vm6032_vm15, %v18087_v21, 0.0 }
0x1321   :  { %14364 = vmatpush3.msra.mxu0 %v17795_v29  ;;  %v9675_v38 = vmul.f32 %v18015_v32, %v18096_v17  ;;  %14371 = vmatprep.mubr.msk.f32.mxu0 %vm15571_vm0, %v19145_v33 }
0x1322   :  { %14365 = vmatprep.subr.mxu0 %v19145_v33  ;;  %14375 = vmatpush3.msra.mxu1 %v17728_v23  ;;  %v19206_v23 = vld [vmem:[#allocation21_spill] sm:$0xff] }
0x1323   :  { %14366 = vmatpush3.msra.mxu0 %v17812_v59  ;;  %v9687_v56 = vsel %vm1041_vm1, %v9675_v38, 0.0  ;;  %14376 = vmatprep.subr.mxu1 %v19145_v33 }
0x1324   :  { %14367 = vmatprep.subr.mxu0 %v19145_v33  ;;  %9688 = vadd.xlane.f32.xlu0 %v9687_v56 }
0x1325   :  { %14368 = vmatpush3.msra.mxu0 %v17821_v8  ;;  %14377 = vmatpush3.msra.mxu1 %v17730_v48  ;;  %v7531_v48 = vadd.f32 %v19206_v23, %v17904_v5 }
0x1326   :  { %14369 = vmatprep.subr.mxu0 %v19145_v33  ;;  %14378 = vmatprep.subr.mxu1 %v19145_v33 }
0x1327   :  { %14370 = vmatpush3.msra.mxu0 %v17830_v12  ;;  %14379 = vmatpush3.msra.mxu1 %v17740_v15 }
0x1328   :  { %14372 = vmatmul.mubr.msk.f32.vlgmr.msra.gmra.mxu0 %vm1041_vm1, %v18087_v21  ;;  %14385 = vmatprep.subr.mxu0 %v19145_v33 }
0x1329   :  { %14386 = vmatpush3.msra.mxu0 %v17788_v16  ;;  %14380 = vmatprep.subr.mxu1 %v19145_v33 }
0x132a   :  { %14387 = vmatprep.subr.mxu0 %v19145_v33  ;;  %14381 = vmatpush3.msra.mxu1 %v17749_v9 }
0x132b   :  { %14388 = vmatpush3.msra.mxu0 %v17793_v58  ;;  %14382 = vmatprep.mubr.msk.f32.mxu1 %vm15571_vm0, %v19145_v33 }
0x132c   :  { %14389 = vmatprep.subr.mxu0 %v19145_v33  ;;  %14393 = vmatprep.mubr.msk.f32.mxu0 %vm15571_vm0, %v19145_v33 }
0x132d   :  { %14390 = vmatpush3.msra.mxu0 %v17801_v22  ;;  %14396 = vmatprep.subr.mxu1 %v19145_v33 }
0x132e   :  { %14391 = vmatprep.subr.mxu0 %v19145_v33 }
0x132f   :  { %14392 = vmatpush3.msra.mxu0 %v17810_v31 }
0x1330   :  { %14407 = vmatprep.subr.mxu0 %v19145_v33 }
0x13e0   :  { %v8567_v15 = vpop.f32.mrf.mxu0  ;;  %v8637_v9 = vpop.f32.mrf.mxu1 }
0x13e1   :  { %v8711_v19 = vadd.f32 %v8567_v15, %v7531_v48  ;;  %v8718_v3 = vadd.f32 %v8637_v9, %v7649_v36  ;;  %v18166_v48 = vld [vmem:[#allocation9 + $0x70] sm:$0xff]  ;;  %v18172_v15 = vld [vmem:[#allocation9 + $0x68] sm:$0xff]  ;;  %v18181_v9 = vld [vmem:[#allocation9 + $0x60] sm:$0xff] }
0x13e2   :  { %v14351_v60 = vpop.f32.mrf.mxu0  ;;  %v14362_v40 = vpop.f32.mrf.mxu1 }
0x13e3   :  { %v12381_v49 = vmul.f32 -1.442695, %v8711_v19  ;;  %v12382_v24 = vmul.f32 -1.442695, %v8718_v3  ;;  %v19211_v3 = vld [vmem:[#allocation48_spill] sm:$0xff] }
0x13e5   :  { %15146 = vpow2.f32 %v12381_v49 }
0x13e6   :  { %15148 = vpow2.f32 %v12382_v24 }
0x13e8   :  { %v8707_v63 = vpop.f32.mrf.mxu0 }
0x13e9   :  { %v8708_v18 = vadd.f32 %v17954_v13, %v8707_v63 }
0x13ea   :  { %v14373_v53 = vpop.f32.mrf.mxu0 }
0x13f2   :  { %v15147_v30 = vpop.eup %15146 }
0x13f3   :  { %v8715_v51 = vadd.f32 1.0, %v15147_v30  ;;  %v15149_v34 = vpop.eup %15148 }
0x13f4   :  { %v8722_v46 = vadd.f32 1.0, %v15149_v34 }
0x13f5   :  { %15150 = vrcp.f32 %v8715_v51 }
0x13f6   :  { %15152 = vrcp.f32 %v8722_v46 }
0x1402   :  { %v15151_v43 = vpop.eup %15150 }
0x1403   :  { %v8725_v45 = vmul.f32 %v15151_v43, %v8708_v18  ;;  %v15153_v10 = vpop.eup %15152 }
0x1404   :  { %v8728_v42 = vsub.f32 1.0, %v15153_v10  ;;  %v8730_v20 = vmul.f32 %v15153_v10, %v18087_v21  ;;  %v18158_v21 = vld [vmem:[#allocation9 + $0x78] sm:$0xff] }
0x1405   :  { %v8726_v0 = vadd.f32 %v8725_v45, %v7767_v14 }
0x1407   :  { %15154 = vtanh.f32 %v8726_v0 }
0x1414   :  { %v15155_v27 = vpop.eup %15154 }
0x1415   :  { %v8729_v62 = vmul.f32 %v15155_v27, %v8728_v42 }
0x1417   :  { %v18141_v37 = vadd.f32 %v8730_v20, %v8729_v62 }
0x1419   :  { %14383 = vmatmul.mubr.msk.f32.vlgmr.msra.gmra.mxu1 %vm1041_vm1, %v18141_v37  ;;  %14394 = vmatmul.mubr.msk.f32.vlgmr.msra.gmra.mxu0 %vm1041_vm1, %v18141_v37  ;;  %v18150_v38 = vsel %vm6272_vm2, %v18141_v37, 0.0 }
0x141a   :  { %14397 = vmatpush3.msra.mxu1 %v17795_v29  ;;  %v9676_v56 = vmul.f32 %v18015_v32, %v18150_v38  ;;  %14404 = vmatprep.mubr.msk.f32.mxu1 %vm15571_vm0, %v19145_v33 }
0x141b   :  { %14398 = vmatprep.subr.mxu1 %v19145_v33  ;;  %14408 = vmatpush3.msra.mxu0 %v18158_v21 }
0x141c   :  { %14399 = vmatpush3.msra.mxu1 %v17812_v59  ;;  %v9690_v23 = vsel %vm1041_vm1, %v9676_v56, 0.0  ;;  %14409 = vmatprep.subr.mxu0 %v19145_v33 }
0x141d   :  { %14400 = vmatprep.subr.mxu1 %v19145_v33  ;;  %9691 = vadd.xlane.f32.xlu0 %v9690_v23 }
0x141e   :  { %14401 = vmatpush3.msra.mxu1 %v17821_v8  ;;  %14410 = vmatpush3.msra.mxu0 %v18166_v48 }
0x141f   :  { %14402 = vmatprep.subr.mxu1 %v19145_v33  ;;  %14411 = vmatprep.subr.mxu0 %v19145_v33 }
0x1420   :  { %14403 = vmatpush3.msra.mxu1 %v17830_v12  ;;  %14412 = vmatpush3.msra.mxu0 %v18172_v15 }
0x1421   :  { %14405 = vmatmul.mubr.msk.f32.vlgmr.msra.gmra.mxu1 %vm1041_vm1, %v18141_v37  ;;  %14418 = vmatprep.subr.mxu1 %v19145_v33 }
0x1422   :  { %14419 = vmatpush3.msra.mxu1 %v17788_v16  ;;  %14413 = vmatprep.subr.mxu0 %v19145_v33  ;;  %v19210_v16 = vld [vmem:[#allocation32_spill] sm:$0xff] }
0x1423   :  { %14420 = vmatprep.subr.mxu1 %v19145_v33  ;;  %14414 = vmatpush3.msra.mxu0 %v18181_v9 }
0x1424   :  { %14421 = vmatpush3.msra.mxu1 %v17793_v58  ;;  %14415 = vmatprep.mubr.msk.f32.mxu0 %vm15571_vm0, %v19145_v33  ;;  %v7536_v58 = vadd.f32 %v17904_v5, %v19210_v16  ;;  %v19213_v16 = vld [vmem:[#allocation36_spill] sm:$0xff] }
0x1425   :  { %14422 = vmatprep.subr.mxu1 %v19145_v33  ;;  %14426 = vmatprep.mubr.msk.f32.mxu1 %vm15571_vm0, %v19145_v33 }
0x1426   :  { %14423 = vmatpush3.msra.mxu1 %v17801_v22  ;;  %14429 = vmatprep.subr.mxu0 %v19145_v33  ;;  %v7654_v22 = vadd.f32 %v17921_v28, %v19211_v3  ;;  %v19214_v3 = vld [vmem:[#allocation45_spill] sm:$0xff] }
0x1427   :  { %14424 = vmatprep.subr.mxu1 %v19145_v33 }
0x1428   :  { %14425 = vmatpush3.msra.mxu1 %v17810_v31 }
0x1429   :  { %14440 = vmatprep.subr.mxu1 %v19145_v33 }
0x14d9   :  { %v8802_v19 = vpop.f32.mrf.mxu1  ;;  %v8872_v60 = vpop.f32.mrf.mxu0 }
0x14da   :  { %v8946_v40 = vadd.f32 %v8802_v19, %v7536_v58  ;;  %v8953_v63 = vadd.f32 %v8872_v60, %v7654_v22  ;;  %v7541_v58 = vadd.f32 %v19213_v16, %v17904_v5  ;;  %v7659_v22 = vadd.f32 %v19214_v3, %v17921_v28  ;;  %v19216_v16 = vld [vmem:[#allocation42_spill] sm:$0xff]  ;;  %v19218_v3 = vld [vmem:[#allocation33_spill] sm:$0xff] }
0x14db   :  { %v14384_v49 = vpop.f32.mrf.mxu1  ;;  %v14395_v47 = vpop.f32.mrf.mxu0 }
0x14dc   :  { %v12386_v36 = vmul.f32 -1.442695, %v8946_v40  ;;  %v12387_v30 = vmul.f32 -1.442695, %v8953_v63 }
0x14de   :  { %15156 = vpow2.f32 %v12386_v36 }
0x14df   :  { %15158 = vpow2.f32 %v12387_v30 }
0x14e1   :  { %v8942_v53 = vpop.f32.mrf.mxu1 }
0x14e2   :  { %v8943_v18 = vadd.f32 %v17954_v13, %v8942_v53 }
0x14e3   :  { %v14406_v24 = vpop.f32.mrf.mxu1 }
0x14eb   :  { %v15157_v31 = vpop.eup %15156 }
0x14ec   :  { %v8950_v51 = vadd.f32 1.0, %v15157_v31  ;;  %v15159_v34 = vpop.eup %15158 }
0x14ed   :  { %v8957_v46 = vadd.f32 1.0, %v15159_v34 }
0x14ee   :  { %15160 = vrcp.f32 %v8950_v51 }
0x14ef   :  { %15162 = vrcp.f32 %v8957_v46 }
0x14fb   :  { %v15161_v43 = vpop.eup %15160 }
0x14fc   :  { %v8960_v14 = vmul.f32 %v15161_v43, %v8943_v18  ;;  %v15163_v0 = vpop.eup %15162 }
0x14fd   :  { %v8963_v10 = vsub.f32 1.0, %v15163_v0  ;;  %v8965_v62 = vmul.f32 %v15163_v0, %v18141_v37 }
0x14fe   :  { %v8961_v45 = vadd.f32 %v8960_v14, %v7772_v61  ;;  %v19215_v61 = vld [vmem:[#allocation27_spill] sm:$0xff] }
0x14ff   :  { %v7777_v14 = vadd.f32 %v19215_v61, %v17964_v6 }
0x1500   :  { %15164 = vtanh.f32 %v8961_v45 }
0x150d   :  { %v15165_v42 = vpop.eup %15164 }
0x150e   :  { %v8964_v27 = vmul.f32 %v15165_v42, %v8963_v10 }
0x1510   :  { %v18203_v20 = vadd.f32 %v8965_v62, %v8964_v27 }
0x1512   :  { %14416 = vmatmul.mubr.msk.f32.vlgmr.msra.gmra.mxu0 %vm1041_vm1, %v18203_v20  ;;  %14427 = vmatmul.mubr.msk.f32.vlgmr.msra.gmra.mxu1 %vm1041_vm1, %v18203_v20  ;;  %v18212_v56 = vsel %vm19101_vm3, %v18203_v20, 0.0  ;;  %vm19217_vm3 = vcmp.eq.s32.totalorder %v19216_v16, 1 }
0x1513   :  { %14430 = vmatpush3.msra.mxu0 %v17795_v29  ;;  %v9677_v23 = vmul.f32 %v18015_v32, %v18212_v56  ;;  %14437 = vmatprep.mubr.msk.f32.mxu0 %vm15571_vm0, %v19145_v33  ;;  %v18234_v29 = vld [vmem:[#allocation9 + $0x98] sm:$0xff] }
0x1514   :  { %14431 = vmatprep.subr.mxu0 %v19145_v33  ;;  %14441 = vmatpush3.msra.mxu1 %v18158_v21 }
0x1515   :  { %14432 = vmatpush3.msra.mxu0 %v17812_v59  ;;  %v9693_v37 = vsel %vm1041_vm1, %v9677_v23, 0.0  ;;  %14442 = vmatprep.subr.mxu1 %v19145_v33  ;;  %v18240_v59 = vld [vmem:[#allocation9 + $0x90] sm:$0xff] }
0x1516   :  { %14433 = vmatprep.subr.mxu0 %v19145_v33  ;;  %9694 = vadd.xlane.f32.xlu1 %v9693_v37 }
0x1517   :  { %14434 = vmatpush3.msra.mxu0 %v17821_v8  ;;  %14443 = vmatpush3.msra.mxu1 %v18166_v48  ;;  %v18248_v8 = vld [vmem:[#allocation9 + $0x88] sm:$0xff] }
0x1518   :  { %14435 = vmatprep.subr.mxu0 %v19145_v33  ;;  %14444 = vmatprep.subr.mxu1 %v19145_v33 }
0x1519   :  { %14436 = vmatpush3.msra.mxu0 %v17830_v12  ;;  %14445 = vmatpush3.msra.mxu1 %v18172_v15  ;;  %v18253_v12 = vld [vmem:[#allocation9 + $0x80] sm:$0xff] }
0x151a   :  { %14438 = vmatmul.mubr.msk.f32.vlgmr.msra.gmra.mxu0 %vm1041_vm1, %v18203_v20  ;;  %14451 = vmatprep.subr.mxu0 %v19145_v33 }
0x151b   :  { %14452 = vmatpush3.msra.mxu0 %v18234_v29  ;;  %14446 = vmatprep.subr.mxu1 %v19145_v33 }
0x151c   :  { %14453 = vmatprep.subr.mxu0 %v19145_v33  ;;  %14447 = vmatpush3.msra.mxu1 %v18181_v9 }
0x151d   :  { %14454 = vmatpush3.msra.mxu0 %v18240_v59  ;;  %14448 = vmatprep.mubr.msk.f32.mxu1 %vm15571_vm0, %v19145_v33 }
0x151e   :  { %14455 = vmatprep.subr.mxu0 %v19145_v33  ;;  %14459 = vmatprep.mubr.msk.f32.mxu0 %vm15571_vm0, %v19145_v33 }
0x151f   :  { %14456 = vmatpush3.msra.mxu0 %v18248_v8  ;;  %14462 = vmatprep.subr.mxu1 %v19145_v33 }
0x1520   :  { %14457 = vmatprep.subr.mxu0 %v19145_v33 }
0x1521   :  { %14458 = vmatpush3.msra.mxu0 %v18253_v12 }
0x1522   :  { %14473 = vmatprep.subr.mxu0 %v19145_v33 }
0x15d2   :  { %v9037_v19 = vpop.f32.mrf.mxu0  ;;  %v9107_v60 = vpop.f32.mrf.mxu1 }
0x15d3   :  { %v9181_v40 = vadd.f32 %v9037_v19, %v7541_v58  ;;  %v9188_v63 = vadd.f32 %v9107_v60, %v7659_v22  ;;  %v18276_v19 = vld [vmem:[#allocation9 + $0xb8] sm:$0xff]  ;;  %v18285_v60 = vld [vmem:[#allocation9 + $0xb0] sm:$0xff]  ;;  %v7546_v22 = vadd.f32 %v17904_v5, %v19218_v3 }
0x15d4   :  { %v14417_v49 = vpop.f32.mrf.mxu0  ;;  %v14428_v47 = vpop.f32.mrf.mxu1 }
0x15d5   :  { %v12391_v36 = vmul.f32 -1.442695, %v9181_v40  ;;  %v12392_v30 = vmul.f32 -1.442695, %v9188_v63  ;;  %v18291_v49 = vld [vmem:[#allocation9 + $0xa8] sm:$0xff]  ;;  %v18297_v47 = vld [vmem:[#allocation9 + $0xa0] sm:$0xff] }
0x15d7   :  { %15166 = vpow2.f32 %v12391_v36  ;;  %v15423_v36 = vld [vmem:[%s19060_s11 + $0x78] sm:$0xff] }
0x15d8   :  { %15168 = vpow2.f32 %v12392_v30 }
0x15da   :  { %v9177_v53 = vpop.f32.mrf.mxu0 }
0x15db   :  { %v9178_v18 = vadd.f32 %v17954_v13, %v9177_v53 }
0x15dc   :  { %v14439_v24 = vpop.f32.mrf.mxu0 }
0x15e4   :  { %v15167_v31 = vpop.eup %15166 }
0x15e5   :  { %v9185_v51 = vadd.f32 1.0, %v15167_v31  ;;  %v15169_v34 = vpop.eup %15168 }
0x15e6   :  { %v9192_v46 = vadd.f32 1.0, %v15169_v34  ;;  %v19219_v34 = vld [vmem:[#allocation44_spill] sm:$0xff] }
0x15e7   :  { %15170 = vrcp.f32 %v9185_v51 }
0x15e8   :  { %15172 = vrcp.f32 %v9192_v46  ;;  %v7664_v46 = vadd.f32 %v17921_v28, %v19219_v34  ;;  %v15429_v34 = vld [vmem:[%s19060_s11 + $0xb8] sm:$0xff] }
0x15f4   :  { %v15171_v43 = vpop.eup %15170 }
0x15f5   :  { %v9195_v45 = vmul.f32 %v15171_v43, %v9178_v18  ;;  %v15173_v10 = vpop.eup %15172 }
0x15f6   :  { %v9198_v42 = vsub.f32 1.0, %v15173_v10  ;;  %v9200_v23 = vmul.f32 %v15173_v10, %v18203_v20 }
0x15f7   :  { %v9196_v0 = vadd.f32 %v9195_v45, %v7777_v14 }
0x15f9   :  { %15174 = vtanh.f32 %v9196_v0 }
0x1606   :  { %v15175_v27 = vpop.eup %15174 }
0x1607   :  { %v9199_v62 = vmul.f32 %v15175_v27, %v9198_v42 }
0x1609   :  { %v18265_v37 = vadd.f32 %v9200_v23, %v9199_v62  ;;  %v7782_v62 = vadd.f32 %v17964_v6, %v17935_v44  ;;  %v19220_v44 = vld [vmem:[#allocation28_spill] sm:$0xff] }
0x160b   :  { %14449 = vmatmul.mubr.msk.f32.vlgmr.msra.gmra.mxu1 %vm1041_vm1, %v18265_v37  ;;  %14460 = vmatmul.mubr.msk.f32.vlgmr.msra.gmra.mxu0 %vm1041_vm1, %v18265_v37  ;;  %v18274_v58 = vsel %vm19217_vm3, %v18265_v37, 0.0  ;;  %vm19221_vm3 = vcmp.eq.s32.totalorder %v19220_v44, 1 }
0x160c   :  { %14463 = vmatpush3.msra.mxu1 %v18276_v19  ;;  %v9678_v20 = vmul.f32 %v18015_v32, %v18274_v58  ;;  %14470 = vmatprep.mubr.msk.f32.mxu1 %vm15571_vm0, %v19145_v33 }
0x160d   :  { %14464 = vmatprep.subr.mxu1 %v19145_v33  ;;  %14474 = vmatpush3.msra.mxu0 %v18158_v21 }
0x160e   :  { %14465 = vmatpush3.msra.mxu1 %v18285_v60  ;;  %v9696_v40 = vsel %vm1041_vm1, %v9678_v20, 0.0  ;;  %14475 = vmatprep.subr.mxu0 %v19145_v33 }
0x160f   :  { %14466 = vmatprep.subr.mxu1 %v19145_v33  ;;  %9697 = vadd.xlane.f32.xlu0 %v9696_v40 }
0x1610   :  { %14467 = vmatpush3.msra.mxu1 %v18291_v49  ;;  %14476 = vmatpush3.msra.mxu0 %v18166_v48 }
0x1611   :  { %14468 = vmatprep.subr.mxu1 %v19145_v33  ;;  %14477 = vmatprep.subr.mxu0 %v19145_v33 }
0x1612   :  { %14469 = vmatpush3.msra.mxu1 %v18297_v47  ;;  %14478 = vmatpush3.msra.mxu0 %v18172_v15 }
0x1613   :  { %14471 = vmatmul.mubr.msk.f32.vlgmr.msra.gmra.mxu1 %vm1041_vm1, %v18265_v37  ;;  %14484 = vmatprep.subr.mxu1 %v19145_v33 }
0x1614   :  { %14485 = vmatpush3.msra.mxu1 %v18234_v29  ;;  %14479 = vmatprep.subr.mxu0 %v19145_v33 }
0x1615   :  { %14486 = vmatprep.subr.mxu1 %v19145_v33  ;;  %14480 = vmatpush3.msra.mxu0 %v18181_v9 }
0x1616   :  { %14487 = vmatpush3.msra.mxu1 %v18240_v59  ;;  %14481 = vmatprep.mubr.msk.f32.mxu0 %vm15571_vm0, %v19145_v33 }
0x1617   :  { %14488 = vmatprep.subr.mxu1 %v19145_v33  ;;  %14492 = vmatprep.mubr.msk.f32.mxu1 %vm15571_vm0, %v19145_v33 }
0x1618   :  { %14489 = vmatpush3.msra.mxu1 %v18248_v8  ;;  %14495 = vmatprep.subr.mxu0 %v19145_v33 }
0x1619   :  { %14490 = vmatprep.subr.mxu1 %v19145_v33 }
0x161a   :  { %14491 = vmatpush3.msra.mxu1 %v18253_v12 }
0x161b   :  { %14506 = vmatprep.subr.mxu1 %v15423_v36 }
0x16cb   :  { %v9272_v63 = vpop.f32.mrf.mxu1  ;;  %v9342_v53 = vpop.f32.mrf.mxu0 }
0x16cc   :  { %v9416_v24 = vadd.f32 %v9272_v63, %v7546_v22  ;;  %v9423_v18 = vadd.f32 %v9342_v53, %v7664_v46  ;;  %v15430_v46 = vld [vmem:[%s19060_s11 + $0x88] sm:$0xff] }
0x16cd   :  { %v14450_v30 = vpop.f32.mrf.mxu1  ;;  %v14461_v31 = vpop.f32.mrf.mxu0 }
0x16ce   :  { %v12396_v51 = vmul.f32 -1.442695, %v9416_v24  ;;  %v12397_v14 = vmul.f32 -1.442695, %v9423_v18  ;;  %v15426_v30 = vld [vmem:[%s19060_s11 + $0x60] sm:$0xff]  ;;  %v15427_v31 = vld [vmem:[%s19060_s11 + $0x98] sm:$0xff] }
0x16cf   :  { %v15431_v18 = vld [vmem:[%s19060_s11 + $0x80] sm:$0xff] }
0x16d0   :  { %15176 = vpow2.f32 %v12396_v51  ;;  %v15428_v51 = vld [vmem:[%s19060_s11 + $0x90] sm:$0xff] }
0x16d1   :  { %15178 = vpow2.f32 %v12397_v14  ;;  %v15434_v14 = vld [vmem:[%s19060_s11 + $0xa0] sm:$0xff] }
0x16d3   :  { %v9412_v43 = vpop.f32.mrf.mxu1 }
0x16d4   :  { %v9413_v42 = vadd.f32 %v17954_v13, %v9412_v43  ;;  %v15432_v43 = vld [vmem:[%s19060_s11 + $0xb0] sm:$0xff] }
0x16d5   :  { %v14472_v61 = vpop.f32.mrf.mxu1 }
0x16d6   :  { %v15433_v61 = vld [vmem:[%s19060_s11 + $0xa8] sm:$0xff] }
0x16dd   :  { %v15177_v45 = vpop.eup %15176 }
0x16de   :  { %v9420_v0 = vadd.f32 1.0, %v15177_v45  ;;  %v15179_v10 = vpop.eup %15178  ;;  %v18428_v45 = vld [vmem:[%s19062_s13 + $0x4] ss:$0 sm:$0xff] }
0x16df   :  { %v9427_v5 = vadd.f32 1.0, %v15179_v10 }
0x16e0   :  { %15180 = vrcp.f32 %v9420_v0  ;;  %v19222_v0 = vld [vmem:[#allocation20_spill] sm:$0xff] }
0x16e1   :  { %15182 = vrcp.f32 %v9427_v5  ;;  %v7551_v10 = vadd.f32 %v18428_v45, %v19222_v0 }
0x16ed   :  { %v15181_v27 = vpop.eup %15180 }
0x16ee   :  { %v9430_v23 = vmul.f32 %v15181_v27, %v9413_v42  ;;  %v15183_v20 = vpop.eup %15182 }
0x16ef   :  { %v9433_v40 = vsub.f32 1.0, %v15183_v20  ;;  %v9435_v63 = vmul.f32 %v15183_v20, %v18265_v37  ;;  %v15424_v37 = vld [vmem:[%s19060_s11 + $0x70] sm:$0xff]  ;;  %v18435_v20 = vld [vmem:[%s19062_s13 + $0x5] ss:$0 sm:$0xff] }
0x16f0   :  { %v9431_v28 = vadd.f32 %v9430_v23, %v7782_v62 }
0x16f2   :  { %15184 = vtanh.f32 %v9431_v28 }
0x16ff   :  { %v15185_v3 = vpop.eup %15184 }
0x1700   :  { %v9434_v22 = vmul.f32 %v15185_v3, %v9433_v40  ;;  %v19223_v40 = vld [vmem:[#allocation22_spill] sm:$0xff] }
0x1701   :  { %v7669_v3 = vadd.f32 %v18435_v20, %v19223_v40 }
0x1702   :  { %v18329_v53 = vadd.f32 %v9435_v63, %v9434_v22 }
0x1704   :  { %14482 = vmatmul.mubr.msk.f32.vlgmr.msra.gmra.mxu0 %vm1041_vm1, %v18329_v53  ;;  %14493 = vmatmul.mubr.msk.f32.vlgmr.msra.gmra.mxu1 %vm1041_vm1, %v18329_v53  ;;  %v18338_v13 = vsel %vm19221_vm3, %v18329_v53, 0.0 }
0x1705   :  { %14496 = vmatpush3.msra.mxu0 %v18276_v19  ;;  %14507 = vmatpush3.msra.mxu1 %v15423_v36  ;;  %v9679_v6 = vmul.f32 %v18015_v32, %v18338_v13  ;;  %v15425_v36 = vld [vmem:[%s19060_s11 + $0x68] sm:$0xff] }
0x1706   :  { %14497 = vmatprep.subr.mxu0 %v19145_v33  ;;  %14508 = vmatprep.subr.mxu1 %v15424_v37 }
0x1707   :  { %14514 = vmatprep.mubr.msk.f32.mxu1 %vm1041_vm1, %v18020_v7  ;;  %14498 = vmatpush3.msra.mxu0 %v18285_v60  ;;  %v9699_v24 = vsel %vm1041_vm1, %v9679_v6, 0.0 }
0x1708   :  { %14509 = vmatpush3.msra.mxu1 %v15424_v37  ;;  %14499 = vmatprep.subr.mxu0 %v19145_v33 }
0x1709   :  { %14510 = vmatprep.subr.mxu1 %v15425_v36  ;;  %14500 = vmatpush3.msra.mxu0 %v18291_v49 }
0x170a   :  { %14511 = vmatpush3.msra.mxu1 %v15425_v36  ;;  %9700 = vadd.xlane.f32.xlu1 %v9699_v24 }
0x170b   :  { %14501 = vmatprep.subr.mxu0 %v19145_v33  ;;  %14512 = vmatprep.subr.mxu1 %v15426_v30 }
0x170c   :  { %14502 = vmatpush3.msra.mxu0 %v18297_v47  ;;  %14503 = vmatprep.mubr.msk.f32.mxu0 %vm15571_vm0, %v19145_v33 }
0x170d   :  { %14513 = vmatpush3.msra.mxu1 %v15426_v30  ;;  %14504 = vmatmul.mubr.msk.f32.vlgmr.msra.gmra.mxu0 %vm1041_vm1, %v18329_v53 }
0x170e   :  { %14515 = vmatmul.mubr.msk.f32.vlgmr.msra.gmra.mxu1 %vm1041_vm1, %v18042_v1  ;;  %14526 = vmatprep.subr.mxu0 %v15427_v31 }
0x170f   :  { %14517 = vmatprep.mubr.msk.f32.mxu1 %vm1041_vm1, %v18096_v17  ;;  %14527 = vmatpush3.msra.mxu0 %v15427_v31 }
0x1710   :  { %14534 = vmatprep.mubr.msk.f32.mxu0 %vm1041_vm1, %v18020_v7  ;;  %14528 = vmatprep.subr.mxu0 %v15428_v51 }
0x1711   :  { %14529 = vmatpush3.msra.mxu0 %v15428_v51  ;;  %14546 = vmatprep.subr.mxu1 %v15429_v34  ;;  %v18442_v51 = vld [vmem:[%s19062_s13 + $0x7] ss:$0 sm:$0xff] }
0x1712   :  { %14518 = vmatmul.mubr.msk.f32.gmra.mxu1 %vm1041_vm1, %v18150_v38  ;;  %14530 = vmatprep.subr.mxu0 %v15430_v46 }
0x1713   :  { %14520 = vmatprep.mubr.msk.f32.mxu1 %vm1041_vm1, %v18212_v56  ;;  %14531 = vmatpush3.msra.mxu0 %v15430_v46 }
0x1714   :  { %14532 = vmatprep.subr.mxu0 %v15431_v18  ;;  %14547 = vmatpush3.msra.mxu1 %v15429_v34 }
0x1715   :  { %14533 = vmatpush3.msra.mxu0 %v15431_v18  ;;  %14548 = vmatprep.subr.mxu1 %v15432_v43  ;;  %v18448_v18 = vld [vmem:[%s19062_s13 + $0x6] ss:$0 sm:$0xff] }
0x1716   :  { %14521 = vmatmul.mubr.msk.f32.gmra.mxu1 %vm1041_vm1, %v18274_v58  ;;  %14535 = vmatmul.mubr.msk.f32.vlgmr.msra.gmra.mxu0 %vm1041_vm1, %v18042_v1 }
0x1717   :  { %14523 = vmatprep.mubr.msk.f32.mxu1 %vm1041_vm1, %v18338_v13  ;;  %14537 = vmatprep.mubr.msk.f32.mxu0 %vm1041_vm1, %v18096_v17 }
0x1718   :  { %14549 = vmatpush3.msra.mxu1 %v15432_v43  ;;  %14566 = vmatprep.subr.mxu0 %v19145_v33  ;;  %v19224_v43 = vld [vmem:[#allocation40_spill] sm:$0xff] }
0x1719   :  { %14550 = vmatprep.subr.mxu1 %v15433_v61  ;;  %14567 = vmatpush3.msra.mxu0 %v18158_v21 }
0x171a   :  { %14538 = vmatmul.mubr.msk.f32.gmra.mxu0 %vm1041_vm1, %v18150_v38  ;;  %14551 = vmatpush3.msra.mxu1 %v15433_v61  ;;  %v7787_v61 = vadd.f32 %v18448_v18, %v19224_v43 }
0x171b   :  { %14540 = vmatprep.mubr.msk.f32.mxu0 %vm1041_vm1, %v18212_v56  ;;  %14552 = vmatprep.subr.mxu1 %v15434_v14 }
0x171c   :  { %14553 = vmatpush3.msra.mxu1 %v15434_v14  ;;  %14568 = vmatprep.subr.mxu0 %v19145_v33 }
0x171d   :  { %14569 = vmatpush3.msra.mxu0 %v18166_v48  ;;  %14588 = vmatprep.subr.mxu1 %v19145_v33 }
0x171e   :  { %14541 = vmatmul.mubr.msk.f32.gmra.mxu0 %vm1041_vm1, %v18274_v58  ;;  %14570 = vmatprep.subr.mxu0 %v19145_v33 }
0x171f   :  { %14543 = vmatprep.mubr.msk.f32.mxu0 %vm1041_vm1, %v18338_v13  ;;  %14571 = vmatpush3.msra.mxu0 %v18172_v15 }
0x1720   :  { %14572 = vmatprep.subr.mxu0 %v19145_v33 }
0x1721   :  { %14573 = vmatpush3.msra.mxu0 %v18181_v9 }
0x1722   :  { %14577 = vmatprep.subr.mxu0 %v19145_v33 }
0x17c4   :  { %v9507_v5 = vpop.f32.mrf.mxu0  ;;  %v9577_v42 = vpop.f32.mrf.mxu1 }
0x17c5   :  { %v9651_v27 = vadd.f32 %v9507_v5, %v7551_v10  ;;  %v9658_v22 = vadd.f32 %v9577_v42, %v7669_v3 }
0x17c6   :  { %v14483_v62 = vpop.f32.mrf.mxu0  ;;  %v14494_v23 = vpop.f32.mrf.mxu1 }
0x17c7   :  { %v12401_v28 = vmul.f32 -1.442695, %v9651_v27  ;;  %v12402_v6 = vmul.f32 -1.442695, %v9658_v22  ;;  %v9683_v22 = vpop.xlane.xlu0 %9682 }
0x17c9   :  { %15186 = vpow2.f32 %v12401_v28 }
0x17ca   :  { %15188 = vpow2.f32 %v12402_v6 }
0x17cb   :  { %v9689_v6 = vpop.xlane.xlu0 %9688 }
0x17cd   :  { %v9647_v63 = vpop.f32.mrf.mxu0 }
0x17ce   :  { %v9648_v34 = vadd.f32 %v18442_v51, %v9647_v63  ;;  %v9686_v63 = vpop.xlane.xlu1 %9685 }
0x17cf   :  { %v14505_v37 = vpop.f32.mrf.mxu0 }
0x17d0   :  { %v9692_v37 = vpop.xlane.xlu0 %9691 }
0x17d6   :  { %v15187_v24 = vpop.eup %15186  ;;  %v18512_v16 = vpop.f32.mrf.mxu0 }
0x17d7   :  { %v9655_v36 = vadd.f32 1.0, %v15187_v24  ;;  %v15189_v30 = vpop.eup %15188  ;;  %v9695_v24 = vpop.xlane.xlu1 %9694 }
0x17d8   :  { %v9662_v31 = vadd.f32 1.0, %v15189_v30 }
0x17d9   :  { %15190 = vrcp.f32 %v9655_v36  ;;  %v9698_v36 = vpop.xlane.xlu0 %9697 }
0x17da   :  { %15192 = vrcp.f32 %v9662_v31 }
0x17db   :  { %v9701_v30 = vpop.xlane.xlu1 %9700 }
0x17e6   :  { %v15191_v46 = vpop.eup %15190 }
0x17e7   :  { %v9665_v14 = vmul.f32 %v15191_v46, %v9648_v34  ;;  %v15193_v10 = vpop.eup %15192 }
0x17e8   :  { %v9668_v5 = vsub.f32 1.0, %v15193_v10  ;;  %v9670_v62 = vmul.f32 %v15193_v10, %v18329_v53 }
0x17e9   :  { %v9666_v0 = vadd.f32 %v9665_v14, %v7787_v61 }
0x17eb   :  { %15194 = vtanh.f32 %v9666_v0 }
0x17ec   :  { %15196 = vtanh.f32 %v9686_v63 }
0x17ed   :  { %15198 = vtanh.f32 %v9683_v22 }
0x17ee   :  { %15200 = vtanh.f32 %v9689_v6 }
0x17ef   :  { %15202 = vtanh.f32 %v9692_v37 }
0x17f0   :  { %15204 = vtanh.f32 %v9695_v24 }
0x17f1   :  { %15206 = vtanh.f32 %v9698_v36 }
0x17f2   :  { %15208 = vtanh.f32 %v9701_v30 }
0x17f8   :  { %v15195_v42 = vpop.eup %15194 }
0x17f9   :  { %v9669_v27 = vmul.f32 %v15195_v42, %v9668_v5  ;;  %v15197_v31 = vpop.eup %15196 }
0x17fa   :  { %v15199_v34 = vpop.eup %15198  ;;  %v9714_v14 = vsel %vm243_vm7, %v15197_v31, -1e+30 }
0x17fb   :  { %v9671_v23 = vadd.f32 %v9670_v62, %v9669_v27  ;;  %v15201_v46 = vpop.eup %15200  ;;  %v9713_v10 = vsel %vm242_vm10, %v15199_v34, -1e+30  ;;  %v18498_v62 = vpop.f32.mrf.mxu1 }
0x17fc   :  { %v15203_v0 = vpop.eup %15202  ;;  %v9715_v5 = vsel %vm244_vm11, %v15201_v46, -1e+30  ;;  %v9721_v27 = vmax.f32 %v9713_v10, %v9714_v14 }
0x17fd   :  { %v18455_v40 = vsel %vm7232_vm4, %v9671_v23, 0.0  ;;  %v15205_v42 = vpop.eup %15204  ;;  %v9716_v23 = vsel %vm245_vm8, %v15203_v0, -1e+30  ;;  %v9924_v37 = vpop.f32.mrf.mxu1  ;;  %v19227_v0 = vld [vmem:[#allocation31_spill] sm:$0xff] }
0x17fe   :  { %14524 = vmatmul.mubr.msk.f32.gmra.mxu1 %vm1041_vm1, %v18455_v40  ;;  %14544 = vmatmul.mubr.msk.f32.gmra.mxu0 %vm1041_vm1, %v18455_v40  ;;  %v9680_v3 = vmul.f32 %v18015_v32, %v18455_v40  ;;  %v9717_v22 = vsel %vm246_vm12, %v15205_v42, -1e+30  ;;  %v9925_v31 = vadd.f32 %v18428_v45, %v9924_v37 }
0x17ff   :  { %14554 = vmatprep.mubr.msk.f32.mxu1 %vm1041_vm1, %v18020_v7  ;;  %14574 = vmatprep.mubr.msk.f32.mxu0 %vm15571_vm0, %v19145_v33 }
0x1800   :  { %v9702_v53 = vsel %vm1041_vm1, %v9680_v3, 0.0  ;;  %v15207_v3 = vpop.eup %15206 }
0x1801   :  { %9703 = vadd.xlane.f32.xlu0 %v9702_v53  ;;  %v9722_v53 = vmax.f32 %v9721_v27, %v9715_v5  ;;  %v15209_v63 = vpop.eup %15208  ;;  %v9718_v24 = vsel %vm247_vm9, %v15207_v3, -1e+30  ;;  %v10173_v27 = vadd.f32 %v9925_v31, %v19227_v0 }
0x1802   :  { %14555 = vmatmul.mubr.msk.f32.vlgmr.msra.gmra.mxu1 %vm1041_vm1, %v18042_v1  ;;  %v9719_v30 = vsel %vm248_vm13, %v15209_v63, -1e+30  ;;  %v10029_v63 = vpop.f32.mrf.mxu0 }
0x1803   :  { %14557 = vmatprep.mubr.msk.f32.mxu1 %vm1041_vm1, %v18096_v17  ;;  %14589 = vmatpush3.msra.mxu1 %v18276_v19  ;;  %v9723_v6 = vmax.f32 %v9722_v53, %v9716_v23  ;;  %v12427_v53 = vmul.f32 -1.442695, %v10173_v27 }
0x1804   :  { %14590 = vmatprep.subr.mxu1 %v19145_v33 }
0x1805   :  { %14591 = vmatpush3.msra.mxu1 %v18285_v60  ;;  %v9724_v36 = vmax.f32 %v9723_v6, %v9717_v22 }
0x1806   :  { %14558 = vmatmul.mubr.msk.f32.gmra.mxu1 %vm1041_vm1, %v18150_v38  ;;  %14592 = vmatprep.subr.mxu1 %v19145_v33 }
0x1807   :  { %14560 = vmatprep.mubr.msk.f32.mxu1 %vm1041_vm1, %v18212_v56  ;;  %14593 = vmatpush3.msra.mxu1 %v18291_v49  ;;  %v9725_v34 = vmax.f32 %v9724_v36, %v9718_v24 }
0x1808   :  { %14594 = vmatprep.subr.mxu1 %v19145_v33 }
0x1809   :  { %14595 = vmatpush3.msra.mxu1 %v18297_v47 }
0x180a   :  { %14561 = vmatmul.mubr.msk.f32.gmra.mxu1 %vm1041_vm1, %v18274_v58  ;;  %14610 = vmatprep.subr.mxu1 %v19145_v33 }
0x180b   :  { %14563 = vmatprep.mubr.msk.f32.mxu1 %vm1041_vm1, %v18338_v13 }
0x180e   :  { %14564 = vmatmul.mubr.msk.f32.gmra.mxu1 %vm1041_vm1, %v18455_v40 }
0x180f   :  { %14596 = vmatprep.mubr.msk.f32.mxu1 %vm15571_vm0, %v19145_v33 }
0x188a   :  { %v9704_v43 = vpop.xlane.xlu0 %9703 }
0x188b   :  { %15210 = vtanh.f32 %v9704_v43  ;;  %v9726_v43 = vmax.f32 %v9725_v34, %v9719_v30  ;;  %v10030_v34 = vadd.f32 %v18435_v20, %v10029_v63 }
0x188c   :  { %15212 = vpow2.f32 %v12427_v53 }
0x1898   :  { %v15211_v46 = vpop.eup %15210 }
0x1899   :  { %v9720_v42 = vsel %vm249_vm14, %v15211_v46, -1e+30  ;;  %v15213_v53 = vpop.eup %15212 }
0x189a   :  { %v9727_v28 = vmax.f32 %v9726_v43, %v9720_v42 }
0x189c   :  { %v9728_v44 = vsub.f32 %v9713_v10, %v9727_v28  ;;  %v9731_v3 = vsub.f32 %v9714_v14, %v9727_v28  ;;  %v9734_v6 = vsub.f32 %v9715_v5, %v9727_v28  ;;  %v9737_v52 = vsub.f32 %v9716_v23, %v9727_v28  ;;  %v19228_v10 = vld [vmem:[#allocation25_spill] sm:$0xff] }
0x189d   :  { %v9740_v25 = vsub.f32 %v9717_v22, %v9727_v28  ;;  %v9743_v0 = vsub.f32 %v9718_v24, %v9727_v28  ;;  %v9746_v43 = vsub.f32 %v9719_v30, %v9727_v28  ;;  %v10180_v27 = vadd.f32 %v10030_v34, %v19228_v10 }
0x189e   :  { %v9729_v54 = vmul.f32 1.442695, %v9728_v44  ;;  %v9732_v37 = vmul.f32 1.442695, %v9731_v3  ;;  %v9735_v36 = vmul.f32 1.442695, %v9734_v6  ;;  %v9749_v5 = vsub.f32 %v9720_v42, %v9727_v28  ;;  %v18516_v3 = vpop.f32.mrf.mxu1 }
0x189f   :  { %v9738_v31 = vmul.f32 1.442695, %v9737_v52  ;;  %v9741_v46 = vmul.f32 1.442695, %v9740_v25  ;;  %v9744_v14 = vmul.f32 1.442695, %v9743_v0 }
0x18a0   :  { %15214 = vpow2.f32 %v9729_v54  ;;  %v9747_v44 = vmul.f32 1.442695, %v9746_v43  ;;  %v12428_v23 = vmul.f32 -1.442695, %v10180_v27  ;;  %v9750_v22 = vmul.f32 1.442695, %v9749_v5  ;;  %v18518_v24 = vpop.f32.mrf.mxu1 }
0x18a1   :  { %15216 = vpow2.f32 %v9732_v37  ;;  %v10177_v52 = vadd.f32 1.0, %v15213_v53 }
0x18a2   :  { %15218 = vpow2.f32 %v9735_v36  ;;  %v18520_v63 = vpop.f32.mrf.mxu1 }
0x18a3   :  { %15220 = vpow2.f32 %v9738_v31  ;;  %19229 = vst [vmem:[#allocation49_spill] sm:$0xff] %v18520_v63 }
0x18a4   :  { %15222 = vpow2.f32 %v9741_v46  ;;  %v18522_v0 = vpop.f32.mrf.mxu1 }
0x18a5   :  { %15224 = vpow2.f32 %v9744_v14  ;;  %19230 = vst [vmem:[#allocation37_spill] sm:$0xff] %v18522_v0 }
0x18a6   :  { %15226 = vpow2.f32 %v9747_v44 }
0x18a7   :  { %15228 = vpow2.f32 %v12428_v23 }
0x18a8   :  { %15230 = vpow2.f32 %v9750_v22 }
0x18a9   :  { %15232 = vrcp.f32 %v10177_v52 }
0x18ad   :  { %v15215_v54 = vpop.eup %15214 }
0x18ae   :  { %v15217_v25 = vpop.eup %15216 }
0x18af   :  { %v9752_v30 = vadd.f32 %v15217_v25, %v15215_v54  ;;  %v15219_v6 = vpop.eup %15218 }
0x18b0   :  { %v15221_v42 = vpop.eup %15220 }
0x18b1   :  { %v9753_v28 = vadd.f32 %v15219_v6, %v9752_v30  ;;  %v15223_v36 = vpop.eup %15222 }
0x18b2   :  { %v15225_v31 = vpop.eup %15224 }
0x18b3   :  { %v9754_v37 = vadd.f32 %v15221_v42, %v9753_v28  ;;  %v15227_v43 = vpop.eup %15226 }
0x18b4   :  { %v15229_v10 = vpop.eup %15228 }
0x18b5   :  { %v9755_v34 = vadd.f32 %v15223_v36, %v9754_v37  ;;  %v15231_v5 = vpop.eup %15230  ;;  %v10184_v53 = vadd.f32 1.0, %v15229_v10 }
0x18b6   :  { %v15233_v22 = vpop.eup %15232 }
0x18b7   :  { %v9756_v46 = vadd.f32 %v15225_v31, %v9755_v34  ;;  %v10187_v37 = vmul.f32 %v15233_v22, %v17957_v26 }
0x18b9   :  { %v9757_v14 = vadd.f32 %v15227_v43, %v9756_v46 }
0x18bb   :  { %v9758_v23 = vadd.f32 %v15231_v5, %v9757_v14 }
0x18bd   :  { %15234 = vrcp.f32 %v9758_v23 }
0x18be   :  { %v18524_v27 = vpop.f32.mrf.mxu1  ;;  %15236 = vrcp.f32 %v10184_v53 }
0x18bf   :  { %19231 = vst [vmem:[#allocation51_spill] sm:$0xff] %v18524_v27 }
0x18c0   :  { %v18526_v44 = vpop.f32.mrf.mxu1 }
0x18c1   :  { %19232 = vst [vmem:[#allocation23_spill] sm:$0xff] %v18526_v44 }
0x18c2   :  { %v18528_v52 = vpop.f32.mrf.mxu1 }
0x18c4   :  { %v10134_v30 = vpop.f32.mrf.mxu1 }
0x18c5   :  { %v10135_v28 = vadd.f32 %v18448_v18, %v10134_v30 }
0x18c7   :  { %v10188_v34 = vadd.f32 %v10187_v37, %v10135_v28 }
0x18c9   :  { %15238 = vtanh.f32 %v10188_v34 }
0x18ca   :  { %v15235_v63 = vpop.eup %15234 }
0x18cb   :  { %v9769_v27 = vmul.f32 %v15235_v63, %v15217_v25  ;;  %v9760_v46 = vmul.f32 %v15235_v63, %v15215_v54  ;;  %v15237_v0 = vpop.eup %15236  ;;  %v9796_v44 = vmul.f32 %v15235_v63, %v15223_v36  ;;  %v9778_v23 = vmul.f32 %v15235_v63, %v15219_v6 }
0x18cc   :  { %v10190_v53 = vsub.f32 1.0, %v15237_v0  ;;  %v9814_v54 = vmul.f32 %v15235_v63, %v15227_v43  ;;  %v9787_v22 = vmul.f32 %v15235_v63, %v15221_v42  ;;  %v10192_v37 = vmul.f32 0.0, %v15237_v0 }
0x18cd   :  { %v9770_v14 = vsel %vm243_vm7, %v9769_v27, 0.0  ;;  %v9761_v10 = vsel %vm242_vm10, %v9760_v46, 0.0  ;;  %v9797_v26 = vsel %vm246_vm12, %v9796_v44, 0.0  ;;  %v9779_v25 = vsel %vm244_vm11, %v9778_v23, 0.0 }
0x18ce   :  { %9773 = vperm.xlu0 %14820, %v9770_v14   ;;  %9764 = vperm.xlu1 %14821, %v9761_v10   ;;  %v9815_v6 = vsel %vm248_vm13, %v9814_v54, 0.0  ;;  %v9788_v36 = vsel %vm245_vm8, %v9787_v22, 0.0  ;;  %v9805_v34 = vmul.f32 %v15235_v63, %v15225_v31  ;;  %v9823_v0 = vmul.f32 %v15235_v63, %v15231_v5 }
0x18d0   :  { %v9806_v42 = vsel %vm247_vm9, %v9805_v34, 0.0  ;;  %v9824_v31 = vsel %vm249_vm14, %v9823_v0, 0.0 }
0x18d2   :  { %9800 = vperm.xlu0 %14820, %v9797_v26   ;;  %9782 = vperm.xlu1 %14821, %v9779_v25  }
0x18d6   :  { %v15239_v30 = vpop.eup %15238  ;;  %9818 = vperm.xlu0 %14820, %v9815_v6   ;;  %9791 = vperm.xlu1 %14821, %v9788_v36   ;;  %v18605_v36 = vpop.f32.mrf.mxu1 }
0x18d7   :  { %v10191_v28 = vmul.f32 %v15239_v30, %v10190_v53 }
0x18d8   :  { %v18609_v34 = vpop.f32.mrf.mxu1 }
0x18d9   :  { %v18540_v27 = vadd.f32 %v10192_v37, %v10191_v28 }
0x18da   :  { %9809 = vperm.xlu1 %14821, %v9806_v42   ;;  %v18613_v42 = vpop.f32.mrf.mxu1 }
0x18db   :  { %14575 = vmatmul.mubr.msk.f32.vlgmr.msra.gmra.mxu0 %vm1041_vm1, %v18540_v27  ;;  %14597 = vmatmul.mubr.msk.f32.vlgmr.msra.gmra.mxu1 %vm1041_vm1, %v18540_v27 }
0x18dc   :  { %14578 = vmatpush3.msra.mxu0 %v18234_v29  ;;  %14585 = vmatprep.mubr.msk.f32.mxu0 %vm15571_vm0, %v19145_v33  ;;  %v18617_v11 = vpop.f32.mrf.mxu1 }
0x18dd   :  { %14579 = vmatprep.subr.mxu0 %v19145_v33  ;;  %14611 = vmatpush3.msra.mxu1 %v18234_v29 }
0x18de   :  { %14580 = vmatpush3.msra.mxu0 %v18240_v59  ;;  %14612 = vmatprep.subr.mxu1 %v19145_v33 }
0x18df   :  { %14581 = vmatprep.subr.mxu0 %v19145_v33  ;;  %14613 = vmatpush3.msra.mxu1 %v18240_v59 }
0x18e0   :  { %14582 = vmatpush3.msra.mxu0 %v18248_v8  ;;  %14614 = vmatprep.subr.mxu1 %v19145_v33 }
0x18e1   :  { %14583 = vmatprep.subr.mxu0 %v19145_v33  ;;  %9827 = vperm.xlu1 %14821, %v9824_v31  }
0x18e2   :  { %14584 = vmatpush3.msra.mxu0 %v18253_v12  ;;  %14615 = vmatpush3.msra.mxu1 %v18248_v8 }
0x18e3   :  { %14586 = vmatmul.mubr.msk.f32.vlgmr.msra.gmra.mxu0 %vm1041_vm1, %v18540_v27  ;;  %14599 = vmatprep.subr.mxu0 %v19145_v33 }
0x18e4   :  { %14600 = vmatpush3.msra.mxu0 %v18158_v21  ;;  %14616 = vmatprep.subr.mxu1 %v19145_v33 }
0x18e5   :  { %14601 = vmatprep.subr.mxu0 %v19145_v33  ;;  %14607 = vmatprep.mubr.msk.f32.mxu0 %vm15571_vm0, %v19145_v33 }
0x18e6   :  { %14602 = vmatpush3.msra.mxu0 %v18166_v48  ;;  %14617 = vmatpush3.msra.mxu1 %v18253_v12 }
0x18e7   :  { %14603 = vmatprep.subr.mxu0 %v19145_v33  ;;  %14618 = vmatprep.mubr.msk.f32.mxu1 %vm15571_vm0, %v19145_v33 }
0x18e8   :  { %14604 = vmatpush3.msra.mxu0 %v18172_v15  ;;  %14632 = vmatprep.subr.mxu1 %v19145_v33 }
0x18e9   :  { %14605 = vmatprep.subr.mxu0 %v19145_v33 }
0x18ea   :  { %14606 = vmatpush3.msra.mxu0 %v18181_v9 }
0x18eb   :  { %14621 = vmatprep.subr.mxu0 %v19145_v33 }
0x1949   :  { %v9774_v21 = vpop.permute.xlu0 %9773  ;;  %v9765_v48 = vpop.permute.xlu1 %9764 }
0x194a   :  { %v9776_v63 = vmul.f32 %v9774_v21, %v18042_v1  ;;  %v9767_v43 = vmul.f32 %v9765_v48, %v18020_v7  ;;  %v18623_v48 = vpop.f32.mrf.mxu1 }
0x194c   :  { %v9777_v46 = vadd.f32 %v9776_v63, %v9767_v43  ;;  %v18627_v43 = vpop.f32.mrf.mxu1 }
0x194d   :  { %v9783_v5 = vpop.permute.xlu1 %9782  ;;  %v9801_v44 = vpop.permute.xlu0 %9800 }
0x194e   :  { %v9785_v15 = vmul.f32 %v9783_v5, %v18096_v17  ;;  %v9803_v53 = vmul.f32 %v9801_v44, %v18212_v56  ;;  %v18600_v56 = vsel %vm5552_vm5, %v18540_v27, 0.0  ;;  %v9930_v5 = vadd.f32 %v18428_v45, %v18498_v62 }
0x1950   :  { %v9786_v10 = vadd.f32 %v9785_v15, %v9777_v46 }
0x1951   :  { %v9792_v14 = vpop.permute.xlu1 %9791  ;;  %v9819_v30 = vpop.permute.xlu0 %9818 }
0x1952   :  { %v9794_v23 = vmul.f32 %v9792_v14, %v18150_v38  ;;  %v9821_v1 = vmul.f32 %v9819_v30, %v18338_v13 }
0x1954   :  { %v9795_v9 = vadd.f32 %v9794_v23, %v9786_v10 }
0x1955   :  { %v9810_v26 = vpop.permute.xlu1 %9809 }
0x1956   :  { %v9804_v25 = vadd.f32 %v9803_v53, %v9795_v9  ;;  %v9812_v54 = vmul.f32 %v9810_v26, %v18274_v58  ;;  %v10035_v53 = vadd.f32 %v18435_v20, %v18512_v16 }
0x1958   :  { %v9813_v7 = vadd.f32 %v9812_v54, %v9804_v25 }
0x195a   :  { %v9822_v28 = vadd.f32 %v9821_v1, %v9813_v7 }
0x195c   :  { %v9828_v22 = vpop.permute.xlu1 %9827 }
0x195d   :  { %v9830_v17 = vmul.f32 %v9828_v22, %v18455_v40  ;;  %v18607_v40 = vpop.f32.mrf.mxu0 }
0x195f   :  { %v9831_v37 = vadd.f32 %v9830_v17, %v9822_v28  ;;  %v10140_v17 = vadd.f32 %v18448_v18, %v18528_v52 }
0x1961   :  { %v9832_v6 = vadd.f32 %v18015_v32, %v9831_v37  ;;  %v18611_v32 = vpop.f32.mrf.mxu0 }
0x1963   :  { %15240 = vtanh.f32 %v9832_v6  ;;  %v18615_v0 = vpop.f32.mrf.mxu0 }
0x1965   :  { %v18619_v31 = vpop.f32.mrf.mxu0 }
0x1967   :  { %v18621_v21 = vpop.f32.mrf.mxu0 }
0x1969   :  { %v18625_v63 = vpop.f32.mrf.mxu0 }
0x1970   :  { %v18595_v38 = vpop.eup %15240 }
0x1971   :  { %v11840_v58 = vmul.f32 %v18595_v38, %v18600_v56 }
0x1973   :  { %v11848_v13 = vsel %vm1041_vm1, %v11840_v58, 0.0 }
0x1974   :  { %11849 = vadd.xlane.f32.xlu0 %v11848_v13 }
0x199b   :  { %v10264_v15 = vpop.f32.mrf.mxu0  ;;  %v10404_v44 = vpop.f32.mrf.mxu1 }
0x199c   :  { %v10408_v46 = vadd.f32 %v10264_v15, %v9930_v5  ;;  %v10405_v22 = vadd.f32 %v18442_v51, %v10404_v44 }
0x199d   :  { %v14576_v14 = vpop.f32.mrf.mxu0  ;;  %v14598_v10 = vpop.f32.mrf.mxu1 }
0x199e   :  { %v12432_v23 = vmul.f32 -1.442695, %v10408_v46  ;;  %v18662_v14 = vld [vmem:[#allocation9 + $0x70] sm:$0xff]  ;;  %v18668_v10 = vld [vmem:[#allocation9 + $0x68] sm:$0xff] }
0x19a0   :  { %15242 = vpow2.f32 %v12432_v23  ;;  %v18677_v23 = vld [vmem:[#allocation9 + $0x60] sm:$0xff] }
0x19a3   :  { %v10334_v9 = vpop.f32.mrf.mxu0 }
0x19a4   :  { %v10415_v30 = vadd.f32 %v10334_v9, %v10035_v53 }
0x19a5   :  { %v14587_v26 = vpop.f32.mrf.mxu0 }
0x19a6   :  { %v12433_v25 = vmul.f32 -1.442695, %v10415_v30 }
0x19a8   :  { %15244 = vpow2.f32 %v12433_v25 }
0x19ad   :  { %v15243_v54 = vpop.eup %15242 }
0x19ae   :  { %v10412_v1 = vadd.f32 1.0, %v15243_v54 }
0x19b0   :  { %15246 = vrcp.f32 %v10412_v1 }
0x19b5   :  { %v15245_v7 = vpop.eup %15244 }
0x19b6   :  { %v10419_v62 = vadd.f32 1.0, %v15245_v7 }
0x19b8   :  { %15248 = vrcp.f32 %v10419_v62 }
0x19bd   :  { %v15247_v28 = vpop.eup %15246 }
0x19be   :  { %v10422_v37 = vmul.f32 %v15247_v28, %v10405_v22 }
0x19c0   :  { %v10423_v6 = vadd.f32 %v10422_v37, %v10140_v17 }
0x19c2   :  { %15250 = vtanh.f32 %v10423_v6  ;;  %v10145_v6 = vadd.f32 %v18448_v18, %v18609_v34 }
0x19c5   :  { %v15249_v16 = vpop.eup %15248 }
0x19c6   :  { %v10425_v58 = vsub.f32 1.0, %v15249_v16  ;;  %v10427_v15 = vmul.f32 %v15249_v16, %v18540_v27  ;;  %v18654_v27 = vld [vmem:[#allocation9 + $0x78] sm:$0xff] }
0x19cf   :  { %v15251_v13 = vpop.eup %15250 }
0x19d0   :  { %v10426_v5 = vmul.f32 %v15251_v13, %v10425_v58 }
0x19d2   :  { %v18637_v46 = vadd.f32 %v10427_v15, %v10426_v5 }
0x19d4   :  { %14608 = vmatmul.mubr.msk.f32.vlgmr.msra.gmra.mxu0 %vm1041_vm1, %v18637_v46  ;;  %14619 = vmatmul.mubr.msk.f32.vlgmr.msra.gmra.mxu1 %vm1041_vm1, %v18637_v46  ;;  %v18646_v52 = vsel %vm5792_vm6, %v18637_v46, 0.0 }
0x19d5   :  { %14622 = vmatpush3.msra.mxu0 %v18276_v19  ;;  %v11841_v44 = vmul.f32 %v18595_v38, %v18646_v52  ;;  %14629 = vmatprep.mubr.msk.f32.mxu0 %vm15571_vm0, %v19145_v33 }
0x19d6   :  { %14623 = vmatprep.subr.mxu0 %v19145_v33  ;;  %14633 = vmatpush3.msra.mxu1 %v18654_v27 }
0x19d7   :  { %14624 = vmatpush3.msra.mxu0 %v18285_v60  ;;  %v11851_v41 = vsel %vm1041_vm1, %v11841_v44, 0.0  ;;  %14634 = vmatprep.subr.mxu1 %v19145_v33 }
0x19d8   :  { %14625 = vmatprep.subr.mxu0 %v19145_v33  ;;  %11852 = vadd.xlane.f32.xlu1 %v11851_v41 }
0x19d9   :  { %14626 = vmatpush3.msra.mxu0 %v18291_v49  ;;  %14635 = vmatpush3.msra.mxu1 %v18662_v14 }
0x19da   :  { %14627 = vmatprep.subr.mxu0 %v19145_v33  ;;  %14636 = vmatprep.subr.mxu1 %v19145_v33 }
0x19db   :  { %14628 = vmatpush3.msra.mxu0 %v18297_v47  ;;  %14637 = vmatpush3.msra.mxu1 %v18668_v10 }
0x19dc   :  { %14630 = vmatmul.mubr.msk.f32.vlgmr.msra.gmra.mxu0 %vm1041_vm1, %v18637_v46  ;;  %14643 = vmatprep.subr.mxu0 %v19145_v33 }
0x19dd   :  { %14644 = vmatpush3.msra.mxu0 %v18234_v29  ;;  %14638 = vmatprep.subr.mxu1 %v19145_v33  ;;  %v9935_v29 = vadd.f32 %v18428_v45, %v18518_v24 }
0x19de   :  { %14645 = vmatprep.subr.mxu0 %v19145_v33  ;;  %14639 = vmatpush3.msra.mxu1 %v18677_v23 }
0x19df   :  { %14646 = vmatpush3.msra.mxu0 %v18240_v59  ;;  %14640 = vmatprep.mubr.msk.f32.mxu1 %vm15571_vm0, %v19145_v33 }
0x19e0   :  { %14647 = vmatprep.subr.mxu0 %v19145_v33  ;;  %14651 = vmatprep.mubr.msk.f32.mxu0 %vm15571_vm0, %v19145_v33 }
0x19e1   :  { %14648 = vmatpush3.msra.mxu0 %v18248_v8  ;;  %14654 = vmatprep.subr.mxu1 %v19145_v33  ;;  %v10040_v8 = vadd.f32 %v18435_v20, %v18611_v32 }
0x19e2   :  { %14649 = vmatprep.subr.mxu0 %v19145_v33 }
0x19e3   :  { %14650 = vmatpush3.msra.mxu0 %v18253_v12 }
0x19e4   :  { %14665 = vmatprep.subr.mxu0 %v19145_v33 }
0x1a94   :  { %v10499_v59 = vpop.f32.mrf.mxu0  ;;  %v10569_v53 = vpop.f32.mrf.mxu1 }
0x1a95   :  { %v10643_v9 = vadd.f32 %v10499_v59, %v9935_v29  ;;  %v10650_v54 = vadd.f32 %v10569_v53, %v10040_v8  ;;  %v9940_v53 = vadd.f32 %v18428_v45, %v18516_v3 }
0x1a96   :  { %v14609_v30 = vpop.f32.mrf.mxu0  ;;  %v14620_v26 = vpop.f32.mrf.mxu1 }
0x1a97   :  { %v12437_v25 = vmul.f32 -1.442695, %v10643_v9  ;;  %v12438_v62 = vmul.f32 -1.442695, %v10650_v54 }
0x1a99   :  { %15252 = vpow2.f32 %v12437_v25 }
0x1a9a   :  { %15254 = vpow2.f32 %v12438_v62 }
0x1a9c   :  { %v10639_v1 = vpop.f32.mrf.mxu0 }
0x1a9d   :  { %v10640_v17 = vadd.f32 %v18442_v51, %v10639_v1  ;;  %v10045_v1 = vadd.f32 %v18435_v20, %v18607_v40 }
0x1a9e   :  { %v14631_v7 = vpop.f32.mrf.mxu0 }
0x1aa6   :  { %v15253_v12 = vpop.eup %15252 }
0x1aa7   :  { %v10647_v22 = vadd.f32 1.0, %v15253_v12  ;;  %v15255_v28 = vpop.eup %15254 }
0x1aa8   :  { %v10654_v24 = vadd.f32 1.0, %v15255_v28 }
0x1aa9   :  { %15256 = vrcp.f32 %v10647_v22 }
0x1aaa   :  { %15258 = vrcp.f32 %v10654_v24 }
0x1ab6   :  { %v15257_v37 = vpop.eup %15256 }
0x1ab7   :  { %v10657_v16 = vmul.f32 %v15257_v37, %v10640_v17  ;;  %v15259_v58 = vpop.eup %15258 }
0x1ab8   :  { %v10660_v13 = vsub.f32 1.0, %v15259_v58  ;;  %v10662_v44 = vmul.f32 %v15259_v58, %v18637_v46 }
0x1ab9   :  { %v10658_v32 = vadd.f32 %v10657_v16, %v10145_v6  ;;  %v10150_v16 = vadd.f32 %v18448_v18, %v18605_v36 }
0x1abb   :  { %15260 = vtanh.f32 %v10658_v32 }
0x1ac8   :  { %v15261_v5 = vpop.eup %15260 }
0x1ac9   :  { %v10661_v15 = vmul.f32 %v15261_v5, %v10660_v13 }
0x1acb   :  { %v18699_v41 = vadd.f32 %v10662_v44, %v10661_v15 }
0x1acd   :  { %14641 = vmatmul.mubr.msk.f32.vlgmr.msra.gmra.mxu1 %vm1041_vm1, %v18699_v41  ;;  %14652 = vmatmul.mubr.msk.f32.vlgmr.msra.gmra.mxu0 %vm1041_vm1, %v18699_v41  ;;  %v18708_v29 = vsel %vm6032_vm15, %v18699_v41, 0.0  ;;  %vm19243_vm15 = vmmov %vm19221_vm3 }
0x1ace   :  { %14655 = vmatpush3.msra.mxu1 %v18276_v19  ;;  %v11842_v59 = vmul.f32 %v18595_v38, %v18708_v29  ;;  %14662 = vmatprep.mubr.msk.f32.mxu1 %vm15571_vm0, %v19145_v33  ;;  %v18730_v19 = vld [vmem:[#allocation9 + $0x98] sm:$0xff] }
0x1acf   :  { %14656 = vmatprep.subr.mxu1 %v19145_v33  ;;  %14666 = vmatpush3.msra.mxu0 %v18654_v27 }
0x1ad0   :  { %14657 = vmatpush3.msra.mxu1 %v18285_v60  ;;  %v11854_v46 = vsel %vm1041_vm1, %v11842_v59, 0.0  ;;  %14667 = vmatprep.subr.mxu0 %v19145_v33  ;;  %v18736_v60 = vld [vmem:[#allocation9 + $0x90] sm:$0xff] }
0x1ad1   :  { %14658 = vmatprep.subr.mxu1 %v19145_v33  ;;  %11855 = vadd.xlane.f32.xlu0 %v11854_v46  ;;  %v18772_v46 = vld [vmem:[#allocation9 + $0xb8] sm:$0xff] }
0x1ad2   :  { %14659 = vmatpush3.msra.mxu1 %v18291_v49  ;;  %14668 = vmatpush3.msra.mxu0 %v18662_v14  ;;  %v18744_v49 = vld [vmem:[#allocation9 + $0x88] sm:$0xff] }
0x1ad3   :  { %14660 = vmatprep.subr.mxu1 %v19145_v33  ;;  %14669 = vmatprep.subr.mxu0 %v19145_v33 }
0x1ad4   :  { %14661 = vmatpush3.msra.mxu1 %v18297_v47  ;;  %14670 = vmatpush3.msra.mxu0 %v18668_v10  ;;  %v18749_v47 = vld [vmem:[#allocation9 + $0x80] sm:$0xff] }
0x1ad5   :  { %14663 = vmatmul.mubr.msk.f32.vlgmr.msra.gmra.mxu1 %vm1041_vm1, %v18699_v41  ;;  %14676 = vmatprep.subr.mxu1 %v19145_v33 }
0x1ad6   :  { %14677 = vmatpush3.msra.mxu1 %v18730_v19  ;;  %14671 = vmatprep.subr.mxu0 %v19145_v33 }
0x1ad7   :  { %14678 = vmatprep.subr.mxu1 %v19145_v33  ;;  %14672 = vmatpush3.msra.mxu0 %v18677_v23 }
0x1ad8   :  { %14679 = vmatpush3.msra.mxu1 %v18736_v60  ;;  %14673 = vmatprep.mubr.msk.f32.mxu0 %vm15571_vm0, %v19145_v33 }
0x1ad9   :  { %14680 = vmatprep.subr.mxu1 %v19145_v33  ;;  %14684 = vmatprep.mubr.msk.f32.mxu1 %vm15571_vm0, %v19145_v33 }
0x1ada   :  { %14681 = vmatpush3.msra.mxu1 %v18744_v49  ;;  %14687 = vmatprep.subr.mxu0 %v19145_v33 }
0x1adb   :  { %14682 = vmatprep.subr.mxu1 %v19145_v33 }
0x1adc   :  { %14683 = vmatpush3.msra.mxu1 %v18749_v47 }
0x1add   :  { %14698 = vmatprep.subr.mxu1 %v19145_v33 }
0x1b8d   :  { %v10734_v9 = vpop.f32.mrf.mxu1  ;;  %v10804_v30 = vpop.f32.mrf.mxu0 }
0x1b8e   :  { %v10878_v26 = vadd.f32 %v10734_v9, %v9940_v53  ;;  %v10885_v7 = vadd.f32 %v10804_v30, %v10045_v1  ;;  %v18781_v53 = vld [vmem:[#allocation9 + $0xb0] sm:$0xff]  ;;  %v18787_v30 = vld [vmem:[#allocation9 + $0xa8] sm:$0xff] }
0x1b8f   :  { %v14642_v25 = vpop.f32.mrf.mxu1  ;;  %v14653_v8 = vpop.f32.mrf.mxu0 }
0x1b90   :  { %v12442_v54 = vmul.f32 -1.442695, %v10878_v26  ;;  %v12443_v22 = vmul.f32 -1.442695, %v10885_v7  ;;  %v18793_v26 = vld [vmem:[#allocation9 + $0xa0] sm:$0xff] }
0x1b91   :  { %v19235_v25 = vld [vmem:[#allocation37_spill] sm:$0xff] }
0x1b92   :  { %15262 = vpow2.f32 %v12442_v54  ;;  %v9945_v8 = vadd.f32 %v18428_v45, %v19235_v25  ;;  %v18872_v25 = vld [vmem:[%s19062_s13 + $0x4] ss:$0 sm:$0xff] }
0x1b93   :  { %15264 = vpow2.f32 %v12443_v22 }
0x1b95   :  { %v10874_v62 = vpop.f32.mrf.mxu1 }
0x1b96   :  { %v10875_v37 = vadd.f32 %v18442_v51, %v10874_v62 }
0x1b97   :  { %v14664_v12 = vpop.f32.mrf.mxu1 }
0x1b9f   :  { %v15263_v28 = vpop.eup %15262 }
0x1ba0   :  { %v10882_v24 = vadd.f32 1.0, %v15263_v28  ;;  %v15265_v17 = vpop.eup %15264  ;;  %v10050_v28 = vadd.f32 %v18435_v20, %v18619_v31 }
0x1ba1   :  { %v10889_v3 = vadd.f32 1.0, %v15265_v17 }
0x1ba2   :  { %15266 = vrcp.f32 %v10882_v24 }
0x1ba3   :  { %15268 = vrcp.f32 %v10889_v3 }
0x1baf   :  { %v15267_v6 = vpop.eup %15266 }
0x1bb0   :  { %v10892_v32 = vmul.f32 %v15267_v6, %v10875_v37  ;;  %v15269_v58 = vpop.eup %15268 }
0x1bb1   :  { %v10895_v13 = vsub.f32 1.0, %v15269_v58  ;;  %v10897_v44 = vmul.f32 %v15269_v58, %v18699_v41 }
0x1bb2   :  { %v10893_v40 = vadd.f32 %v10892_v32, %v10150_v16 }
0x1bb4   :  { %15270 = vtanh.f32 %v10893_v40 }
0x1bc1   :  { %v15271_v5 = vpop.eup %15270 }
0x1bc2   :  { %v10896_v15 = vmul.f32 %v15271_v5, %v10895_v13  ;;  %v10155_v13 = vadd.f32 %v18448_v18, %v18617_v11 }
0x1bc4   :  { %v18761_v34 = vadd.f32 %v10897_v44, %v10896_v15 }
0x1bc6   :  { %14674 = vmatmul.mubr.msk.f32.vlgmr.msra.gmra.mxu0 %vm1041_vm1, %v18761_v34  ;;  %14685 = vmatmul.mubr.msk.f32.vlgmr.msra.gmra.mxu1 %vm1041_vm1, %v18761_v34  ;;  %v18770_v59 = vsel %vm6272_vm2, %v18761_v34, 0.0 }
0x1bc7   :  { %14688 = vmatpush3.msra.mxu0 %v18772_v46  ;;  %v11843_v41 = vmul.f32 %v18595_v38, %v18770_v59  ;;  %14695 = vmatprep.mubr.msk.f32.mxu0 %vm15571_vm0, %v19145_v33 }
0x1bc8   :  { %14689 = vmatprep.subr.mxu0 %v19145_v33  ;;  %14699 = vmatpush3.msra.mxu1 %v18654_v27 }
0x1bc9   :  { %14690 = vmatpush3.msra.mxu0 %v18781_v53  ;;  %v11857_v9 = vsel %vm1041_vm1, %v11843_v41, 0.0  ;;  %14700 = vmatprep.subr.mxu1 %v19145_v33 }
0x1bca   :  { %14691 = vmatprep.subr.mxu0 %v19145_v33  ;;  %11858 = vadd.xlane.f32.xlu0 %v11857_v9 }
0x1bcb   :  { %14692 = vmatpush3.msra.mxu0 %v18787_v30  ;;  %14701 = vmatpush3.msra.mxu1 %v18662_v14 }
0x1bcc   :  { %14693 = vmatprep.subr.mxu0 %v19145_v33  ;;  %14702 = vmatprep.subr.mxu1 %v19145_v33 }
0x1bcd   :  { %14694 = vmatpush3.msra.mxu0 %v18793_v26  ;;  %14703 = vmatpush3.msra.mxu1 %v18668_v10 }
0x1bce   :  { %14696 = vmatmul.mubr.msk.f32.vlgmr.msra.gmra.mxu0 %vm1041_vm1, %v18761_v34  ;;  %14709 = vmatprep.subr.mxu0 %v19145_v33 }
0x1bcf   :  { %14710 = vmatpush3.msra.mxu0 %v18730_v19  ;;  %14704 = vmatprep.subr.mxu1 %v19145_v33 }
0x1bd0   :  { %14711 = vmatprep.subr.mxu0 %v19145_v33  ;;  %14705 = vmatpush3.msra.mxu1 %v18677_v23 }
0x1bd1   :  { %14712 = vmatpush3.msra.mxu0 %v18736_v60  ;;  %14706 = vmatprep.mubr.msk.f32.mxu1 %vm15571_vm0, %v19145_v33 }
0x1bd2   :  { %14713 = vmatprep.subr.mxu0 %v19145_v33  ;;  %14717 = vmatprep.mubr.msk.f32.mxu0 %vm15571_vm0, %v19145_v33 }
0x1bd3   :  { %14714 = vmatpush3.msra.mxu0 %v18744_v49  ;;  %14720 = vmatprep.subr.mxu1 %v19145_v33 }
0x1bd4   :  { %14715 = vmatprep.subr.mxu0 %v19145_v33 }
0x1bd5   :  { %14716 = vmatpush3.msra.mxu0 %v18749_v47 }
0x1bd6   :  { %14731 = vmatprep.subr.mxu0 %v19145_v33 }
0x1c86   :  { %v10969_v54 = vpop.f32.mrf.mxu0  ;;  %v11039_v1 = vpop.f32.mrf.mxu1 }
0x1c87   :  { %v11113_v7 = vadd.f32 %v10969_v54, %v9945_v8  ;;  %v11120_v24 = vadd.f32 %v11039_v1, %v10050_v28  ;;  %v19238_v8 = vld [vmem:[#allocation49_spill] sm:$0xff] }
0x1c88   :  { %v14675_v62 = vpop.f32.mrf.mxu0  ;;  %v14686_v12 = vpop.f32.mrf.mxu1  ;;  %v9950_v54 = vadd.f32 %v18872_v25, %v19238_v8 }
0x1c89   :  { %v12447_v22 = vmul.f32 -1.442695, %v11113_v7  ;;  %v12448_v37 = vmul.f32 -1.442695, %v11120_v24  ;;  %v18879_v24 = vld [vmem:[%s19062_s13 + $0x5] ss:$0 sm:$0xff] }
0x1c8b   :  { %15272 = vpow2.f32 %v12447_v22 }
0x1c8c   :  { %15274 = vpow2.f32 %v12448_v37 }
0x1c8e   :  { %v11109_v17 = vpop.f32.mrf.mxu0 }
0x1c8f   :  { %v11110_v40 = vadd.f32 %v18442_v51, %v11109_v17  ;;  %v19236_v51 = vld [vmem:[#allocation29_spill] sm:$0xff]  ;;  %v10055_v17 = vadd.f32 %v18879_v24, %v18615_v0  ;;  %v18892_v0 = vld [vmem:[%s19062_s13 + $0x6] ss:$0 sm:$0xff] }
0x1c90   :  { %v14697_v3 = vpop.f32.mrf.mxu0  ;;  %vm19237_vm5 = vcmp.eq.s32.totalorder %v19236_v51, 1 }
0x1c98   :  { %v15273_v6 = vpop.eup %15272 }
0x1c99   :  { %v11117_v16 = vadd.f32 1.0, %v15273_v6  ;;  %v15275_v32 = vpop.eup %15274 }
0x1c9a   :  { %v11124_v45 = vadd.f32 1.0, %v15275_v32 }
0x1c9b   :  { %15276 = vrcp.f32 %v11117_v16 }
0x1c9c   :  { %15278 = vrcp.f32 %v11124_v45 }
0x1ca8   :  { %v15277_v58 = vpop.eup %15276 }
0x1ca9   :  { %v11127_v5 = vmul.f32 %v15277_v58, %v11110_v40  ;;  %v15279_v31 = vpop.eup %15278 }
0x1caa   :  { %v11130_v15 = vsub.f32 1.0, %v15279_v31  ;;  %v11132_v41 = vmul.f32 %v15279_v31, %v18761_v34  ;;  %v10160_v31 = vadd.f32 %v18892_v0, %v18613_v42  ;;  %v19239_v42 = vld [vmem:[#allocation42_spill] sm:$0xff] }
0x1cab   :  { %v11128_v20 = vadd.f32 %v11127_v5, %v10155_v13  ;;  %v18886_v13 = vld [vmem:[%s19062_s13 + $0x7] ss:$0 sm:$0xff]  ;;  %vm19240_vm6 = vcmp.eq.s32.totalorder %v19239_v42, 1 }
0x1cad   :  { %15280 = vtanh.f32 %v11128_v20 }
0x1cba   :  { %v15281_v44 = vpop.eup %15280 }
0x1cbb   :  { %v11131_v36 = vmul.f32 %v15281_v44, %v11130_v15 }
0x1cbd   :  { %v18823_v9 = vadd.f32 %v11132_v41, %v11131_v36 }
0x1cbf   :  { %14707 = vmatmul.mubr.msk.f32.vlgmr.msra.gmra.mxu1 %vm1041_vm1, %v18823_v9  ;;  %14718 = vmatmul.mubr.msk.f32.vlgmr.msra.gmra.mxu0 %vm1041_vm1, %v18823_v9  ;;  %v18832_v18 = vsel %vm19237_vm5, %v18823_v9, 0.0 }
0x1cc0   :  { %14721 = vmatpush3.msra.mxu1 %v18772_v46  ;;  %v11844_v11 = vmul.f32 %v18595_v38, %v18832_v18  ;;  %14728 = vmatprep.mubr.msk.f32.mxu1 %vm15571_vm0, %v19145_v33 }
0x1cc1   :  { %14722 = vmatprep.subr.mxu1 %v19145_v33  ;;  %14732 = vmatpush3.msra.mxu0 %v18654_v27 }
0x1cc2   :  { %14723 = vmatpush3.msra.mxu1 %v18781_v53  ;;  %v11860_v34 = vsel %vm1041_vm1, %v11844_v11, 0.0  ;;  %14733 = vmatprep.subr.mxu0 %v19145_v33 }
0x1cc3   :  { %14724 = vmatprep.subr.mxu1 %v19145_v33  ;;  %11861 = vadd.xlane.f32.xlu1 %v11860_v34 }
0x1cc4   :  { %14725 = vmatpush3.msra.mxu1 %v18787_v30  ;;  %14734 = vmatpush3.msra.mxu0 %v18662_v14 }
0x1cc5   :  { %14726 = vmatprep.subr.mxu1 %v19145_v33  ;;  %14735 = vmatprep.subr.mxu0 %v19145_v33 }
0x1cc6   :  { %14727 = vmatpush3.msra.mxu1 %v18793_v26  ;;  %14736 = vmatpush3.msra.mxu0 %v18668_v10 }
0x1cc7   :  { %14729 = vmatmul.mubr.msk.f32.vlgmr.msra.gmra.mxu1 %vm1041_vm1, %v18823_v9  ;;  %14742 = vmatprep.subr.mxu1 %v19145_v33 }
0x1cc8   :  { %14743 = vmatpush3.msra.mxu1 %v18730_v19  ;;  %14737 = vmatprep.subr.mxu0 %v19145_v33 }
0x1cc9   :  { %14744 = vmatprep.subr.mxu1 %v19145_v33  ;;  %14738 = vmatpush3.msra.mxu0 %v18677_v23 }
0x1cca   :  { %14745 = vmatpush3.msra.mxu1 %v18736_v60  ;;  %14739 = vmatprep.mubr.msk.f32.mxu0 %vm15571_vm0, %v19145_v33 }
0x1ccb   :  { %14746 = vmatprep.subr.mxu1 %v19145_v33  ;;  %14750 = vmatprep.mubr.msk.f32.mxu1 %vm15571_vm0, %v19145_v33 }
0x1ccc   :  { %14747 = vmatpush3.msra.mxu1 %v18744_v49  ;;  %14753 = vmatprep.subr.mxu0 %v19145_v33 }
0x1ccd   :  { %14748 = vmatprep.subr.mxu1 %v19145_v33 }
0x1cce   :  { %14749 = vmatpush3.msra.mxu1 %v18749_v47 }
0x1ccf   :  { %14764 = vmatprep.subr.mxu1 %v19145_v33 }
0x1d7f   :  { %v11204_v1 = vpop.f32.mrf.mxu1  ;;  %v11274_v7 = vpop.f32.mrf.mxu0 }
0x1d80   :  { %v11348_v62 = vadd.f32 %v11204_v1, %v9950_v54  ;;  %v11355_v3 = vadd.f32 %v11274_v7, %v10055_v17 }
0x1d81   :  { %v14708_v12 = vpop.f32.mrf.mxu1  ;;  %v14719_v22 = vpop.f32.mrf.mxu0 }
0x1d82   :  { %v12452_v28 = vmul.f32 -1.442695, %v11348_v62  ;;  %v12453_v16 = vmul.f32 -1.442695, %v11355_v3 }
0x1d84   :  { %15282 = vpow2.f32 %v12452_v28 }
0x1d85   :  { %15284 = vpow2.f32 %v12453_v16 }
0x1d87   :  { %v11344_v37 = vpop.f32.mrf.mxu1 }
0x1d88   :  { %v11345_v5 = vadd.f32 %v18886_v13, %v11344_v37 }
0x1d89   :  { %v14730_v6 = vpop.f32.mrf.mxu1 }
0x1d91   :  { %v15283_v32 = vpop.eup %15282 }
0x1d92   :  { %v11352_v45 = vadd.f32 1.0, %v15283_v32  ;;  %v15285_v40 = vpop.eup %15284 }
0x1d93   :  { %v11359_v58 = vadd.f32 1.0, %v15285_v40 }
0x1d94   :  { %15286 = vrcp.f32 %v11352_v45  ;;  %v10165_v45 = vadd.f32 %v18892_v0, %v18627_v43 }
0x1d95   :  { %15288 = vrcp.f32 %v11359_v58 }
0x1da1   :  { %v15287_v20 = vpop.eup %15286 }
0x1da2   :  { %v11362_v15 = vmul.f32 %v15287_v20, %v11345_v5  ;;  %v15289_v36 = vpop.eup %15288 }
0x1da3   :  { %v11365_v41 = vsub.f32 1.0, %v15289_v36  ;;  %v11367_v34 = vmul.f32 %v15289_v36, %v18823_v9 }
0x1da4   :  { %v11363_v44 = vadd.f32 %v11362_v15, %v10160_v31 }
0x1da6   :  { %15290 = vtanh.f32 %v11363_v44 }
0x1db3   :  { %v15291_v51 = vpop.eup %15290 }
0x1db4   :  { %v11366_v11 = vmul.f32 %v15291_v51, %v11365_v41 }
0x1db6   :  { %v18897_v8 = vadd.f32 %v11367_v34, %v11366_v11 }
0x1db8   :  { %14740 = vmatmul.mubr.msk.f32.vlgmr.msra.gmra.mxu0 %vm1041_vm1, %v18897_v8  ;;  %14751 = vmatmul.mubr.msk.f32.vlgmr.msra.gmra.mxu1 %vm1041_vm1, %v18897_v8  ;;  %v18906_v54 = vsel %vm19240_vm6, %v18897_v8, 0.0 }
0x1db9   :  { %14754 = vmatpush3.msra.mxu0 %v18772_v46  ;;  %v11845_v1 = vmul.f32 %v18595_v38, %v18906_v54  ;;  %14761 = vmatprep.mubr.msk.f32.mxu0 %vm15571_vm0, %v19145_v33 }
0x1dba   :  { %14755 = vmatprep.subr.mxu0 %v19145_v33  ;;  %14765 = vmatpush3.msra.mxu1 %v18654_v27  ;;  %v19241_v27 = vld [vmem:[#allocation23_spill] sm:$0xff] }
0x1dbb   :  { %14756 = vmatpush3.msra.mxu0 %v18781_v53  ;;  %v11863_v9 = vsel %vm1041_vm1, %v11845_v1, 0.0  ;;  %14766 = vmatprep.subr.mxu1 %v19145_v33 }
0x1dbc   :  { %14757 = vmatprep.subr.mxu0 %v19145_v33  ;;  %11864 = vadd.xlane.f32.xlu0 %v11863_v9 }
0x1dbd   :  { %14758 = vmatpush3.msra.mxu0 %v18787_v30  ;;  %14767 = vmatpush3.msra.mxu1 %v18662_v14  ;;  %v9955_v14 = vadd.f32 %v18872_v25, %v19241_v27  ;;  %v10065_v27 = vadd.f32 %v18879_v24, %v18621_v21 }
0x1dbe   :  { %14759 = vmatprep.subr.mxu0 %v19145_v33  ;;  %14768 = vmatprep.subr.mxu1 %v19145_v33 }
0x1dbf   :  { %14760 = vmatpush3.msra.mxu0 %v18793_v26  ;;  %14769 = vmatpush3.msra.mxu1 %v18668_v10 }
0x1dc0   :  { %14762 = vmatmul.mubr.msk.f32.vlgmr.msra.gmra.mxu0 %vm1041_vm1, %v18897_v8  ;;  %14775 = vmatprep.subr.mxu0 %v19145_v33 }
0x1dc1   :  { %14776 = vmatpush3.msra.mxu0 %v18730_v19  ;;  %14770 = vmatprep.subr.mxu1 %v19145_v33 }
0x1dc2   :  { %14777 = vmatprep.subr.mxu0 %v19145_v33  ;;  %14771 = vmatpush3.msra.mxu1 %v18677_v23 }
0x1dc3   :  { %14778 = vmatpush3.msra.mxu0 %v18736_v60  ;;  %14772 = vmatprep.mubr.msk.f32.mxu1 %vm15571_vm0, %v19145_v33 }
0x1dc4   :  { %14779 = vmatprep.subr.mxu0 %v19145_v33  ;;  %14783 = vmatprep.mubr.msk.f32.mxu0 %vm15571_vm0, %v19145_v33 }
0x1dc5   :  { %14780 = vmatpush3.msra.mxu0 %v18744_v49  ;;  %14786 = vmatprep.subr.mxu1 %v19145_v33  ;;  %v10060_v49 = vadd.f32 %v18879_v24, %v18625_v63 }
0x1dc6   :  { %14781 = vmatprep.subr.mxu0 %v19145_v33 }
0x1dc7   :  { %14782 = vmatpush3.msra.mxu0 %v18749_v47 }
0x1dc8   :  { %14797 = vmatprep.subr.mxu0 %v19145_v33 }
0x1e78   :  { %v11439_v10 = vpop.f32.mrf.mxu0  ;;  %v11509_v23 = vpop.f32.mrf.mxu1 }
0x1e79   :  { %v11583_v19 = vadd.f32 %v11439_v10, %v9955_v14  ;;  %v11590_v12 = vadd.f32 %v11509_v23, %v10060_v49  ;;  %v10170_v49 = vadd.f32 %v18892_v0, %v18623_v48  ;;  %v11850_v48 = vpop.xlane.xlu0 %11849  ;;  %v11853_v0 = vpop.xlane.xlu1 %11852 }
0x1e7a   :  { %v14741_v60 = vpop.f32.mrf.mxu0  ;;  %v14752_v7 = vpop.f32.mrf.mxu1 }
0x1e7b   :  { %v12457_v62 = vmul.f32 -1.442695, %v11583_v19  ;;  %v12458_v17 = vmul.f32 -1.442695, %v11590_v12 }
0x1e7d   :  { %15292 = vpow2.f32 %v12457_v62 }
0x1e7e   :  { %15294 = vpow2.f32 %v12458_v17 }
0x1e80   :  { %v11579_v22 = vpop.f32.mrf.mxu0 }
0x1e81   :  { %v11580_v16 = vadd.f32 %v18886_v13, %v11579_v22 }
0x1e82   :  { %v14763_v28 = vpop.f32.mrf.mxu0 }
0x1e8a   :  { %v15293_v47 = vpop.eup %15292 }
0x1e8b   :  { %v11587_v3 = vadd.f32 1.0, %v15293_v47  ;;  %v15295_v37 = vpop.eup %15294 }
0x1e8c   :  { %v11594_v6 = vadd.f32 1.0, %v15295_v37 }
0x1e8d   :  { %15296 = vrcp.f32 %v11587_v3 }
0x1e8e   :  { %15298 = vrcp.f32 %v11594_v6 }
0x1e9a   :  { %v15297_v32 = vpop.eup %15296 }
0x1e9b   :  { %v11597_v40 = vmul.f32 %v15297_v32, %v11580_v16  ;;  %v15299_v58 = vpop.eup %15298  ;;  %v11856_v32 = vpop.xlane.xlu0 %11855 }
0x1e9c   :  { %v11600_v5 = vsub.f32 1.0, %v15299_v58  ;;  %v11602_v15 = vmul.f32 %v15299_v58, %v18897_v8 }
0x1e9d   :  { %v11598_v63 = vadd.f32 %v11597_v40, %v10165_v45  ;;  %v11862_v40 = vpop.xlane.xlu1 %11861 }
0x1e9f   :  { %15300 = vtanh.f32 %v11598_v63  ;;  %v11859_v45 = vpop.xlane.xlu0 %11858 }
0x1ea3   :  { %v11865_v63 = vpop.xlane.xlu0 %11864 }
0x1eac   :  { %v15301_v20 = vpop.eup %15300 }
0x1ead   :  { %v11601_v31 = vmul.f32 %v15301_v20, %v11600_v5 }
0x1eaf   :  { %v11603_v44 = vadd.f32 %v11602_v15, %v11601_v31 }
0x1eb1   :  { %14773 = vmatmul.mubr.msk.f32.vlgmr.msra.gmra.mxu1 %vm1041_vm1, %v11603_v44  ;;  %14784 = vmatmul.mubr.msk.f32.vlgmr.msra.gmra.mxu0 %vm1041_vm1, %v11603_v44  ;;  %v18955_v41 = vsel %vm19243_vm15, %v11603_v44, 0.0 }
0x1eb2   :  { %14787 = vmatpush3.msra.mxu1 %v18772_v46  ;;  %v11846_v43 = vmul.f32 %v18595_v38, %v18955_v41  ;;  %14794 = vmatprep.mubr.msk.f32.mxu1 %vm15571_vm0, %v19145_v33  ;;  %v19244_v46 = vld [vmem:[#allocation51_spill] sm:$0xff] }
0x1eb3   :  { %14788 = vmatprep.subr.mxu1 %v19145_v33  ;;  %14805 = vmatprep.mubr.msk.f32.mxu0 %vm15571_vm0, %v19145_v33  ;;  %v9960_v11 = vadd.f32 %v18872_v25, %v19244_v46  ;;  %vm12085_vm0 = vcmask 31744  }
0x1eb4   :  { %14789 = vmatpush3.msra.mxu1 %v18781_v53  ;;  %v11866_v51 = vsel %vm1041_vm1, %v11846_v43, 0.0  ;;  %14798 = vmatpush3.msra.mxu0 %v12004_v50 }
0x1eb5   :  { %14790 = vmatprep.subr.mxu1 %v19145_v33  ;;  %11867 = vadd.xlane.f32.xlu1 %v11866_v51 }
0x1eb6   :  { %14791 = vmatpush3.msra.mxu1 %v18787_v30  ;;  %14799 = vmatprep.subr.mxu0 %v19145_v33 }
0x1eb7   :  { %14792 = vmatprep.subr.mxu1 %v19145_v33  ;;  %14800 = vmatpush3.msra.mxu0 %v12003_v57 }
0x1eb8   :  { %14793 = vmatpush3.msra.mxu1 %v18793_v26  ;;  %14801 = vmatprep.subr.mxu0 %v19145_v33 }
0x1eb9   :  { %14795 = vmatmul.mubr.msk.f32.vlgmr.msra.gmra.mxu1 %vm1041_vm1, %v11603_v44  ;;  %14802 = vmatpush3.msra.mxu0 %v12002_v4 }
0x1eba   :  { %14803 = vmatprep.subr.mxu0 %v19145_v33 }
0x1ebb   :  { %14804 = vmatpush3.msra.mxu0 %v12001_v39 }
0x1f3e   :  { %v11868_v58 = vpop.xlane.xlu1 %11867 }
0x1f71   :  { %v11674_v34 = vpop.f32.mrf.mxu1  ;;  %v11744_v8 = vpop.f32.mrf.mxu0 }
0x1f72   :  { %v11818_v42 = vadd.f32 %v11674_v34, %v9960_v11  ;;  %v11825_v30 = vadd.f32 %v11744_v8, %v10065_v27 }
0x1f73   :  { %v14774_v53 = vpop.f32.mrf.mxu1  ;;  %v14785_v1 = vpop.f32.mrf.mxu0 }
0x1f74   :  { %v12462_v9 = vmul.f32 -1.442695, %v11818_v42  ;;  %v12463_v23 = vmul.f32 -1.442695, %v11825_v30 }
0x1f76   :  { %15302 = vpow2.f32 %v12462_v9 }
0x1f77   :  { %15304 = vpow2.f32 %v12463_v23 }
0x1f79   :  { %v11814_v14 = vpop.f32.mrf.mxu1 }
0x1f7a   :  { %v11815_v7 = vadd.f32 %v18886_v13, %v11814_v14 }
0x1f7b   :  { %v14796_v10 = vpop.f32.mrf.mxu1 }
0x1f83   :  { %v15303_v26 = vpop.eup %15302 }
0x1f84   :  { %v11822_v19 = vadd.f32 1.0, %v15303_v26  ;;  %v15305_v60 = vpop.eup %15304 }
0x1f85   :  { %v11829_v25 = vadd.f32 1.0, %v15305_v60 }
0x1f86   :  { %15306 = vrcp.f32 %v11822_v19 }
0x1f87   :  { %15308 = vrcp.f32 %v11829_v25 }
0x1f93   :  { %v15307_v62 = vpop.eup %15306 }
0x1f94   :  { %v11832_v12 = vmul.f32 %v15307_v62, %v11815_v7  ;;  %v15309_v24 = vpop.eup %15308 }
0x1f95   :  { %v11835_v22 = vsub.f32 1.0, %v15309_v24  ;;  %v11837_v47 = vmul.f32 %v15309_v24, %v11603_v44 }
0x1f96   :  { %v11833_v21 = vadd.f32 %v11832_v12, %v10170_v49 }
0x1f98   :  { %15310 = vtanh.f32 %v11833_v21 }
0x1f99   :  { %15312 = vtanh.f32 %v11853_v0 }
0x1f9a   :  { %15314 = vtanh.f32 %v11850_v48 }
0x1f9b   :  { %15316 = vtanh.f32 %v11856_v32 }
0x1f9c   :  { %15318 = vtanh.f32 %v11859_v45 }
0x1f9d   :  { %15320 = vtanh.f32 %v11862_v40 }
0x1f9e   :  { %15322 = vtanh.f32 %v11865_v63 }
0x1f9f   :  { %15324 = vtanh.f32 %v11868_v58 }
0x1fa5   :  { %v15311_v28 = vpop.eup %15310 }
0x1fa6   :  { %v11836_v17 = vmul.f32 %v15311_v28, %v11835_v22  ;;  %v15313_v5 = vpop.eup %15312 }
0x1fa7   :  { %v15315_v20 = vpop.eup %15314  ;;  %v11881_v44 = vsel %vm243_vm7, %v15313_v5, -1e+30 }
0x1fa8   :  { %v11838_v3 = vadd.f32 %v11837_v47, %v11836_v17  ;;  %v15317_v31 = vpop.eup %15316  ;;  %v11880_v43 = vsel %vm242_vm10, %v15315_v20, -1e+30 }
0x1fa9   :  { %v15319_v36 = vpop.eup %15318  ;;  %v11882_v51 = vsel %vm244_vm11, %v15317_v31, -1e+30  ;;  %v11888_v11 = vmax.f32 %v11880_v43, %v11881_v44 }
0x1faa   :  { %v18981_v6 = vsel %vm7232_vm4, %v11838_v3, 0.0  ;;  %v15321_v46 = vpop.eup %15320  ;;  %v11883_v34 = vsel %vm245_vm8, %v15319_v36, -1e+30 }
0x1fab   :  { %v11847_v13 = vmul.f32 %v18595_v38, %v18981_v6  ;;  %v15323_v8 = vpop.eup %15322  ;;  %v11889_v42 = vmax.f32 %v11888_v11, %v11882_v51  ;;  %v11884_v53 = vsel %vm246_vm12, %v15321_v46, -1e+30 }
0x1fac   :  { %v15325_v1 = vpop.eup %15324  ;;  %v11885_v27 = vsel %vm247_vm9, %v15323_v8, -1e+30 }
0x1fad   :  { %v11869_v16 = vsel %vm1041_vm1, %v11847_v13, 0.0  ;;  %v11890_v9 = vmax.f32 %v11889_v42, %v11883_v34  ;;  %v11886_v14 = vsel %vm248_vm13, %v15325_v1, -1e+30 }
0x1fae   :  { %11870 = vadd.xlane.f32.xlu0 %v11869_v16 }
0x1faf   :  { %v11891_v30 = vmax.f32 %v11890_v9, %v11884_v53 }
0x1fb1   :  { %v11892_v10 = vmax.f32 %v11891_v30, %v11885_v27 }
0x1fb3   :  { %v11893_v26 = vmax.f32 %v11892_v10, %v11886_v14 }
0x2037   :  { %v11871_v15 = vpop.xlane.xlu0 %11870 }
0x2038   :  { %15326 = vtanh.f32 %v11871_v15 }
0x2045   :  { %v15327_v23 = vpop.eup %15326 }
0x2046   :  { %v11887_v19 = vsel %vm249_vm14, %v15327_v23, -1e+30 }
0x2047   :  { %v11894_v60 = vmax.f32 %v11893_v26, %v11887_v19 }
0x2049   :  { %v11895_v25 = vsub.f32 %v11880_v43, %v11894_v60  ;;  %v11898_v7 = vsub.f32 %v11881_v44, %v11894_v60  ;;  %v11901_v62 = vsub.f32 %v11882_v51, %v11894_v60  ;;  %v11904_v12 = vsub.f32 %v11883_v34, %v11894_v60 }
0x204a   :  { %v11907_v22 = vsub.f32 %v11884_v53, %v11894_v60  ;;  %v11910_v17 = vsub.f32 %v11885_v27, %v11894_v60  ;;  %v11913_v3 = vsub.f32 %v11886_v14, %v11894_v60  ;;  %v11916_v13 = vsub.f32 %v11887_v19, %v11894_v60 }
0x204b   :  { %v11896_v49 = vmul.f32 1.442695, %v11895_v25  ;;  %v11899_v21 = vmul.f32 1.442695, %v11898_v7  ;;  %v11902_v24 = vmul.f32 1.442695, %v11901_v62 }
0x204c   :  { %v11905_v28 = vmul.f32 1.442695, %v11904_v12  ;;  %v11908_v47 = vmul.f32 1.442695, %v11907_v22  ;;  %v11911_v37 = vmul.f32 1.442695, %v11910_v17 }
0x204d   :  { %15328 = vpow2.f32 %v11896_v49  ;;  %v11914_v16 = vmul.f32 1.442695, %v11913_v3  ;;  %v11917_v48 = vmul.f32 1.442695, %v11916_v13 }
0x204e   :  { %15330 = vpow2.f32 %v11899_v21 }
0x204f   :  { %15332 = vpow2.f32 %v11902_v24 }
0x2050   :  { %15334 = vpow2.f32 %v11905_v28 }
0x2051   :  { %15336 = vpow2.f32 %v11908_v47 }
0x2052   :  { %15338 = vpow2.f32 %v11911_v37 }
0x2053   :  { %15340 = vpow2.f32 %v11914_v16 }
0x2054   :  { %15342 = vpow2.f32 %v11917_v48 }
0x205a   :  { %v15329_v0 = vpop.eup %15328 }
0x205b   :  { %v15331_v32 = vpop.eup %15330 }
0x205c   :  { %v11919_v45 = vadd.f32 %v15331_v32, %v15329_v0  ;;  %v15333_v40 = vpop.eup %15332 }
0x205d   :  { %v15335_v58 = vpop.eup %15334 }
0x205e   :  { %v11920_v63 = vadd.f32 %v15333_v40, %v11919_v45  ;;  %v15337_v20 = vpop.eup %15336 }
0x205f   :  { %v15339_v15 = vpop.eup %15338 }
0x2060   :  { %v11921_v5 = vadd.f32 %v15335_v58, %v11920_v63  ;;  %v15341_v36 = vpop.eup %15340 }
0x2061   :  { %v15343_v51 = vpop.eup %15342 }
0x2062   :  { %v11922_v31 = vadd.f32 %v15337_v20, %v11921_v5 }
0x2064   :  { %v11923_v44 = vadd.f32 %v15339_v15, %v11922_v31 }
0x2066   :  { %v11924_v43 = vadd.f32 %v15341_v36, %v11923_v44 }
0x2068   :  { %v11925_v46 = vadd.f32 %v15343_v51, %v11924_v43 }
0x206a   :  { %15344 = vrcp.f32 %v11925_v46 }
0x2077   :  { %v15345_v11 = vpop.eup %15344 }
0x2078   :  { %v11936_v34 = vmul.f32 %v15345_v11, %v15331_v32  ;;  %v11927_v8 = vmul.f32 %v15345_v11, %v15329_v0  ;;  %v11963_v1 = vmul.f32 %v15345_v11, %v15337_v20  ;;  %v11945_v9 = vmul.f32 %v15345_v11, %v15333_v40 }
0x2079   :  { %v11981_v14 = vmul.f32 %v15345_v11, %v15341_v36  ;;  %v11954_v10 = vmul.f32 %v15345_v11, %v15335_v58  ;;  %v11972_v23 = vmul.f32 %v15345_v11, %v15339_v15  ;;  %v11990_v26 = vmul.f32 %v15345_v11, %v15343_v51 }
0x207a   :  { %v11937_v42 = vsel %vm243_vm7, %v11936_v34, 0.0  ;;  %v11928_v53 = vsel %vm242_vm10, %v11927_v8, 0.0  ;;  %v11964_v27 = vsel %vm246_vm12, %v11963_v1, 0.0  ;;  %v11946_v30 = vsel %vm244_vm11, %v11945_v9, 0.0 }
0x207b   :  { %11940 = vperm.xlu0 %14820, %v11937_v42   ;;  %11931 = vperm.xlu1 %14821, %v11928_v53   ;;  %v11982_v61 = vsel %vm248_vm13, %v11981_v14, 0.0  ;;  %v11955_v35 = vsel %vm245_vm8, %v11954_v10, 0.0  ;;  %v11973_v55 = vsel %vm247_vm9, %v11972_v23, 0.0  ;;  %v11991_v2 = vsel %vm249_vm14, %v11990_v26, 0.0 }
0x207f   :  { %11967 = vperm.xlu0 %14820, %v11964_v27   ;;  %11949 = vperm.xlu1 %14821, %v11946_v30  }
0x2083   :  { %11985 = vperm.xlu0 %14820, %v11982_v61   ;;  %11958 = vperm.xlu1 %14821, %v11955_v35  }
0x2087   :  { %11976 = vperm.xlu1 %14821, %v11973_v55  }
0x208b   :  { %11994 = vperm.xlu1 %14821, %v11991_v2  }
0x20f6   :  { %v11941_v19 = vpop.permute.xlu0 %11940  ;;  %v11932_v60 = vpop.permute.xlu1 %11931 }
0x20f7   :  { %v11943_v25 = vmul.f32 %v11941_v19, %v18646_v52  ;;  %v11934_v7 = vmul.f32 %v11932_v60, %v18600_v56 }
0x20f9   :  { %v11944_v21 = vadd.f32 %v11943_v25, %v11934_v7 }
0x20fa   :  { %v11950_v62 = vpop.permute.xlu1 %11949  ;;  %v11968_v12 = vpop.permute.xlu0 %11967 }
0x20fb   :  { %v11952_v49 = vmul.f32 %v11950_v62, %v18708_v29  ;;  %v11970_v17 = vmul.f32 %v11968_v12, %v18832_v18  ;;  %v12464_v18 = vld [vmem:[%s19064_s15] ss:$0 sm:$0xff] }
0x20fd   :  { %v11953_v22 = vadd.f32 %v11952_v49, %v11944_v21 }
0x20fe   :  { %v11959_v24 = vpop.permute.xlu1 %11958  ;;  %v11986_v33 = vpop.permute.xlu0 %11985 }
0x20ff   :  { %v11961_v28 = vmul.f32 %v11959_v24, %v18770_v59  ;;  %v11988_v52 = vmul.f32 %v11986_v33, %v18955_v41 }
0x2101   :  { %v11962_v47 = vadd.f32 %v11961_v28, %v11953_v22 }
0x2102   :  { %v11977_v3 = vpop.permute.xlu1 %11976 }
0x2103   :  { %v11971_v37 = vadd.f32 %v11970_v17, %v11962_v47  ;;  %v11979_v13 = vmul.f32 %v11977_v3, %v18906_v54 }
0x2105   :  { %v11980_v56 = vadd.f32 %v11979_v13, %v11971_v37 }
0x2106   :  { %v11995_v16 = vpop.permute.xlu1 %11994 }
0x2107   :  { %v11989_v48 = vadd.f32 %v11988_v52, %v11980_v56  ;;  %v11997_v29 = vmul.f32 %v11995_v16, %v18981_v6 }
0x2109   :  { %v11998_v0 = vadd.f32 %v11997_v29, %v11989_v48 }
0x210b   :  { %v11999_v32 = vadd.f32 %v18595_v38, %v11998_v0 }
0x210d   :  { %15346 = vtanh.f32 %v11999_v32 }
0x211a   :  { %v15347_v59 = vpop.eup %15346 }
0x211b   :  { %14806 = vmatmul.mubr.msk.f32.vlgmr.msra.gmra.mxu0 %vm1041_vm1, %v15347_v59 }
0x21db   :  { %v12081_v45 = vpop.f32.mrf.mxu0 }
0x21dc   :  { %v12082_v54 = vadd.f32 %v12464_v18, %v12081_v45 }
0x21dd   :  { %v14807_v41 = vpop.f32.mrf.mxu0 }
0x21de   :  { %12086 = vst.msk [vmem:[%s19065_s16] sm:$0xff] %vm12085_vm0, %v12082_v54 }
0x21df   :  { %12091 = vsyncpa [#allocation3], 1 }
0x21e0   :  { %12092 = vsyncpa [#allocation5], 1 }
0x21e1   :  { %12093 = vsyncpa [#allocation8], 1 }

</bundles_post_ra>
